<compile_context>
chip_gen: v6e
topology: v6e:2x2x1
jax: 0.10.0
libtpu: 0.0.40
codegen_flags: <defaults>
</compile_context>

<pallas_src>
import math
import numpy as np

import jax
import jax.numpy as jnp
from jax import lax
from jax.experimental import pallas as pl
from jax.experimental.pallas import tpu as pltpu

LANE = 128                       # TPU lane width: all matmul N dims padded to this
_BPAD = 8                        # batch rows padded to one f32 sublane tile
_VMEM_LIMIT = 32 * 1024 * 1024   # <= half of v7x's 64 MiB VMEM; safe on v5e/v6e too

# Real (unpadded) Net dims, used only for honest CostEstimates.
_C1_REAL, _C2_REAL = 6, 16
_FC_DIMS = (120, 84, 10)


# ----------------------------------------------------------------------------
# Kernel A: conv1 + bias + relu + 2x2 maxpool (all 4 corners in one MXU matmul)
# ----------------------------------------------------------------------------
def _conv_pool_kernel(p_ref, w_ref, b_ref, o_ref):
    """p_ref: (4*N, F) bf16, rows ordered (corner, b, i, j); w_ref: (F, 128) bf16;
       b_ref: (1, 128) f32; o_ref: (N, C_store) bf16 (C_store lane-padded channels)."""
    n4, _ = p_ref.shape
    n = n4 // 4                       # multiple of 8 here (B=2 * 18 * 18 = 648)
    c_store = o_ref.shape[1]
    s = jnp.dot(p_ref[...], w_ref[...], preferred_element_type=jnp.float32)   # (4N,128)
    s = s.reshape(4, n, LANE)         # free reshape: n % 8 == 0 for f32 sublane tiles
    m = jnp.max(s, axis=0)            # 2x2 maxpool == elementwise max over 4 corners
    # relu(max_q(s_q) + b) == max_q(relu(s_q + b)): shared bias, relu monotone.
    o_ref[...] = jnp.maximum(m + b_ref[...], 0.0)[:, :c_store].astype(o_ref.dtype)


# ----------------------------------------------------------------------------
# Kernel B: conv2 + bias + relu + maxpool  fused with  fc1 -> relu -> fc2 -> relu -> fc3
# ----------------------------------------------------------------------------
def _conv_mlp_kernel(p_ref, w2_ref, b2_ref, w1_ref, b1_ref,
                     wf2_ref, bf2_ref, wf3_ref, bf3_ref, o_ref):
    """p_ref : (4*S*8, F2) bf16, rows ordered (corner, spatial s, batch padded to 8)
       w2_ref: (F2, 128) bf16 conv2 weight, rows in (cin, kh, kw) order, lane-padded
       w1_ref: (S, 16, 128) bf16 fc1 weight regrouped per spatial position
       wf2/wf3: (128, 128) bf16; biases (1, 128) f32; o_ref: (8, 128) f32."""
    n4, _ = p_ref.shape
    n = n4 // 4                       # = S * 8, always a multiple of 8
    n_sp = w1_ref.shape[0]            # S = 49 spatial positions
    kc = w1_ref.shape[1]              # 16 conv2 output channels feeding fc1
    bpad = o_ref.shape[0]             # 8 (batch rows padded to one sublane tile)

    # conv2 over all 4 pooling corners in ONE MXU matmul, then corner-max + bias + relu.
    s = jnp.dot(p_ref[...], w2_ref[...], preferred_element_type=jnp.float32)  # (4n,128)
    s = s.reshape(4, n, LANE)
    po = jnp.maximum(jnp.max(s, axis=0) + b2_ref[...], 0.0)                   # (n,128) f32

    # fc1: PyTorch flatten order is (c, h, w); rows of `po` are (spatial, batch8),
    # so each spatial position is one aligned 8-row f32 tile -> 49 tiny MXU matmuls,
    # all resident in VMEM (no HBM round trip of the feature tensor).
    acc = jnp.zeros((bpad, LANE), jnp.float32)
    for sp in range(n_sp):
        blk = po[sp * bpad:(sp + 1) * bpad, :kc].astype(jnp.bfloat16)   # (8,16) aligned
        acc = acc + jnp.dot(blk, w1_ref[sp], preferred_element_type=jnp.float32)
    h = jnp.maximum(acc + b1_ref[...], 0.0).astype(jnp.bfloat16)        # (8,128)

    h = jnp.dot(h, wf2_ref[...], preferred_element_type=jnp.float32) + bf2_ref[...]
    h = jnp.maximum(h, 0.0).astype(jnp.bfloat16)
    o_ref[...] = jnp.dot(h, wf3_ref[...], preferred_element_type=jnp.float32) + bf3_ref[...]


# ----------------------------------------------------------------------------
# pallas_call wrappers (whole-block specs, grid=(1,): everything fits VMEM easily)
# ----------------------------------------------------------------------------
def _whole_block(a):
    nd = a.ndim
    return pl.BlockSpec(tuple(a.shape), lambda *_: (0,) * nd)


def _pallas_conv_pool(p_flat, w, b, c_store, cout_real):
    n4, f = p_flat.shape
    n = n4 // 4
    cost = pl.CostEstimate(
        flops=int(2 * n4 * f * cout_real),
        transcendentals=0,
        bytes_accessed=int(p_flat.size * 2 + f * cout_real * 2
                           + cout_real * 4 + n * cout_real * 2))
    return pl.pallas_call(
        _conv_pool_kernel,
        grid=(1,),
        in_specs=[_whole_block(p_flat), _whole_block(w), _whole_block(b)],
        out_specs=pl.BlockSpec((n, c_store), lambda *_: (0, 0)),
        out_shape=jax.ShapeDtypeStruct((n, c_store), jnp.bfloat16),
        compiler_params=pltpu.CompilerParams(
            dimension_semantics=("arbitrary",),
            vmem_limit_bytes=_VMEM_LIMIT),
        cost_estimate=cost,
    )(p_flat, w, b)


def _pallas_conv_mlp(p_flat, w2, b2, w1r, b1, wf2, bf2, wf3, bf3, *, batch, real_dims):
    f2r, c2r, d1, d2, d3 = real_dims
    n_sp = w1r.shape[0]
    args = (p_flat, w2, b2, w1r, b1, wf2, bf2, wf3, bf3)
    flops = int(2 * 4 * n_sp * batch * f2r * c2r
                + 2 * batch * (n_sp * c2r * d1 + d1 * d2 + d2 * d3))
    byts = int(sum(int(a.size) * a.dtype.itemsize for a in args) + batch * d3 * 4)
    return pl.pallas_call(
        _conv_mlp_kernel,
        grid=(1,),
        in_specs=[_whole_block(a) for a in args],
        out_specs=pl.BlockSpec((_BPAD, LANE), lambda *_: (0, 0)),
        out_shape=jax.ShapeDtypeStruct((_BPAD, LANE), jnp.float32),
        compiler_params=pltpu.CompilerParams(
            dimension_semantics=("arbitrary",),
            vmem_limit_bytes=_VMEM_LIMIT),
        cost_estimate=pl.CostEstimate(flops=flops, transcendentals=0, bytes_accessed=byts),
    )(*args)


# ----------------------------------------------------------------------------
# Glue: im2col patch extraction (data movement only, a handful of tiny XLA ops)
# ----------------------------------------------------------------------------
def _corner_patches(x, k):
    """x: (B,H,W,C) -> (4*B*Hp*Wp, C*k*k), rows ordered (corner q, b, i, j).
    Feature order (cin, kh, kw) matches PyTorch OIHW weight flattening."""
    B, H, W, C = x.shape
    Hp, Wp = (H - k + 1) // 2, (W - k + 1) // 2
    F = C * k * k
    pat = lax.conv_general_dilated_patches(
        x, (k, k), (1, 1), 'VALID',
        dimension_numbers=('NHWC', 'HWIO', 'NHWC'))          # (B, Hc, Wc, F)
    pat = pat[:, :2 * Hp, :2 * Wp, :]
    pat = pat.reshape(B, Hp, 2, Wp, 2, F)
    pat = jnp.transpose(pat, (2, 4, 0, 1, 3, 5))             # (2,2,B,Hp,Wp,F)
    return pat.reshape(4 * B * Hp * Wp, F), Hp, Wp


def _corner_patches_spatial_major(x, k, bpad=_BPAD):
    """x: (B,H,W,C) -> (4*Hp*Wp*bpad, C*k*k), rows ordered (corner, spatial, batch_pad).
    Batch is zero-padded to `bpad` rows so each spatial position is an aligned 8-row tile."""
    B, H, W, C = x.shape
    Hp, Wp = (H - k + 1) // 2, (W - k + 1) // 2
    F = C * k * k
    pat = lax.conv_general_dilated_patches(
        x, (k, k), (1, 1), 'VALID',
        dimension_numbers=('NHWC', 'HWIO', 'NHWC'))          # (B, Hc, Wc, F)
    pat = pat[:, :2 * Hp, :2 * Wp, :]
    pat = pat.reshape(B, Hp, 2, Wp, 2, F)
    pat = jnp.transpose(pat, (2, 4, 1, 3, 0, 5))             # (2,2,Hp,Wp,B,F)
    pat = jnp.pad(pat, ((0, 0),) * 4 + ((0, bpad - B), (0, 0)))
    return pat.reshape(4 * Hp * Wp * bpad, F), Hp, Wp


# ----------------------------------------------------------------------------
# One-time parameter preprocessing (outside jit): transpose, regroup, pad, cast
# ----------------------------------------------------------------------------
def prepare_params(params, input_hw=(40, 40), k1=5, k2=5):
    (w1, b1, w2, b2, fw1, fb1, fw2, fb2, fw3, fb3) = params
    Hp1 = (input_hw[0] - k1 + 1) // 2
    Hp2 = ((Hp1 - k2 + 1) // 2)
    Wp1 = (input_hw[1] - k1 + 1) // 2
    Wp2 = ((Wp1 - k2 + 1) // 2)
    C2 = w2.shape[0]
    S = Hp2 * Wp2

    def pad_bias(bv):
        return jnp.pad(bv, (0, LANE - bv.shape[0])).astype(jnp.float32).reshape(1, LANE)

    # conv1: (6,1,5,5) -> (25, 128) bf16, rows in (cin, kh, kw) order
    c1, cin1 = w1.shape[0], w1.shape[1]
    w1m = jnp.pad(w1.reshape(c1, cin1 * k1 * k1).T, ((0, 0), (0, LANE - c1)))
    w1m = w1m.astype(jnp.bfloat16)
    b1m = pad_bias(b1)

    # conv2: input channels padded 6 -> 8 (kernel A stores 8 channels, last 2 are zero)
    w2p = jnp.pad(w2, ((0, 0), (0, 8 - w2.shape[1]), (0, 0), (0, 0)))   # (16,8,5,5)
    w2m = jnp.pad(w2p.reshape(C2, 8 * k2 * k2).T, ((0, 0), (0, LANE - C2)))
    w2m = w2m.astype(jnp.bfloat16)
    b2m = pad_bias(b2)

    # fc1: PyTorch flatten order is (c, h, w). Regroup per spatial position:
    # fw1r[s, c, o] = fw1[o, c*S + s], outputs padded 120 -> 128.
    fw1r = jnp.transpose(fw1.reshape(fw1.shape[0], C2, S), (2, 1, 0))   # (S, 16, 120)
    fw1r = jnp.pad(fw1r, ((0, 0), (0, 0), (0, LANE - fw1.shape[0]))).astype(jnp.bfloat16)
    fb1m = pad_bias(fb1)

    def fc_w(w):                                           # (out, in) -> (128, 128) bf16
        wt = w.T
        return jnp.pad(wt, ((0, LANE - wt.shape[0]),
                            (0, LANE - wt.shape[1]))).astype(jnp.bfloat16)

    fw2m, fb2m = fc_w(fw2), pad_bias(fb2)
    fw3m, fb3m = fc_w(fw3), pad_bias(fb3)
    return (w1m, b1m, w2m, b2m, fw1r, fb1m, fw2m, fb2m, fw3m, fb3m)


# ----------------------------------------------------------------------------
# Full forward pass (2 pallas_calls)
# ----------------------------------------------------------------------------
def net_forward_pallas(x_nchw, prepped):
    (w1m, b1m, w2m, b2m, fw1r, fb1m, fw2m, fb2m, fw3m, fb3m) = prepped
    B = x_nchw.shape[0]
    assert B <= _BPAD, "batch > 8 needs a batch-tiled grid on the fused conv2+MLP kernel"
    x = jnp.transpose(x_nchw, (0, 2, 3, 1)).astype(jnp.bfloat16)        # NHWC, bf16

    # stage 1: conv1(1->6, k=5) + relu + pool -> (B,18,18,8), channels 6..7 exactly 0
    p1, Hp1, Wp1 = _corner_patches(x, 5)                                # (2592, 25)
    o1 = _pallas_conv_pool(p1, w1m, b1m, c_store=8, cout_real=_C1_REAL)  # (648, 8) bf16
    y1 = o1.reshape(B, Hp1, Wp1, 8)

    # stage 2 + 3 fused: conv2(+relu+pool) + fc1/relu/fc2/relu/fc3 in ONE kernel
    p2, Hp2, Wp2 = _corner_patches_spatial_major(y1, 5)                 # (1568, 200)
    real_dims = (_C1_REAL * 5 * 5, _C2_REAL) + _FC_DIMS                 # (150,16,120,84,10)
    out = _pallas_conv_mlp(p2, w2m, b2m, fw1r, fb1m, fw2m, fb2m, fw3m, fb3m,
                           batch=B, real_dims=real_dims)                # (8, 128) f32
    return out[:B, :10]


# ----------------------------------------------------------------------------
# Pure-JAX reference (for correctness check)
# ----------------------------------------------------------------------------
def net_forward_ref(x_nchw, params):
    (w1, b1, w2, b2, fw1, fb1, fw2, fb2, fw3, fb3) = params
    dn = ('NCHW', 'OIHW', 'NCHW')
    y = lax.conv_general_dilated(x_nchw, w1, (1, 1), 'VALID', dimension_numbers=dn)
    y = jnp.maximum(y + b1[None, :, None, None], 0.0)
    y = lax.reduce_window(y, -jnp.inf, lax.max, (1, 1, 2, 2), (1, 1, 2, 2), 'VALID')
    y = lax.conv_general_dilated(y, w2, (1, 1), 'VALID', dimension_numbers=dn)
    y = jnp.maximum(y + b2[None, :, None, None], 0.0)
    y = lax.reduce_window(y, -jnp.inf, lax.max, (1, 1, 2, 2), (1, 1, 2, 2), 'VALID')
    y = y.reshape(y.shape[0], -1)                                       # (c, h, w) order
    y = jnp.maximum(y @ fw1.T + fb1, 0.0)
    y = jnp.maximum(y @ fw2.T + fb2, 0.0)
    return y @ fw3.T + fb3


# ----------------------------------------------------------------------------
# Deterministic parameter init (PyTorch-like uniform(-1/sqrt(fan_in), +))
# ----------------------------------------------------------------------------
def init_params(key):
    ks = jax.random.split(key, 10)

    def u(k, shape, fan_in):
        bound = 1.0 / math.sqrt(fan_in)
        return jax.random.uniform(k, shape, jnp.float32, -bound, bound)

    w1 = u(ks[0], (6, 1, 5, 5), 25);    b1 = u(ks[1], (6,), 25)
    w2 = u(ks[2], (16, 6, 5, 5), 150);  b2 = u(ks[3], (16,), 150)
    fw1 = u(ks[4], (120, 16 * 7 * 7), 784); fb1 = u(ks[5], (120,), 784)
    fw2 = u(ks[6], (84, 120), 120);     fb2 = u(ks[7], (84,), 120)
    fw3 = u(ks[8], (10, 84), 84);       fb3 = u(ks[9], (10,), 84)
    return (w1, b1, w2, b2, fw1, fb1, fw2, fb2, fw3, fb3)


if __name__ == "__main__":
    key = jax.random.PRNGKey(0)
    kx, kp = jax.random.split(key)
    # Net.input_dim = (40, 40), 1 input channel (fc1 expects 16*7*7 features)
    x = jax.random.normal(kx, (2, 1, 40, 40), jnp.float32)
    params = init_params(kp)
    prepped = prepare_params(params)      # one-time weight permute/regroup/pad/cast

    fwd = jax.jit(net_forward_pallas)
    out = jax.block_until_ready(fwd(x, prepped))
    assert out.shape == (2, 10), out.shape

    ref = jax.block_until_ready(net_forward_ref(x, params))
    np.testing.assert_allclose(np.asarray(out, dtype=np.float32), np.asarray(ref),
                               rtol=5e-2, atol=5e-2)

    # TODO(synk): the debug `print(self.num_flat_features(x), 16*5*5)` in forward is a
    # host-side side effect with no kernel equivalent; intentionally omitted.
    print("KERNEL_OK")
</pallas_src>

<mosaic_0001>
module attributes {stable_mosaic.version = 11 : i64} {
  func.func @_conv_pool_kernel(%arg0: i32, %arg1: memref<2592x25xbf16, #tpu.memory_space<vmem>>, %arg2: memref<25x128xbf16, #tpu.memory_space<vmem>>, %arg3: memref<1x128xf32, #tpu.memory_space<vmem>>, %arg4: memref<648x8xbf16, #tpu.memory_space<vmem>>) attributes {dimension_semantics = [#tpu.dimension_semantics<arbitrary>], iteration_bounds = array<i64: 1>, scalar_prefetch = 0 : i64, scratch_operands = 0 : i64, tpu.core_type = #tpu.core_type<tc>, window_params = [{pipeline_mode = #tpu.pipeline_mode<synchronous>, transform_indices = @transform_0, window_bounds = array<i64: 2592, 25>}, {pipeline_mode = #tpu.pipeline_mode<synchronous>, transform_indices = @transform_1, window_bounds = array<i64: 25, 128>}, {pipeline_mode = #tpu.pipeline_mode<synchronous>, transform_indices = @transform_2, window_bounds = array<i64: 1, 128>}, {pipeline_mode = #tpu.pipeline_mode<synchronous>, transform_indices = @transform_3, window_bounds = array<i64: 648, 8>}]} {
    %c0 = arith.constant 0 : index
    %c0_0 = arith.constant 0 : index
    %0 = vector.load %arg1[%c0, %c0_0] : memref<2592x25xbf16, #tpu.memory_space<vmem>>, vector<2592x25xbf16>
    %c0_1 = arith.constant 0 : index
    %c0_2 = arith.constant 0 : index
    %1 = vector.load %arg2[%c0_1, %c0_2] : memref<25x128xbf16, #tpu.memory_space<vmem>>, vector<25x128xbf16>
    %cst = arith.constant dense<0.000000e+00> : vector<2592x128xf32>
    %2 = tpu.matmul %0, %1, %cst {dimension_numbers = #tpu.dot_dimension_numbers<[1], [0], [0], [1], [0, 0, 1, 1], [], []>} : vector<2592x25xbf16>, vector<25x128xbf16>, vector<2592x128xf32> -> vector<2592x128xf32>
    %3 = vector.shape_cast %2 : vector<2592x128xf32> to vector<4x648x128xf32>
    %cst_3 = arith.constant dense<0xFF800000> : vector<648x128xf32>
    %4 = vector.multi_reduction <maximumf>, %3, %cst_3 [0] : vector<4x648x128xf32> to vector<648x128xf32>
    %c0_4 = arith.constant 0 : index
    %c0_5 = arith.constant 0 : index
    %5 = vector.load %arg3[%c0_4, %c0_5] : memref<1x128xf32, #tpu.memory_space<vmem>>, vector<1x128xf32>
    %6 = vector.broadcast %5 : vector<1x128xf32> to vector<648x128xf32>
    %7 = arith.addf %4, %6 : vector<648x128xf32>
    %cst_6 = arith.constant 0.000000e+00 : f32
    %8 = vector.broadcast %cst_6 : f32 to vector<648x128xf32>
    %9 = arith.maximumf %7, %8 : vector<648x128xf32>
    %10 = vector.extract_strided_slice %9 {offsets = [0, 0], sizes = [648, 8], strides = [1, 1]} : vector<648x128xf32> to vector<648x8xf32>
    %11 = arith.truncf %10 : vector<648x8xf32> to vector<648x8xbf16>
    %c0_7 = arith.constant 0 : index
    %c0_8 = arith.constant 0 : index
    %12 = vector.load %arg4[%c0_7, %c0_8] : memref<648x8xbf16, #tpu.memory_space<vmem>>, vector<648x8xbf16>
    tpu.vector_store %arg4[%c0_7, %c0_8], %11 {strides = array<i32>} : memref<648x8xbf16, #tpu.memory_space<vmem>>, vector<648x8xbf16>,
    return
  }
  func.func @transform_0(%arg0: i32) -> (i32, i32) {
    %c0_i32 = arith.constant 0 : i32
    %c0_i32_0 = arith.constant 0 : i32
    %c0_i32_1 = arith.constant 0 : i32
    return %c0_i32, %c0_i32_0 : i32, i32
  }
  func.func @transform_1(%arg0: i32) -> (i32, i32) {
    %c0_i32 = arith.constant 0 : i32
    %c0_i32_0 = arith.constant 0 : i32
    %c0_i32_1 = arith.constant 0 : i32
    return %c0_i32, %c0_i32_0 : i32, i32
  }
  func.func @transform_2(%arg0: i32) -> (i32, i32) {
    %c0_i32 = arith.constant 0 : i32
    %c0_i32_0 = arith.constant 0 : i32
    %c0_i32_1 = arith.constant 0 : i32
    return %c0_i32, %c0_i32_0 : i32, i32
  }
  func.func @transform_3(%arg0: i32) -> (i32, i32) {
    %c0_i32 = arith.constant 0 : i32
    %c0_i32_0 = arith.constant 0 : i32
    %c0_i32_1 = arith.constant 0 : i32
    return %c0_i32, %c0_i32_0 : i32, i32
  }
}

module attributes {stable_mosaic.version = 11 : i64} {
  func.func @_conv_mlp_kernel(%arg0: i32, %arg1: memref<1568x200xbf16, #tpu.memory_space<vmem>>, %arg2: memref<200x128xbf16, #tpu.memory_space<vmem>>, %arg3: memref<1x128xf32, #tpu.memory_space<vmem>>, %arg4: memref<49x16x128xbf16, #tpu.memory_space<vmem>>, %arg5: memref<1x128xf32, #tpu.memory_space<vmem>>, %arg6: memref<128x128xbf16, #tpu.memory_space<vmem>>, %arg7: memref<1x128xf32, #tpu.memory_space<vmem>>, %arg8: memref<128x128xbf16, #tpu.memory_space<vmem>>, %arg9: memref<1x128xf32, #tpu.memory_space<vmem>>, %arg10: memref<8x128xf32, #tpu.memory_space<vmem>>) attributes {dimension_semantics = [#tpu.dimension_semantics<arbitrary>], iteration_bounds = array<i64: 1>, scalar_prefetch = 0 : i64, scratch_operands = 0 : i64, tpu.core_type = #tpu.core_type<tc>, window_params = [{pipeline_mode = #tpu.pipeline_mode<synchronous>, transform_indices = @transform_0, window_bounds = array<i64: 1568, 200>}, {pipeline_mode = #tpu.pipeline_mode<synchronous>, transform_indices = @transform_1, window_bounds = array<i64: 200, 128>}, {pipeline_mode = #tpu.pipeline_mode<synchronous>, transform_indices = @transform_2, window_bounds = array<i64: 1, 128>}, {pipeline_mode = #tpu.pipeline_mode<synchronous>, transform_indices = @transform_3, window_bounds = array<i64: 49, 16, 128>}, {pipeline_mode = #tpu.pipeline_mode<synchronous>, transform_indices = @transform_4, window_bounds = array<i64: 1, 128>}, {pipeline_mode = #tpu.pipeline_mode<synchronous>, transform_indices = @transform_5, window_bounds = array<i64: 128, 128>}, {pipeline_mode = #tpu.pipeline_mode<synchronous>, transform_indices = @transform_6, window_bounds = array<i64: 1, 128>}, {pipeline_mode = #tpu.pipeline_mode<synchronous>, transform_indices = @transform_7, window_bounds = array<i64: 128, 128>}, {pipeline_mode = #tpu.pipeline_mode<synchronous>, transform_indices = @transform_8, window_bounds = array<i64: 1, 128>}, {pipeline_mode = #tpu.pipeline_mode<synchronous>, transform_indices = @transform_9, window_bounds = array<i64: 8, 128>}]} {
    %c0 = arith.constant 0 : index
    %c0_0 = arith.constant 0 : index
    %0 = vector.load %arg1[%c0, %c0_0] : memref<1568x200xbf16, #tpu.memory_space<vmem>>, vector<1568x200xbf16>
    %c0_1 = arith.constant 0 : index
    %c0_2 = arith.constant 0 : index
    %1 = vector.load %arg2[%c0_1, %c0_2] : memref<200x128xbf16, #tpu.memory_space<vmem>>, vector<200x128xbf16>
    %cst = arith.constant dense<0.000000e+00> : vector<1568x128xf32>
    %2 = tpu.matmul %0, %1, %cst {dimension_numbers = #tpu.dot_dimension_numbers<[1], [0], [0], [1], [0, 0, 1, 1], [], []>} : vector<1568x200xbf16>, vector<200x128xbf16>, vector<1568x128xf32> -> vector<1568x128xf32>
    %3 = vector.shape_cast %2 : vector<1568x128xf32> to vector<4x392x128xf32>
    %cst_3 = arith.constant dense<0xFF800000> : vector<392x128xf32>
    %4 = vector.multi_reduction <maximumf>, %3, %cst_3 [0] : vector<4x392x128xf32> to vector<392x128xf32>
    %c0_4 = arith.constant 0 : index
    %c0_5 = arith.constant 0 : index
    %5 = vector.load %arg3[%c0_4, %c0_5] : memref<1x128xf32, #tpu.memory_space<vmem>>, vector<1x128xf32>
    %6 = vector.broadcast %5 : vector<1x128xf32> to vector<392x128xf32>
    %7 = arith.addf %4, %6 : vector<392x128xf32>
    %cst_6 = arith.constant 0.000000e+00 : f32
    %8 = vector.broadcast %cst_6 : f32 to vector<392x128xf32>
    %9 = arith.maximumf %7, %8 : vector<392x128xf32>
    %cst_7 = arith.constant 0.000000e+00 : f32
    %10 = vector.broadcast %cst_7 : f32 to vector<8x128xf32>
    %11 = vector.extract_strided_slice %9 {offsets = [0, 0], sizes = [8, 16], strides = [1, 1]} : vector<392x128xf32> to vector<8x16xf32>
    %12 = arith.truncf %11 : vector<8x16xf32> to vector<8x16xbf16>
    %c0_8 = arith.constant 0 : index
    %c0_9 = arith.constant 0 : index
    %c0_10 = arith.constant 0 : index
    %13 = vector.load %arg4[%c0_8, %c0_9, %c0_10] : memref<49x16x128xbf16, #tpu.memory_space<vmem>>, vector<1x16x128xbf16>
    %14 = vector.shape_cast %13 : vector<1x16x128xbf16> to vector<16x128xbf16>
    %cst_11 = arith.constant dense<0.000000e+00> : vector<8x128xf32>
    %15 = tpu.matmul %12, %14, %cst_11 {dimension_numbers = #tpu.dot_dimension_numbers<[1], [0], [0], [1], [0, 0, 1, 1], [], []>} : vector<8x16xbf16>, vector<16x128xbf16>, vector<8x128xf32> -> vector<8x128xf32>
    %16 = arith.addf %10, %15 : vector<8x128xf32>
    %17 = vector.extract_strided_slice %9 {offsets = [8, 0], sizes = [8, 16], strides = [1, 1]} : vector<392x128xf32> to vector<8x16xf32>
    %18 = arith.truncf %17 : vector<8x16xf32> to vector<8x16xbf16>
    %c1 = arith.constant 1 : index
    %c0_12 = arith.constant 0 : index
    %c0_13 = arith.constant 0 : index
    %19 = vector.load %arg4[%c1, %c0_12, %c0_13] : memref<49x16x128xbf16, #tpu.memory_space<vmem>>, vector<1x16x128xbf16>
    %20 = vector.shape_cast %19 : vector<1x16x128xbf16> to vector<16x128xbf16>
    %cst_14 = arith.constant dense<0.000000e+00> : vector<8x128xf32>
    %21 = tpu.matmul %18, %20, %cst_14 {dimension_numbers = #tpu.dot_dimension_numbers<[1], [0], [0], [1], [0, 0, 1, 1], [], []>} : vector<8x16xbf16>, vector<16x128xbf16>, vector<8x128xf32> -> vector<8x128xf32>
    %22 = arith.addf %16, %21 : vector<8x128xf32>
    %23 = vector.extract_strided_slice %9 {offsets = [16, 0], sizes = [8, 16], strides = [1, 1]} : vector<392x128xf32> to vector<8x16xf32>
    %24 = arith.truncf %23 : vector<8x16xf32> to vector<8x16xbf16>
    %c2 = arith.constant 2 : index
    %c0_15 = arith.constant 0 : index
    %c0_16 = arith.constant 0 : index
    %25 = vector.load %arg4[%c2, %c0_15, %c0_16] : memref<49x16x128xbf16, #tpu.memory_space<vmem>>, vector<1x16x128xbf16>
    %26 = vector.shape_cast %25 : vector<1x16x128xbf16> to vector<16x128xbf16>
    %cst_17 = arith.constant dense<0.000000e+00> : vector<8x128xf32>
    %27 = tpu.matmul %24, %26, %cst_17 {dimension_numbers = #tpu.dot_dimension_numbers<[1], [0], [0], [1], [0, 0, 1, 1], [], []>} : vector<8x16xbf16>, vector<16x128xbf16>, vector<8x128xf32> -> vector<8x128xf32>
    %28 = arith.addf %22, %27 : vector<8x128xf32>
    %29 = vector.extract_strided_slice %9 {offsets = [24, 0], sizes = [8, 16], strides = [1, 1]} : vector<392x128xf32> to vector<8x16xf32>
    %30 = arith.truncf %29 : vector<8x16xf32> to vector<8x16xbf16>
    %c3 = arith.constant 3 : index
    %c0_18 = arith.constant 0 : index
    %c0_19 = arith.constant 0 : index
    %31 = vector.load %arg4[%c3, %c0_18, %c0_19] : memref<49x16x128xbf16, #tpu.memory_space<vmem>>, vector<1x16x128xbf16>
    %32 = vector.shape_cast %31 : vector<1x16x128xbf16> to vector<16x128xbf16>
    %cst_20 = arith.constant dense<0.000000e+00> : vector<8x128xf32>
    %33 = tpu.matmul %30, %32, %cst_20 {dimension_numbers = #tpu.dot_dimension_numbers<[1], [0], [0], [1], [0, 0, 1, 1], [], []>} : vector<8x16xbf16>, vector<16x128xbf16>, vector<8x128xf32> -> vector<8x128xf32>
    %34 = arith.addf %28, %33 : vector<8x128xf32>
    %35 = vector.extract_strided_slice %9 {offsets = [32, 0], sizes = [8, 16], strides = [1, 1]} : vector<392x128xf32> to vector<8x16xf32>
    %36 = arith.truncf %35 : vector<8x16xf32> to vector<8x16xbf16>
    %c4 = arith.constant 4 : index
    %c0_21 = arith.constant 0 : index
    %c0_22 = arith.constant 0 : index
    %37 = vector.load %arg4[%c4, %c0_21, %c0_22] : memref<49x16x128xbf16, #tpu.memory_space<vmem>>, vector<1x16x128xbf16>
    %38 = vector.shape_cast %37 : vector<1x16x128xbf16> to vector<16x128xbf16>
    %cst_23 = arith.constant dense<0.000000e+00> : vector<8x128xf32>
    %39 = tpu.matmul %36, %38, %cst_23 {dimension_numbers = #tpu.dot_dimension_numbers<[1], [0], [0], [1], [0, 0, 1, 1], [], []>} : vector<8x16xbf16>, vector<16x128xbf16>, vector<8x128xf32> -> vector<8x128xf32>
    %40 = arith.addf %34, %39 : vector<8x128xf32>
    %41 = vector.extract_strided_slice %9 {offsets = [40, 0], sizes = [8, 16], strides = [1, 1]} : vector<392x128xf32> to vector<8x16xf32>
    %42 = arith.truncf %41 : vector<8x16xf32> to vector<8x16xbf16>
    %c5 = arith.constant 5 : index
    %c0_24 = arith.constant 0 : index
    %c0_25 = arith.constant 0 : index
    %43 = vector.load %arg4[%c5, %c0_24, %c0_25] : memref<49x16x128xbf16, #tpu.memory_space<vmem>>, vector<1x16x128xbf16>
    %44 = vector.shape_cast %43 : vector<1x16x128xbf16> to vector<16x128xbf16>
    %cst_26 = arith.constant dense<0.000000e+00> : vector<8x128xf32>
    %45 = tpu.matmul %42, %44, %cst_26 {dimension_numbers = #tpu.dot_dimension_numbers<[1], [0], [0], [1], [0, 0, 1, 1], [], []>} : vector<8x16xbf16>, vector<16x128xbf16>, vector<8x128xf32> -> vector<8x128xf32>
    %46 = arith.addf %40, %45 : vector<8x128xf32>
    %47 = vector.extract_strided_slice %9 {offsets = [48, 0], sizes = [8, 16], strides = [1, 1]} : vector<392x128xf32> to vector<8x16xf32>
    %48 = arith.truncf %47 : vector<8x16xf32> to vector<8x16xbf16>
    %c6 = arith.constant 6 : index
    %c0_27 = arith.constant 0 : index
    %c0_28 = arith.constant 0 : index
    %49 = vector.load %arg4[%c6, %c0_27, %c0_28] : memref<49x16x128xbf16, #tpu.memory_space<vmem>>, vector<1x16x128xbf16>
    %50 = vector.shape_cast %49 : vector<1x16x128xbf16> to vector<16x128xbf16>
    %cst_29 = arith.constant dense<0.000000e+00> : vector<8x128xf32>
    %51 = tpu.matmul %48, %50, %cst_29 {dimension_numbers = #tpu.dot_dimension_numbers<[1], [0], [0], [1], [0, 0, 1, 1], [], []>} : vector<8x16xbf16>, vector<16x128xbf16>, vector<8x128xf32> -> vector<8x128xf32>
    %52 = arith.addf %46, %51 : vector<8x128xf32>
    %53 = vector.extract_strided_slice %9 {offsets = [56, 0], sizes = [8, 16], strides = [1, 1]} : vector<392x128xf32> to vector<8x16xf32>
    %54 = arith.truncf %53 : vector<8x16xf32> to vector<8x16xbf16>
    %c7 = arith.constant 7 : index
    %c0_30 = arith.constant 0 : index
    %c0_31 = arith.constant 0 : index
    %55 = vector.load %arg4[%c7, %c0_30, %c0_31] : memref<49x16x128xbf16, #tpu.memory_space<vmem>>, vector<1x16x128xbf16>
    %56 = vector.shape_cast %55 : vector<1x16x128xbf16> to vector<16x128xbf16>
    %cst_32 = arith.constant dense<0.000000e+00> : vector<8x128xf32>
    %57 = tpu.matmul %54, %56, %cst_32 {dimension_numbers = #tpu.dot_dimension_numbers<[1], [0], [0], [1], [0, 0, 1, 1], [], []>} : vector<8x16xbf16>, vector<16x128xbf16>, vector<8x128xf32> -> vector<8x128xf32>
    %58 = arith.addf %52, %57 : vector<8x128xf32>
    %59 = vector.extract_strided_slice %9 {offsets = [64, 0], sizes = [8, 16], strides = [1, 1]} : vector<392x128xf32> to vector<8x16xf32>
    %60 = arith.truncf %59 : vector<8x16xf32> to vector<8x16xbf16>
    %c8 = arith.constant 8 : index
    %c0_33 = arith.constant 0 : index
    %c0_34 = arith.constant 0 : index
    %61 = vector.load %arg4[%c8, %c0_33, %c0_34] : memref<49x16x128xbf16, #tpu.memory_space<vmem>>, vector<1x16x128xbf16>
    %62 = vector.shape_cast %61 : vector<1x16x128xbf16> to vector<16x128xbf16>
    %cst_35 = arith.constant dense<0.000000e+00> : vector<8x128xf32>
    %63 = tpu.matmul %60, %62, %cst_35 {dimension_numbers = #tpu.dot_dimension_numbers<[1], [0], [0], [1], [0, 0, 1, 1], [], []>} : vector<8x16xbf16>, vector<16x128xbf16>, vector<8x128xf32> -> vector<8x128xf32>
    %64 = arith.addf %58, %63 : vector<8x128xf32>
    %65 = vector.extract_strided_slice %9 {offsets = [72, 0], sizes = [8, 16], strides = [1, 1]} : vector<392x128xf32> to vector<8x16xf32>
    %66 = arith.truncf %65 : vector<8x16xf32> to vector<8x16xbf16>
    %c9 = arith.constant 9 : index
    %c0_36 = arith.constant 0 : index
    %c0_37 = arith.constant 0 : index
    %67 = vector.load %arg4[%c9, %c0_36, %c0_37] : memref<49x16x128xbf16, #tpu.memory_space<vmem>>, vector<1x16x128xbf16>
    %68 = vector.shape_cast %67 : vector<1x16x128xbf16> to vector<16x128xbf16>
    %cst_38 = arith.constant dense<0.000000e+00> : vector<8x128xf32>
    %69 = tpu.matmul %66, %68, %cst_38 {dimension_numbers = #tpu.dot_dimension_numbers<[1], [0], [0], [1], [0, 0, 1, 1], [], []>} : vector<8x16xbf16>, vector<16x128xbf16>, vector<8x128xf32> -> vector<8x128xf32>
    %70 = arith.addf %64, %69 : vector<8x128xf32>
    %71 = vector.extract_strided_slice %9 {offsets = [80, 0], sizes = [8, 16], strides = [1, 1]} : vector<392x128xf32> to vector<8x16xf32>
    %72 = arith.truncf %71 : vector<8x16xf32> to vector<8x16xbf16>
    %c10 = arith.constant 10 : index
    %c0_39 = arith.constant 0 : index
    %c0_40 = arith.constant 0 : index
    %73 = vector.load %arg4[%c10, %c0_39, %c0_40] : memref<49x16x128xbf16, #tpu.memory_space<vmem>>, vector<1x16x128xbf16>
    %74 = vector.shape_cast %73 : vector<1x16x128xbf16> to vector<16x128xbf16>
    %cst_41 = arith.constant dense<0.000000e+00> : vector<8x128xf32>
    %75 = tpu.matmul %72, %74, %cst_41 {dimension_numbers = #tpu.dot_dimension_numbers<[1], [0], [0], [1], [0, 0, 1, 1], [], []>} : vector<8x16xbf16>, vector<16x128xbf16>, vector<8x128xf32> -> vector<8x128xf32>
    %76 = arith.addf %70, %75 : vector<8x128xf32>
    %77 = vector.extract_strided_slice %9 {offsets = [88, 0], sizes = [8, 16], strides = [1, 1]} : vector<392x128xf32> to vector<8x16xf32>
    %78 = arith.truncf %77 : vector<8x16xf32> to vector<8x16xbf16>
    %c11 = arith.constant 11 : index
    %c0_42 = arith.constant 0 : index
    %c0_43 = arith.constant 0 : index
    %79 = vector.load %arg4[%c11, %c0_42, %c0_43] : memref<49x16x128xbf16, #tpu.memory_space<vmem>>, vector<1x16x128xbf16>
    %80 = vector.shape_cast %79 : vector<1x16x128xbf16> to vector<16x128xbf16>
    %cst_44 = arith.constant dense<0.000000e+00> : vector<8x128xf32>
    %81 = tpu.matmul %78, %80, %cst_44 {dimension_numbers = #tpu.dot_dimension_numbers<[1], [0], [0], [1], [0, 0, 1, 1], [], []>} : vector<8x16xbf16>, vector<16x128xbf16>, vector<8x128xf32> -> vector<8x128xf32>
    %82 = arith.addf %76, %81 : vector<8x128xf32>
    %83 = vector.extract_strided_slice %9 {offsets = [96, 0], sizes = [8, 16], strides = [1, 1]} : vector<392x128xf32> to vector<8x16xf32>
    %84 = arith.truncf %83 : vector<8x16xf32> to vector<8x16xbf16>
    %c12 = arith.constant 12 : index
    %c0_45 = arith.constant 0 : index
    %c0_46 = arith.constant 0 : index
    %85 = vector.load %arg4[%c12, %c0_45, %c0_46] : memref<49x16x128xbf16, #tpu.memory_space<vmem>>, vector<1x16x128xbf16>
    %86 = vector.shape_cast %85 : vector<1x16x128xbf16> to vector<16x128xbf16>
    %cst_47 = arith.constant dense<0.000000e+00> : vector<8x128xf32>
    %87 = tpu.matmul %84, %86, %cst_47 {dimension_numbers = #tpu.dot_dimension_numbers<[1], [0], [0], [1], [0, 0, 1, 1], [], []>} : vector<8x16xbf16>, vector<16x128xbf16>, vector<8x128xf32> -> vector<8x128xf32>
    %88 = arith.addf %82, %87 : vector<8x128xf32>
    %89 = vector.extract_strided_slice %9 {offsets = [104, 0], sizes = [8, 16], strides = [1, 1]} : vector<392x128xf32> to vector<8x16xf32>
    %90 = arith.truncf %89 : vector<8x16xf32> to vector<8x16xbf16>
    %c13 = arith.constant 13 : index
    %c0_48 = arith.constant 0 : index
    %c0_49 = arith.constant 0 : index
    %91 = vector.load %arg4[%c13, %c0_48, %c0_49] : memref<49x16x128xbf16, #tpu.memory_space<vmem>>, vector<1x16x128xbf16>
    %92 = vector.shape_cast %91 : vector<1x16x128xbf16> to vector<16x128xbf16>
    %cst_50 = arith.constant dense<0.000000e+00> : vector<8x128xf32>
    %93 = tpu.matmul %90, %92, %cst_50 {dimension_numbers = #tpu.dot_dimension_numbers<[1], [0], [0], [1], [0, 0, 1, 1], [], []>} : vector<8x16xbf16>, vector<16x128xbf16>, vector<8x128xf32> -> vector<8x128xf32>
    %94 = arith.addf %88, %93 : vector<8x128xf32>
    %95 = vector.extract_strided_slice %9 {offsets = [112, 0], sizes = [8, 16], strides = [1, 1]} : vector<392x128xf32> to vector<8x16xf32>
    %96 = arith.truncf %95 : vector<8x16xf32> to vector<8x16xbf16>
    %c14 = arith.constant 14 : index
    %c0_51 = arith.constant 0 : index
    %c0_52 = arith.constant 0 : index
    %97 = vector.load %arg4[%c14, %c0_51, %c0_52] : memref<49x16x128xbf16, #tpu.memory_space<vmem>>, vector<1x16x128xbf16>
    %98 = vector.shape_cast %97 : vector<1x16x128xbf16> to vector<16x128xbf16>
    %cst_53 = arith.constant dense<0.000000e+00> : vector<8x128xf32>
    %99 = tpu.matmul %96, %98, %cst_53 {dimension_numbers = #tpu.dot_dimension_numbers<[1], [0], [0], [1], [0, 0, 1, 1], [], []>} : vector<8x16xbf16>, vector<16x128xbf16>, vector<8x128xf32> -> vector<8x128xf32>
    %100 = arith.addf %94, %99 : vector<8x128xf32>
    %101 = vector.extract_strided_slice %9 {offsets = [120, 0], sizes = [8, 16], strides = [1, 1]} : vector<392x128xf32> to vector<8x16xf32>
    %102 = arith.truncf %101 : vector<8x16xf32> to vector<8x16xbf16>
    %c15 = arith.constant 15 : index
    %c0_54 = arith.constant 0 : index
    %c0_55 = arith.constant 0 : index
    %103 = vector.load %arg4[%c15, %c0_54, %c0_55] : memref<49x16x128xbf16, #tpu.memory_space<vmem>>, vector<1x16x128xbf16>
    %104 = vector.shape_cast %103 : vector<1x16x128xbf16> to vector<16x128xbf16>
    %cst_56 = arith.constant dense<0.000000e+00> : vector<8x128xf32>
    %105 = tpu.matmul %102, %104, %cst_56 {dimension_numbers = #tpu.dot_dimension_numbers<[1], [0], [0], [1], [0, 0, 1, 1], [], []>} : vector<8x16xbf16>, vector<16x128xbf16>, vector<8x128xf32> -> vector<8x128xf32>
    %106 = arith.addf %100, %105 : vector<8x128xf32>
    %107 = vector.extract_strided_slice %9 {offsets = [128, 0], sizes = [8, 16], strides = [1, 1]} : vector<392x128xf32> to vector<8x16xf32>
    %108 = arith.truncf %107 : vector<8x16xf32> to vector<8x16xbf16>
    %c16 = arith.constant 16 : index
    %c0_57 = arith.constant 0 : index
    %c0_58 = arith.constant 0 : index
    %109 = vector.load %arg4[%c16, %c0_57, %c0_58] : memref<49x16x128xbf16, #tpu.memory_space<vmem>>, vector<1x16x128xbf16>
    %110 = vector.shape_cast %109 : vector<1x16x128xbf16> to vector<16x128xbf16>
    %cst_59 = arith.constant dense<0.000000e+00> : vector<8x128xf32>
    %111 = tpu.matmul %108, %110, %cst_59 {dimension_numbers = #tpu.dot_dimension_numbers<[1], [0], [0], [1], [0, 0, 1, 1], [], []>} : vector<8x16xbf16>, vector<16x128xbf16>, vector<8x128xf32> -> vector<8x128xf32>
    %112 = arith.addf %106, %111 : vector<8x128xf32>
    %113 = vector.extract_strided_slice %9 {offsets = [136, 0], sizes = [8, 16], strides = [1, 1]} : vector<392x128xf32> to vector<8x16xf32>
    %114 = arith.truncf %113 : vector<8x16xf32> to vector<8x16xbf16>
    %c17 = arith.constant 17 : index
    %c0_60 = arith.constant 0 : index
    %c0_61 = arith.constant 0 : index
    %115 = vector.load %arg4[%c17, %c0_60, %c0_61] : memref<49x16x128xbf16, #tpu.memory_space<vmem>>, vector<1x16x128xbf16>
    %116 = vector.shape_cast %115 : vector<1x16x128xbf16> to vector<16x128xbf16>
    %cst_62 = arith.constant dense<0.000000e+00> : vector<8x128xf32>
    %117 = tpu.matmul %114, %116, %cst_62 {dimension_numbers = #tpu.dot_dimension_numbers<[1], [0], [0], [1], [0, 0, 1, 1], [], []>} : vector<8x16xbf16>, vector<16x128xbf16>, vector<8x128xf32> -> vector<8x128xf32>
    %118 = arith.addf %112, %117 : vector<8x128xf32>
    %119 = vector.extract_strided_slice %9 {offsets = [144, 0], sizes = [8, 16], strides = [1, 1]} : vector<392x128xf32> to vector<8x16xf32>
    %120 = arith.truncf %119 : vector<8x16xf32> to vector<8x16xbf16>
    %c18 = arith.constant 18 : index
    %c0_63 = arith.constant 0 : index
    %c0_64 = arith.constant 0 : index
    %121 = vector.load %arg4[%c18, %c0_63, %c0_64] : memref<49x16x128xbf16, #tpu.memory_space<vmem>>, vector<1x16x128xbf16>
    %122 = vector.shape_cast %121 : vector<1x16x128xbf16> to vector<16x128xbf16>
    %cst_65 = arith.constant dense<0.000000e+00> : vector<8x128xf32>
    %123 = tpu.matmul %120, %122, %cst_65 {dimension_numbers = #tpu.dot_dimension_numbers<[1], [0], [0], [1], [0, 0, 1, 1], [], []>} : vector<8x16xbf16>, vector<16x128xbf16>, vector<8x128xf32> -> vector<8x128xf32>
    %124 = arith.addf %118, %123 : vector<8x128xf32>
    %125 = vector.extract_strided_slice %9 {offsets = [152, 0], sizes = [8, 16], strides = [1, 1]} : vector<392x128xf32> to vector<8x16xf32>
    %126 = arith.truncf %125 : vector<8x16xf32> to vector<8x16xbf16>
    %c19 = arith.constant 19 : index
    %c0_66 = arith.constant 0 : index
    %c0_67 = arith.constant 0 : index
    %127 = vector.load %arg4[%c19, %c0_66, %c0_67] : memref<49x16x128xbf16, #tpu.memory_space<vmem>>, vector<1x16x128xbf16>
    %128 = vector.shape_cast %127 : vector<1x16x128xbf16> to vector<16x128xbf16>
    %cst_68 = arith.constant dense<0.000000e+00> : vector<8x128xf32>
    %129 = tpu.matmul %126, %128, %cst_68 {dimension_numbers = #tpu.dot_dimension_numbers<[1], [0], [0], [1], [0, 0, 1, 1], [], []>} : vector<8x16xbf16>, vector<16x128xbf16>, vector<8x128xf32> -> vector<8x128xf32>
    %130 = arith.addf %124, %129 : vector<8x128xf32>
    %131 = vector.extract_strided_slice %9 {offsets = [160, 0], sizes = [8, 16], strides = [1, 1]} : vector<392x128xf32> to vector<8x16xf32>
    %132 = arith.truncf %131 : vector<8x16xf32> to vector<8x16xbf16>
    %c20 = arith.constant 20 : index
    %c0_69 = arith.constant 0 : index
    %c0_70 = arith.constant 0 : index
    %133 = vector.load %arg4[%c20, %c0_69, %c0_70] : memref<49x16x128xbf16, #tpu.memory_space<vmem>>, vector<1x16x128xbf16>
    %134 = vector.shape_cast %133 : vector<1x16x128xbf16> to vector<16x128xbf16>
    %cst_71 = arith.constant dense<0.000000e+00> : vector<8x128xf32>
    %135 = tpu.matmul %132, %134, %cst_71 {dimension_numbers = #tpu.dot_dimension_numbers<[1], [0], [0], [1], [0, 0, 1, 1], [], []>} : vector<8x16xbf16>, vector<16x128xbf16>, vector<8x128xf32> -> vector<8x128xf32>
    %136 = arith.addf %130, %135 : vector<8x128xf32>
    %137 = vector.extract_strided_slice %9 {offsets = [168, 0], sizes = [8, 16], strides = [1, 1]} : vector<392x128xf32> to vector<8x16xf32>
    %138 = arith.truncf %137 : vector<8x16xf32> to vector<8x16xbf16>
    %c21 = arith.constant 21 : index
    %c0_72 = arith.constant 0 : index
    %c0_73 = arith.constant 0 : index
    %139 = vector.load %arg4[%c21, %c0_72, %c0_73] : memref<49x16x128xbf16, #tpu.memory_space<vmem>>, vector<1x16x128xbf16>
    %140 = vector.shape_cast %139 : vector<1x16x128xbf16> to vector<16x128xbf16>
    %cst_74 = arith.constant dense<0.000000e+00> : vector<8x128xf32>
    %141 = tpu.matmul %138, %140, %cst_74 {dimension_numbers = #tpu.dot_dimension_numbers<[1], [0], [0], [1], [0, 0, 1, 1], [], []>} : vector<8x16xbf16>, vector<16x128xbf16>, vector<8x128xf32> -> vector<8x128xf32>
    %142 = arith.addf %136, %141 : vector<8x128xf32>
    %143 = vector.extract_strided_slice %9 {offsets = [176, 0], sizes = [8, 16], strides = [1, 1]} : vector<392x128xf32> to vector<8x16xf32>
    %144 = arith.truncf %143 : vector<8x16xf32> to vector<8x16xbf16>
    %c22 = arith.constant 22 : index
    %c0_75 = arith.constant 0 : index
    %c0_76 = arith.constant 0 : index
    %145 = vector.load %arg4[%c22, %c0_75, %c0_76] : memref<49x16x128xbf16, #tpu.memory_space<vmem>>, vector<1x16x128xbf16>
    %146 = vector.shape_cast %145 : vector<1x16x128xbf16> to vector<16x128xbf16>
    %cst_77 = arith.constant dense<0.000000e+00> : vector<8x128xf32>
    %147 = tpu.matmul %144, %146, %cst_77 {dimension_numbers = #tpu.dot_dimension_numbers<[1], [0], [0], [1], [0, 0, 1, 1], [], []>} : vector<8x16xbf16>, vector<16x128xbf16>, vector<8x128xf32> -> vector<8x128xf32>
    %148 = arith.addf %142, %147 : vector<8x128xf32>
    %149 = vector.extract_strided_slice %9 {offsets = [184, 0], sizes = [8, 16], strides = [1, 1]} : vector<392x128xf32> to vector<8x16xf32>
    %150 = arith.truncf %149 : vector<8x16xf32> to vector<8x16xbf16>
    %c23 = arith.constant 23 : index
    %c0_78 = arith.constant 0 : index
    %c0_79 = arith.constant 0 : index
    %151 = vector.load %arg4[%c23, %c0_78, %c0_79] : memref<49x16x128xbf16, #tpu.memory_space<vmem>>, vector<1x16x128xbf16>
    %152 = vector.shape_cast %151 : vector<1x16x128xbf16> to vector<16x128xbf16>
    %cst_80 = arith.constant dense<0.000000e+00> : vector<8x128xf32>
    %153 = tpu.matmul %150, %152, %cst_80 {dimension_numbers = #tpu.dot_dimension_numbers<[1], [0], [0], [1], [0, 0, 1, 1], [], []>} : vector<8x16xbf16>, vector<16x128xbf16>, vector<8x128xf32> -> vector<8x128xf32>
    %154 = arith.addf %148, %153 : vector<8x128xf32>
    %155 = vector.extract_strided_slice %9 {offsets = [192, 0], sizes = [8, 16], strides = [1, 1]} : vector<392x128xf32> to vector<8x16xf32>
    %156 = arith.truncf %155 : vector<8x16xf32> to vector<8x16xbf16>
    %c24 = arith.constant 24 : index
    %c0_81 = arith.constant 0 : index
    %c0_82 = arith.constant 0 : index
    %157 = vector.load %arg4[%c24, %c0_81, %c0_82] : memref<49x16x128xbf16, #tpu.memory_space<vmem>>, vector<1x16x128xbf16>
    %158 = vector.shape_cast %157 : vector<1x16x128xbf16> to vector<16x128xbf16>
    %cst_83 = arith.constant dense<0.000000e+00> : vector<8x128xf32>
    %159 = tpu.matmul %156, %158, %cst_83 {dimension_numbers = #tpu.dot_dimension_numbers<[1], [0], [0], [1], [0, 0, 1, 1], [], []>} : vector<8x16xbf16>, vector<16x128xbf16>, vector<8x128xf32> -> vector<8x128xf32>
    %160 = arith.addf %154, %159 : vector<8x128xf32>
    %161 = vector.extract_strided_slice %9 {offsets = [200, 0], sizes = [8, 16], strides = [1, 1]} : vector<392x128xf32> to vector<8x16xf32>
    %162 = arith.truncf %161 : vector<8x16xf32> to vector<8x16xbf16>
    %c25 = arith.constant 25 : index
    %c0_84 = arith.constant 0 : index
    %c0_85 = arith.constant 0 : index
    %163 = vector.load %arg4[%c25, %c0_84, %c0_85] : memref<49x16x128xbf16, #tpu.memory_space<vmem>>, vector<1x16x128xbf16>
    %164 = vector.shape_cast %163 : vector<1x16x128xbf16> to vector<16x128xbf16>
    %cst_86 = arith.constant dense<0.000000e+00> : vector<8x128xf32>
    %165 = tpu.matmul %162, %164, %cst_86 {dimension_numbers = #tpu.dot_dimension_numbers<[1], [0], [0], [1], [0, 0, 1, 1], [], []>} : vector<8x16xbf16>, vector<16x128xbf16>, vector<8x128xf32> -> vector<8x128xf32>
    %166 = arith.addf %160, %165 : vector<8x128xf32>
    %167 = vector.extract_strided_slice %9 {offsets = [208, 0], sizes = [8, 16], strides = [1, 1]} : vector<392x128xf32> to vector<8x16xf32>
    %168 = arith.truncf %167 : vector<8x16xf32> to vector<8x16xbf16>
    %c26 = arith.constant 26 : index
    %c0_87 = arith.constant 0 : index
    %c0_88 = arith.constant 0 : index
    %169 = vector.load %arg4[%c26, %c0_87, %c0_88] : memref<49x16x128xbf16, #tpu.memory_space<vmem>>, vector<1x16x128xbf16>
    %170 = vector.shape_cast %169 : vector<1x16x128xbf16> to vector<16x128xbf16>
    %cst_89 = arith.constant dense<0.000000e+00> : vector<8x128xf32>
    %171 = tpu.matmul %168, %170, %cst_89 {dimension_numbers = #tpu.dot_dimension_numbers<[1], [0], [0], [1], [0, 0, 1, 1], [], []>} : vector<8x16xbf16>, vector<16x128xbf16>, vector<8x128xf32> -> vector<8x128xf32>
    %172 = arith.addf %166, %171 : vector<8x128xf32>
    %173 = vector.extract_strided_slice %9 {offsets = [216, 0], sizes = [8, 16], strides = [1, 1]} : vector<392x128xf32> to vector<8x16xf32>
    %174 = arith.truncf %173 : vector<8x16xf32> to vector<8x16xbf16>
    %c27 = arith.constant 27 : index
    %c0_90 = arith.constant 0 : index
    %c0_91 = arith.constant 0 : index
    %175 = vector.load %arg4[%c27, %c0_90, %c0_91] : memref<49x16x128xbf16, #tpu.memory_space<vmem>>, vector<1x16x128xbf16>
    %176 = vector.shape_cast %175 : vector<1x16x128xbf16> to vector<16x128xbf16>
    %cst_92 = arith.constant dense<0.000000e+00> : vector<8x128xf32>
    %177 = tpu.matmul %174, %176, %cst_92 {dimension_numbers = #tpu.dot_dimension_numbers<[1], [0], [0], [1], [0, 0, 1, 1], [], []>} : vector<8x16xbf16>, vector<16x128xbf16>, vector<8x128xf32> -> vector<8x128xf32>
    %178 = arith.addf %172, %177 : vector<8x128xf32>
    %179 = vector.extract_strided_slice %9 {offsets = [224, 0], sizes = [8, 16], strides = [1, 1]} : vector<392x128xf32> to vector<8x16xf32>
    %180 = arith.truncf %179 : vector<8x16xf32> to vector<8x16xbf16>
    %c28 = arith.constant 28 : index
    %c0_93 = arith.constant 0 : index
    %c0_94 = arith.constant 0 : index
    %181 = vector.load %arg4[%c28, %c0_93, %c0_94] : memref<49x16x128xbf16, #tpu.memory_space<vmem>>, vector<1x16x128xbf16>
    %182 = vector.shape_cast %181 : vector<1x16x128xbf16> to vector<16x128xbf16>
    %cst_95 = arith.constant dense<0.000000e+00> : vector<8x128xf32>
    %183 = tpu.matmul %180, %182, %cst_95 {dimension_numbers = #tpu.dot_dimension_numbers<[1], [0], [0], [1], [0, 0, 1, 1], [], []>} : vector<8x16xbf16>, vector<16x128xbf16>, vector<8x128xf32> -> vector<8x128xf32>
    %184 = arith.addf %178, %183 : vector<8x128xf32>
    %185 = vector.extract_strided_slice %9 {offsets = [232, 0], sizes = [8, 16], strides = [1, 1]} : vector<392x128xf32> to vector<8x16xf32>
    %186 = arith.truncf %185 : vector<8x16xf32> to vector<8x16xbf16>
    %c29 = arith.constant 29 : index
    %c0_96 = arith.constant 0 : index
    %c0_97 = arith.constant 0 : index
    %187 = vector.load %arg4[%c29, %c0_96, %c0_97] : memref<49x16x128xbf16, #tpu.memory_space<vmem>>, vector<1x16x128xbf16>
    %188 = vector.shape_cast %187 : vector<1x16x128xbf16> to vector<16x128xbf16>
    %cst_98 = arith.constant dense<0.000000e+00> : vector<8x128xf32>
    %189 = tpu.matmul %186, %188, %cst_98 {dimension_numbers = #tpu.dot_dimension_numbers<[1], [0], [0], [1], [0, 0, 1, 1], [], []>} : vector<8x16xbf16>, vector<16x128xbf16>, vector<8x128xf32> -> vector<8x128xf32>
    %190 = arith.addf %184, %189 : vector<8x128xf32>
    %191 = vector.extract_strided_slice %9 {offsets = [240, 0], sizes = [8, 16], strides = [1, 1]} : vector<392x128xf32> to vector<8x16xf32>
    %192 = arith.truncf %191 : vector<8x16xf32> to vector<8x16xbf16>
    %c30 = arith.constant 30 : index
    %c0_99 = arith.constant 0 : index
    %c0_100 = arith.constant 0 : index
    %193 = vector.load %arg4[%c30, %c0_99, %c0_100] : memref<49x16x128xbf16, #tpu.memory_space<vmem>>, vector<1x16x128xbf16>
    %194 = vector.shape_cast %193 : vector<1x16x128xbf16> to vector<16x128xbf16>
    %cst_101 = arith.constant dense<0.000000e+00> : vector<8x128xf32>
    %195 = tpu.matmul %192, %194, %cst_101 {dimension_numbers = #tpu.dot_dimension_numbers<[1], [0], [0], [1], [0, 0, 1, 1], [], []>} : vector<8x16xbf16>, vector<16x128xbf16>, vector<8x128xf32> -> vector<8x128xf32>
    %196 = arith.addf %190, %195 : vector<8x128xf32>
    %197 = vector.extract_strided_slice %9 {offsets = [248, 0], sizes = [8, 16], strides = [1, 1]} : vector<392x128xf32> to vector<8x16xf32>
    %198 = arith.truncf %197 : vector<8x16xf32> to vector<8x16xbf16>
    %c31 = arith.constant 31 : index
    %c0_102 = arith.constant 0 : index
    %c0_103 = arith.constant 0 : index
    %199 = vector.load %arg4[%c31, %c0_102, %c0_103] : memref<49x16x128xbf16, #tpu.memory_space<vmem>>, vector<1x16x128xbf16>
    %200 = vector.shape_cast %199 : vector<1x16x128xbf16> to vector<16x128xbf16>
    %cst_104 = arith.constant dense<0.000000e+00> : vector<8x128xf32>
    %201 = tpu.matmul %198, %200, %cst_104 {dimension_numbers = #tpu.dot_dimension_numbers<[1], [0], [0], [1], [0, 0, 1, 1], [], []>} : vector<8x16xbf16>, vector<16x128xbf16>, vector<8x128xf32> -> vector<8x128xf32>
    %202 = arith.addf %196, %201 : vector<8x128xf32>
    %203 = vector.extract_strided_slice %9 {offsets = [256, 0], sizes = [8, 16], strides = [1, 1]} : vector<392x128xf32> to vector<8x16xf32>
    %204 = arith.truncf %203 : vector<8x16xf32> to vector<8x16xbf16>
    %c32 = arith.constant 32 : index
    %c0_105 = arith.constant 0 : index
    %c0_106 = arith.constant 0 : index
    %205 = vector.load %arg4[%c32, %c0_105, %c0_106] : memref<49x16x128xbf16, #tpu.memory_space<vmem>>, vector<1x16x128xbf16>
    %206 = vector.shape_cast %205 : vector<1x16x128xbf16> to vector<16x128xbf16>
    %cst_107 = arith.constant dense<0.000000e+00> : vector<8x128xf32>
    %207 = tpu.matmul %204, %206, %cst_107 {dimension_numbers = #tpu.dot_dimension_numbers<[1], [0], [0], [1], [0, 0, 1, 1], [], []>} : vector<8x16xbf16>, vector<16x128xbf16>, vector<8x128xf32> -> vector<8x128xf32>
    %208 = arith.addf %202, %207 : vector<8x128xf32>
    %209 = vector.extract_strided_slice %9 {offsets = [264, 0], sizes = [8, 16], strides = [1, 1]} : vector<392x128xf32> to vector<8x16xf32>
    %210 = arith.truncf %209 : vector<8x16xf32> to vector<8x16xbf16>
    %c33 = arith.constant 33 : index
    %c0_108 = arith.constant 0 : index
    %c0_109 = arith.constant 0 : index
    %211 = vector.load %arg4[%c33, %c0_108, %c0_109] : memref<49x16x128xbf16, #tpu.memory_space<vmem>>, vector<1x16x128xbf16>
    %212 = vector.shape_cast %211 : vector<1x16x128xbf16> to vector<16x128xbf16>
    %cst_110 = arith.constant dense<0.000000e+00> : vector<8x128xf32>
    %213 = tpu.matmul %210, %212, %cst_110 {dimension_numbers = #tpu.dot_dimension_numbers<[1], [0], [0], [1], [0, 0, 1, 1], [], []>} : vector<8x16xbf16>, vector<16x128xbf16>, vector<8x128xf32> -> vector<8x128xf32>
    %214 = arith.addf %208, %213 : vector<8x128xf32>
    %215 = vector.extract_strided_slice %9 {offsets = [272, 0], sizes = [8, 16], strides = [1, 1]} : vector<392x128xf32> to vector<8x16xf32>
    %216 = arith.truncf %215 : vector<8x16xf32> to vector<8x16xbf16>
    %c34 = arith.constant 34 : index
    %c0_111 = arith.constant 0 : index
    %c0_112 = arith.constant 0 : index
    %217 = vector.load %arg4[%c34, %c0_111, %c0_112] : memref<49x16x128xbf16, #tpu.memory_space<vmem>>, vector<1x16x128xbf16>
    %218 = vector.shape_cast %217 : vector<1x16x128xbf16> to vector<16x128xbf16>
    %cst_113 = arith.constant dense<0.000000e+00> : vector<8x128xf32>
    %219 = tpu.matmul %216, %218, %cst_113 {dimension_numbers = #tpu.dot_dimension_numbers<[1], [0], [0], [1], [0, 0, 1, 1], [], []>} : vector<8x16xbf16>, vector<16x128xbf16>, vector<8x128xf32> -> vector<8x128xf32>
    %220 = arith.addf %214, %219 : vector<8x128xf32>
    %221 = vector.extract_strided_slice %9 {offsets = [280, 0], sizes = [8, 16], strides = [1, 1]} : vector<392x128xf32> to vector<8x16xf32>
    %222 = arith.truncf %221 : vector<8x16xf32> to vector<8x16xbf16>
    %c35 = arith.constant 35 : index
    %c0_114 = arith.constant 0 : index
    %c0_115 = arith.constant 0 : index
    %223 = vector.load %arg4[%c35, %c0_114, %c0_115] : memref<49x16x128xbf16, #tpu.memory_space<vmem>>, vector<1x16x128xbf16>
    %224 = vector.shape_cast %223 : vector<1x16x128xbf16> to vector<16x128xbf16>
    %cst_116 = arith.constant dense<0.000000e+00> : vector<8x128xf32>
    %225 = tpu.matmul %222, %224, %cst_116 {dimension_numbers = #tpu.dot_dimension_numbers<[1], [0], [0], [1], [0, 0, 1, 1], [], []>} : vector<8x16xbf16>, vector<16x128xbf16>, vector<8x128xf32> -> vector<8x128xf32>
    %226 = arith.addf %220, %225 : vector<8x128xf32>
    %227 = vector.extract_strided_slice %9 {offsets = [288, 0], sizes = [8, 16], strides = [1, 1]} : vector<392x128xf32> to vector<8x16xf32>
    %228 = arith.truncf %227 : vector<8x16xf32> to vector<8x16xbf16>
    %c36 = arith.constant 36 : index
    %c0_117 = arith.constant 0 : index
    %c0_118 = arith.constant 0 : index
    %229 = vector.load %arg4[%c36, %c0_117, %c0_118] : memref<49x16x128xbf16, #tpu.memory_space<vmem>>, vector<1x16x128xbf16>
    %230 = vector.shape_cast %229 : vector<1x16x128xbf16> to vector<16x128xbf16>
    %cst_119 = arith.constant dense<0.000000e+00> : vector<8x128xf32>
    %231 = tpu.matmul %228, %230, %cst_119 {dimension_numbers = #tpu.dot_dimension_numbers<[1], [0], [0], [1], [0, 0, 1, 1], [], []>} : vector<8x16xbf16>, vector<16x128xbf16>, vector<8x128xf32> -> vector<8x128xf32>
    %232 = arith.addf %226, %231 : vector<8x128xf32>
    %233 = vector.extract_strided_slice %9 {offsets = [296, 0], sizes = [8, 16], strides = [1, 1]} : vector<392x128xf32> to vector<8x16xf32>
    %234 = arith.truncf %233 : vector<8x16xf32> to vector<8x16xbf16>
    %c37 = arith.constant 37 : index
    %c0_120 = arith.constant 0 : index
    %c0_121 = arith.constant 0 : index
    %235 = vector.load %arg4[%c37, %c0_120, %c0_121] : memref<49x16x128xbf16, #tpu.memory_space<vmem>>, vector<1x16x128xbf16>
    %236 = vector.shape_cast %235 : vector<1x16x128xbf16> to vector<16x128xbf16>
    %cst_122 = arith.constant dense<0.000000e+00> : vector<8x128xf32>
    %237 = tpu.matmul %234, %236, %cst_122 {dimension_numbers = #tpu.dot_dimension_numbers<[1], [0], [0], [1], [0, 0, 1, 1], [], []>} : vector<8x16xbf16>, vector<16x128xbf16>, vector<8x128xf32> -> vector<8x128xf32>
    %238 = arith.addf %232, %237 : vector<8x128xf32>
    %239 = vector.extract_strided_slice %9 {offsets = [304, 0], sizes = [8, 16], strides = [1, 1]} : vector<392x128xf32> to vector<8x16xf32>
    %240 = arith.truncf %239 : vector<8x16xf32> to vector<8x16xbf16>
    %c38 = arith.constant 38 : index
    %c0_123 = arith.constant 0 : index
    %c0_124 = arith.constant 0 : index
    %241 = vector.load %arg4[%c38, %c0_123, %c0_124] : memref<49x16x128xbf16, #tpu.memory_space<vmem>>, vector<1x16x128xbf16>
    %242 = vector.shape_cast %241 : vector<1x16x128xbf16> to vector<16x128xbf16>
    %cst_125 = arith.constant dense<0.000000e+00> : vector<8x128xf32>
    %243 = tpu.matmul %240, %242, %cst_125 {dimension_numbers = #tpu.dot_dimension_numbers<[1], [0], [0], [1], [0, 0, 1, 1], [], []>} : vector<8x16xbf16>, vector<16x128xbf16>, vector<8x128xf32> -> vector<8x128xf32>
    %244 = arith.addf %238, %243 : vector<8x128xf32>
    %245 = vector.extract_strided_slice %9 {offsets = [312, 0], sizes = [8, 16], strides = [1, 1]} : vector<392x128xf32> to vector<8x16xf32>
    %246 = arith.truncf %245 : vector<8x16xf32> to vector<8x16xbf16>
    %c39 = arith.constant 39 : index
    %c0_126 = arith.constant 0 : index
    %c0_127 = arith.constant 0 : index
    %247 = vector.load %arg4[%c39, %c0_126, %c0_127] : memref<49x16x128xbf16, #tpu.memory_space<vmem>>, vector<1x16x128xbf16>
    %248 = vector.shape_cast %247 : vector<1x16x128xbf16> to vector<16x128xbf16>
    %cst_128 = arith.constant dense<0.000000e+00> : vector<8x128xf32>
    %249 = tpu.matmul %246, %248, %cst_128 {dimension_numbers = #tpu.dot_dimension_numbers<[1], [0], [0], [1], [0, 0, 1, 1], [], []>} : vector<8x16xbf16>, vector<16x128xbf16>, vector<8x128xf32> -> vector<8x128xf32>
    %250 = arith.addf %244, %249 : vector<8x128xf32>
    %251 = vector.extract_strided_slice %9 {offsets = [320, 0], sizes = [8, 16], strides = [1, 1]} : vector<392x128xf32> to vector<8x16xf32>
    %252 = arith.truncf %251 : vector<8x16xf32> to vector<8x16xbf16>
    %c40 = arith.constant 40 : index
    %c0_129 = arith.constant 0 : index
    %c0_130 = arith.constant 0 : index
    %253 = vector.load %arg4[%c40, %c0_129, %c0_130] : memref<49x16x128xbf16, #tpu.memory_space<vmem>>, vector<1x16x128xbf16>
    %254 = vector.shape_cast %253 : vector<1x16x128xbf16> to vector<16x128xbf16>
    %cst_131 = arith.constant dense<0.000000e+00> : vector<8x128xf32>
    %255 = tpu.matmul %252, %254, %cst_131 {dimension_numbers = #tpu.dot_dimension_numbers<[1], [0], [0], [1], [0, 0, 1, 1], [], []>} : vector<8x16xbf16>, vector<16x128xbf16>, vector<8x128xf32> -> vector<8x128xf32>
    %256 = arith.addf %250, %255 : vector<8x128xf32>
    %257 = vector.extract_strided_slice %9 {offsets = [328, 0], sizes = [8, 16], strides = [1, 1]} : vector<392x128xf32> to vector<8x16xf32>
    %258 = arith.truncf %257 : vector<8x16xf32> to vector<8x16xbf16>
    %c41 = arith.constant 41 : index
    %c0_132 = arith.constant 0 : index
    %c0_133 = arith.constant 0 : index
    %259 = vector.load %arg4[%c41, %c0_132, %c0_133] : memref<49x16x128xbf16, #tpu.memory_space<vmem>>, vector<1x16x128xbf16>
    %260 = vector.shape_cast %259 : vector<1x16x128xbf16> to vector<16x128xbf16>
    %cst_134 = arith.constant dense<0.000000e+00> : vector<8x128xf32>
    %261 = tpu.matmul %258, %260, %cst_134 {dimension_numbers = #tpu.dot_dimension_numbers<[1], [0], [0], [1], [0, 0, 1, 1], [], []>} : vector<8x16xbf16>, vector<16x128xbf16>, vector<8x128xf32> -> vector<8x128xf32>
    %262 = arith.addf %256, %261 : vector<8x128xf32>
    %263 = vector.extract_strided_slice %9 {offsets = [336, 0], sizes = [8, 16], strides = [1, 1]} : vector<392x128xf32> to vector<8x16xf32>
    %264 = arith.truncf %263 : vector<8x16xf32> to vector<8x16xbf16>
    %c42 = arith.constant 42 : index
    %c0_135 = arith.constant 0 : index
    %c0_136 = arith.constant 0 : index
    %265 = vector.load %arg4[%c42, %c0_135, %c0_136] : memref<49x16x128xbf16, #tpu.memory_space<vmem>>, vector<1x16x128xbf16>
    %266 = vector.shape_cast %265 : vector<1x16x128xbf16> to vector<16x128xbf16>
    %cst_137 = arith.constant dense<0.000000e+00> : vector<8x128xf32>
    %267 = tpu.matmul %264, %266, %cst_137 {dimension_numbers = #tpu.dot_dimension_numbers<[1], [0], [0], [1], [0, 0, 1, 1], [], []>} : vector<8x16xbf16>, vector<16x128xbf16>, vector<8x128xf32> -> vector<8x128xf32>
    %268 = arith.addf %262, %267 : vector<8x128xf32>
    %269 = vector.extract_strided_slice %9 {offsets = [344, 0], sizes = [8, 16], strides = [1, 1]} : vector<392x128xf32> to vector<8x16xf32>
    %270 = arith.truncf %269 : vector<8x16xf32> to vector<8x16xbf16>
    %c43 = arith.constant 43 : index
    %c0_138 = arith.constant 0 : index
    %c0_139 = arith.constant 0 : index
    %271 = vector.load %arg4[%c43, %c0_138, %c0_139] : memref<49x16x128xbf16, #tpu.memory_space<vmem>>, vector<1x16x128xbf16>
    %272 = vector.shape_cast %271 : vector<1x16x128xbf16> to vector<16x128xbf16>
    %cst_140 = arith.constant dense<0.000000e+00> : vector<8x128xf32>
    %273 = tpu.matmul %270, %272, %cst_140 {dimension_numbers = #tpu.dot_dimension_numbers<[1], [0], [0], [1], [0, 0, 1, 1], [], []>} : vector<8x16xbf16>, vector<16x128xbf16>, vector<8x128xf32> -> vector<8x128xf32>
    %274 = arith.addf %268, %273 : vector<8x128xf32>
    %275 = vector.extract_strided_slice %9 {offsets = [352, 0], sizes = [8, 16], strides = [1, 1]} : vector<392x128xf32> to vector<8x16xf32>
    %276 = arith.truncf %275 : vector<8x16xf32> to vector<8x16xbf16>
    %c44 = arith.constant 44 : index
    %c0_141 = arith.constant 0 : index
    %c0_142 = arith.constant 0 : index
    %277 = vector.load %arg4[%c44, %c0_141, %c0_142] : memref<49x16x128xbf16, #tpu.memory_space<vmem>>, vector<1x16x128xbf16>
    %278 = vector.shape_cast %277 : vector<1x16x128xbf16> to vector<16x128xbf16>
    %cst_143 = arith.constant dense<0.000000e+00> : vector<8x128xf32>
    %279 = tpu.matmul %276, %278, %cst_143 {dimension_numbers = #tpu.dot_dimension_numbers<[1], [0], [0], [1], [0, 0, 1, 1], [], []>} : vector<8x16xbf16>, vector<16x128xbf16>, vector<8x128xf32> -> vector<8x128xf32>
    %280 = arith.addf %274, %279 : vector<8x128xf32>
    %281 = vector.extract_strided_slice %9 {offsets = [360, 0], sizes = [8, 16], strides = [1, 1]} : vector<392x128xf32> to vector<8x16xf32>
    %282 = arith.truncf %281 : vector<8x16xf32> to vector<8x16xbf16>
    %c45 = arith.constant 45 : index
    %c0_144 = arith.constant 0 : index
    %c0_145 = arith.constant 0 : index
    %283 = vector.load %arg4[%c45, %c0_144, %c0_145] : memref<49x16x128xbf16, #tpu.memory_space<vmem>>, vector<1x16x128xbf16>
    %284 = vector.shape_cast %283 : vector<1x16x128xbf16> to vector<16x128xbf16>
    %cst_146 = arith.constant dense<0.000000e+00> : vector<8x128xf32>
    %285 = tpu.matmul %282, %284, %cst_146 {dimension_numbers = #tpu.dot_dimension_numbers<[1], [0], [0], [1], [0, 0, 1, 1], [], []>} : vector<8x16xbf16>, vector<16x128xbf16>, vector<8x128xf32> -> vector<8x128xf32>
    %286 = arith.addf %280, %285 : vector<8x128xf32>
    %287 = vector.extract_strided_slice %9 {offsets = [368, 0], sizes = [8, 16], strides = [1, 1]} : vector<392x128xf32> to vector<8x16xf32>
    %288 = arith.truncf %287 : vector<8x16xf32> to vector<8x16xbf16>
    %c46 = arith.constant 46 : index
    %c0_147 = arith.constant 0 : index
    %c0_148 = arith.constant 0 : index
    %289 = vector.load %arg4[%c46, %c0_147, %c0_148] : memref<49x16x128xbf16, #tpu.memory_space<vmem>>, vector<1x16x128xbf16>
    %290 = vector.shape_cast %289 : vector<1x16x128xbf16> to vector<16x128xbf16>
    %cst_149 = arith.constant dense<0.000000e+00> : vector<8x128xf32>
    %291 = tpu.matmul %288, %290, %cst_149 {dimension_numbers = #tpu.dot_dimension_numbers<[1], [0], [0], [1], [0, 0, 1, 1], [], []>} : vector<8x16xbf16>, vector<16x128xbf16>, vector<8x128xf32> -> vector<8x128xf32>
    %292 = arith.addf %286, %291 : vector<8x128xf32>
    %293 = vector.extract_strided_slice %9 {offsets = [376, 0], sizes = [8, 16], strides = [1, 1]} : vector<392x128xf32> to vector<8x16xf32>
    %294 = arith.truncf %293 : vector<8x16xf32> to vector<8x16xbf16>
    %c47 = arith.constant 47 : index
    %c0_150 = arith.constant 0 : index
    %c0_151 = arith.constant 0 : index
    %295 = vector.load %arg4[%c47, %c0_150, %c0_151] : memref<49x16x128xbf16, #tpu.memory_space<vmem>>, vector<1x16x128xbf16>
    %296 = vector.shape_cast %295 : vector<1x16x128xbf16> to vector<16x128xbf16>
    %cst_152 = arith.constant dense<0.000000e+00> : vector<8x128xf32>
    %297 = tpu.matmul %294, %296, %cst_152 {dimension_numbers = #tpu.dot_dimension_numbers<[1], [0], [0], [1], [0, 0, 1, 1], [], []>} : vector<8x16xbf16>, vector<16x128xbf16>, vector<8x128xf32> -> vector<8x128xf32>
    %298 = arith.addf %292, %297 : vector<8x128xf32>
    %299 = vector.extract_strided_slice %9 {offsets = [384, 0], sizes = [8, 16], strides = [1, 1]} : vector<392x128xf32> to vector<8x16xf32>
    %300 = arith.truncf %299 : vector<8x16xf32> to vector<8x16xbf16>
    %c48 = arith.constant 48 : index
    %c0_153 = arith.constant 0 : index
    %c0_154 = arith.constant 0 : index
    %301 = vector.load %arg4[%c48, %c0_153, %c0_154] : memref<49x16x128xbf16, #tpu.memory_space<vmem>>, vector<1x16x128xbf16>
    %302 = vector.shape_cast %301 : vector<1x16x128xbf16> to vector<16x128xbf16>
    %cst_155 = arith.constant dense<0.000000e+00> : vector<8x128xf32>
    %303 = tpu.matmul %300, %302, %cst_155 {dimension_numbers = #tpu.dot_dimension_numbers<[1], [0], [0], [1], [0, 0, 1, 1], [], []>} : vector<8x16xbf16>, vector<16x128xbf16>, vector<8x128xf32> -> vector<8x128xf32>
    %304 = arith.addf %298, %303 : vector<8x128xf32>
    %c0_156 = arith.constant 0 : index
    %c0_157 = arith.constant 0 : index
    %305 = vector.load %arg5[%c0_156, %c0_157] : memref<1x128xf32, #tpu.memory_space<vmem>>, vector<1x128xf32>
    %306 = vector.broadcast %305 : vector<1x128xf32> to vector<8x128xf32>
    %307 = arith.addf %304, %306 : vector<8x128xf32>
    %cst_158 = arith.constant 0.000000e+00 : f32
    %308 = vector.broadcast %cst_158 : f32 to vector<8x128xf32>
    %309 = arith.maximumf %307, %308 : vector<8x128xf32>
    %310 = arith.truncf %309 : vector<8x128xf32> to vector<8x128xbf16>
    %c0_159 = arith.constant 0 : index
    %c0_160 = arith.constant 0 : index
    %311 = vector.load %arg6[%c0_159, %c0_160] : memref<128x128xbf16, #tpu.memory_space<vmem>>, vector<128x128xbf16>
    %cst_161 = arith.constant dense<0.000000e+00> : vector<8x128xf32>
    %312 = tpu.matmul %310, %311, %cst_161 {dimension_numbers = #tpu.dot_dimension_numbers<[1], [0], [0], [1], [0, 0, 1, 1], [], []>} : vector<8x128xbf16>, vector<128x128xbf16>, vector<8x128xf32> -> vector<8x128xf32>
    %c0_162 = arith.constant 0 : index
    %c0_163 = arith.constant 0 : index
    %313 = vector.load %arg7[%c0_162, %c0_163] : memref<1x128xf32, #tpu.memory_space<vmem>>, vector<1x128xf32>
    %314 = vector.broadcast %313 : vector<1x128xf32> to vector<8x128xf32>
    %315 = arith.addf %312, %314 : vector<8x128xf32>
    %cst_164 = arith.constant 0.000000e+00 : f32
    %316 = vector.broadcast %cst_164 : f32 to vector<8x128xf32>
    %317 = arith.maximumf %315, %316 : vector<8x128xf32>
    %318 = arith.truncf %317 : vector<8x128xf32> to vector<8x128xbf16>
    %c0_165 = arith.constant 0 : index
    %c0_166 = arith.constant 0 : index
    %319 = vector.load %arg8[%c0_165, %c0_166] : memref<128x128xbf16, #tpu.memory_space<vmem>>, vector<128x128xbf16>
    %cst_167 = arith.constant dense<0.000000e+00> : vector<8x128xf32>
    %320 = tpu.matmul %318, %319, %cst_167 {dimension_numbers = #tpu.dot_dimension_numbers<[1], [0], [0], [1], [0, 0, 1, 1], [], []>} : vector<8x128xbf16>, vector<128x128xbf16>, vector<8x128xf32> -> vector<8x128xf32>
    %c0_168 = arith.constant 0 : index
    %c0_169 = arith.constant 0 : index
    %321 = vector.load %arg9[%c0_168, %c0_169] : memref<1x128xf32, #tpu.memory_space<vmem>>, vector<1x128xf32>
    %322 = vector.broadcast %321 : vector<1x128xf32> to vector<8x128xf32>
    %323 = arith.addf %320, %322 : vector<8x128xf32>
    %c0_170 = arith.constant 0 : index
    %c0_171 = arith.constant 0 : index
    %324 = vector.load %arg10[%c0_170, %c0_171] : memref<8x128xf32, #tpu.memory_space<vmem>>, vector<8x128xf32>
    tpu.vector_store %arg10[%c0_170, %c0_171], %323 {strides = array<i32>} : memref<8x128xf32, #tpu.memory_space<vmem>>, vector<8x128xf32>,
    return
  }
  func.func @transform_0(%arg0: i32) -> (i32, i32) {
    %c0_i32 = arith.constant 0 : i32
    %c0_i32_0 = arith.constant 0 : i32
    %c0_i32_1 = arith.constant 0 : i32
    return %c0_i32, %c0_i32_0 : i32, i32
  }
  func.func @transform_1(%arg0: i32) -> (i32, i32) {
    %c0_i32 = arith.constant 0 : i32
    %c0_i32_0 = arith.constant 0 : i32
    %c0_i32_1 = arith.constant 0 : i32
    return %c0_i32, %c0_i32_0 : i32, i32
  }
  func.func @transform_2(%arg0: i32) -> (i32, i32) {
    %c0_i32 = arith.constant 0 : i32
    %c0_i32_0 = arith.constant 0 : i32
    %c0_i32_1 = arith.constant 0 : i32
    return %c0_i32, %c0_i32_0 : i32, i32
  }
  func.func @transform_3(%arg0: i32) -> (i32, i32, i32) {
    %c0_i32 = arith.constant 0 : i32
    %c0_i32_0 = arith.constant 0 : i32
    %c0_i32_1 = arith.constant 0 : i32
    %c0_i32_2 = arith.constant 0 : i32
    return %c0_i32, %c0_i32_0, %c0_i32_1 : i32, i32, i32
  }
  func.func @transform_4(%arg0: i32) -> (i32, i32) {
    %c0_i32 = arith.constant 0 : i32
    %c0_i32_0 = arith.constant 0 : i32
    %c0_i32_1 = arith.constant 0 : i32
    return %c0_i32, %c0_i32_0 : i32, i32
  }
  func.func @transform_5(%arg0: i32) -> (i32, i32) {
    %c0_i32 = arith.constant 0 : i32
    %c0_i32_0 = arith.constant 0 : i32
    %c0_i32_1 = arith.constant 0 : i32
    return %c0_i32, %c0_i32_0 : i32, i32
  }
  func.func @transform_6(%arg0: i32) -> (i32, i32) {
    %c0_i32 = arith.constant 0 : i32
    %c0_i32_0 = arith.constant 0 : i32
    %c0_i32_1 = arith.constant 0 : i32
    return %c0_i32, %c0_i32_0 : i32, i32
  }
  func.func @transform_7(%arg0: i32) -> (i32, i32) {
    %c0_i32 = arith.constant 0 : i32
    %c0_i32_0 = arith.constant 0 : i32
    %c0_i32_1 = arith.constant 0 : i32
    return %c0_i32, %c0_i32_0 : i32, i32
  }
  func.func @transform_8(%arg0: i32) -> (i32, i32) {
    %c0_i32 = arith.constant 0 : i32
    %c0_i32_0 = arith.constant 0 : i32
    %c0_i32_1 = arith.constant 0 : i32
    return %c0_i32, %c0_i32_0 : i32, i32
  }
  func.func @transform_9(%arg0: i32) -> (i32, i32) {
    %c0_i32 = arith.constant 0 : i32
    %c0_i32_0 = arith.constant 0 : i32
    %c0_i32_1 = arith.constant 0 : i32
    return %c0_i32, %c0_i32_0 : i32, i32
  }
}

</mosaic_0001>

<bundles_post_ra>
// kernel: net_forward_pallas.2
= control target key start
LH: loop header
LB: loop body
LE: loop exit
PB: predicated region body
PF: predicated region fallthrough
CT: control target
= control target key end

     0   :  { %vm1651_vm0 = vcmask 1043456   ;;  %vm1652_vm1 = vcmask 1044480   ;;  %v4961_v1 = vmov 65535   ;;  %vm1164_vm2 = vcmask 203776   ;;  %s6654_s1 = inlined_call_operand.vmem [shape: bf16[25,128], index: 1, kind: input, shape index: {}]   ;;  %s6655_s0 = inlined_call_operand.vmem [shape: bf16[2592,25], index: 0, kind: input, shape index: {}]   ;;  %s6656_s2 = inlined_call_operand.vmem [shape: f32[1,128], index: 2, kind: input, shape index: {}]   ;;  %s6657_s3 = inlined_call_operand.vmem [shape: bf16[648,8], index: 3, kind: output, shape index: {}]  }
   0x1   :  { %v4796_v0 = vld [vmem:[%s6654_s1 + $0x8] sm:$0x1f]   ;;  %v1653_v2 = vsel %vm1651_vm0, 4294967295, %v4961_v1  ;;  %v4798_v4 = vld [vmem:[%s6655_s0] sm:$0xff]   ;;  %v4800_v7 = vld [vmem:[%s6655_s0 + $0x290] sm:$0xff]   ;;  %vm3724_vm3 = vcmask 60416  }
   0x2   :  { %v1654_v3 = vsel %vm1652_vm1, %v1653_v2, 0  ;;  %v4797_v6 = vld [vmem:[%s6654_s1] sm:$0xff]   ;;  %4467 = vmatprep.mubr.msk.bf16.mxu0 %vm1164_vm2, %v4798_v4  ;;  %v4799_v8 = vld [vmem:[%s6655_s0 + $0x8] sm:$0xff]   ;;  %4631 = vmatprep.mubr.msk.bf16.mxu1 %vm1164_vm2, %v4800_v7  ;;  %v4801_v9 = vld [vmem:[%s6655_s0 + $0x298] sm:$0xff]  }
   0x3   :  { %v1656_v5 = vand.u32 %v4796_v0, %v1654_v3  ;;  %v4802_v10 = vld [vmem:[%s6655_s0 + $0x10] sm:$0xff]   ;;  %v4804_v11 = vld [vmem:[%s6655_s0 + $0x2a0] sm:$0xff]   ;;  %v4803_v12 = vld [vmem:[%s6655_s0 + $0x18] sm:$0xff]  }
   0x4   :  { %v4805_v13 = vld [vmem:[%s6655_s0 + $0x2a8] sm:$0xff]   ;;  %v4806_v14 = vld [vmem:[%s6655_s0 + $0x20] sm:$0xff]   ;;  %v4808_v15 = vld [vmem:[%s6655_s0 + $0x2b0] sm:$0xff]  }
   0x5   :  { %4463 = vmatprep.subr.bf16.mxu0 %v1656_v5  ;;  %4791 = vmatprep.subr.bf16.mxu1 %v1656_v5  ;;  %v4807_v16 = vld [vmem:[%s6655_s0 + $0x28] sm:$0xff]   ;;  %v4809_v17 = vld [vmem:[%s6655_s0 + $0x2b8] sm:$0xff]   ;;  %v4810_v18 = vld [vmem:[%s6655_s0 + $0x30] sm:$0xff]  }
   0x6   :  { %4464 = vmatpush3.bf16.msra.mxu0 %v1656_v5  ;;  %4793 = vmatpush3.bf16.msra.mxu1 %v1656_v5  ;;  %v4812_v19 = vld [vmem:[%s6655_s0 + $0x2c0] sm:$0xff]   ;;  %v4811_v20 = vld [vmem:[%s6655_s0 + $0x38] sm:$0xff]   ;;  %v4813_v21 = vld [vmem:[%s6655_s0 + $0x2c8] sm:$0xff]  }
   0x7   :  { %4465 = vmatprep.subr.bf16.mxu0 %v4797_v6  ;;  %4792 = vmatprep.subr.bf16.mxu1 %v4797_v6  ;;  %v4814_v22 = vld [vmem:[%s6655_s0 + $0x40] sm:$0xff]   ;;  %v4816_v23 = vld [vmem:[%s6655_s0 + $0x2d0] sm:$0xff]   ;;  %v4815_v24 = vld [vmem:[%s6655_s0 + $0x48] sm:$0xff]  }
   0x8   :  { %v4817_v25 = vld [vmem:[%s6655_s0 + $0x2d8] sm:$0xff]   ;;  %v4818_v26 = vld [vmem:[%s6655_s0 + $0x50] sm:$0xff]   ;;  %v4820_v27 = vld [vmem:[%s6655_s0 + $0x2e0] sm:$0xff]  }
   0x9   :  { %v4819_v28 = vld [vmem:[%s6655_s0 + $0x58] sm:$0xff]   ;;  %v4821_v29 = vld [vmem:[%s6655_s0 + $0x2e8] sm:$0xff]   ;;  %v4822_v30 = vld [vmem:[%s6655_s0 + $0x60] sm:$0xff]  }
   0xa   :  { %4466 = vmatpush3.bf16.msra.mxu0 %v4797_v6  ;;  %4794 = vmatpush3.bf16.msra.mxu1 %v4797_v6  ;;  %v4824_v31 = vld [vmem:[%s6655_s0 + $0x2f0] sm:$0xff]   ;;  %v4823_v32 = vld [vmem:[%s6655_s0 + $0x68] sm:$0xff]   ;;  %v4825_v33 = vld [vmem:[%s6655_s0 + $0x2f8] sm:$0xff]  }
   0xb   :  { %v4826_v34 = vld [vmem:[%s6655_s0 + $0x70] sm:$0xff]   ;;  %v4828_v35 = vld [vmem:[%s6655_s0 + $0x300] sm:$0xff]   ;;  %v4827_v36 = vld [vmem:[%s6655_s0 + $0x78] sm:$0xff]  }
   0xc   :  { %v4829_v37 = vld [vmem:[%s6655_s0 + $0x308] sm:$0xff]   ;;  %v4830_v38 = vld [vmem:[%s6655_s0 + $0x80] sm:$0xff]   ;;  %v4832_v39 = vld [vmem:[%s6655_s0 + $0x310] sm:$0xff]  }
   0xd   :  { %4468 = vmatmul.mubr.msk.bf16.vlgmr.msra.gmra.mxu0 %vm1164_vm2, %v4799_v8  ;;  %4632 = vmatmul.mubr.msk.bf16.vlgmr.msra.gmra.mxu1 %vm1164_vm2, %v4801_v9  ;;  %v4831_v40 = vld [vmem:[%s6655_s0 + $0x88] sm:$0xff]   ;;  %v4833_v41 = vld [vmem:[%s6655_s0 + $0x318] sm:$0xff]   ;;  %v4834_v42 = vld [vmem:[%s6655_s0 + $0x90] sm:$0xff]  }
   0xe   :  { %4471 = vmatprep.mubr.msk.bf16.mxu0 %vm1164_vm2, %v4802_v10  ;;  %4635 = vmatprep.mubr.msk.bf16.mxu1 %vm1164_vm2, %v4804_v11  ;;  %v4836_v43 = vld [vmem:[%s6655_s0 + $0x320] sm:$0xff]   ;;  %v4835_v44 = vld [vmem:[%s6655_s0 + $0x98] sm:$0xff]   ;;  %v4837_v45 = vld [vmem:[%s6655_s0 + $0x328] sm:$0xff]  }
   0xf   :  { %v4838_v46 = vld [vmem:[%s6655_s0 + $0xa0] sm:$0xff]   ;;  %v4840_v47 = vld [vmem:[%s6655_s0 + $0x330] sm:$0xff]   ;;  %v4839_v48 = vld [vmem:[%s6655_s0 + $0xa8] sm:$0xff]  }
  0x10   :  { %v4841_v49 = vld [vmem:[%s6655_s0 + $0x338] sm:$0xff]   ;;  %v4842_v50 = vld [vmem:[%s6655_s0 + $0xb0] sm:$0xff]   ;;  %v4844_v51 = vld [vmem:[%s6655_s0 + $0x340] sm:$0xff]  }
  0x11   :  { %v4843_v52 = vld [vmem:[%s6655_s0 + $0xb8] sm:$0xff]   ;;  %v4845_v53 = vld [vmem:[%s6655_s0 + $0x348] sm:$0xff]   ;;  %v4846_v54 = vld [vmem:[%s6655_s0 + $0xc0] sm:$0xff]  }
  0x12   :  { %v4848_v55 = vld [vmem:[%s6655_s0 + $0x350] sm:$0xff]   ;;  %v4847_v56 = vld [vmem:[%s6655_s0 + $0xc8] sm:$0xff]   ;;  %v4849_v57 = vld [vmem:[%s6655_s0 + $0x358] sm:$0xff]  }
  0x13   :  { %v4850_v58 = vld [vmem:[%s6655_s0 + $0xd0] sm:$0xff]   ;;  %v4852_v59 = vld [vmem:[%s6655_s0 + $0x360] sm:$0xff]   ;;  %v4851_v60 = vld [vmem:[%s6655_s0 + $0xd8] sm:$0xff]  }
  0x14   :  { %v4853_v61 = vld [vmem:[%s6655_s0 + $0x368] sm:$0xff]   ;;  %v4854_v62 = vld [vmem:[%s6655_s0 + $0xe0] sm:$0xff]   ;;  %v4856_v63 = vld [vmem:[%s6655_s0 + $0x370] sm:$0xff]  }
  0x15   :  { %4472 = vmatmul.mubr.msk.bf16.gmra.mxu0 %vm1164_vm2, %v4803_v12  ;;  %4636 = vmatmul.mubr.msk.bf16.gmra.mxu1 %vm1164_vm2, %v4805_v13  ;;  %v4855_v0 = vld [vmem:[%s6655_s0 + $0xe8] sm:$0xff]   ;;  %v4857_v1 = vld [vmem:[%s6655_s0 + $0x378] sm:$0xff]   ;;  %v4858_v2 = vld [vmem:[%s6655_s0 + $0xf0] sm:$0xff]  }
  0x16   :  { %4475 = vmatprep.mubr.msk.bf16.mxu0 %vm1164_vm2, %v4806_v14  ;;  %4639 = vmatprep.mubr.msk.bf16.mxu1 %vm1164_vm2, %v4808_v15  ;;  %v4860_v3 = vld [vmem:[%s6655_s0 + $0x380] sm:$0xff]   ;;  %v4859_v4 = vld [vmem:[%s6655_s0 + $0xf8] sm:$0xff]   ;;  %v4861_v5 = vld [vmem:[%s6655_s0 + $0x388] sm:$0xff]  }
  0x17   :  { %v4862_v6 = vld [vmem:[%s6655_s0 + $0x100] sm:$0xff]   ;;  %v4864_v7 = vld [vmem:[%s6655_s0 + $0x390] sm:$0xff]   ;;  %v4863_v8 = vld [vmem:[%s6655_s0 + $0x108] sm:$0xff]  }
  0x18   :  { %v4865_v9 = vld [vmem:[%s6655_s0 + $0x398] sm:$0xff]   ;;  %v4866_v10 = vld [vmem:[%s6655_s0 + $0x110] sm:$0xff]   ;;  %v4868_v11 = vld [vmem:[%s6655_s0 + $0x3a0] sm:$0xff]  }
  0x19   :  { %v4867_v12 = vld [vmem:[%s6655_s0 + $0x118] sm:$0xff]   ;;  %v4869_v13 = vld [vmem:[%s6655_s0 + $0x3a8] sm:$0xff]   ;;  %v4870_v14 = vld [vmem:[%s6655_s0 + $0x120] sm:$0xff]  }
  0x1a   :  { %v4872_v15 = vld [vmem:[%s6655_s0 + $0x3b0] sm:$0xff]  }
  0x1d   :  { %4476 = vmatmul.mubr.msk.bf16.gmra.mxu0 %vm1164_vm2, %v4807_v16  ;;  %4640 = vmatmul.mubr.msk.bf16.gmra.mxu1 %vm1164_vm2, %v4809_v17  ;;  %v4871_v16 = vld [vmem:[%s6655_s0 + $0x128] sm:$0xff]   ;;  %v4873_v17 = vld [vmem:[%s6655_s0 + $0x3b8] sm:$0xff]  }
  0x1e   :  { %4479 = vmatprep.mubr.msk.bf16.mxu0 %vm1164_vm2, %v4810_v18  ;;  %4643 = vmatprep.mubr.msk.bf16.mxu1 %vm1164_vm2, %v4812_v19  ;;  %v4874_v18 = vld [vmem:[%s6655_s0 + $0x130] sm:$0xff]   ;;  %v4876_v19 = vld [vmem:[%s6655_s0 + $0x3c0] sm:$0xff]  }
  0x25   :  { %4480 = vmatmul.mubr.msk.bf16.gmra.mxu0 %vm1164_vm2, %v4811_v20  ;;  %4644 = vmatmul.mubr.msk.bf16.gmra.mxu1 %vm1164_vm2, %v4813_v21  ;;  %v4875_v20 = vld [vmem:[%s6655_s0 + $0x138] sm:$0xff]   ;;  %v4877_v21 = vld [vmem:[%s6655_s0 + $0x3c8] sm:$0xff]  }
  0x26   :  { %4483 = vmatprep.mubr.msk.bf16.mxu0 %vm1164_vm2, %v4814_v22  ;;  %4647 = vmatprep.mubr.msk.bf16.mxu1 %vm1164_vm2, %v4816_v23  ;;  %v4878_v22 = vld [vmem:[%s6655_s0 + $0x140] sm:$0xff]   ;;  %v4880_v23 = vld [vmem:[%s6655_s0 + $0x3d0] sm:$0xff]  }
  0x2d   :  { %4484 = vmatmul.mubr.msk.bf16.gmra.mxu0 %vm1164_vm2, %v4815_v24  ;;  %4648 = vmatmul.mubr.msk.bf16.gmra.mxu1 %vm1164_vm2, %v4817_v25  ;;  %v4879_v24 = vld [vmem:[%s6655_s0 + $0x148] sm:$0xff]   ;;  %v4881_v25 = vld [vmem:[%s6655_s0 + $0x3d8] sm:$0xff]  }
  0x2e   :  { %4487 = vmatprep.mubr.msk.bf16.mxu0 %vm1164_vm2, %v4818_v26  ;;  %4651 = vmatprep.mubr.msk.bf16.mxu1 %vm1164_vm2, %v4820_v27  ;;  %v4882_v26 = vld [vmem:[%s6655_s0 + $0x150] sm:$0xff]   ;;  %v4884_v27 = vld [vmem:[%s6655_s0 + $0x3e0] sm:$0xff]  }
  0x35   :  { %4488 = vmatmul.mubr.msk.bf16.gmra.mxu0 %vm1164_vm2, %v4819_v28  ;;  %4652 = vmatmul.mubr.msk.bf16.gmra.mxu1 %vm1164_vm2, %v4821_v29  ;;  %v4883_v28 = vld [vmem:[%s6655_s0 + $0x158] sm:$0xff]   ;;  %v4885_v29 = vld [vmem:[%s6655_s0 + $0x3e8] sm:$0xff]  }
  0x36   :  { %4491 = vmatprep.mubr.msk.bf16.mxu0 %vm1164_vm2, %v4822_v30  ;;  %4655 = vmatprep.mubr.msk.bf16.mxu1 %vm1164_vm2, %v4824_v31  ;;  %v4886_v30 = vld [vmem:[%s6655_s0 + $0x160] sm:$0xff]   ;;  %v4888_v31 = vld [vmem:[%s6655_s0 + $0x3f0] sm:$0xff]  }
  0x3d   :  { %4492 = vmatmul.mubr.msk.bf16.gmra.mxu0 %vm1164_vm2, %v4823_v32  ;;  %4656 = vmatmul.mubr.msk.bf16.gmra.mxu1 %vm1164_vm2, %v4825_v33  ;;  %v4887_v32 = vld [vmem:[%s6655_s0 + $0x168] sm:$0xff]   ;;  %v4889_v33 = vld [vmem:[%s6655_s0 + $0x3f8] sm:$0xff]  }
  0x3e   :  { %4495 = vmatprep.mubr.msk.bf16.mxu0 %vm1164_vm2, %v4826_v34  ;;  %4659 = vmatprep.mubr.msk.bf16.mxu1 %vm1164_vm2, %v4828_v35  ;;  %v4890_v34 = vld [vmem:[%s6655_s0 + $0x170] sm:$0xff]   ;;  %v4892_v35 = vld [vmem:[%s6655_s0 + $0x400] sm:$0xff]  }
  0x45   :  { %4496 = vmatmul.mubr.msk.bf16.gmra.mxu0 %vm1164_vm2, %v4827_v36  ;;  %4660 = vmatmul.mubr.msk.bf16.gmra.mxu1 %vm1164_vm2, %v4829_v37  ;;  %v4891_v36 = vld [vmem:[%s6655_s0 + $0x178] sm:$0xff]   ;;  %v4893_v37 = vld [vmem:[%s6655_s0 + $0x408] sm:$0xff]  }
  0x46   :  { %4499 = vmatprep.mubr.msk.bf16.mxu0 %vm1164_vm2, %v4830_v38  ;;  %4663 = vmatprep.mubr.msk.bf16.mxu1 %vm1164_vm2, %v4832_v39  ;;  %v4894_v38 = vld [vmem:[%s6655_s0 + $0x180] sm:$0xff]   ;;  %v4896_v39 = vld [vmem:[%s6655_s0 + $0x410] sm:$0xff]  }
  0x4d   :  { %4500 = vmatmul.mubr.msk.bf16.gmra.mxu0 %vm1164_vm2, %v4831_v40  ;;  %4664 = vmatmul.mubr.msk.bf16.gmra.mxu1 %vm1164_vm2, %v4833_v41  ;;  %v4895_v40 = vld [vmem:[%s6655_s0 + $0x188] sm:$0xff]   ;;  %v4897_v41 = vld [vmem:[%s6655_s0 + $0x418] sm:$0xff]  }
  0x4e   :  { %4503 = vmatprep.mubr.msk.bf16.mxu0 %vm1164_vm2, %v4834_v42  ;;  %4667 = vmatprep.mubr.msk.bf16.mxu1 %vm1164_vm2, %v4836_v43  ;;  %v4898_v42 = vld [vmem:[%s6655_s0 + $0x190] sm:$0xff]   ;;  %v4900_v43 = vld [vmem:[%s6655_s0 + $0x420] sm:$0xff]  }
  0x55   :  { %4504 = vmatmul.mubr.msk.bf16.gmra.mxu0 %vm1164_vm2, %v4835_v44  ;;  %4668 = vmatmul.mubr.msk.bf16.gmra.mxu1 %vm1164_vm2, %v4837_v45 }
  0x56   :  { %4507 = vmatprep.mubr.msk.bf16.mxu0 %vm1164_vm2, %v4838_v46  ;;  %4671 = vmatprep.mubr.msk.bf16.mxu1 %vm1164_vm2, %v4840_v47 }
  0x5d   :  { %4508 = vmatmul.mubr.msk.bf16.gmra.mxu0 %vm1164_vm2, %v4839_v48  ;;  %4672 = vmatmul.mubr.msk.bf16.gmra.mxu1 %vm1164_vm2, %v4841_v49 }
  0x5e   :  { %4511 = vmatprep.mubr.msk.bf16.mxu0 %vm1164_vm2, %v4842_v50  ;;  %4675 = vmatprep.mubr.msk.bf16.mxu1 %vm1164_vm2, %v4844_v51  ;;  %v4899_v50 = vld [vmem:[%s6655_s0 + $0x198] sm:$0xff]   ;;  %v4901_v51 = vld [vmem:[%s6655_s0 + $0x428] sm:$0xff]  }
  0x65   :  { %4512 = vmatmul.mubr.msk.bf16.gmra.mxu0 %vm1164_vm2, %v4843_v52  ;;  %4676 = vmatmul.mubr.msk.bf16.gmra.mxu1 %vm1164_vm2, %v4845_v53  ;;  %v4902_v52 = vld [vmem:[%s6655_s0 + $0x1a0] sm:$0xff]   ;;  %v4904_v53 = vld [vmem:[%s6655_s0 + $0x430] sm:$0xff]  }
  0x66   :  { %4515 = vmatprep.mubr.msk.bf16.mxu0 %vm1164_vm2, %v4846_v54  ;;  %4679 = vmatprep.mubr.msk.bf16.mxu1 %vm1164_vm2, %v4848_v55 }
  0x6d   :  { %4516 = vmatmul.mubr.msk.bf16.gmra.mxu0 %vm1164_vm2, %v4847_v56  ;;  %4680 = vmatmul.mubr.msk.bf16.gmra.mxu1 %vm1164_vm2, %v4849_v57 }
  0x6e   :  { %4519 = vmatprep.mubr.msk.bf16.mxu0 %vm1164_vm2, %v4850_v58  ;;  %4683 = vmatprep.mubr.msk.bf16.mxu1 %vm1164_vm2, %v4852_v59 }
  0x75   :  { %4520 = vmatmul.mubr.msk.bf16.gmra.mxu0 %vm1164_vm2, %v4851_v60  ;;  %4684 = vmatmul.mubr.msk.bf16.gmra.mxu1 %vm1164_vm2, %v4853_v61 }
  0x76   :  { %4523 = vmatprep.mubr.msk.bf16.mxu0 %vm1164_vm2, %v4854_v62  ;;  %4687 = vmatprep.mubr.msk.bf16.mxu1 %vm1164_vm2, %v4856_v63  ;;  %v4903_v62 = vld [vmem:[%s6655_s0 + $0x1a8] sm:$0xff]   ;;  %v4905_v63 = vld [vmem:[%s6655_s0 + $0x438] sm:$0xff]  }
  0x7d   :  { %4524 = vmatmul.mubr.msk.bf16.gmra.mxu0 %vm1164_vm2, %v4855_v0  ;;  %4688 = vmatmul.mubr.msk.bf16.gmra.mxu1 %vm1164_vm2, %v4857_v1  ;;  %v4906_v0 = vld [vmem:[%s6655_s0 + $0x1b0] sm:$0xff]   ;;  %v4908_v1 = vld [vmem:[%s6655_s0 + $0x440] sm:$0xff]  }
  0x7e   :  { %4527 = vmatprep.mubr.msk.bf16.mxu0 %vm1164_vm2, %v4858_v2  ;;  %4691 = vmatprep.mubr.msk.bf16.mxu1 %vm1164_vm2, %v4860_v3 }
  0x85   :  { %4528 = vmatmul.mubr.msk.bf16.gmra.mxu0 %vm1164_vm2, %v4859_v4  ;;  %4692 = vmatmul.mubr.msk.bf16.gmra.mxu1 %vm1164_vm2, %v4861_v5 }
  0x86   :  { %4531 = vmatprep.mubr.msk.bf16.mxu0 %vm1164_vm2, %v4862_v6  ;;  %4695 = vmatprep.mubr.msk.bf16.mxu1 %vm1164_vm2, %v4864_v7 }
  0x8d   :  { %4532 = vmatmul.mubr.msk.bf16.gmra.mxu0 %vm1164_vm2, %v4863_v8  ;;  %4696 = vmatmul.mubr.msk.bf16.gmra.mxu1 %vm1164_vm2, %v4865_v9 }
  0x8e   :  { %4535 = vmatprep.mubr.msk.bf16.mxu0 %vm1164_vm2, %v4866_v10  ;;  %4699 = vmatprep.mubr.msk.bf16.mxu1 %vm1164_vm2, %v4868_v11  ;;  %v4907_v10 = vld [vmem:[%s6655_s0 + $0x1b8] sm:$0xff]   ;;  %v4909_v11 = vld [vmem:[%s6655_s0 + $0x448] sm:$0xff]  }
  0x95   :  { %4536 = vmatmul.mubr.msk.bf16.gmra.mxu0 %vm1164_vm2, %v4867_v12  ;;  %4700 = vmatmul.mubr.msk.bf16.gmra.mxu1 %vm1164_vm2, %v4869_v13  ;;  %v4910_v12 = vld [vmem:[%s6655_s0 + $0x1c0] sm:$0xff]   ;;  %v4912_v13 = vld [vmem:[%s6655_s0 + $0x450] sm:$0xff]  }
  0x96   :  { %4539 = vmatprep.mubr.msk.bf16.mxu0 %vm1164_vm2, %v4870_v14  ;;  %4703 = vmatprep.mubr.msk.bf16.mxu1 %vm1164_vm2, %v4872_v15 }
  0x9d   :  { %4540 = vmatmul.mubr.msk.bf16.gmra.mxu0 %vm1164_vm2, %v4871_v16  ;;  %4704 = vmatmul.mubr.msk.bf16.gmra.mxu1 %vm1164_vm2, %v4873_v17 }
  0x9e   :  { %4543 = vmatprep.mubr.msk.bf16.mxu0 %vm1164_vm2, %v4874_v18  ;;  %4707 = vmatprep.mubr.msk.bf16.mxu1 %vm1164_vm2, %v4876_v19 }
  0xa5   :  { %4544 = vmatmul.mubr.msk.bf16.gmra.mxu0 %vm1164_vm2, %v4875_v20  ;;  %4708 = vmatmul.mubr.msk.bf16.gmra.mxu1 %vm1164_vm2, %v4877_v21 }
  0xa6   :  { %4547 = vmatprep.mubr.msk.bf16.mxu0 %vm1164_vm2, %v4878_v22  ;;  %4711 = vmatprep.mubr.msk.bf16.mxu1 %vm1164_vm2, %v4880_v23  ;;  %v4911_v22 = vld [vmem:[%s6655_s0 + $0x1c8] sm:$0xff]   ;;  %v4913_v23 = vld [vmem:[%s6655_s0 + $0x458] sm:$0xff]  }
  0xad   :  { %4548 = vmatmul.mubr.msk.bf16.gmra.mxu0 %vm1164_vm2, %v4879_v24  ;;  %4712 = vmatmul.mubr.msk.bf16.gmra.mxu1 %vm1164_vm2, %v4881_v25  ;;  %v4914_v24 = vld [vmem:[%s6655_s0 + $0x1d0] sm:$0xff]   ;;  %v4916_v25 = vld [vmem:[%s6655_s0 + $0x460] sm:$0xff]  }
  0xae   :  { %4551 = vmatprep.mubr.msk.bf16.mxu0 %vm1164_vm2, %v4882_v26  ;;  %4715 = vmatprep.mubr.msk.bf16.mxu1 %vm1164_vm2, %v4884_v27 }
  0xb5   :  { %4552 = vmatmul.mubr.msk.bf16.gmra.mxu0 %vm1164_vm2, %v4883_v28  ;;  %4716 = vmatmul.mubr.msk.bf16.gmra.mxu1 %vm1164_vm2, %v4885_v29 }
  0xb6   :  { %4555 = vmatprep.mubr.msk.bf16.mxu0 %vm1164_vm2, %v4886_v30  ;;  %4719 = vmatprep.mubr.msk.bf16.mxu1 %vm1164_vm2, %v4888_v31 }
  0xbd   :  { %4556 = vmatmul.mubr.msk.bf16.gmra.mxu0 %vm1164_vm2, %v4887_v32  ;;  %4720 = vmatmul.mubr.msk.bf16.gmra.mxu1 %vm1164_vm2, %v4889_v33 }
  0xbe   :  { %4559 = vmatprep.mubr.msk.bf16.mxu0 %vm1164_vm2, %v4890_v34  ;;  %4723 = vmatprep.mubr.msk.bf16.mxu1 %vm1164_vm2, %v4892_v35  ;;  %v4915_v34 = vld [vmem:[%s6655_s0 + $0x1d8] sm:$0xff]   ;;  %v4917_v35 = vld [vmem:[%s6655_s0 + $0x468] sm:$0xff]  }
  0xc5   :  { %4560 = vmatmul.mubr.msk.bf16.gmra.mxu0 %vm1164_vm2, %v4891_v36  ;;  %4724 = vmatmul.mubr.msk.bf16.gmra.mxu1 %vm1164_vm2, %v4893_v37  ;;  %v4918_v36 = vld [vmem:[%s6655_s0 + $0x1e0] sm:$0xff]   ;;  %v4920_v37 = vld [vmem:[%s6655_s0 + $0x470] sm:$0xff]  }
  0xc6   :  { %4563 = vmatprep.mubr.msk.bf16.mxu0 %vm1164_vm2, %v4894_v38  ;;  %4727 = vmatprep.mubr.msk.bf16.mxu1 %vm1164_vm2, %v4896_v39 }
  0xcd   :  { %v5392_v44 = vpop.f32.mrf.mxu0  ;;  %4564 = vmatmul.mubr.msk.bf16.gmra.mxu0 %vm1164_vm2, %v4895_v40  ;;  %v5395_v45 = vpop.f32.mrf.mxu1  ;;  %4728 = vmatmul.mubr.msk.bf16.gmra.mxu1 %vm1164_vm2, %v4897_v41 }
  0xce   :  { %4567 = vmatprep.mubr.msk.bf16.mxu0 %vm1164_vm2, %v4898_v42  ;;  %4731 = vmatprep.mubr.msk.bf16.mxu1 %vm1164_vm2, %v4900_v43 }
  0xcf   :  { %v5400_v46 = vpop.f32.mrf.mxu0  ;;  %v5402_v47 = vpop.f32.mrf.mxu1 }
  0xd0   :  { %6658 = vst [vmem:[#allocation2_spill] sm:$0xff] %v5400_v46 }
  0xd1   :  { %v5404_v48 = vpop.f32.mrf.mxu0  ;;  %v5406_v49 = vpop.f32.mrf.mxu1 }
  0xd3   :  { %v5420_v54 = vpop.f32.mrf.mxu0  ;;  %v5422_v55 = vpop.f32.mrf.mxu1 }
  0xd4   :  { %6659 = vst [vmem:[#allocation3_spill] sm:$0xff] %v5420_v54 }
  0xd5   :  { %v5424_v56 = vpop.f32.mrf.mxu0  ;;  %4568 = vmatmul.mubr.msk.bf16.gmra.mxu0 %vm1164_vm2, %v4899_v50  ;;  %v5427_v57 = vpop.f32.mrf.mxu1  ;;  %4732 = vmatmul.mubr.msk.bf16.gmra.mxu1 %vm1164_vm2, %v4901_v51 }
  0xd6   :  { %4571 = vmatprep.mubr.msk.bf16.mxu0 %vm1164_vm2, %v4902_v52  ;;  %4735 = vmatprep.mubr.msk.bf16.mxu1 %vm1164_vm2, %v4904_v53  ;;  %v4919_v52 = vld [vmem:[%s6655_s0 + $0x1e8] sm:$0xff]   ;;  %v4921_v53 = vld [vmem:[%s6655_s0 + $0x478] sm:$0xff]  }
  0xd7   :  { %v5432_v58 = vpop.f32.mrf.mxu0  ;;  %v5434_v59 = vpop.f32.mrf.mxu1 }
  0xd9   :  { %v5436_v60 = vpop.f32.mrf.mxu0  ;;  %v5438_v61 = vpop.f32.mrf.mxu1 }
  0xdb   :  { %v5452_v2 = vpop.f32.mrf.mxu0  ;;  %v5454_v3 = vpop.f32.mrf.mxu1 }
  0xdd   :  { %v5456_v4 = vpop.f32.mrf.mxu0  ;;  %4572 = vmatmul.mubr.msk.bf16.gmra.mxu0 %vm1164_vm2, %v4903_v62  ;;  %v5459_v5 = vpop.f32.mrf.mxu1  ;;  %4736 = vmatmul.mubr.msk.bf16.gmra.mxu1 %vm1164_vm2, %v4905_v63  ;;  %v4922_v62 = vld [vmem:[%s6655_s0 + $0x1f0] sm:$0xff]   ;;  %v4924_v63 = vld [vmem:[%s6655_s0 + $0x480] sm:$0xff]  }
  0xde   :  { %4575 = vmatprep.mubr.msk.bf16.mxu0 %vm1164_vm2, %v4906_v0  ;;  %4739 = vmatprep.mubr.msk.bf16.mxu1 %vm1164_vm2, %v4908_v1 }
  0xdf   :  { %v5464_v6 = vpop.f32.mrf.mxu0  ;;  %v5466_v7 = vpop.f32.mrf.mxu1 }
  0xe1   :  { %v5468_v8 = vpop.f32.mrf.mxu0  ;;  %v5470_v9 = vpop.f32.mrf.mxu1 }
  0xe3   :  { %v5484_v14 = vpop.f32.mrf.mxu0  ;;  %v5486_v15 = vpop.f32.mrf.mxu1 }
  0xe5   :  { %v5488_v16 = vpop.f32.mrf.mxu0  ;;  %4576 = vmatmul.mubr.msk.bf16.gmra.mxu0 %vm1164_vm2, %v4907_v10  ;;  %v5491_v17 = vpop.f32.mrf.mxu1  ;;  %4740 = vmatmul.mubr.msk.bf16.gmra.mxu1 %vm1164_vm2, %v4909_v11 }
  0xe6   :  { %4579 = vmatprep.mubr.msk.bf16.mxu0 %vm1164_vm2, %v4910_v12  ;;  %4743 = vmatprep.mubr.msk.bf16.mxu1 %vm1164_vm2, %v4912_v13 }
  0xe7   :  { %v5496_v18 = vpop.f32.mrf.mxu0  ;;  %v5498_v19 = vpop.f32.mrf.mxu1 }
  0xe9   :  { %v5500_v20 = vpop.f32.mrf.mxu0  ;;  %v5502_v21 = vpop.f32.mrf.mxu1 }
  0xeb   :  { %v5516_v26 = vpop.f32.mrf.mxu0  ;;  %v5518_v27 = vpop.f32.mrf.mxu1 }
  0xed   :  { %v5520_v28 = vpop.f32.mrf.mxu0  ;;  %4580 = vmatmul.mubr.msk.bf16.gmra.mxu0 %vm1164_vm2, %v4911_v22  ;;  %v5523_v29 = vpop.f32.mrf.mxu1  ;;  %4744 = vmatmul.mubr.msk.bf16.gmra.mxu1 %vm1164_vm2, %v4913_v23 }
  0xee   :  { %4583 = vmatprep.mubr.msk.bf16.mxu0 %vm1164_vm2, %v4914_v24  ;;  %4747 = vmatprep.mubr.msk.bf16.mxu1 %vm1164_vm2, %v4916_v25  ;;  %v4923_v24 = vld [vmem:[%s6655_s0 + $0x1f8] sm:$0xff]   ;;  %v4925_v25 = vld [vmem:[%s6655_s0 + $0x488] sm:$0xff]  }
  0xef   :  { %v5528_v30 = vpop.f32.mrf.mxu0  ;;  %v5530_v31 = vpop.f32.mrf.mxu1 }
  0xf1   :  { %v5532_v32 = vpop.f32.mrf.mxu0  ;;  %v5534_v33 = vpop.f32.mrf.mxu1 }
  0xf3   :  { %v5548_v38 = vpop.f32.mrf.mxu0  ;;  %v5550_v39 = vpop.f32.mrf.mxu1 }
  0xf5   :  { %v5552_v40 = vpop.f32.mrf.mxu0  ;;  %4584 = vmatmul.mubr.msk.bf16.gmra.mxu0 %vm1164_vm2, %v4915_v34  ;;  %v5555_v41 = vpop.f32.mrf.mxu1  ;;  %4748 = vmatmul.mubr.msk.bf16.gmra.mxu1 %vm1164_vm2, %v4917_v35  ;;  %v4926_v34 = vld [vmem:[%s6655_s0 + $0x200] sm:$0xff]   ;;  %v4928_v35 = vld [vmem:[%s6655_s0 + $0x490] sm:$0xff]  }
  0xf6   :  { %6660 = vst [vmem:[#allocation4_spill] sm:$0xff] %v5555_v41  ;;  %4587 = vmatprep.mubr.msk.bf16.mxu0 %vm1164_vm2, %v4918_v36  ;;  %4751 = vmatprep.mubr.msk.bf16.mxu1 %vm1164_vm2, %v4920_v37 }
  0xf7   :  { %v5560_v42 = vpop.f32.mrf.mxu0  ;;  %v5562_v43 = vpop.f32.mrf.mxu1 }
  0xf9   :  { %v5564_v50 = vpop.f32.mrf.mxu0  ;;  %v5566_v51 = vpop.f32.mrf.mxu1 }
  0xfb   :  { %v5580_v0 = vpop.f32.mrf.mxu0  ;;  %v5582_v1 = vpop.f32.mrf.mxu1 }
  0xfd   :  { %v5584_v10 = vpop.f32.mrf.mxu0  ;;  %4588 = vmatmul.mubr.msk.bf16.gmra.mxu0 %vm1164_vm2, %v4919_v52  ;;  %v5587_v11 = vpop.f32.mrf.mxu1  ;;  %4752 = vmatmul.mubr.msk.bf16.gmra.mxu1 %vm1164_vm2, %v4921_v53 }
  0xfe   :  { %6661 = vst [vmem:[#allocation5_spill] sm:$0xff] %v5584_v10  ;;  %6662 = vst [vmem:[#allocation6_spill] sm:$0xff] %v5587_v11  ;;  %4591 = vmatprep.mubr.msk.bf16.mxu0 %vm1164_vm2, %v4922_v62  ;;  %4755 = vmatprep.mubr.msk.bf16.mxu1 %vm1164_vm2, %v4924_v63 }
  0xff   :  { %v5592_v12 = vpop.f32.mrf.mxu0  ;;  %v5594_v13 = vpop.f32.mrf.mxu1 }
 0x100   :  { %6663 = vst [vmem:[#allocation7_spill] sm:$0xff] %v5592_v12  ;;  %6664 = vst [vmem:[#allocation8_spill] sm:$0xff] %v5594_v13 }
 0x101   :  { %v5596_v22 = vpop.f32.mrf.mxu0  ;;  %v5598_v23 = vpop.f32.mrf.mxu1 }
 0x102   :  { %6665 = vst [vmem:[#allocation9_spill] sm:$0xff] %v5596_v22  ;;  %6666 = vst [vmem:[#allocation10_spill] sm:$0xff] %v5598_v23 }
 0x103   :  { %v5612_v36 = vpop.f32.mrf.mxu0  ;;  %v5614_v37 = vpop.f32.mrf.mxu1 }
 0x104   :  { %6667 = vst [vmem:[#allocation11_spill] sm:$0xff] %v5614_v37 }
 0x105   :  { %v5616_v52 = vpop.f32.mrf.mxu0  ;;  %4592 = vmatmul.mubr.msk.bf16.gmra.mxu0 %vm1164_vm2, %v4923_v24  ;;  %v5619_v53 = vpop.f32.mrf.mxu1  ;;  %4756 = vmatmul.mubr.msk.bf16.gmra.mxu1 %vm1164_vm2, %v4925_v25  ;;  %v4927_v24 = vld [vmem:[%s6655_s0 + $0x208] sm:$0xff]   ;;  %v4929_v25 = vld [vmem:[%s6655_s0 + $0x498] sm:$0xff]  }
 0x106   :  { %6668 = vst [vmem:[#allocation12_spill] sm:$0xff] %v5616_v52  ;;  %6669 = vst [vmem:[#allocation13_spill] sm:$0xff] %v5619_v53  ;;  %4595 = vmatprep.mubr.msk.bf16.mxu0 %vm1164_vm2, %v4926_v34  ;;  %4759 = vmatprep.mubr.msk.bf16.mxu1 %vm1164_vm2, %v4928_v35  ;;  %v4930_v34 = vld [vmem:[%s6655_s0 + $0x210] sm:$0xff]   ;;  %v4932_v35 = vld [vmem:[%s6655_s0 + $0x4a0] sm:$0xff]  }
 0x107   :  { %v5624_v62 = vpop.f32.mrf.mxu0  ;;  %v5626_v63 = vpop.f32.mrf.mxu1 }
 0x108   :  { %6670 = vst [vmem:[#allocation14_spill] sm:$0xff] %v5624_v62  ;;  %6671 = vst [vmem:[#allocation15_spill] sm:$0xff] %v5626_v63 }
 0x109   :  { %v5628_v54 = vpop.f32.mrf.mxu0  ;;  %v5630_v46 = vpop.f32.mrf.mxu1 }
 0x10a   :  { %6672 = vst [vmem:[#allocation16_spill] sm:$0xff] %v5628_v54  ;;  %6673 = vst [vmem:[#allocation17_spill] sm:$0xff] %v5630_v46 }
 0x10b   :  { %v5644_v53 = vpop.f32.mrf.mxu0  ;;  %v5646_v54 = vpop.f32.mrf.mxu1 }
 0x10c   :  { %6674 = vst [vmem:[#allocation18_spill] sm:$0xff] %v5644_v53  ;;  %6675 = vst [vmem:[#allocation19_spill] sm:$0xff] %v5646_v54 }
 0x10d   :  { %v5648_v46 = vpop.f32.mrf.mxu0  ;;  %4596 = vmatmul.mubr.msk.bf16.gmra.mxu0 %vm1164_vm2, %v4927_v24  ;;  %v5651_v11 = vpop.f32.mrf.mxu1  ;;  %4760 = vmatmul.mubr.msk.bf16.gmra.mxu1 %vm1164_vm2, %v4929_v25  ;;  %v4931_v24 = vld [vmem:[%s6655_s0 + $0x218] sm:$0xff]   ;;  %v4933_v25 = vld [vmem:[%s6655_s0 + $0x4a8] sm:$0xff]  }
 0x10e   :  { %6676 = vst [vmem:[#allocation20_spill] sm:$0xff] %v5648_v46  ;;  %6677 = vst [vmem:[#allocation21_spill] sm:$0xff] %v5651_v11  ;;  %4599 = vmatprep.mubr.msk.bf16.mxu0 %vm1164_vm2, %v4930_v34  ;;  %4763 = vmatprep.mubr.msk.bf16.mxu1 %vm1164_vm2, %v4932_v35  ;;  %v4934_v34 = vld [vmem:[%s6655_s0 + $0x220] sm:$0xff]   ;;  %v4936_v35 = vld [vmem:[%s6655_s0 + $0x4b0] sm:$0xff]  }
 0x10f   :  { %v5656_v63 = vpop.f32.mrf.mxu0  ;;  %v5658_v62 = vpop.f32.mrf.mxu1 }
 0x110   :  { %6678 = vst [vmem:[#allocation22_spill] sm:$0xff] %v5656_v63  ;;  %6679 = vst [vmem:[#allocation23_spill] sm:$0xff] %v5658_v62 }
 0x111   :  { %v5660_v52 = vpop.f32.mrf.mxu0  ;;  %v5662_v37 = vpop.f32.mrf.mxu1 }
 0x112   :  { %6680 = vst [vmem:[#allocation24_spill] sm:$0xff] %v5660_v52  ;;  %6681 = vst [vmem:[#allocation25_spill] sm:$0xff] %v5662_v37 }
 0x113   :  { %v5676_v11 = vpop.f32.mrf.mxu0  ;;  %v5678_v52 = vpop.f32.mrf.mxu1 }
 0x114   :  { %6682 = vst [vmem:[#allocation26_spill] sm:$0xff] %v5676_v11  ;;  %6683 = vst [vmem:[#allocation27_spill] sm:$0xff] %v5678_v52 }
 0x115   :  { %v5680_v37 = vpop.f32.mrf.mxu0  ;;  %4600 = vmatmul.mubr.msk.bf16.gmra.mxu0 %vm1164_vm2, %v4931_v24  ;;  %v5683_v62 = vpop.f32.mrf.mxu1  ;;  %4764 = vmatmul.mubr.msk.bf16.gmra.mxu1 %vm1164_vm2, %v4933_v25  ;;  %v4935_v24 = vld [vmem:[%s6655_s0 + $0x228] sm:$0xff]   ;;  %v4937_v25 = vld [vmem:[%s6655_s0 + $0x4b8] sm:$0xff]  }
 0x116   :  { %6684 = vst [vmem:[#allocation28_spill] sm:$0xff] %v5680_v37  ;;  %6685 = vst [vmem:[#allocation29_spill] sm:$0xff] %v5683_v62  ;;  %4603 = vmatprep.mubr.msk.bf16.mxu0 %vm1164_vm2, %v4934_v34  ;;  %4767 = vmatprep.mubr.msk.bf16.mxu1 %vm1164_vm2, %v4936_v35  ;;  %v4938_v34 = vld [vmem:[%s6655_s0 + $0x230] sm:$0xff]   ;;  %v4940_v35 = vld [vmem:[%s6655_s0 + $0x4c0] sm:$0xff]  }
 0x117   :  { %v5688_v63 = vpop.f32.mrf.mxu0  ;;  %v5690_v46 = vpop.f32.mrf.mxu1 }
 0x118   :  { %6686 = vst [vmem:[#allocation30_spill] sm:$0xff] %v5688_v63  ;;  %6687 = vst [vmem:[#allocation31_spill] sm:$0xff] %v5690_v46 }
 0x119   :  { %v5692_v54 = vpop.f32.mrf.mxu0  ;;  %v5694_v11 = vpop.f32.mrf.mxu1 }
 0x11a   :  { %6688 = vst [vmem:[#allocation32_spill] sm:$0xff] %v5692_v54  ;;  %6689 = vst [vmem:[#allocation33_spill] sm:$0xff] %v5694_v11 }
 0x11b   :  { %v5708_v62 = vpop.f32.mrf.mxu0  ;;  %v5710_v54 = vpop.f32.mrf.mxu1 }
 0x11c   :  { %6690 = vst [vmem:[#allocation34_spill] sm:$0xff] %v5708_v62  ;;  %6691 = vst [vmem:[#allocation35_spill] sm:$0xff] %v5710_v54 }
 0x11d   :  { %v5712_v11 = vpop.f32.mrf.mxu0  ;;  %4604 = vmatmul.mubr.msk.bf16.gmra.mxu0 %vm1164_vm2, %v4935_v24  ;;  %v5715_v46 = vpop.f32.mrf.mxu1  ;;  %4768 = vmatmul.mubr.msk.bf16.gmra.mxu1 %vm1164_vm2, %v4937_v25  ;;  %v4939_v24 = vld [vmem:[%s6655_s0 + $0x238] sm:$0xff]   ;;  %v4941_v25 = vld [vmem:[%s6655_s0 + $0x4c8] sm:$0xff]  }
 0x11e   :  { %6692 = vst [vmem:[#allocation36_spill] sm:$0xff] %v5712_v11  ;;  %6693 = vst [vmem:[#allocation37_spill] sm:$0xff] %v5715_v46  ;;  %4607 = vmatprep.mubr.msk.bf16.mxu0 %vm1164_vm2, %v4938_v34  ;;  %4771 = vmatprep.mubr.msk.bf16.mxu1 %vm1164_vm2, %v4940_v35  ;;  %v4942_v34 = vld [vmem:[%s6655_s0 + $0x240] sm:$0xff]   ;;  %v4944_v35 = vld [vmem:[%s6655_s0 + $0x4d0] sm:$0xff]  }
 0x11f   :  { %v5720_v63 = vpop.f32.mrf.mxu0  ;;  %v5722_v37 = vpop.f32.mrf.mxu1 }
 0x120   :  { %6694 = vst [vmem:[#allocation38_spill] sm:$0xff] %v5720_v63  ;;  %6695 = vst [vmem:[#allocation39_spill] sm:$0xff] %v5722_v37 }
 0x121   :  { %v5724_v52 = vpop.f32.mrf.mxu0  ;;  %v5726_v62 = vpop.f32.mrf.mxu1 }
 0x122   :  { %6696 = vst [vmem:[#allocation40_spill] sm:$0xff] %v5724_v52  ;;  %6697 = vst [vmem:[#allocation41_spill] sm:$0xff] %v5726_v62 }
 0x123   :  { %v5740_v46 = vpop.f32.mrf.mxu0  ;;  %v5742_v52 = vpop.f32.mrf.mxu1 }
 0x124   :  { %6698 = vst [vmem:[#allocation42_spill] sm:$0xff] %v5740_v46  ;;  %6699 = vst [vmem:[#allocation43_spill] sm:$0xff] %v5742_v52 }
 0x125   :  { %v5744_v62 = vpop.f32.mrf.mxu0  ;;  %4608 = vmatmul.mubr.msk.bf16.gmra.mxu0 %vm1164_vm2, %v4939_v24  ;;  %v5747_v37 = vpop.f32.mrf.mxu1  ;;  %4772 = vmatmul.mubr.msk.bf16.gmra.mxu1 %vm1164_vm2, %v4941_v25  ;;  %v4943_v24 = vld [vmem:[%s6655_s0 + $0x248] sm:$0xff]   ;;  %v4945_v25 = vld [vmem:[%s6655_s0 + $0x4d8] sm:$0xff]  }
 0x126   :  { %6700 = vst [vmem:[#allocation44_spill] sm:$0xff] %v5744_v62  ;;  %6701 = vst [vmem:[#allocation45_spill] sm:$0xff] %v5747_v37  ;;  %4611 = vmatprep.mubr.msk.bf16.mxu0 %vm1164_vm2, %v4942_v34  ;;  %4775 = vmatprep.mubr.msk.bf16.mxu1 %vm1164_vm2, %v4944_v35  ;;  %v4946_v34 = vld [vmem:[%s6655_s0 + $0x250] sm:$0xff]   ;;  %v4948_v35 = vld [vmem:[%s6655_s0 + $0x4e0] sm:$0xff]  }
 0x127   :  { %v5752_v63 = vpop.f32.mrf.mxu0  ;;  %v5754_v11 = vpop.f32.mrf.mxu1 }
 0x128   :  { %6702 = vst [vmem:[#allocation46_spill] sm:$0xff] %v5752_v63  ;;  %6703 = vst [vmem:[#allocation47_spill] sm:$0xff] %v5754_v11 }
 0x129   :  { %v5756_v54 = vpop.f32.mrf.mxu0  ;;  %v5758_v46 = vpop.f32.mrf.mxu1 }
 0x12a   :  { %6704 = vst [vmem:[#allocation48_spill] sm:$0xff] %v5756_v54  ;;  %6705 = vst [vmem:[#allocation49_spill] sm:$0xff] %v5758_v46 }
 0x12b   :  { %v5772_v37 = vpop.f32.mrf.mxu0  ;;  %v5774_v54 = vpop.f32.mrf.mxu1 }
 0x12c   :  { %6706 = vst [vmem:[#allocation50_spill] sm:$0xff] %v5772_v37  ;;  %6707 = vst [vmem:[#allocation51_spill] sm:$0xff] %v5774_v54 }
 0x12d   :  { %v5776_v46 = vpop.f32.mrf.mxu0  ;;  %4612 = vmatmul.mubr.msk.bf16.gmra.mxu0 %vm1164_vm2, %v4943_v24  ;;  %v5779_v11 = vpop.f32.mrf.mxu1  ;;  %4776 = vmatmul.mubr.msk.bf16.gmra.mxu1 %vm1164_vm2, %v4945_v25  ;;  %v4947_v24 = vld [vmem:[%s6655_s0 + $0x258] sm:$0xff]   ;;  %v4949_v25 = vld [vmem:[%s6655_s0 + $0x4e8] sm:$0xff]  }
 0x12e   :  { %6708 = vst [vmem:[#allocation52_spill] sm:$0xff] %v5776_v46  ;;  %6709 = vst [vmem:[#allocation53_spill] sm:$0xff] %v5779_v11  ;;  %4615 = vmatprep.mubr.msk.bf16.mxu0 %vm1164_vm2, %v4946_v34  ;;  %4779 = vmatprep.mubr.msk.bf16.mxu1 %vm1164_vm2, %v4948_v35  ;;  %v4950_v34 = vld [vmem:[%s6655_s0 + $0x260] sm:$0xff]   ;;  %v4952_v35 = vld [vmem:[%s6655_s0 + $0x4f0] sm:$0xff]  }
 0x12f   :  { %v5784_v63 = vpop.f32.mrf.mxu0  ;;  %v5786_v62 = vpop.f32.mrf.mxu1 }
 0x130   :  { %6710 = vst [vmem:[#allocation54_spill] sm:$0xff] %v5784_v63  ;;  %6711 = vst [vmem:[#allocation55_spill] sm:$0xff] %v5786_v62 }
 0x131   :  { %v5788_v52 = vpop.f32.mrf.mxu0  ;;  %v5790_v37 = vpop.f32.mrf.mxu1 }
 0x132   :  { %6712 = vst [vmem:[#allocation56_spill] sm:$0xff] %v5788_v52  ;;  %6713 = vst [vmem:[#allocation57_spill] sm:$0xff] %v5790_v37 }
 0x133   :  { %v5804_v11 = vpop.f32.mrf.mxu0  ;;  %v5806_v52 = vpop.f32.mrf.mxu1 }
 0x134   :  { %6714 = vst [vmem:[#allocation58_spill] sm:$0xff] %v5804_v11  ;;  %6715 = vst [vmem:[#allocation59_spill] sm:$0xff] %v5806_v52 }
 0x135   :  { %v5808_v37 = vpop.f32.mrf.mxu0  ;;  %4616 = vmatmul.mubr.msk.bf16.gmra.mxu0 %vm1164_vm2, %v4947_v24  ;;  %v5811_v62 = vpop.f32.mrf.mxu1  ;;  %4780 = vmatmul.mubr.msk.bf16.gmra.mxu1 %vm1164_vm2, %v4949_v25  ;;  %v4951_v24 = vld [vmem:[%s6655_s0 + $0x268] sm:$0xff]   ;;  %v4953_v25 = vld [vmem:[%s6655_s0 + $0x4f8] sm:$0xff]  }
 0x136   :  { %6716 = vst [vmem:[#allocation60_spill] sm:$0xff] %v5808_v37  ;;  %6717 = vst [vmem:[#allocation61_spill] sm:$0xff] %v5811_v62  ;;  %4619 = vmatprep.mubr.msk.bf16.mxu0 %vm1164_vm2, %v4950_v34  ;;  %4783 = vmatprep.mubr.msk.bf16.mxu1 %vm1164_vm2, %v4952_v35  ;;  %v4954_v34 = vld [vmem:[%s6655_s0 + $0x270] sm:$0xff]   ;;  %v4956_v35 = vld [vmem:[%s6655_s0 + $0x500] sm:$0xff]  }
 0x137   :  { %v5816_v63 = vpop.f32.mrf.mxu0  ;;  %v5818_v46 = vpop.f32.mrf.mxu1 }
 0x138   :  { %6718 = vst [vmem:[#allocation62_spill] sm:$0xff] %v5816_v63  ;;  %6719 = vst [vmem:[#allocation63_spill] sm:$0xff] %v5818_v46 }
 0x139   :  { %v5820_v54 = vpop.f32.mrf.mxu0  ;;  %v5822_v11 = vpop.f32.mrf.mxu1 }
 0x13a   :  { %6720 = vst [vmem:[#allocation64_spill] sm:$0xff] %v5820_v54  ;;  %6721 = vst [vmem:[#allocation65_spill] sm:$0xff] %v5822_v11 }
 0x13b   :  { %v5836_v62 = vpop.f32.mrf.mxu0  ;;  %v5838_v54 = vpop.f32.mrf.mxu1 }
 0x13c   :  { %6722 = vst [vmem:[#allocation66_spill] sm:$0xff] %v5836_v62  ;;  %6723 = vst [vmem:[#allocation67_spill] sm:$0xff] %v5838_v54 }
 0x13d   :  { %v5840_v11 = vpop.f32.mrf.mxu0  ;;  %4620 = vmatmul.mubr.msk.bf16.gmra.mxu0 %vm1164_vm2, %v4951_v24  ;;  %v5843_v46 = vpop.f32.mrf.mxu1  ;;  %4784 = vmatmul.mubr.msk.bf16.gmra.mxu1 %vm1164_vm2, %v4953_v25  ;;  %v4955_v24 = vld [vmem:[%s6655_s0 + $0x278] sm:$0xff]   ;;  %v4957_v25 = vld [vmem:[%s6655_s0 + $0x508] sm:$0xff]  }
 0x13e   :  { %6724 = vst [vmem:[#allocation68_spill] sm:$0xff] %v5840_v11  ;;  %6725 = vst [vmem:[#allocation69_spill] sm:$0xff] %v5843_v46  ;;  %4623 = vmatprep.mubr.msk.bf16.mxu0 %vm1164_vm2, %v4954_v34  ;;  %4787 = vmatprep.mubr.msk.bf16.mxu1 %vm1164_vm2, %v4956_v35  ;;  %v4958_v34 = vld [vmem:[%s6655_s0 + $0x280] sm:$0xff]  }
 0x13f   :  { %v5848_v63 = vpop.f32.mrf.mxu0  ;;  %v5850_v37 = vpop.f32.mrf.mxu1 }
 0x140   :  { %6726 = vst [vmem:[#allocation70_spill] sm:$0xff] %v5848_v63  ;;  %6727 = vst [vmem:[#allocation71_spill] sm:$0xff] %v5850_v37 }
 0x141   :  { %v5852_v52 = vpop.f32.mrf.mxu0  ;;  %v5854_v62 = vpop.f32.mrf.mxu1 }
 0x142   :  { %6728 = vst [vmem:[#allocation72_spill] sm:$0xff] %v5852_v52  ;;  %6729 = vst [vmem:[#allocation73_spill] sm:$0xff] %v5854_v62 }
 0x143   :  { %v5865_v35 = vpop.f32.mrf.mxu0  ;;  %v5867_v46 = vpop.f32.mrf.mxu1 }
 0x144   :  { %6730 = vst [vmem:[#allocation74_spill] sm:$0xff] %v5865_v35  ;;  %6731 = vst [vmem:[#allocation75_spill] sm:$0xff] %v5867_v46 }
 0x145   :  { %v5869_v37 = vpop.f32.mrf.mxu0  ;;  %4624 = vmatmul.mubr.msk.bf16.gmra.mxu0 %vm1164_vm2, %v4955_v24  ;;  %v5872_v62 = vpop.f32.mrf.mxu1  ;;  %4788 = vmatmul.mubr.msk.bf16.gmra.mxu1 %vm1164_vm2, %v4957_v25 }
 0x146   :  { %6732 = vst [vmem:[#allocation76_spill] sm:$0xff] %v5869_v37  ;;  %6733 = vst [vmem:[#allocation77_spill] sm:$0xff] %v5872_v62  ;;  %4627 = vmatprep.mubr.msk.bf16.mxu0 %vm1164_vm2, %v4958_v34  ;;  %v4959_v37 = vld [vmem:[%s6655_s0 + $0x288] sm:$0xff]  }
 0x147   :  { %v5876_v52 = vpop.f32.mrf.mxu0  ;;  %v5878_v63 = vpop.f32.mrf.mxu1 }
 0x148   :  { %6734 = vst [vmem:[#allocation78_spill] sm:$0xff] %v5876_v52  ;;  %6735 = vst [vmem:[#allocation79_spill] sm:$0xff] %v5878_v63 }
 0x149   :  { %v5880_v11 = vpop.f32.mrf.mxu0  ;;  %v5882_v54 = vpop.f32.mrf.mxu1 }
 0x14a   :  { %6736 = vst [vmem:[#allocation80_spill] sm:$0xff] %v5880_v11  ;;  %6737 = vst [vmem:[#allocation81_spill] sm:$0xff] %v5882_v54 }
 0x14b   :  { %v5887_v46 = vpop.f32.mrf.mxu0  ;;  %v5889_v24 = vpop.f32.mrf.mxu1 }
 0x14c   :  { %6738 = vst [vmem:[#allocation82_spill] sm:$0xff] %v5887_v46  ;;  %6739 = vst [vmem:[#allocation83_spill] sm:$0xff] %v5889_v24 }
 0x14d   :  { %v5891_v62 = vpop.f32.mrf.mxu0  ;;  %4628 = vmatmul.mubr.msk.bf16.gmra.mxu0 %vm1164_vm2, %v4959_v37  ;;  %v5894_v25 = vpop.f32.mrf.mxu1 }
 0x14e   :  { %6740 = vst [vmem:[#allocation84_spill] sm:$0xff] %v5891_v62  ;;  %6741 = vst [vmem:[#allocation85_spill] sm:$0xff] %v5894_v25 }
 0x14f   :  { %v5896_v34 = vpop.f32.mrf.mxu0  ;;  %v5898_v63 = vpop.f32.mrf.mxu1 }
 0x150   :  { %6742 = vst [vmem:[#allocation86_spill] sm:$0xff] %v5896_v34  ;;  %6743 = vst [vmem:[#allocation87_spill] sm:$0xff] %v5898_v63 }
 0x151   :  { %v5900_v11 = vpop.f32.mrf.mxu0  ;;  %v5902_v54 = vpop.f32.mrf.mxu1 }
 0x152   :  { %6744 = vst [vmem:[#allocation88_spill] sm:$0xff] %v5900_v11  ;;  %6745 = vst [vmem:[#allocation89_spill] sm:$0xff] %v5902_v54 }
 0x153   :  { %v5904_v52 = vpop.f32.mrf.mxu0  ;;  %v5906_v35 = vpop.f32.mrf.mxu1 }
 0x154   :  { %6746 = vst [vmem:[#allocation90_spill] sm:$0xff] %v5904_v52  ;;  %6747 = vst [vmem:[#allocation91_spill] sm:$0xff] %v5906_v35 }
 0x155   :  { %v5908_v46 = vpop.f32.mrf.mxu0  ;;  %v5910_v24 = vpop.f32.mrf.mxu1 }
 0x156   :  { %6748 = vst [vmem:[#allocation92_spill] sm:$0xff] %v5908_v46  ;;  %6749 = vst [vmem:[#allocation93_spill] sm:$0xff] %v5910_v24 }
 0x157   :  { %v5912_v62 = vpop.f32.mrf.mxu0  ;;  %v5914_v37 = vpop.f32.mrf.mxu1 }
 0x158   :  { %6750 = vst [vmem:[#allocation94_spill] sm:$0xff] %v5912_v62  ;;  %6751 = vst [vmem:[#allocation95_spill] sm:$0xff] %v5914_v37 }
 0x159   :  { %v5916_v25 = vpop.f32.mrf.mxu0  ;;  %v5918_v34 = vpop.f32.mrf.mxu1 }
 0x15a   :  { %6752 = vst [vmem:[#allocation96_spill] sm:$0xff] %v5916_v25  ;;  %6753 = vst [vmem:[#allocation97_spill] sm:$0xff] %v5918_v34 }
 0x15b   :  { %v5920_v63 = vpop.f32.mrf.mxu0  ;;  %v5922_v11 = vpop.f32.mrf.mxu1 }
 0x15c   :  { %6754 = vst [vmem:[#allocation98_spill] sm:$0xff] %v5920_v63  ;;  %6755 = vst [vmem:[#allocation99_spill] sm:$0xff] %v5922_v11 }
 0x15d   :  { %v5924_v54 = vpop.f32.mrf.mxu0  ;;  %v5926_v52 = vpop.f32.mrf.mxu1 }
 0x15e   :  { %6756 = vst [vmem:[#allocation100_spill] sm:$0xff] %v5924_v54  ;;  %6757 = vst [vmem:[#allocation101_spill] sm:$0xff] %v5926_v52 }
 0x15f   :  { %v5928_v35 = vpop.f32.mrf.mxu0  ;;  %v5930_v46 = vpop.f32.mrf.mxu1 }
 0x160   :  { %6758 = vst [vmem:[#allocation102_spill] sm:$0xff] %v5928_v35  ;;  %6759 = vst [vmem:[#allocation103_spill] sm:$0xff] %v5930_v46 }
 0x161   :  { %v5932_v24 = vpop.f32.mrf.mxu0  ;;  %v5934_v62 = vpop.f32.mrf.mxu1 }
 0x162   :  { %6760 = vst [vmem:[#allocation104_spill] sm:$0xff] %v5932_v24  ;;  %6761 = vst [vmem:[#allocation105_spill] sm:$0xff] %v5934_v62 }
 0x163   :  { %v5936_v37 = vpop.f32.mrf.mxu0  ;;  %v5938_v25 = vpop.f32.mrf.mxu1 }
 0x164   :  { %6762 = vst [vmem:[#allocation106_spill] sm:$0xff] %v5936_v37  ;;  %6763 = vst [vmem:[#allocation107_spill] sm:$0xff] %v5938_v25 }
 0x165   :  { %v5940_v34 = vpop.f32.mrf.mxu0  ;;  %v5942_v63 = vpop.f32.mrf.mxu1 }
 0x166   :  { %6764 = vst [vmem:[#allocation108_spill] sm:$0xff] %v5940_v34  ;;  %6765 = vst [vmem:[#allocation109_spill] sm:$0xff] %v5942_v63 }
 0x167   :  { %v5944_v11 = vpop.f32.mrf.mxu0  ;;  %v5946_v54 = vpop.f32.mrf.mxu1 }
 0x168   :  { %6766 = vst [vmem:[#allocation110_spill] sm:$0xff] %v5944_v11  ;;  %6767 = vst [vmem:[#allocation111_spill] sm:$0xff] %v5946_v54 }
 0x169   :  { %v5948_v52 = vpop.f32.mrf.mxu0  ;;  %v5950_v35 = vpop.f32.mrf.mxu1 }
 0x16a   :  { %6768 = vst [vmem:[#allocation112_spill] sm:$0xff] %v5948_v52  ;;  %6769 = vst [vmem:[#allocation113_spill] sm:$0xff] %v5950_v35 }
 0x16b   :  { %v5952_v46 = vpop.f32.mrf.mxu0  ;;  %v5954_v24 = vpop.f32.mrf.mxu1 }
 0x16c   :  { %6770 = vst [vmem:[#allocation114_spill] sm:$0xff] %v5952_v46  ;;  %6771 = vst [vmem:[#allocation115_spill] sm:$0xff] %v5954_v24  ;;  %v5969_v24 = vld [vmem:[%s6656_s2] ss:$0 sm:$0xff] }
 0x16d   :  { %v5956_v62 = vpop.f32.mrf.mxu0  ;;  %v4713_v37 = vpop.f32.mrf.mxu1 }
 0x16e   :  { %6772 = vst [vmem:[#allocation116_spill] sm:$0xff] %v5956_v62 }
 0x16f   :  { %v5958_v25 = vpop.f32.mrf.mxu0  ;;  %v5960_v34 = vpop.f32.mrf.mxu1 }
 0x170   :  { %6773 = vst [vmem:[#allocation117_spill] sm:$0xff] %v5958_v25  ;;  %6774 = vst [vmem:[#allocation118_spill] sm:$0xff] %v5960_v34 }
 0x171   :  { %v4550_v63 = vpop.f32.mrf.mxu0  ;;  %v4714_v23 = vpop.f32.mrf.mxu1 }
 0x172   :  { %v2993_v11 = vmax.f32 %v5392_v44, %v4550_v63 }
 0x173   :  { %v5963_v54 = vpop.f32.mrf.mxu0  ;;  %v2671_v52 = vpop.f32.mrf.mxu1 }
 0x174   :  { %6775 = vst [vmem:[#allocation119_spill] sm:$0xff] %v5963_v54  ;;  %v2994_v35 = vmax.f32 %v2993_v11, %v5402_v47 }
 0x175   :  { %v4553_v22 = vpop.f32.mrf.mxu0  ;;  %v4717_v62 = vpop.f32.mrf.mxu1 }
 0x176   :  { %v3002_v25 = vmax.f32 %v5452_v2, %v4553_v22  ;;  %v2995_v46 = vmax.f32 %v2994_v35, %v2671_v52 }
 0x177   :  { %v2028_v34 = vpop.f32.mrf.mxu0  ;;  %v2684_v53 = vpop.f32.mrf.mxu1 }
 0x178   :  { %v3239_v41 = vadd.f32 %v5969_v24, %v2995_v46  ;;  %v2996_v44 = vmax.f32 %v5404_v48, %v2028_v34  ;;  %v3003_v63 = vmax.f32 %v3002_v25, %v5406_v49 }
 0x179   :  { %v4554_v54 = vpop.f32.mrf.mxu0  ;;  %v5975_v47 = vpop.f32.mrf.mxu1 }
 0x17a   :  { %v3320_v11 = vmax.f32 %v3239_v41, 0.0  ;;  %v2997_v13 = vmax.f32 %v2996_v44, %v5422_v55  ;;  %v3005_v12 = vmax.f32 %v5424_v56, %v4554_v54  ;;  %v3004_v10 = vmax.f32 %v3003_v63, %v2684_v53 }
 0x17b   :  { %v2031_v2 = vpop.f32.mrf.mxu0  ;;  %v2687_v22 = vpop.f32.mrf.mxu1 }
 0x17c   :  { %v4220_v52 = vpack.c.bf16 %v3320_v11, %v3320_v11  ;;  %v2998_v35 = vmax.f32 %v2997_v13, %v4713_v37  ;;  %v3242_v46 = vadd.f32 %v5969_v24, %v3004_v10  ;;  %v2999_v48 = vmax.f32 %v5432_v58, %v2031_v2 }
 0x17d   :  { %v4557_v34 = vpop.f32.mrf.mxu0  ;;  %v3006_v49 = vmax.f32 %v3005_v12, %v5434_v59  ;;  %v5982_v25 = vpop.f32.mrf.mxu1 }
 0x17e   :  { %3727 = vst.msk [vmem:[%s6657_s3 + $0x8] sm:$0xf] %vm3724_vm3, %v4220_v52  ;;  %v3240_v54 = vadd.f32 %v5969_v24, %v2998_v35  ;;  %v3323_v55 = vmax.f32 %v3242_v46, 0.0  ;;  %v3000_v56 = vmax.f32 %v2999_v48, %v5395_v45  ;;  %v3014_v41 = vmax.f32 %v5484_v14, %v4557_v34 }
 0x17f   :  { %v3007_v10 = vmax.f32 %v3006_v49, %v2687_v22  ;;  %v2044_v13 = vpop.f32.mrf.mxu0  ;;  %v2700_v58 = vpop.f32.mrf.mxu1 }
 0x180   :  { %v3321_v53 = vmax.f32 %v3240_v54, 0.0  ;;  %v4223_v37 = vpack.c.bf16 %v3323_v55, %v3323_v55  ;;  %v3001_v59 = vmax.f32 %v3000_v56, %v4714_v23  ;;  %v3008_v12 = vmax.f32 %v5436_v60, %v2044_v13 }
 0x181   :  { %v3243_v44 = vadd.f32 %v5969_v24, %v3007_v10  ;;  %v4558_v63 = vpop.f32.mrf.mxu0  ;;  %v3015_v11 = vmax.f32 %v3014_v41, %v5438_v61  ;;  %v5994_v2 = vpop.f32.mrf.mxu1 }
 0x182   :  { %v4221_v52 = vpack.c.bf16 %v3321_v53, %v3321_v53  ;;  %3730 = vst.msk [vmem:[%s6657_s3 + $0x14] sm:$0xf] %vm3724_vm3, %v4223_v37  ;;  %v3241_v45 = vadd.f32 %v5969_v24, %v3001_v59  ;;  %v3009_v14 = vmax.f32 %v3008_v12, %v5454_v3  ;;  %v3017_v23 = vmax.f32 %v5456_v4, %v4558_v63 }
 0x183   :  { %v3324_v60 = vmax.f32 %v3243_v44, 0.0  ;;  %v3016_v22 = vmax.f32 %v3015_v11, %v2700_v58  ;;  %v2047_v35 = vpop.f32.mrf.mxu0  ;;  %v2703_v46 = vpop.f32.mrf.mxu1 }
 0x184   :  { %3728 = vst.msk [vmem:[%s6657_s3 + $0xc] sm:$0xf] %vm3724_vm3, %v4221_v52  ;;  %v3322_v61 = vmax.f32 %v3241_v45, 0.0  ;;  %v3010_v48 = vmax.f32 %v3009_v14, %v4717_v62  ;;  %v3011_v34 = vmax.f32 %v5464_v6, %v2047_v35  ;;  %v3018_v49 = vmax.f32 %v3017_v23, %v5466_v7 }
 0x185   :  { %v4224_v54 = vpack.c.bf16 %v3324_v60, %v3324_v60  ;;  %v3246_v3 = vadd.f32 %v5969_v24, %v3016_v22  ;;  %v4561_v55 = vpop.f32.mrf.mxu0  ;;  %v6010_v4 = vpop.f32.mrf.mxu1 }
 0x186   :  { %v4222_v56 = vpack.c.bf16 %v3322_v61, %v3322_v61  ;;  %v3244_v41 = vadd.f32 %v5969_v24, %v3010_v48  ;;  %v3012_v10 = vmax.f32 %v3011_v34, %v5427_v57  ;;  %v3026_v13 = vmax.f32 %v5516_v26, %v4561_v55 }
 0x187   :  { %3731 = vst.msk [vmem:[%s6657_s3 + $0x18] sm:$0xf] %vm3724_vm3, %v4224_v54  ;;  %v3327_v6 = vmax.f32 %v3246_v3, 0.0  ;;  %v3019_v7 = vmax.f32 %v3018_v49, %v2703_v46  ;;  %v2060_v62 = vpop.f32.mrf.mxu0  ;;  %v2716_v58 = vpop.f32.mrf.mxu1 }
 0x188   :  { %3729 = vst.msk [vmem:[%s6657_s3 + $0x10] sm:$0xf] %vm3724_vm3, %v4222_v56  ;;  %v3325_v53 = vmax.f32 %v3244_v41, 0.0  ;;  %v3013_v37 = vmax.f32 %v3012_v10, %v5975_v47  ;;  %v3020_v57 = vmax.f32 %v5468_v8, %v2060_v62  ;;  %v3027_v26 = vmax.f32 %v3026_v13, %v5470_v9 }
 0x189   :  { %v4227_v59 = vpack.c.bf16 %v3327_v6, %v3327_v6  ;;  %v3247_v12 = vadd.f32 %v5969_v24, %v3019_v7  ;;  %v4562_v44 = vpop.f32.mrf.mxu0  ;;  %v6027_v63 = vpop.f32.mrf.mxu1 }
 0x18a   :  { %v4225_v11 = vpack.c.bf16 %v3325_v53, %v3325_v53  ;;  %v3245_v52 = vadd.f32 %v5969_v24, %v3013_v37  ;;  %v3021_v45 = vmax.f32 %v3020_v57, %v5486_v15  ;;  %v3029_v14 = vmax.f32 %v5488_v16, %v4562_v44 }
 0x18b   :  { %3734 = vst.msk [vmem:[%s6657_s3 + $0x24] sm:$0xf] %vm3724_vm3, %v4227_v59  ;;  %v3328_v8 = vmax.f32 %v3247_v12, 0.0  ;;  %v3028_v9 = vmax.f32 %v3027_v26, %v2716_v58  ;;  %v2063_v47 = vpop.f32.mrf.mxu0  ;;  %v2719_v23 = vpop.f32.mrf.mxu1 }
 0x18c   :  { %3732 = vst.msk [vmem:[%s6657_s3 + $0x1c] sm:$0xf] %vm3724_vm3, %v4225_v11  ;;  %v3326_v60 = vmax.f32 %v3245_v52, 0.0  ;;  %v3022_v22 = vmax.f32 %v3021_v45, %v5982_v25  ;;  %v3023_v15 = vmax.f32 %v5496_v18, %v2063_v47  ;;  %v3030_v16 = vmax.f32 %v3029_v14, %v5498_v19 }
 0x18d   :  { %v4228_v35 = vpack.c.bf16 %v3328_v8, %v3328_v8  ;;  %v3250_v46 = vadd.f32 %v5969_v24, %v3028_v9  ;;  %v4565_v61 = vpop.f32.mrf.mxu0  ;;  %v6044_v48 = vpop.f32.mrf.mxu1 }
 0x18e   :  { %v4226_v34 = vpack.c.bf16 %v3326_v60, %v3326_v60  ;;  %v3248_v49 = vadd.f32 %v5969_v24, %v3022_v22  ;;  %v3024_v54 = vmax.f32 %v3023_v15, %v5459_v5  ;;  %v3038_v3 = vmax.f32 %v5548_v38, %v4565_v61 }
 0x18f   :  { %3735 = vst.msk [vmem:[%s6657_s3 + $0x28] sm:$0xf] %vm3724_vm3, %v4228_v35  ;;  %v3331_v18 = vmax.f32 %v3250_v46, 0.0  ;;  %v3031_v19 = vmax.f32 %v3030_v16, %v2719_v23  ;;  %v2076_v25 = vpop.f32.mrf.mxu0  ;;  %v2732_v55 = vpop.f32.mrf.mxu1 }
 0x190   :  { %3733 = vst.msk [vmem:[%s6657_s3 + $0x20] sm:$0xf] %vm3724_vm3, %v4226_v34  ;;  %v3329_v56 = vmax.f32 %v3248_v49, 0.0  ;;  %v3025_v41 = vmax.f32 %v3024_v54, %v5994_v2  ;;  %v3032_v5 = vmax.f32 %v5500_v20, %v2076_v25  ;;  %v3039_v38 = vmax.f32 %v3038_v3, %v5502_v21 }
 0x191   :  { %v4231_v10 = vpack.c.bf16 %v3331_v18, %v3331_v18  ;;  %v3251_v13 = vadd.f32 %v5969_v24, %v3031_v19  ;;  %v4566_v6 = vpop.f32.mrf.mxu0  ;;  %v6061_v7 = vpop.f32.mrf.mxu1 }
 0x192   :  { %v4229_v62 = vpack.c.bf16 %v3329_v56, %v3329_v56  ;;  %v3249_v58 = vadd.f32 %v5969_v24, %v3025_v41  ;;  %v3033_v53 = vmax.f32 %v3032_v5, %v5518_v27  ;;  %v3041_v37 = vmax.f32 %v5520_v28, %v4566_v6 }
 0x193   :  { %3738 = vst.msk [vmem:[%s6657_s3 + $0x34] sm:$0xf] %vm3724_vm3, %v4231_v10  ;;  %v3332_v20 = vmax.f32 %v3251_v13, 0.0  ;;  %v3040_v21 = vmax.f32 %v3039_v38, %v2732_v55  ;;  %v2079_v2 = vpop.f32.mrf.mxu0  ;;  %v2735_v57 = vpop.f32.mrf.mxu1 }
 0x194   :  { %3736 = vst.msk [vmem:[%s6657_s3 + $0x2c] sm:$0xf] %vm3724_vm3, %v4229_v62  ;;  %v3330_v26 = vmax.f32 %v3249_v58, 0.0  ;;  %v3034_v59 = vmax.f32 %v3033_v53, %v6010_v4  ;;  %v3035_v27 = vmax.f32 %v5528_v30, %v2079_v2  ;;  %v3042_v28 = vmax.f32 %v3041_v37, %v5530_v31 }
 0x195   :  { %v4232_v12 = vpack.c.bf16 %v3332_v20, %v3332_v20  ;;  %v3254_v44 = vadd.f32 %v5969_v24, %v3040_v21  ;;  %v4569_v11 = vpop.f32.mrf.mxu0  ;;  %v6078_v52 = vpop.f32.mrf.mxu1 }
 0x196   :  { %v4230_v45 = vpack.c.bf16 %v3330_v26, %v3330_v26  ;;  %v3252_v14 = vadd.f32 %v5969_v24, %v3034_v59  ;;  %v3036_v8 = vmax.f32 %v3035_v27, %v5491_v17  ;;  %v3050_v9 = vmax.f32 %v5580_v0, %v4569_v11  ;;  %v6776_v26 = vld [vmem:[#allocation5_spill] sm:$0xff]  ;;  %v6778_v11 = vld [vmem:[#allocation8_spill] sm:$0xff] }
 0x197   :  { %3739 = vst.msk [vmem:[%s6657_s3 + $0x38] sm:$0xf] %vm3724_vm3, %v4232_v12  ;;  %v3335_v30 = vmax.f32 %v3254_v44, 0.0  ;;  %v3043_v31 = vmax.f32 %v3042_v28, %v2735_v57  ;;  %v2092_v4 = vpop.f32.mrf.mxu0  ;;  %v2748_v47 = vpop.f32.mrf.mxu1 }
 0x198   :  { %3737 = vst.msk [vmem:[%s6657_s3 + $0x30] sm:$0xf] %vm3724_vm3, %v4230_v45  ;;  %v3333_v23 = vmax.f32 %v3252_v14, 0.0  ;;  %v3037_v60 = vmax.f32 %v3036_v8, %v6027_v63  ;;  %v3044_v17 = vmax.f32 %v5532_v32, %v2092_v4  ;;  %v3051_v0 = vmax.f32 %v3050_v9, %v5534_v33 }
 0x199   :  { %v4235_v22 = vpack.c.bf16 %v3335_v30, %v3335_v30  ;;  %v3255_v15 = vadd.f32 %v5969_v24, %v3043_v31  ;;  %v4570_v16 = vpop.f32.mrf.mxu0  ;;  %v6095_v35 = vpop.f32.mrf.mxu1 }
 0x19a   :  { %v4233_v46 = vpack.c.bf16 %v3333_v23, %v3333_v23  ;;  %v3253_v61 = vadd.f32 %v5969_v24, %v3037_v60  ;;  %v3045_v34 = vmax.f32 %v3044_v17, %v5550_v39  ;;  %v3053_v49 = vmax.f32 %v5552_v40, %v4570_v16  ;;  %v6780_v60 = vld [vmem:[#allocation18_spill] sm:$0xff] }
 0x19b   :  { %3742 = vst.msk [vmem:[%s6657_s3 + $0x44] sm:$0xf] %vm3724_vm3, %v4235_v22  ;;  %v3336_v32 = vmax.f32 %v3255_v15, 0.0  ;;  %v3052_v33 = vmax.f32 %v3051_v0, %v2748_v47  ;;  %v2095_v63 = vpop.f32.mrf.mxu0  ;;  %v2751_v54 = vpop.f32.mrf.mxu1  ;;  %v6779_v47 = vld [vmem:[#allocation4_spill] sm:$0xff] }
 0x19c   :  { %3740 = vst.msk [vmem:[%s6657_s3 + $0x3c] sm:$0xf] %vm3724_vm3, %v4233_v46  ;;  %v3334_v3 = vmax.f32 %v3253_v61, 0.0  ;;  %v3046_v18 = vmax.f32 %v3045_v34, %v6044_v48  ;;  %v3047_v39 = vmax.f32 %v5560_v42, %v2095_v63  ;;  %v3054_v40 = vmax.f32 %v3053_v49, %v5562_v43  ;;  %v6781_v61 = vld [vmem:[#allocation9_spill] sm:$0xff]  ;;  %v6782_v49 = vld [vmem:[#allocation10_spill] sm:$0xff] }
 0x19d   :  { %v4236_v19 = vpack.c.bf16 %v3336_v32, %v3336_v32  ;;  %v3258_v25 = vadd.f32 %v5969_v24, %v3052_v33  ;;  %v4573_v55 = vpop.f32.mrf.mxu0  ;;  %v6112_v56 = vpop.f32.mrf.mxu1 }
 0x19e   :  { %v4234_v41 = vpack.c.bf16 %v3334_v3, %v3334_v3  ;;  %v3256_v5 = vadd.f32 %v5969_v24, %v3046_v18  ;;  %v3048_v38 = vmax.f32 %v3047_v39, %v5523_v29  ;;  %v3062_v10 = vmax.f32 %v5612_v36, %v4573_v55 }
 0x19f   :  { %3743 = vst.msk [vmem:[%s6657_s3 + $0x48] sm:$0xf] %vm3724_vm3, %v4236_v19  ;;  %v3339_v42 = vmax.f32 %v3258_v25, 0.0  ;;  %v3055_v43 = vmax.f32 %v3054_v40, %v2751_v54  ;;  %v2108_v48 = vpop.f32.mrf.mxu0  ;;  %v2764_v13 = vpop.f32.mrf.mxu1  ;;  %v6783_v40 = vld [vmem:[#allocation11_spill] sm:$0xff]  ;;  %v6784_v25 = vld [vmem:[#allocation12_spill] sm:$0xff] }
 0x1a0   :  { %3741 = vst.msk [vmem:[%s6657_s3 + $0x40] sm:$0xf] %vm3724_vm3, %v4234_v41  ;;  %v3337_v6 = vmax.f32 %v3256_v5, 0.0  ;;  %v3049_v62 = vmax.f32 %v3048_v38, %v6061_v7  ;;  %v3056_v29 = vmax.f32 %v5564_v50, %v2108_v48  ;;  %v3063_v36 = vmax.f32 %v3062_v10, %v5566_v51 }
 0x1a1   :  { %v4239_v58 = vpack.c.bf16 %v3339_v42, %v3339_v42  ;;  %v3259_v53 = vadd.f32 %v5969_v24, %v3055_v43  ;;  %v4574_v37 = vpop.f32.mrf.mxu0  ;;  %v6129_v20 = vpop.f32.mrf.mxu1  ;;  %v6785_v43 = vld [vmem:[#allocation14_spill] sm:$0xff] }
 0x1a2   :  { %v4237_v21 = vpack.c.bf16 %v3337_v6, %v3337_v6  ;;  %v3257_v2 = vadd.f32 %v5969_v24, %v3049_v62  ;;  %v3057_v57 = vmax.f32 %v3056_v29, %v5582_v1  ;;  %v3065_v59 = vmax.f32 %v6776_v26, %v4574_v37  ;;  %v6777_v1 = vld [vmem:[#allocation7_spill] sm:$0xff] }
 0x1a3   :  { %3746 = vst.msk [vmem:[%s6657_s3 + $0x54] sm:$0xf] %vm3724_vm3, %v4239_v58  ;;  %v3340_v50 = vmax.f32 %v3259_v53, 0.0  ;;  %v3064_v51 = vmax.f32 %v3063_v36, %v2764_v13  ;;  %v2111_v7 = vpop.f32.mrf.mxu0  ;;  %v2767_v27 = vpop.f32.mrf.mxu1  ;;  %v6786_v13 = vld [vmem:[#allocation15_spill] sm:$0xff] }
 0x1a4   :  { %3744 = vst.msk [vmem:[%s6657_s3 + $0x4c] sm:$0xf] %vm3724_vm3, %v4237_v21  ;;  %v3338_v28 = vmax.f32 %v3257_v2, 0.0  ;;  %v3058_v12 = vmax.f32 %v3057_v57, %v6078_v52  ;;  %v3059_v44 = vmax.f32 %v6777_v1, %v2111_v7  ;;  %v3066_v45 = vmax.f32 %v3065_v59, %v6778_v11  ;;  %v6787_v21 = vld [vmem:[#allocation6_spill] sm:$0xff]  ;;  %v6790_v1 = vld [vmem:[#allocation17_spill] sm:$0xff] }
 0x1a5   :  { %v4240_v14 = vpack.c.bf16 %v3340_v50, %v3340_v50  ;;  %v3262_v8 = vadd.f32 %v5969_v24, %v3064_v51  ;;  %v4577_v9 = vpop.f32.mrf.mxu0  ;;  %v6146_v30 = vpop.f32.mrf.mxu1  ;;  %v6788_v57 = vld [vmem:[#allocation26_spill] sm:$0xff] }
 0x1a6   :  { %v4238_v31 = vpack.c.bf16 %v3338_v28, %v3338_v28  ;;  %v3260_v4 = vadd.f32 %v5969_v24, %v3058_v12  ;;  %v3060_v23 = vmax.f32 %v3059_v44, %v6779_v47  ;;  %v3074_v17 = vmax.f32 %v6780_v60, %v4577_v9  ;;  %v6789_v28 = vld [vmem:[#allocation16_spill] sm:$0xff] }
 0x1a7   :  { %3747 = vst.msk [vmem:[%s6657_s3 + $0x58] sm:$0xf] %vm3724_vm3, %v4240_v14  ;;  %v3343_v52 = vmax.f32 %v3262_v8, 0.0  ;;  %v3067_v0 = vmax.f32 %v3066_v45, %v2767_v27  ;;  %v2124_v22 = vpop.f32.mrf.mxu0  ;;  %v2780_v15 = vpop.f32.mrf.mxu1 }
 0x1a8   :  { %3745 = vst.msk [vmem:[%s6657_s3 + $0x50] sm:$0xf] %vm3724_vm3, %v4238_v31  ;;  %v3341_v16 = vmax.f32 %v3260_v4, 0.0  ;;  %v3061_v46 = vmax.f32 %v3060_v23, %v6095_v35  ;;  %v3068_v34 = vmax.f32 %v6781_v61, %v2124_v22  ;;  %v3075_v32 = vmax.f32 %v3074_v17, %v6782_v49  ;;  %v6791_v4 = vld [vmem:[#allocation19_spill] sm:$0xff]  ;;  %v6792_v23 = vld [vmem:[#allocation20_spill] sm:$0xff] }
 0x1a9   :  { %v4243_v33 = vpack.c.bf16 %v3343_v52, %v3343_v52  ;;  %v3263_v63 = vadd.f32 %v5969_v24, %v3067_v0  ;;  %v4578_v54 = vpop.f32.mrf.mxu0  ;;  %v6163_v3 = vpop.f32.mrf.mxu1  ;;  %v6794_v61 = vld [vmem:[#allocation23_spill] sm:$0xff] }
 0x1aa   :  { %v4241_v18 = vpack.c.bf16 %v3341_v16, %v3341_v16  ;;  %v3261_v39 = vadd.f32 %v5969_v24, %v3061_v46  ;;  %v3069_v19 = vmax.f32 %v3068_v34, %v6783_v40  ;;  %v3077_v55 = vmax.f32 %v6784_v25, %v4578_v54  ;;  %v6793_v16 = vld [vmem:[#allocation22_spill] sm:$0xff] }
 0x1ab   :  { %3750 = vst.msk [vmem:[%s6657_s3 + $0x64] sm:$0xf] %vm3724_vm3, %v4243_v33  ;;  %v3344_v35 = vmax.f32 %v3263_v63, 0.0  ;;  %v3076_v41 = vmax.f32 %v3075_v32, %v2780_v15  ;;  %v2127_v5 = vpop.f32.mrf.mxu0  ;;  %v2783_v38 = vpop.f32.mrf.mxu1 }
 0x1ac   :  { %3748 = vst.msk [vmem:[%s6657_s3 + $0x5c] sm:$0xf] %vm3724_vm3, %v4241_v18  ;;  %v3342_v10 = vmax.f32 %v3261_v39, 0.0  ;;  %v3070_v42 = vmax.f32 %v3069_v19, %v6112_v56  ;;  %v3071_v48 = vmax.f32 %v6785_v43, %v2127_v5  ;;  %v3078_v6 = vmax.f32 %v3077_v55, %v6786_v13  ;;  %v6795_v39 = vld [vmem:[#allocation13_spill] sm:$0xff]  ;;  %v6796_v19 = vld [vmem:[#allocation34_spill] sm:$0xff] }
 0x1ad   :  { %v4244_v62 = vpack.c.bf16 %v3344_v35, %v3344_v35  ;;  %v3266_v29 = vadd.f32 %v5969_v24, %v3076_v41  ;;  %v4581_v36 = vpop.f32.mrf.mxu0  ;;  %v6180_v58 = vpop.f32.mrf.mxu1  ;;  %v6798_v43 = vld [vmem:[#allocation25_spill] sm:$0xff] }
 0x1ae   :  { %v4242_v53 = vpack.c.bf16 %v3342_v10, %v3342_v10  ;;  %v3264_v37 = vadd.f32 %v5969_v24, %v3070_v42  ;;  %v3072_v2 = vmax.f32 %v3071_v48, %v6787_v21  ;;  %v3086_v26 = vmax.f32 %v6788_v57, %v4581_v36  ;;  %v6797_v10 = vld [vmem:[#allocation24_spill] sm:$0xff] }
 0x1af   :  { %3751 = vst.msk [vmem:[%s6657_s3 + $0x68] sm:$0xf] %vm3724_vm3, %v4244_v62  ;;  %v3347_v56 = vmax.f32 %v3266_v29, 0.0  ;;  %v3079_v59 = vmax.f32 %v3078_v6, %v2783_v38  ;;  %v2140_v50 = vpop.f32.mrf.mxu0  ;;  %v2796_v51 = vpop.f32.mrf.mxu1 }
 0x1b0   :  { %3749 = vst.msk [vmem:[%s6657_s3 + $0x60] sm:$0xf] %vm3724_vm3, %v4242_v53  ;;  %v3345_v7 = vmax.f32 %v3264_v37, 0.0  ;;  %v3073_v27 = vmax.f32 %v3072_v2, %v6129_v20  ;;  %v3080_v12 = vmax.f32 %v6789_v28, %v2140_v50  ;;  %v3087_v44 = vmax.f32 %v3086_v26, %v6790_v1  ;;  %v6799_v37 = vld [vmem:[#allocation27_spill] sm:$0xff]  ;;  %v6800_v2 = vld [vmem:[#allocation28_spill] sm:$0xff] }
 0x1b1   :  { %v4247_v11 = vpack.c.bf16 %v3347_v56, %v3347_v56  ;;  %v3267_v45 = vadd.f32 %v5969_v24, %v3079_v59  ;;  %v4582_v14 = vpop.f32.mrf.mxu0  ;;  %v6197_v8 = vpop.f32.mrf.mxu1  ;;  %v6802_v28 = vld [vmem:[#allocation31_spill] sm:$0xff] }
 0x1b2   :  { %v4245_v9 = vpack.c.bf16 %v3345_v7, %v3345_v7  ;;  %v3265_v31 = vadd.f32 %v5969_v24, %v3073_v27  ;;  %v3081_v47 = vmax.f32 %v3080_v12, %v6791_v4  ;;  %v3089_v60 = vmax.f32 %v6792_v23, %v4582_v14  ;;  %v6801_v7 = vld [vmem:[#allocation30_spill] sm:$0xff] }
 0x1b3   :  { %3754 = vst.msk [vmem:[%s6657_s3 + $0x74] sm:$0xf] %vm3724_vm3, %v4247_v11  ;;  %v3348_v20 = vmax.f32 %v3267_v45, 0.0  ;;  %v3088_v17 = vmax.f32 %v3087_v44, %v2796_v51  ;;  %v2143_v52 = vpop.f32.mrf.mxu0  ;;  %v2799_v0 = vpop.f32.mrf.mxu1 }
 0x1b4   :  { %3752 = vst.msk [vmem:[%s6657_s3 + $0x6c] sm:$0xf] %vm3724_vm3, %v4245_v9  ;;  %v3346_v22 = vmax.f32 %v3265_v31, 0.0  ;;  %v3082_v15 = vmax.f32 %v3081_v47, %v6146_v30  ;;  %v3083_v46 = vmax.f32 %v6793_v16, %v2143_v52  ;;  %v3090_v34 = vmax.f32 %v3089_v60, %v6794_v61  ;;  %v6803_v31 = vld [vmem:[#allocation21_spill] sm:$0xff]  ;;  %v6804_v47 = vld [vmem:[#allocation42_spill] sm:$0xff] }
 0x1b5   :  { %v4248_v49 = vpack.c.bf16 %v3348_v20, %v3348_v20  ;;  %v3270_v32 = vadd.f32 %v5969_v24, %v3088_v17  ;;  %v4585_v33 = vpop.f32.mrf.mxu0  ;;  %v6214_v63 = vpop.f32.mrf.mxu1  ;;  %v6806_v16 = vld [vmem:[#allocation33_spill] sm:$0xff] }
 0x1b6   :  { %v4246_v54 = vpack.c.bf16 %v3346_v22, %v3346_v22  ;;  %v3268_v18 = vadd.f32 %v5969_v24, %v3082_v15  ;;  %v3084_v40 = vmax.f32 %v3083_v46, %v6795_v39  ;;  %v3098_v25 = vmax.f32 %v6796_v19, %v4585_v33  ;;  %v6805_v22 = vld [vmem:[#allocation32_spill] sm:$0xff] }
 0x1b7   :  { %3755 = vst.msk [vmem:[%s6657_s3 + $0x78] sm:$0xf] %vm3724_vm3, %v4248_v49  ;;  %v3351_v30 = vmax.f32 %v3270_v32, 0.0  ;;  %v3091_v55 = vmax.f32 %v3090_v34, %v2799_v0  ;;  %v2156_v35 = vpop.f32.mrf.mxu0  ;;  %v2812_v41 = vpop.f32.mrf.mxu1 }
 0x1b8   :  { %3753 = vst.msk [vmem:[%s6657_s3 + $0x70] sm:$0xf] %vm3724_vm3, %v4246_v54  ;;  %v3349_v5 = vmax.f32 %v3268_v18, 0.0  ;;  %v3085_v38 = vmax.f32 %v3084_v40, %v6163_v3  ;;  %v3092_v42 = vmax.f32 %v6797_v10, %v2156_v35  ;;  %v3099_v48 = vmax.f32 %v3098_v25, %v6798_v43  ;;  %v6807_v18 = vld [vmem:[#allocation35_spill] sm:$0xff]  ;;  %v6808_v40 = vld [vmem:[#allocation36_spill] sm:$0xff] }
 0x1b9   :  { %v4251_v13 = vpack.c.bf16 %v3351_v30, %v3351_v30  ;;  %v3271_v6 = vadd.f32 %v5969_v24, %v3091_v55  ;;  %v4586_v62 = vpop.f32.mrf.mxu0  ;;  %v6231_v29 = vpop.f32.mrf.mxu1  ;;  %v6810_v10 = vld [vmem:[#allocation39_spill] sm:$0xff] }
 0x1ba   :  { %v4249_v36 = vpack.c.bf16 %v3349_v5, %v3349_v5  ;;  %v3269_v53 = vadd.f32 %v5969_v24, %v3085_v38  ;;  %v3093_v21 = vmax.f32 %v3092_v42, %v6799_v37  ;;  %v3101_v57 = vmax.f32 %v6800_v2, %v4586_v62  ;;  %v6809_v5 = vld [vmem:[#allocation38_spill] sm:$0xff] }
 0x1bb   :  { %3758 = vst.msk [vmem:[%s6657_s3 + $0x84] sm:$0xf] %vm3724_vm3, %v4251_v13  ;;  %v3352_v3 = vmax.f32 %v3271_v6, 0.0  ;;  %v3100_v26 = vmax.f32 %v3099_v48, %v2812_v41  ;;  %v2159_v56 = vpop.f32.mrf.mxu0  ;;  %v2815_v59 = vpop.f32.mrf.mxu1 }
 0x1bc   :  { %3756 = vst.msk [vmem:[%s6657_s3 + $0x7c] sm:$0xf] %vm3724_vm3, %v4249_v36  ;;  %v3350_v50 = vmax.f32 %v3269_v53, 0.0  ;;  %v3094_v51 = vmax.f32 %v3093_v21, %v6180_v58  ;;  %v3095_v27 = vmax.f32 %v6801_v7, %v2159_v56  ;;  %v3102_v12 = vmax.f32 %v3101_v57, %v6802_v28  ;;  %v6811_v53 = vld [vmem:[#allocation29_spill] sm:$0xff]  ;;  %v6812_v21 = vld [vmem:[#allocation50_spill] sm:$0xff] }
 0x1bd   :  { %v4252_v1 = vpack.c.bf16 %v3352_v3, %v3352_v3  ;;  %v3274_v44 = vadd.f32 %v5969_v24, %v3100_v26  ;;  %v4589_v11 = vpop.f32.mrf.mxu0  ;;  %v6248_v45 = vpop.f32.mrf.mxu1  ;;  %v6814_v7 = vld [vmem:[#allocation41_spill] sm:$0xff] }
 0x1be   :  { %v4250_v14 = vpack.c.bf16 %v3350_v50, %v3350_v50  ;;  %v3272_v9 = vadd.f32 %v5969_v24, %v3094_v51  ;;  %v3096_v4 = vmax.f32 %v3095_v27, %v6803_v31  ;;  %v3110_v23 = vmax.f32 %v6804_v47, %v4589_v11  ;;  %v6813_v50 = vld [vmem:[#allocation40_spill] sm:$0xff] }
 0x1bf   :  { %3759 = vst.msk [vmem:[%s6657_s3 + $0x88] sm:$0xf] %vm3724_vm3, %v4252_v1  ;;  %v3355_v58 = vmax.f32 %v3274_v44, 0.0  ;;  %v3103_v60 = vmax.f32 %v3102_v12, %v2815_v59  ;;  %v2172_v20 = vpop.f32.mrf.mxu0  ;;  %v2828_v17 = vpop.f32.mrf.mxu1 }
 0x1c0   :  { %3757 = vst.msk [vmem:[%s6657_s3 + $0x80] sm:$0xf] %vm3724_vm3, %v4250_v14  ;;  %v3353_v52 = vmax.f32 %v3272_v9, 0.0  ;;  %v3097_v0 = vmax.f32 %v3096_v4, %v6197_v8  ;;  %v3104_v15 = vmax.f32 %v6805_v22, %v2172_v20  ;;  %v3111_v46 = vmax.f32 %v3110_v23, %v6806_v16  ;;  %v6815_v9 = vld [vmem:[#allocation43_spill] sm:$0xff]  ;;  %v6816_v4 = vld [vmem:[#allocation44_spill] sm:$0xff] }
 0x1c1   :  { %v4255_v61 = vpack.c.bf16 %v3355_v58, %v3355_v58  ;;  %v3275_v34 = vadd.f32 %v5969_v24, %v3103_v60  ;;  %v4590_v49 = vpop.f32.mrf.mxu0  ;;  %v6265_v32 = vpop.f32.mrf.mxu1  ;;  %v6818_v22 = vld [vmem:[#allocation47_spill] sm:$0xff] }
 0x1c2   :  { %v4253_v33 = vpack.c.bf16 %v3353_v52, %v3353_v52  ;;  %v3273_v54 = vadd.f32 %v5969_v24, %v3097_v0  ;;  %v3105_v39 = vmax.f32 %v3104_v15, %v6807_v18  ;;  %v3113_v19 = vmax.f32 %v6808_v40, %v4590_v49  ;;  %v6817_v52 = vld [vmem:[#allocation46_spill] sm:$0xff] }
 0x1c3   :  { %3762 = vst.msk [vmem:[%s6657_s3 + $0x94] sm:$0xf] %vm3724_vm3, %v4255_v61  ;;  %v3356_v8 = vmax.f32 %v3275_v34, 0.0  ;;  %v3112_v25 = vmax.f32 %v3111_v46, %v2828_v17  ;;  %v2175_v30 = vpop.f32.mrf.mxu0  ;;  %v2831_v55 = vpop.f32.mrf.mxu1 }
 0x1c4   :  { %3760 = vst.msk [vmem:[%s6657_s3 + $0x8c] sm:$0xf] %vm3724_vm3, %v4253_v33  ;;  %v3354_v35 = vmax.f32 %v3273_v54, 0.0  ;;  %v3106_v41 = vmax.f32 %v3105_v39, %v6214_v63  ;;  %v3107_v38 = vmax.f32 %v6809_v5, %v2175_v30  ;;  %v3114_v42 = vmax.f32 %v3113_v19, %v6810_v10  ;;  %v6819_v54 = vld [vmem:[#allocation37_spill] sm:$0xff]  ;;  %v6820_v39 = vld [vmem:[#allocation58_spill] sm:$0xff] }
 0x1c5   :  { %v4256_v43 = vpack.c.bf16 %v3356_v8, %v3356_v8  ;;  %v3278_v48 = vadd.f32 %v5969_v24, %v3112_v25  ;;  %v4593_v13 = vpop.f32.mrf.mxu0  ;;  %v6282_v6 = vpop.f32.mrf.mxu1  ;;  %v6822_v5 = vld [vmem:[#allocation49_spill] sm:$0xff] }
 0x1c6   :  { %v4254_v62 = vpack.c.bf16 %v3354_v35, %v3354_v35  ;;  %v3276_v36 = vadd.f32 %v5969_v24, %v3106_v41  ;;  %v3108_v37 = vmax.f32 %v3107_v38, %v6811_v53  ;;  %v3122_v2 = vmax.f32 %v6812_v21, %v4593_v13  ;;  %v6821_v35 = vld [vmem:[#allocation48_spill] sm:$0xff] }
 0x1c7   :  { %3763 = vst.msk [vmem:[%s6657_s3 + $0x98] sm:$0xf] %vm3724_vm3, %v4256_v43  ;;  %v3359_v63 = vmax.f32 %v3278_v48, 0.0  ;;  %v3115_v57 = vmax.f32 %v3114_v42, %v2831_v55  ;;  %v2188_v3 = vpop.f32.mrf.mxu0  ;;  %v2844_v26 = vpop.f32.mrf.mxu1 }
 0x1c8   :  { %3761 = vst.msk [vmem:[%s6657_s3 + $0x90] sm:$0xf] %vm3724_vm3, %v4254_v62  ;;  %v3357_v56 = vmax.f32 %v3276_v36, 0.0  ;;  %v3109_v59 = vmax.f32 %v3108_v37, %v6231_v29  ;;  %v3116_v51 = vmax.f32 %v6813_v50, %v2188_v3  ;;  %v3123_v27 = vmax.f32 %v3122_v2, %v6814_v7  ;;  %v6823_v36 = vld [vmem:[#allocation51_spill] sm:$0xff]  ;;  %v6824_v37 = vld [vmem:[#allocation52_spill] sm:$0xff] }
 0x1c9   :  { %v4259_v28 = vpack.c.bf16 %v3359_v63, %v3359_v63  ;;  %v3279_v12 = vadd.f32 %v5969_v24, %v3115_v57  ;;  %v4594_v1 = vpop.f32.mrf.mxu0  ;;  %v6299_v44 = vpop.f32.mrf.mxu1  ;;  %v6826_v50 = vld [vmem:[#allocation55_spill] sm:$0xff] }
 0x1ca   :  { %v4257_v11 = vpack.c.bf16 %v3357_v56, %v3357_v56  ;;  %v3277_v14 = vadd.f32 %v5969_v24, %v3109_v59  ;;  %v3117_v31 = vmax.f32 %v3116_v51, %v6815_v9  ;;  %v3125_v47 = vmax.f32 %v6816_v4, %v4594_v1  ;;  %v6825_v56 = vld [vmem:[#allocation54_spill] sm:$0xff] }
 0x1cb   :  { %3766 = vst.msk [vmem:[%s6657_s3 + $0xa4] sm:$0xf] %vm3724_vm3, %v4259_v28  ;;  %v3360_v29 = vmax.f32 %v3279_v12, 0.0  ;;  %v3124_v23 = vmax.f32 %v3123_v27, %v2844_v26  ;;  %v2191_v58 = vpop.f32.mrf.mxu0  ;;  %v2847_v60 = vpop.f32.mrf.mxu1 }
 0x1cc   :  { %3764 = vst.msk [vmem:[%s6657_s3 + $0x9c] sm:$0xf] %vm3724_vm3, %v4257_v11  ;;  %v3358_v20 = vmax.f32 %v3277_v14, 0.0  ;;  %v3118_v17 = vmax.f32 %v3117_v31, %v6248_v45  ;;  %v3119_v0 = vmax.f32 %v6817_v52, %v2191_v58  ;;  %v3126_v15 = vmax.f32 %v3125_v47, %v6818_v22  ;;  %v6827_v14 = vld [vmem:[#allocation45_spill] sm:$0xff]  ;;  %v6828_v31 = vld [vmem:[#allocation66_spill] sm:$0xff] }
 0x1cd   :  { %v4260_v16 = vpack.c.bf16 %v3360_v29, %v3360_v29  ;;  %v3282_v46 = vadd.f32 %v5969_v24, %v3124_v23  ;;  %v4597_v61 = vpop.f32.mrf.mxu0  ;;  %v6316_v34 = vpop.f32.mrf.mxu1  ;;  %v6830_v52 = vld [vmem:[#allocation57_spill] sm:$0xff] }
 0x1ce   :  { %v4258_v49 = vpack.c.bf16 %v3358_v20, %v3358_v20  ;;  %v3280_v33 = vadd.f32 %v5969_v24, %v3118_v17  ;;  %v3120_v18 = vmax.f32 %v3119_v0, %v6819_v54  ;;  %v3134_v40 = vmax.f32 %v6820_v39, %v4597_v61  ;;  %v6829_v20 = vld [vmem:[#allocation56_spill] sm:$0xff] }
 0x1cf   :  { %3767 = vst.msk [vmem:[%s6657_s3 + $0xa8] sm:$0xf] %vm3724_vm3, %v4260_v16  ;;  %v3363_v45 = vmax.f32 %v3282_v46, 0.0  ;;  %v3127_v19 = vmax.f32 %v3126_v15, %v2847_v60  ;;  %v2204_v8 = vpop.f32.mrf.mxu0  ;;  %v2860_v25 = vpop.f32.mrf.mxu1 }
 0x1d0   :  { %3765 = vst.msk [vmem:[%s6657_s3 + $0xa0] sm:$0xf] %vm3724_vm3, %v4258_v49  ;;  %v3361_v30 = vmax.f32 %v3280_v33, 0.0  ;;  %v3121_v55 = vmax.f32 %v3120_v18, %v6265_v32  ;;  %v3128_v41 = vmax.f32 %v6821_v35, %v2204_v8  ;;  %v3135_v38 = vmax.f32 %v3134_v40, %v6822_v5  ;;  %v6831_v33 = vld [vmem:[#allocation59_spill] sm:$0xff]  ;;  %v6832_v18 = vld [vmem:[#allocation60_spill] sm:$0xff] }
 0x1d1   :  { %v4263_v10 = vpack.c.bf16 %v3363_v45, %v3363_v45  ;;  %v3283_v42 = vadd.f32 %v5969_v24, %v3127_v19  ;;  %v4598_v43 = vpop.f32.mrf.mxu0  ;;  %v6333_v48 = vpop.f32.mrf.mxu1  ;;  %v6834_v35 = vld [vmem:[#allocation63_spill] sm:$0xff] }
 0x1d2   :  { %v4261_v13 = vpack.c.bf16 %v3361_v30, %v3361_v30  ;;  %v3281_v62 = vadd.f32 %v5969_v24, %v3121_v55  ;;  %v3129_v53 = vmax.f32 %v3128_v41, %v6823_v36  ;;  %v3137_v21 = vmax.f32 %v6824_v37, %v4598_v43  ;;  %v6833_v30 = vld [vmem:[#allocation62_spill] sm:$0xff] }
 0x1d3   :  { %3770 = vst.msk [vmem:[%s6657_s3 + $0xb4] sm:$0xf] %vm3724_vm3, %v4263_v10  ;;  %v3364_v32 = vmax.f32 %v3283_v42, 0.0  ;;  %v3136_v2 = vmax.f32 %v3135_v38, %v2860_v25  ;;  %v2207_v63 = vpop.f32.mrf.mxu0  ;;  %v2863_v57 = vpop.f32.mrf.mxu1 }
 0x1d4   :  { %3768 = vst.msk [vmem:[%s6657_s3 + $0xac] sm:$0xf] %vm3724_vm3, %v4261_v13  ;;  %v3362_v3 = vmax.f32 %v3281_v62, 0.0  ;;  %v3130_v26 = vmax.f32 %v3129_v53, %v6282_v6  ;;  %v3131_v59 = vmax.f32 %v6825_v56, %v2207_v63  ;;  %v3138_v51 = vmax.f32 %v3137_v21, %v6826_v50  ;;  %v6835_v62 = vld [vmem:[#allocation53_spill] sm:$0xff]  ;;  %v6836_v53 = vld [vmem:[#allocation74_spill] sm:$0xff] }
 0x1d5   :  { %v4264_v7 = vpack.c.bf16 %v3364_v32, %v3364_v32  ;;  %v3286_v27 = vadd.f32 %v5969_v24, %v3136_v2  ;;  %v4601_v28 = vpop.f32.mrf.mxu0  ;;  %v6350_v12 = vpop.f32.mrf.mxu1  ;;  %v6838_v56 = vld [vmem:[#allocation65_spill] sm:$0xff] }
 0x1d6   :  { %v4262_v1 = vpack.c.bf16 %v3362_v3, %v3362_v3  ;;  %v3284_v11 = vadd.f32 %v5969_v24, %v3130_v26  ;;  %v3132_v9 = vmax.f32 %v3131_v59, %v6827_v14  ;;  %v3146_v4 = vmax.f32 %v6828_v31, %v4601_v28  ;;  %v6837_v3 = vld [vmem:[#allocation64_spill] sm:$0xff] }
 0x1d7   :  { %3771 = vst.msk [vmem:[%s6657_s3 + $0xb8] sm:$0xf] %vm3724_vm3, %v4264_v7  ;;  %v3367_v6 = vmax.f32 %v3286_v27, 0.0  ;;  %v3139_v47 = vmax.f32 %v3138_v51, %v2863_v57  ;;  %v2220_v29 = vpop.f32.mrf.mxu0  ;;  %v2876_v23 = vpop.f32.mrf.mxu1 }
 0x1d8   :  { %3769 = vst.msk [vmem:[%s6657_s3 + $0xb0] sm:$0xf] %vm3724_vm3, %v4262_v1  ;;  %v3365_v58 = vmax.f32 %v3284_v11, 0.0  ;;  %v3133_v60 = vmax.f32 %v3132_v9, %v6299_v44  ;;  %v3140_v17 = vmax.f32 %v6829_v20, %v2220_v29  ;;  %v3147_v0 = vmax.f32 %v3146_v4, %v6830_v52  ;;  %v6839_v11 = vld [vmem:[#allocation67_spill] sm:$0xff]  ;;  %v6840_v9 = vld [vmem:[#allocation68_spill] sm:$0xff] }
 0x1d9   :  { %v4267_v22 = vpack.c.bf16 %v3367_v6, %v3367_v6  ;;  %v3287_v15 = vadd.f32 %v5969_v24, %v3139_v47  ;;  %v4602_v16 = vpop.f32.mrf.mxu0  ;;  %v6367_v46 = vpop.f32.mrf.mxu1  ;;  %v6842_v20 = vld [vmem:[#allocation71_spill] sm:$0xff] }
 0x1da   :  { %v4265_v61 = vpack.c.bf16 %v3365_v58, %v3365_v58  ;;  %v3285_v49 = vadd.f32 %v5969_v24, %v3133_v60  ;;  %v3141_v54 = vmax.f32 %v3140_v17, %v6831_v33  ;;  %v3149_v39 = vmax.f32 %v6832_v18, %v4602_v16  ;;  %v6841_v58 = vld [vmem:[#allocation70_spill] sm:$0xff] }
 0x1db   :  { %3774 = vst.msk [vmem:[%s6657_s3 + $0xc4] sm:$0xf] %vm3724_vm3, %v4267_v22  ;;  %v3368_v44 = vmax.f32 %v3287_v15, 0.0  ;;  %v3148_v40 = vmax.f32 %v3147_v0, %v2876_v23  ;;  %v2223_v45 = vpop.f32.mrf.mxu0  ;;  %v2879_v19 = vpop.f32.mrf.mxu1 }
 0x1dc   :  { %3772 = vst.msk [vmem:[%s6657_s3 + $0xbc] sm:$0xf] %vm3724_vm3, %v4265_v61  ;;  %v3366_v8 = vmax.f32 %v3285_v49, 0.0  ;;  %v3142_v25 = vmax.f32 %v3141_v54, %v6316_v34  ;;  %v3143_v55 = vmax.f32 %v6833_v30, %v2223_v45  ;;  %v3150_v41 = vmax.f32 %v3149_v39, %v6834_v35  ;;  %v6843_v49 = vld [vmem:[#allocation61_spill] sm:$0xff]  ;;  %v6844_v54 = vld [vmem:[#allocation82_spill] sm:$0xff] }
 0x1dd   :  { %v4268_v5 = vpack.c.bf16 %v3368_v44, %v3368_v44  ;;  %v3290_v38 = vadd.f32 %v5969_v24, %v3148_v40  ;;  %v4605_v10 = vpop.f32.mrf.mxu0  ;;  %v6384_v42 = vpop.f32.mrf.mxu1  ;;  %v6846_v30 = vld [vmem:[#allocation73_spill] sm:$0xff] }
 0x1de   :  { %v4266_v43 = vpack.c.bf16 %v3366_v8, %v3366_v8  ;;  %v3288_v13 = vadd.f32 %v5969_v24, %v3142_v25  ;;  %v3144_v36 = vmax.f32 %v3143_v55, %v6835_v62  ;;  %v3158_v37 = vmax.f32 %v6836_v53, %v4605_v10  ;;  %v6845_v8 = vld [vmem:[#allocation72_spill] sm:$0xff] }
 0x1df   :  { %3775 = vst.msk [vmem:[%s6657_s3 + $0xc8] sm:$0xf] %vm3724_vm3, %v4268_v5  ;;  %v3371_v34 = vmax.f32 %v3290_v38, 0.0  ;;  %v3151_v21 = vmax.f32 %v3150_v41, %v2879_v19  ;;  %v2236_v32 = vpop.f32.mrf.mxu0  ;;  %v2892_v2 = vpop.f32.mrf.mxu1 }
 0x1e0   :  { %3773 = vst.msk [vmem:[%s6657_s3 + $0xc0] sm:$0xf] %vm3724_vm3, %v4266_v43  ;;  %v3369_v63 = vmax.f32 %v3288_v13, 0.0  ;;  %v3145_v57 = vmax.f32 %v3144_v36, %v6333_v48  ;;  %v3152_v26 = vmax.f32 %v6837_v3, %v2236_v32  ;;  %v3159_v59 = vmax.f32 %v3158_v37, %v6838_v56  ;;  %v6847_v13 = vld [vmem:[#allocation75_spill] sm:$0xff]  ;;  %v6848_v36 = vld [vmem:[#allocation76_spill] sm:$0xff] }
 0x1e1   :  { %v4271_v50 = vpack.c.bf16 %v3371_v34, %v3371_v34  ;;  %v3291_v51 = vadd.f32 %v5969_v24, %v3151_v21  ;;  %v4606_v7 = vpop.f32.mrf.mxu0  ;;  %v6401_v27 = vpop.f32.mrf.mxu1  ;;  %v6454_v56 = vld [vmem:[%s6656_s2] ss:$0 sm:$0xff] }
 0x1e2   :  { %v4269_v28 = vpack.c.bf16 %v3369_v63, %v3369_v63  ;;  %v3289_v1 = vadd.f32 %v5969_v24, %v3145_v57  ;;  %v3153_v14 = vmax.f32 %v3152_v26, %v6839_v11  ;;  %v3161_v31 = vmax.f32 %v6840_v9, %v4606_v7  ;;  %v6850_v57 = vld [vmem:[#allocation79_spill] sm:$0xff]  ;;  %v6852_v11 = vld [vmem:[#allocation90_spill] sm:$0xff] }
 0x1e3   :  { %3778 = vst.msk [vmem:[%s6657_s3 + $0xd4] sm:$0xf] %vm3724_vm3, %v4271_v50  ;;  %v3372_v48 = vmax.f32 %v3291_v51, 0.0  ;;  %v3160_v4 = vmax.f32 %v3159_v59, %v2892_v2  ;;  %v2239_v6 = vpop.f32.mrf.mxu0  ;;  %v2895_v47 = vpop.f32.mrf.mxu1  ;;  %v6849_v2 = vld [vmem:[#allocation78_spill] sm:$0xff] }
 0x1e4   :  { %3776 = vst.msk [vmem:[%s6657_s3 + $0xcc] sm:$0xf] %vm3724_vm3, %v4269_v28  ;;  %v3370_v29 = vmax.f32 %v3289_v1, 0.0  ;;  %v3154_v23 = vmax.f32 %v3153_v14, %v6350_v12  ;;  %v3155_v60 = vmax.f32 %v6841_v58, %v2239_v6  ;;  %v3162_v17 = vmax.f32 %v3161_v31, %v6842_v20  ;;  %v6851_v1 = vld [vmem:[#allocation69_spill] sm:$0xff] }
 0x1e5   :  { %v4272_v52 = vpack.c.bf16 %v3372_v48, %v3372_v48  ;;  %v3294_v0 = vadd.f32 %v5969_v24, %v3160_v4  ;;  %v4609_v22 = vpop.f32.mrf.mxu0  ;;  %v6418_v15 = vpop.f32.mrf.mxu1  ;;  %v6854_v58 = vld [vmem:[#allocation81_spill] sm:$0xff] }
 0x1e6   :  { %v4270_v16 = vpack.c.bf16 %v3370_v29, %v3370_v29  ;;  %v3292_v61 = vadd.f32 %v5969_v24, %v3154_v23  ;;  %v3156_v33 = vmax.f32 %v3155_v60, %v6843_v49  ;;  %v3170_v18 = vmax.f32 %v6844_v54, %v4609_v22  ;;  %v6853_v29 = vld [vmem:[#allocation80_spill] sm:$0xff] }
 0x1e7   :  { %3779 = vst.msk [vmem:[%s6657_s3 + $0xd8] sm:$0xf] %vm3724_vm3, %v4272_v52  ;;  %v3375_v12 = vmax.f32 %v3294_v0, 0.0  ;;  %v3163_v39 = vmax.f32 %v3162_v17, %v2895_v47  ;;  %v2252_v44 = vpop.f32.mrf.mxu0  ;;  %v2908_v40 = vpop.f32.mrf.mxu1 }
 0x1e8   :  { %3777 = vst.msk [vmem:[%s6657_s3 + $0xd0] sm:$0xf] %vm3724_vm3, %v4270_v16  ;;  %v3373_v45 = vmax.f32 %v3292_v61, 0.0  ;;  %v3157_v19 = vmax.f32 %v3156_v33, %v6367_v46  ;;  %v3164_v25 = vmax.f32 %v6845_v8, %v2252_v44  ;;  %v3171_v55 = vmax.f32 %v3170_v18, %v6846_v30  ;;  %v6855_v61 = vld [vmem:[#allocation83_spill] sm:$0xff]  ;;  %v6856_v33 = vld [vmem:[#allocation84_spill] sm:$0xff] }
 0x1e9   :  { %v4275_v35 = vpack.c.bf16 %v3375_v12, %v3375_v12  ;;  %v3295_v41 = vadd.f32 %v5969_v24, %v3163_v39  ;;  %v4610_v5 = vpop.f32.mrf.mxu0  ;;  %v6435_v38 = vpop.f32.mrf.mxu1  ;;  %v6858_v8 = vld [vmem:[#allocation87_spill] sm:$0xff] }
 0x1ea   :  { %v4273_v10 = vpack.c.bf16 %v3373_v45, %v3373_v45  ;;  %v3293_v43 = vadd.f32 %v5969_v24, %v3157_v19  ;;  %v3165_v62 = vmax.f32 %v3164_v25, %v6847_v13  ;;  %v3173_v53 = vmax.f32 %v6848_v36, %v4610_v5  ;;  %v6857_v45 = vld [vmem:[#allocation86_spill] sm:$0xff] }
 0x1eb   :  { %3782 = vst.msk [vmem:[%s6657_s3 + $0xe4] sm:$0xf] %vm3724_vm3, %v4275_v35  ;;  %v3376_v46 = vmax.f32 %v3295_v41, 0.0  ;;  %v3172_v37 = vmax.f32 %v3171_v55, %v2908_v40  ;;  %v2255_v34 = vpop.f32.mrf.mxu0  ;;  %v2911_v21 = vpop.f32.mrf.mxu1 }
 0x1ec   :  { %3780 = vst.msk [vmem:[%s6657_s3 + $0xdc] sm:$0xf] %vm3724_vm3, %v4273_v10  ;;  %v3374_v32 = vmax.f32 %v3293_v43, 0.0  ;;  %v3166_v24 = vmax.f32 %v3165_v62, %v6384_v42  ;;  %v3167_v63 = vmax.f32 %v6849_v2, %v2255_v34  ;;  %v3174_v3 = vmax.f32 %v3173_v53, %v6850_v57  ;;  %v6859_v43 = vld [vmem:[#allocation77_spill] sm:$0xff]  ;;  %v6860_v62 = vld [vmem:[#allocation98_spill] sm:$0xff] }
 0x1ed   :  { %v4276_v26 = vpack.c.bf16 %v3376_v46, %v3376_v46  ;;  %v3298_v59 = vadd.f32 %v6454_v56, %v3172_v37  ;;  %v4613_v50 = vpop.f32.mrf.mxu0  ;;  %v6457_v51 = vpop.f32.mrf.mxu1  ;;  %v6862_v2 = vld [vmem:[#allocation89_spill] sm:$0xff] }
 0x1ee   :  { %v4274_v7 = vpack.c.bf16 %v3374_v32, %v3374_v32  ;;  %v3296_v28 = vadd.f32 %v6454_v56, %v3166_v24  ;;  %v3168_v42 = vmax.f32 %v3167_v63, %v6851_v1  ;;  %v3182_v14 = vmax.f32 %v6852_v11, %v4613_v50  ;;  %v6861_v32 = vld [vmem:[#allocation88_spill] sm:$0xff] }
 0x1ef   :  { %3783 = vst.msk [vmem:[%s6657_s3 + $0xe8] sm:$0xf] %vm3724_vm3, %v4276_v26  ;;  %v3379_v9 = vmax.f32 %v3298_v59, 0.0  ;;  %v3175_v31 = vmax.f32 %v3174_v3, %v2911_v21  ;;  %v2268_v48 = vpop.f32.mrf.mxu0  ;;  %v2924_v4 = vpop.f32.mrf.mxu1 }
 0x1f0   :  { %3781 = vst.msk [vmem:[%s6657_s3 + $0xe0] sm:$0xf] %vm3724_vm3, %v4274_v7  ;;  %v3377_v6 = vmax.f32 %v3296_v28, 0.0  ;;  %v3169_v47 = vmax.f32 %v3168_v42, %v6401_v27  ;;  %v3176_v23 = vmax.f32 %v6853_v29, %v2268_v48  ;;  %v3183_v60 = vmax.f32 %v3182_v14, %v6854_v58  ;;  %v6863_v28 = vld [vmem:[#allocation91_spill] sm:$0xff]  ;;  %v6864_v42 = vld [vmem:[#allocation92_spill] sm:$0xff] }
 0x1f1   :  { %v4279_v20 = vpack.c.bf16 %v3379_v9, %v3379_v9  ;;  %v3299_v17 = vadd.f32 %v6454_v56, %v3175_v31  ;;  %v4614_v52 = vpop.f32.mrf.mxu0  ;;  %v6474_v0 = vpop.f32.mrf.mxu1  ;;  %v6866_v29 = vld [vmem:[#allocation95_spill] sm:$0xff] }
 0x1f2   :  { %v4277_v22 = vpack.c.bf16 %v3377_v6, %v3377_v6  ;;  %v3297_v16 = vadd.f32 %v6454_v56, %v3169_v47  ;;  %v3177_v49 = vmax.f32 %v3176_v23, %v6855_v61  ;;  %v3185_v54 = vmax.f32 %v6856_v33, %v4614_v52  ;;  %v6865_v6 = vld [vmem:[#allocation94_spill] sm:$0xff] }
 0x1f3   :  { %3786 = vst.msk [vmem:[%s6657_s3 + $0xf4] sm:$0xf] %vm3724_vm3, %v4279_v20  ;;  %v3380_v27 = vmax.f32 %v3299_v17, 0.0  ;;  %v3184_v18 = vmax.f32 %v3183_v60, %v2924_v4  ;;  %v2271_v12 = vpop.f32.mrf.mxu0  ;;  %v2927_v39 = vpop.f32.mrf.mxu1 }
 0x1f4   :  { %3784 = vst.msk [vmem:[%s6657_s3 + $0xec] sm:$0xf] %vm3724_vm3, %v4277_v22  ;;  %v3378_v44 = vmax.f32 %v3297_v16, 0.0  ;;  %v3178_v40 = vmax.f32 %v3177_v49, %v6418_v15  ;;  %v3179_v19 = vmax.f32 %v6857_v45, %v2271_v12  ;;  %v3186_v25 = vmax.f32 %v3185_v54, %v6858_v8  ;;  %v6867_v16 = vld [vmem:[#allocation85_spill] sm:$0xff]  ;;  %v6868_v49 = vld [vmem:[#allocation106_spill] sm:$0xff] }
 0x1f5   :  { %v4280_v30 = vpack.c.bf16 %v3380_v27, %v3380_v27  ;;  %v3302_v55 = vadd.f32 %v6454_v56, %v3184_v18  ;;  %v4617_v35 = vpop.f32.mrf.mxu0  ;;  %v6491_v41 = vpop.f32.mrf.mxu1  ;;  %v6870_v45 = vld [vmem:[#allocation97_spill] sm:$0xff] }
 0x1f6   :  { %v4278_v5 = vpack.c.bf16 %v3378_v44, %v3378_v44  ;;  %v3300_v10 = vadd.f32 %v6454_v56, %v3178_v40  ;;  %v3180_v13 = vmax.f32 %v3179_v19, %v6859_v43  ;;  %v3194_v36 = vmax.f32 %v6860_v62, %v4617_v35  ;;  %v6869_v44 = vld [vmem:[#allocation96_spill] sm:$0xff] }
 0x1f7   :  { %3787 = vst.msk [vmem:[%s6657_s3 + $0xf8] sm:$0xf] %vm3724_vm3, %v4280_v30  ;;  %v3383_v15 = vmax.f32 %v3302_v55, 0.0  ;;  %v3187_v53 = vmax.f32 %v3186_v25, %v2927_v39  ;;  %v2284_v46 = vpop.f32.mrf.mxu0  ;;  %v2940_v37 = vpop.f32.mrf.mxu1 }
 0x1f8   :  { %3785 = vst.msk [vmem:[%s6657_s3 + $0xf0] sm:$0xf] %vm3724_vm3, %v4278_v5  ;;  %v3381_v34 = vmax.f32 %v3300_v10, 0.0  ;;  %v3181_v21 = vmax.f32 %v3180_v13, %v6435_v38  ;;  %v3188_v24 = vmax.f32 %v6861_v32, %v2284_v46  ;;  %v3195_v63 = vmax.f32 %v3194_v36, %v6862_v2  ;;  %v6871_v10 = vld [vmem:[#allocation99_spill] sm:$0xff]  ;;  %v6872_v13 = vld [vmem:[#allocation100_spill] sm:$0xff] }
 0x1f9   :  { %v4283_v57 = vpack.c.bf16 %v3383_v15, %v3383_v15  ;;  %v3303_v3 = vadd.f32 %v6454_v56, %v3187_v53  ;;  %v4618_v26 = vpop.f32.mrf.mxu0  ;;  %v6508_v59 = vpop.f32.mrf.mxu1  ;;  %v6874_v32 = vld [vmem:[#allocation103_spill] sm:$0xff] }
 0x1fa   :  { %v4281_v50 = vpack.c.bf16 %v3381_v34, %v3381_v34  ;;  %v3301_v7 = vadd.f32 %v6454_v56, %v3181_v21  ;;  %v3189_v1 = vmax.f32 %v3188_v24, %v6863_v28  ;;  %v3197_v11 = vmax.f32 %v6864_v42, %v4618_v26  ;;  %v6873_v34 = vld [vmem:[#allocation102_spill] sm:$0xff] }
 0x1fb   :  { %3790 = vst.msk [vmem:[%s6657_s3 + $0x104] sm:$0xf] %vm3724_vm3, %v4283_v57  ;;  %v3384_v38 = vmax.f32 %v3303_v3, 0.0  ;;  %v3196_v14 = vmax.f32 %v3195_v63, %v2940_v37  ;;  %v2287_v9 = vpop.f32.mrf.mxu0  ;;  %v2943_v31 = vpop.f32.mrf.mxu1 }
 0x1fc   :  { %3788 = vst.msk [vmem:[%s6657_s3 + $0xfc] sm:$0xf] %vm3724_vm3, %v4281_v50  ;;  %v3382_v48 = vmax.f32 %v3301_v7, 0.0  ;;  %v3190_v4 = vmax.f32 %v3189_v1, %v6457_v51  ;;  %v3191_v47 = vmax.f32 %v6865_v6, %v2287_v9  ;;  %v3198_v23 = vmax.f32 %v3197_v11, %v6866_v29  ;;  %v6875_v7 = vld [vmem:[#allocation93_spill] sm:$0xff]  ;;  %v6876_v1 = vld [vmem:[#allocation114_spill] sm:$0xff] }
 0x1fd   :  { %v4284_v58 = vpack.c.bf16 %v3384_v38, %v3384_v38  ;;  %v3306_v60 = vadd.f32 %v6454_v56, %v3196_v14  ;;  %v4621_v20 = vpop.f32.mrf.mxu0  ;;  %v6525_v17 = vpop.f32.mrf.mxu1  ;;  %v6878_v6 = vld [vmem:[#allocation105_spill] sm:$0xff] }
 0x1fe   :  { %v4282_v52 = vpack.c.bf16 %v3382_v48, %v3382_v48  ;;  %v3304_v22 = vadd.f32 %v6454_v56, %v3190_v4  ;;  %v3192_v61 = vmax.f32 %v3191_v47, %v6867_v16  ;;  %v3206_v33 = vmax.f32 %v6868_v49, %v4621_v20  ;;  %v6877_v48 = vld [vmem:[#allocation104_spill] sm:$0xff] }
 0x1ff   :  { %3791 = vst.msk [vmem:[%s6657_s3 + $0x108] sm:$0xf] %vm3724_vm3, %v4284_v58  ;;  %v3387_v51 = vmax.f32 %v3306_v60, 0.0  ;;  %v3199_v54 = vmax.f32 %v3198_v23, %v2943_v31  ;;  %v2300_v27 = vpop.f32.mrf.mxu0  ;;  %v2956_v18 = vpop.f32.mrf.mxu1 }
 0x200   :  { %3789 = vst.msk [vmem:[%s6657_s3 + $0x100] sm:$0xf] %vm3724_vm3, %v4282_v52  ;;  %v3385_v12 = vmax.f32 %v3304_v22, 0.0  ;;  %v3193_v39 = vmax.f32 %v3192_v61, %v6474_v0  ;;  %v3200_v40 = vmax.f32 %v6869_v44, %v2300_v27  ;;  %v3207_v19 = vmax.f32 %v3206_v33, %v6870_v45  ;;  %v6879_v22 = vld [vmem:[#allocation107_spill] sm:$0xff]  ;;  %v6880_v61 = vld [vmem:[#allocation108_spill] sm:$0xff]  ;;  %v6883_v44 = vld [vmem:[#allocation110_spill] sm:$0xff] }
 0x201   :  { %v4287_v8 = vpack.c.bf16 %v3387_v51, %v3387_v51  ;;  %v3307_v25 = vadd.f32 %v6454_v56, %v3199_v54  ;;  %v4622_v30 = vpop.f32.mrf.mxu0  ;;  %v6542_v55 = vpop.f32.mrf.mxu1  ;;  %v6881_v33 = vld [vmem:[#allocation119_spill] sm:$0xff]  ;;  %v6882_v51 = vld [vmem:[#allocation2_spill] sm:$0xff] }
 0x202   :  { %v4285_v35 = vpack.c.bf16 %v3385_v12, %v3385_v12  ;;  %v3305_v5 = vadd.f32 %v6454_v56, %v3193_v39  ;;  %v3201_v43 = vmax.f32 %v3200_v40, %v6871_v10  ;;  %v3209_v62 = vmax.f32 %v6872_v13, %v4622_v30 }
 0x203   :  { %3794 = vst.msk [vmem:[%s6657_s3 + $0x114] sm:$0xf] %vm3724_vm3, %v4287_v8  ;;  %v3388_v0 = vmax.f32 %v3307_v25, 0.0  ;;  %v3208_v36 = vmax.f32 %v3207_v19, %v2956_v18  ;;  %v2303_v15 = vpop.f32.mrf.mxu0  ;;  %v2959_v53 = vpop.f32.mrf.mxu1  ;;  %v6884_v19 = vld [vmem:[#allocation111_spill] sm:$0xff] }
 0x204   :  { %3792 = vst.msk [vmem:[%s6657_s3 + $0x10c] sm:$0xf] %vm3724_vm3, %v4285_v35  ;;  %v3386_v46 = vmax.f32 %v3305_v5, 0.0  ;;  %v3202_v37 = vmax.f32 %v3201_v43, %v6491_v41  ;;  %v3203_v21 = vmax.f32 %v6873_v34, %v2303_v15  ;;  %v3210_v24 = vmax.f32 %v3209_v62, %v6874_v32  ;;  %v6885_v43 = vld [vmem:[#allocation101_spill] sm:$0xff]  ;;  %v6887_v34 = vld [vmem:[#allocation112_spill] sm:$0xff] }
 0x205   :  { %v4288_v2 = vpack.c.bf16 %v3388_v0, %v3388_v0  ;;  %v3310_v63 = vadd.f32 %v6454_v56, %v3208_v36  ;;  %v4625_v57 = vpop.f32.mrf.mxu0  ;;  %v6559_v3 = vpop.f32.mrf.mxu1  ;;  %v6888_v32 = vld [vmem:[#allocation116_spill] sm:$0xff] }
 0x206   :  { %v4286_v26 = vpack.c.bf16 %v3386_v46, %v3386_v46  ;;  %v3308_v50 = vadd.f32 %v6454_v56, %v3202_v37  ;;  %v3204_v28 = vmax.f32 %v3203_v21, %v6875_v7  ;;  %v3218_v42 = vmax.f32 %v6876_v1, %v4625_v57  ;;  %v6886_v46 = vld [vmem:[#allocation113_spill] sm:$0xff]  ;;  %v6890_v1 = vld [vmem:[#allocation115_spill] sm:$0xff] }
 0x207   :  { %3795 = vst.msk [vmem:[%s6657_s3 + $0x118] sm:$0xf] %vm3724_vm3, %v4288_v2  ;;  %v3391_v41 = vmax.f32 %v3310_v63, 0.0  ;;  %v3211_v11 = vmax.f32 %v3210_v24, %v2959_v53  ;;  %v2316_v38 = vpop.f32.mrf.mxu0  ;;  %v2972_v14 = vpop.f32.mrf.mxu1  ;;  %v6889_v24 = vld [vmem:[#allocation3_spill] sm:$0xff] }
 0x208   :  { %3793 = vst.msk [vmem:[%s6657_s3 + $0x110] sm:$0xf] %vm3724_vm3, %v4286_v26  ;;  %v3389_v9 = vmax.f32 %v3308_v50, 0.0  ;;  %v3205_v31 = vmax.f32 %v3204_v28, %v6508_v59  ;;  %v3212_v4 = vmax.f32 %v6877_v48, %v2316_v38  ;;  %v3219_v47 = vmax.f32 %v3218_v42, %v6878_v6  ;;  %v6892_v6 = vld [vmem:[#allocation118_spill] sm:$0xff] }
 0x209   :  { %v4291_v29 = vpack.c.bf16 %v3391_v41, %v3391_v41  ;;  %v3311_v23 = vadd.f32 %v6454_v56, %v3211_v11  ;;  %v4626_v58 = vpop.f32.mrf.mxu0  ;;  %v6576_v60 = vpop.f32.mrf.mxu1  ;;  %v2987_v59 = vmax.f32 %v6882_v51, %v6881_v33  ;;  %v2990_v2 = vmax.f32 %v6889_v24, %v6888_v32 }
 0x20a   :  { %v4289_v20 = vpack.c.bf16 %v3389_v9, %v3389_v9  ;;  %v3309_v52 = vadd.f32 %v6454_v56, %v3205_v31  ;;  %v3213_v16 = vmax.f32 %v3212_v4, %v6879_v22  ;;  %v3221_v49 = vmax.f32 %v6880_v61, %v4626_v58  ;;  %v6891_v31 = vld [vmem:[#allocation117_spill] sm:$0xff] }
 0x20b   :  { %3798 = vst.msk [vmem:[%s6657_s3 + $0x124] sm:$0xf] %vm3724_vm3, %v4291_v29  ;;  %v3392_v54 = vmax.f32 %v3311_v23, 0.0  ;;  %v3220_v27 = vmax.f32 %v3219_v47, %v2972_v14  ;;  %v2319_v18 = vpop.f32.mrf.mxu0  ;;  %v2975_v45 = vpop.f32.mrf.mxu1 }
 0x20c   :  { %3796 = vst.msk [vmem:[%s6657_s3 + $0x11c] sm:$0xf] %vm3724_vm3, %v4289_v20  ;;  %v3390_v12 = vmax.f32 %v3309_v52, 0.0  ;;  %v3214_v39 = vmax.f32 %v3213_v16, %v6525_v17  ;;  %v3215_v40 = vmax.f32 %v6883_v44, %v2319_v18  ;;  %v3222_v8 = vmax.f32 %v3221_v49, %v6884_v19  ;;  %v6893_v20 = vld [vmem:[#allocation109_spill] sm:$0xff] }
 0x20d   :  { %v4292_v25 = vpack.c.bf16 %v3392_v54, %v3392_v54  ;;  %v3314_v30 = vadd.f32 %v6454_v56, %v3220_v27  ;;  %v4629_v35 = vpop.f32.mrf.mxu0 }
 0x20e   :  { %v4290_v5 = vpack.c.bf16 %v3390_v12, %v3390_v12  ;;  %v3312_v10 = vadd.f32 %v6454_v56, %v3214_v39  ;;  %v3216_v13 = vmax.f32 %v3215_v40, %v6885_v43  ;;  %v2988_v62 = vmax.f32 %v2987_v59, %v4629_v35 }
 0x20f   :  { %3799 = vst.msk [vmem:[%s6657_s3 + $0x128] sm:$0xf] %vm3724_vm3, %v4292_v25  ;;  %v3395_v17 = vmax.f32 %v3314_v30, 0.0  ;;  %v3223_v0 = vmax.f32 %v3222_v8, %v2975_v45  ;;  %v2332_v36 = vpop.f32.mrf.mxu0 }
 0x210   :  { %3797 = vst.msk [vmem:[%s6657_s3 + $0x120] sm:$0xf] %vm3724_vm3, %v4290_v5  ;;  %v3393_v15 = vmax.f32 %v3312_v10, 0.0  ;;  %v3217_v53 = vmax.f32 %v3216_v13, %v6542_v55  ;;  %v2989_v37 = vmax.f32 %v2988_v62, %v6886_v46  ;;  %v3224_v21 = vmax.f32 %v6887_v34, %v2332_v36 }
 0x211   :  { %v4295_v63 = vpack.c.bf16 %v3395_v17, %v3395_v17  ;;  %v3315_v57 = vadd.f32 %v6454_v56, %v3223_v0  ;;  %v4630_v26 = vpop.f32.mrf.mxu0 }
 0x212   :  { %v4293_v50 = vpack.c.bf16 %v3393_v15, %v3393_v15  ;;  %v3313_v7 = vadd.f32 %v6454_v56, %v3217_v53  ;;  %v3237_v28 = vadd.f32 %v6454_v56, %v2989_v37  ;;  %v3225_v42 = vmax.f32 %v3224_v21, %v6890_v1 }
 0x213   :  { %3802 = vst.msk [vmem:[%s6657_s3 + $0x134] sm:$0xf] %vm3724_vm3, %v4295_v63  ;;  %v3396_v55 = vmax.f32 %v3315_v57, 0.0  ;;  %v2991_v41 = vmax.f32 %v2990_v2, %v4630_v26  ;;  %v2335_v11 = vpop.f32.mrf.mxu0 }
 0x214   :  { %3800 = vst.msk [vmem:[%s6657_s3 + $0x12c] sm:$0xf] %vm3724_vm3, %v4293_v50  ;;  %v3394_v38 = vmax.f32 %v3313_v7, 0.0  ;;  %v3318_v14 = vmax.f32 %v3237_v28, 0.0  ;;  %v3226_v9 = vmax.f32 %v3225_v42, %v6559_v3  ;;  %v3227_v48 = vmax.f32 %v6891_v31, %v2335_v11 }
 0x215   :  { %v4296_v4 = vpack.c.bf16 %v3396_v55, %v3396_v55  ;;  %v2992_v47 = vmax.f32 %v2991_v41, %v6892_v6 }
 0x216   :  { %v4294_v29 = vpack.c.bf16 %v3394_v38, %v3394_v38  ;;  %v4218_v23 = vpack.c.bf16 %v3318_v14, %v3318_v14  ;;  %v3316_v58 = vadd.f32 %v6454_v56, %v3226_v9  ;;  %v3228_v52 = vmax.f32 %v3227_v48, %v6893_v20 }
 0x217   :  { %3803 = vst.msk [vmem:[%s6657_s3 + $0x138] sm:$0xf] %vm3724_vm3, %v4296_v4  ;;  %v3238_v22 = vadd.f32 %v6454_v56, %v2992_v47 }
 0x218   :  { %3801 = vst.msk [vmem:[%s6657_s3 + $0x130] sm:$0xf] %vm3724_vm3, %v4294_v29  ;;  %3725 = vst.msk [vmem:[%s6657_s3] sm:$0xf] %vm3724_vm3, %v4218_v23  ;;  %v3397_v3 = vmax.f32 %v3316_v58, 0.0  ;;  %v3229_v16 = vmax.f32 %v3228_v52, %v6576_v60 }
 0x219   :  { %v3319_v61 = vmax.f32 %v3238_v22, 0.0 }
 0x21a   :  { %v4297_v49 = vpack.c.bf16 %v3397_v3, %v3397_v3  ;;  %v3317_v33 = vadd.f32 %v6454_v56, %v3229_v16 }
 0x21b   :  { %v4219_v51 = vpack.c.bf16 %v3319_v61, %v3319_v61 }
 0x21c   :  { %3804 = vst.msk [vmem:[%s6657_s3 + $0x13c] sm:$0xf] %vm3724_vm3, %v4297_v49  ;;  %v3398_v59 = vmax.f32 %v3317_v33, 0.0 }
 0x21d   :  { %3726 = vst.msk [vmem:[%s6657_s3 + $0x4] sm:$0xf] %vm3724_vm3, %v4219_v51 }
 0x21e   :  { %v4298_v54 = vpack.c.bf16 %v3398_v59, %v3398_v59 }
 0x220   :  { %3805 = vst.msk [vmem:[%s6657_s3 + $0x140] sm:$0xf] %vm3724_vm3, %v4298_v54 }

// kernel: net_forward_pallas.3
= control target key start
LH: loop header
LB: loop body
LE: loop exit
PB: predicated region body
PF: predicated region fallthrough
CT: control target
= control target key end

     0   :  { %v6835_v0 = vmov 0   ;;  %vm1211_vm0 = vcmask 588800   ;;  %vm1506_vm1 = vcmask 1043456   ;;  %vm6837_vm2 = vmmov 0   ;;  %s8676_s1 = inlined_call_operand.vmem [shape: bf16[200,128], index: 1, kind: input, shape index: {}]   ;;  %s8677_s0 = inlined_call_operand.vmem [shape: bf16[1568,200], index: 0, kind: input, shape index: {}]   ;;  %s8678_s3 = inlined_call_operand.vmem [shape: bf16[49,16,128], index: 3, kind: input, shape index: {}]   ;;  %s8679_s2 = inlined_call_operand.vmem [shape: f32[1,128], index: 2, kind: input, shape index: {}]   ;;  %s8680_s5 = inlined_call_operand.vmem [shape: bf16[128,128], index: 5, kind: input, shape index: {}]   ;;  %s8681_s7 = inlined_call_operand.vmem [shape: bf16[128,128], index: 7, kind: input, shape index: {}]   ;;  %s8682_s4 = inlined_call_operand.vmem [shape: f32[1,128], index: 4, kind: input, shape index: {}]   ;;  %s8683_s6 = inlined_call_operand.vmem [shape: f32[1,128], index: 6, kind: input, shape index: {}]   ;;  %s8684_s8 = inlined_call_operand.vmem [shape: f32[1,128], index: 8, kind: input, shape index: {}]   ;;  %s8685_s9 = inlined_call_operand.vmem [shape: f32[8,128], index: 9, kind: output, shape index: {}]  }
   0x1   :  { %1510 = vmatprep.subr.bf16.mxu0 %v6835_v0  ;;  %v6462_v1 = vld [vmem:[%s8676_s1 + $0x38] sm:$0xff]   ;;  %6433 = vmatprep.subr.bf16.mxu1 %v6835_v0  ;;  %v6463_v2 = vld [vmem:[%s8676_s1 + $0x30] sm:$0xff]   ;;  %v6464_v3 = vld [vmem:[%s8676_s1 + $0x28] sm:$0xff]   ;;  %vm2592_vm3 = vcmask 130048  }
   0x2   :  { %1511 = vmatpush1.bf16.msra.mxu0 %v6462_v1  ;;  %6446 = vmatpush1.bf16.msra.mxu1 %v6462_v1  ;;  %v6465_v4 = vld [vmem:[%s8676_s1 + $0x20] sm:$0xff]   ;;  %v6466_v6 = vld [vmem:[%s8676_s1 + $0x18] sm:$0xff]   ;;  %v6467_v7 = vld [vmem:[%s8676_s1 + $0x10] sm:$0xff]  }
   0x3   :  { %1512 = vmatprep.subr.bf16.mxu0 %v6835_v0  ;;  %6434 = vmatprep.subr.bf16.mxu1 %v6835_v0  ;;  %v6477_v5 = vld [vmem:[%s8677_s0 + $0x4] ss:$8 sps:$4 sm:$0xff]   ;;  %v6470_v10 = vld [vmem:[%s8676_s1 + $0x60] ss:$0 sps:$4 sm:$0xff]   ;;  %v6471_v12 = vld [vmem:[%s8676_s1 + $0x58] sm:$0xff]  }
   0x4   :  { %5671 = vmatprep.mubr.msk.bf16.mxu0 %vm1211_vm0, %v6477_v5  ;;  %v6468_v8 = vld [vmem:[%s8676_s1 + $0x8] sm:$0xff]   ;;  %v6469_v9 = vld [vmem:[%s8676_s1] sm:$0xff]   ;;  %v1508_v11 = vsel %vm1506_vm1, %v6470_v10, 0  ;;  %v6472_v13 = vld [vmem:[%s8676_s1 + $0x50] sm:$0xff]  }
   0x5   :  { %v6473_v14 = vld [vmem:[%s8676_s1 + $0x48] sm:$0xff]   ;;  %v6474_v15 = vld [vmem:[%s8676_s1 + $0x40] sm:$0xff]   ;;  %v6478_v17 = vld [vmem:[%s8677_s0 + $0x14] ss:$8 sps:$4 sm:$0xff]  }
   0x6   :  { %1513 = vmatpush1.bf16.msra.mxu0 %v6463_v2  ;;  %6447 = vmatpush1.bf16.msra.mxu1 %v6463_v2  ;;  %v6475_v16 = vld [vmem:[%s8677_s0] ss:$8 sps:$4 sm:$0xff]   ;;  %v6480_v18 = vld [vmem:[%s8677_s0 + $0x10] ss:$8 sps:$4 sm:$0xff]   ;;  %v6481_v19 = vld [vmem:[%s8677_s0 + $0x24] ss:$8 sps:$4 sm:$0xff]  }
   0x7   :  { %1514 = vmatprep.subr.bf16.mxu0 %v6835_v0  ;;  %6435 = vmatprep.subr.bf16.mxu1 %v6835_v0  ;;  %v6483_v20 = vld [vmem:[%s8677_s0 + $0x20] ss:$8 sps:$4 sm:$0xff]   ;;  %v6484_v21 = vld [vmem:[%s8677_s0 + $0x34] ss:$8 sps:$4 sm:$0xff]   ;;  %v6486_v22 = vld [vmem:[%s8677_s0 + $0x30] ss:$8 sps:$4 sm:$0xff]  }
   0x8   :  { %v6487_v23 = vld [vmem:[%s8677_s0 + $0x44] ss:$8 sps:$4 sm:$0xff]   ;;  %v6489_v24 = vld [vmem:[%s8677_s0 + $0x40] ss:$8 sps:$4 sm:$0xff]   ;;  %v6490_v25 = vld [vmem:[%s8677_s0 + $0x54] ss:$8 sps:$4 sm:$0xff]  }
   0x9   :  { %v6492_v26 = vld [vmem:[%s8677_s0 + $0x50] ss:$8 sps:$4 sm:$0xff]   ;;  %v6493_v27 = vld [vmem:[%s8677_s0 + $0x64] ss:$8 sps:$4 sm:$0xff]   ;;  %v6495_v28 = vld [vmem:[%s8677_s0 + $0x60] ss:$8 sps:$4 sm:$0xff]  }
   0xa   :  { %1515 = vmatpush1.bf16.msra.mxu0 %v6464_v3  ;;  %6448 = vmatpush1.bf16.msra.mxu1 %v6464_v3  ;;  %v6496_v29 = vld [vmem:[%s8677_s0 + $0x74] ss:$8 sps:$4 sm:$0xff]   ;;  %v6498_v30 = vld [vmem:[%s8677_s0 + $0x70] ss:$8 sps:$4 sm:$0xff]   ;;  %v6499_v31 = vld [vmem:[%s8677_s0 + $0x84] ss:$8 sps:$4 sm:$0xff]  }
   0xb   :  { %1516 = vmatprep.subr.bf16.mxu0 %v6835_v0  ;;  %6436 = vmatprep.subr.bf16.mxu1 %v6835_v0  ;;  %v6501_v32 = vld [vmem:[%s8677_s0 + $0x80] ss:$8 sps:$4 sm:$0xff]   ;;  %v6502_v33 = vld [vmem:[%s8677_s0 + $0x94] ss:$8 sps:$4 sm:$0xff]   ;;  %v6504_v34 = vld [vmem:[%s8677_s0 + $0x90] ss:$8 sps:$4 sm:$0xff]  }
   0xc   :  { %v6505_v35 = vld [vmem:[%s8677_s0 + $0xa4] ss:$8 sps:$4 sm:$0xff]   ;;  %v6507_v36 = vld [vmem:[%s8677_s0 + $0xa0] ss:$8 sps:$4 sm:$0xff]   ;;  %v6508_v37 = vld [vmem:[%s8677_s0 + $0xb4] ss:$8 sps:$4 sm:$0xff]  }
   0xd   :  { %v6510_v38 = vld [vmem:[%s8677_s0 + $0xb0] ss:$8 sps:$4 sm:$0xff]   ;;  %v6511_v39 = vld [vmem:[%s8677_s0 + $0xc4] ss:$8 sps:$4 sm:$0xff]   ;;  %v6513_v40 = vld [vmem:[%s8677_s0 + $0xc0] ss:$8 sps:$4 sm:$0xff]  }
   0xe   :  { %1517 = vmatpush1.bf16.msra.mxu0 %v6465_v4  ;;  %6449 = vmatpush1.bf16.msra.mxu1 %v6465_v4  ;;  %v6514_v41 = vld [vmem:[%s8677_s0 + $0xd4] ss:$8 sps:$4 sm:$0xff]   ;;  %v6516_v42 = vld [vmem:[%s8677_s0 + $0xd0] ss:$8 sps:$4 sm:$0xff]   ;;  %v6517_v43 = vld [vmem:[%s8677_s0 + $0xe4] ss:$8 sps:$4 sm:$0xff]  }
   0xf   :  { %1518 = vmatprep.subr.bf16.mxu0 %v6835_v0  ;;  %6437 = vmatprep.subr.bf16.mxu1 %v6835_v0  ;;  %v6519_v44 = vld [vmem:[%s8677_s0 + $0xe0] ss:$8 sps:$4 sm:$0xff]   ;;  %v6520_v45 = vld [vmem:[%s8677_s0 + $0xf4] ss:$8 sps:$4 sm:$0xff]   ;;  %v6522_v46 = vld [vmem:[%s8677_s0 + $0xf0] ss:$8 sps:$4 sm:$0xff]  }
  0x10   :  { %v6523_v47 = vld [vmem:[%s8677_s0 + $0x104] ss:$8 sps:$4 sm:$0xff]   ;;  %v6525_v48 = vld [vmem:[%s8677_s0 + $0x100] ss:$8 sps:$4 sm:$0xff]   ;;  %v6526_v49 = vld [vmem:[%s8677_s0 + $0x114] ss:$8 sps:$4 sm:$0xff]  }
  0x11   :  { %v6528_v50 = vld [vmem:[%s8677_s0 + $0x110] ss:$8 sps:$4 sm:$0xff]   ;;  %v6529_v51 = vld [vmem:[%s8677_s0 + $0x124] ss:$8 sps:$4 sm:$0xff]   ;;  %v6531_v52 = vld [vmem:[%s8677_s0 + $0x120] ss:$8 sps:$4 sm:$0xff]  }
  0x12   :  { %1519 = vmatpush1.bf16.msra.mxu0 %v6466_v6  ;;  %6450 = vmatpush1.bf16.msra.mxu1 %v6466_v6  ;;  %v6532_v53 = vld [vmem:[%s8677_s0 + $0x134] ss:$8 sps:$4 sm:$0xff]   ;;  %v6534_v54 = vld [vmem:[%s8677_s0 + $0x130] ss:$8 sps:$4 sm:$0xff]   ;;  %v6535_v55 = vld [vmem:[%s8677_s0 + $0x144] ss:$8 sps:$4 sm:$0xff]  }
  0x13   :  { %1520 = vmatprep.subr.bf16.mxu0 %v6835_v0  ;;  %6438 = vmatprep.subr.bf16.mxu1 %v6835_v0  ;;  %v6537_v56 = vld [vmem:[%s8677_s0 + $0x140] ss:$8 sps:$4 sm:$0xff]   ;;  %v6538_v57 = vld [vmem:[%s8677_s0 + $0x154] ss:$8 sps:$4 sm:$0xff]   ;;  %v6540_v58 = vld [vmem:[%s8677_s0 + $0x150] ss:$8 sps:$4 sm:$0xff]  }
  0x14   :  { %v6541_v59 = vld [vmem:[%s8677_s0 + $0x164] ss:$8 sps:$4 sm:$0xff]   ;;  %v6543_v60 = vld [vmem:[%s8677_s0 + $0x160] ss:$8 sps:$4 sm:$0xff]   ;;  %v6544_v61 = vld [vmem:[%s8677_s0 + $0x174] ss:$8 sps:$4 sm:$0xff]  }
  0x15   :  { %v6546_v62 = vld [vmem:[%s8677_s0 + $0x170] ss:$8 sps:$4 sm:$0xff]   ;;  %v6547_v63 = vld [vmem:[%s8677_s0 + $0x184] ss:$8 sps:$4 sm:$0xff]   ;;  %v6550_v1 = vld [vmem:[%s8677_s0 + $0x194] ss:$8 sps:$4 sm:$0xff]  }
  0x16   :  { %1521 = vmatpush1.bf16.msra.mxu0 %v6467_v7  ;;  %6451 = vmatpush1.bf16.msra.mxu1 %v6467_v7  ;;  %v6552_v5 = vld [vmem:[%s8677_s0 + $0x190] ss:$8 sps:$4 sm:$0xff]   ;;  %v6553_v6 = vld [vmem:[%s8677_s0 + $0x1a4] ss:$8 sps:$4 sm:$0xff]  }
  0x17   :  { %1522 = vmatprep.subr.bf16.mxu0 %v6835_v0  ;;  %6439 = vmatprep.subr.bf16.mxu1 %v6835_v0 }
  0x1a   :  { %1523 = vmatpush1.bf16.msra.mxu0 %v6468_v8  ;;  %6452 = vmatpush1.bf16.msra.mxu1 %v6468_v8 }
  0x1b   :  { %1524 = vmatprep.subr.bf16.mxu0 %v6835_v0  ;;  %6440 = vmatprep.subr.bf16.mxu1 %v6835_v0 }
  0x1e   :  { %1525 = vmatpush1.bf16.msra.mxu0 %v6469_v9  ;;  %6453 = vmatpush1.bf16.msra.mxu1 %v6469_v9 }
  0x1f   :  { %1532 = vmatprep.subr.bf16.mxu0 %v6835_v0  ;;  %6441 = vmatprep.subr.bf16.mxu1 %v6835_v0 }
  0x22   :  { %1533 = vmatpush2.bf16.msra.mxu0 %v1508_v11  ;;  %6454 = vmatpush2.bf16.msra.mxu1 %v1508_v11  ;;  %v6555_v11 = vld [vmem:[%s8677_s0 + $0x1a0] ss:$8 sps:$4 sm:$0xff]  }
  0x23   :  { %1534 = vmatprep.subr.bf16.mxu0 %v6835_v0  ;;  %6442 = vmatprep.subr.bf16.mxu1 %v6835_v0 }
  0x26   :  { %1535 = vmatpush2.bf16.msra.mxu0 %v6471_v12  ;;  %6455 = vmatpush2.bf16.msra.mxu1 %v6471_v12  ;;  %v6556_v12 = vld [vmem:[%s8677_s0 + $0x1b4] ss:$8 sps:$4 sm:$0xff]  }
  0x27   :  { %1536 = vmatprep.subr.bf16.mxu0 %v6835_v0  ;;  %6443 = vmatprep.subr.bf16.mxu1 %v6835_v0 }
  0x2a   :  { %1537 = vmatpush2.bf16.msra.mxu0 %v6472_v13  ;;  %6456 = vmatpush2.bf16.msra.mxu1 %v6472_v13 }
  0x2b   :  { %1538 = vmatprep.subr.bf16.mxu0 %v6835_v0  ;;  %6444 = vmatprep.subr.bf16.mxu1 %v6835_v0 }
  0x2e   :  { %1539 = vmatpush2.bf16.msra.mxu0 %v6473_v14  ;;  %6457 = vmatpush2.bf16.msra.mxu1 %v6473_v14 }
  0x2f   :  { %1540 = vmatprep.subr.bf16.mxu0 %v6835_v0  ;;  %6445 = vmatprep.subr.bf16.mxu1 %v6835_v0  ;;  %v6549_v0 = vld [vmem:[%s8677_s0 + $0x180] ss:$8 sps:$4 sm:$0xff]  }
  0x32   :  { %1541 = vmatpush2.bf16.msra.mxu0 %v6474_v15  ;;  %6458 = vmatpush2.bf16.msra.mxu1 %v6474_v15 }
  0x35   :  { %1543 = vmatmul.mubr.bf16.vlgmr.msra.gmra.mxu0 %v6475_v16 }
  0x36   :  { %5672 = vmatprep.mubr.msk.bf16.mxu0 %vm1211_vm0, %v6478_v17  ;;  %v6558_v17 = vld [vmem:[%s8677_s0 + $0x1b0] ss:$8 sps:$4 sm:$0xff]  }
  0x3d   :  { %1551 = vmatmul.mubr.bf16.gmra.mxu0 %v6480_v18  ;;  %v6559_v18 = vld [vmem:[%s8677_s0 + $0x1c4] ss:$8 sps:$4 sm:$0xff]  }
  0x3e   :  { %5673 = vmatprep.mubr.msk.bf16.mxu0 %vm1211_vm0, %v6481_v19 }
  0x45   :  { %1559 = vmatmul.mubr.bf16.gmra.mxu0 %v6483_v20 }
  0x46   :  { %5674 = vmatprep.mubr.msk.bf16.mxu0 %vm1211_vm0, %v6484_v21 }
  0x4d   :  { %1567 = vmatmul.mubr.bf16.gmra.mxu0 %v6486_v22 }
  0x4e   :  { %5675 = vmatprep.mubr.msk.bf16.mxu0 %vm1211_vm0, %v6487_v23  ;;  %v6561_v23 = vld [vmem:[%s8677_s0 + $0x1c0] ss:$8 sps:$4 sm:$0xff]  }
  0x55   :  { %1575 = vmatmul.mubr.bf16.gmra.mxu0 %v6489_v24  ;;  %v6562_v24 = vld [vmem:[%s8677_s0 + $0x1d4] ss:$8 sps:$4 sm:$0xff]  }
  0x56   :  { %5676 = vmatprep.mubr.msk.bf16.mxu0 %vm1211_vm0, %v6490_v25 }
  0x5d   :  { %1583 = vmatmul.mubr.bf16.gmra.mxu0 %v6492_v26 }
  0x5e   :  { %5677 = vmatprep.mubr.msk.bf16.mxu0 %vm1211_vm0, %v6493_v27 }
  0x65   :  { %1591 = vmatmul.mubr.bf16.gmra.mxu0 %v6495_v28 }
  0x66   :  { %5678 = vmatprep.mubr.msk.bf16.mxu0 %vm1211_vm0, %v6496_v29  ;;  %v6564_v29 = vld [vmem:[%s8677_s0 + $0x1d0] ss:$8 sps:$4 sm:$0xff]  }
  0x6d   :  { %1599 = vmatmul.mubr.bf16.gmra.mxu0 %v6498_v30  ;;  %v6565_v30 = vld [vmem:[%s8677_s0 + $0x1e4] ss:$8 sps:$4 sm:$0xff]  }
  0x6e   :  { %5679 = vmatprep.mubr.msk.bf16.mxu0 %vm1211_vm0, %v6499_v31 }
  0x75   :  { %1607 = vmatmul.mubr.bf16.gmra.mxu0 %v6501_v32 }
  0x76   :  { %5680 = vmatprep.mubr.msk.bf16.mxu0 %vm1211_vm0, %v6502_v33 }
  0x7d   :  { %1615 = vmatmul.mubr.bf16.gmra.mxu0 %v6504_v34 }
  0x7e   :  { %5681 = vmatprep.mubr.msk.bf16.mxu0 %vm1211_vm0, %v6505_v35  ;;  %v6567_v35 = vld [vmem:[%s8677_s0 + $0x1e0] ss:$8 sps:$4 sm:$0xff]  }
  0x85   :  { %1623 = vmatmul.mubr.bf16.gmra.mxu0 %v6507_v36  ;;  %v6568_v36 = vld [vmem:[%s8677_s0 + $0x1f4] ss:$8 sps:$4 sm:$0xff]  }
  0x86   :  { %5682 = vmatprep.mubr.msk.bf16.mxu0 %vm1211_vm0, %v6508_v37 }
  0x8d   :  { %1631 = vmatmul.mubr.bf16.gmra.mxu0 %v6510_v38 }
  0x8e   :  { %5683 = vmatprep.mubr.msk.bf16.mxu0 %vm1211_vm0, %v6511_v39 }
  0x95   :  { %1639 = vmatmul.mubr.bf16.gmra.mxu0 %v6513_v40 }
  0x96   :  { %5684 = vmatprep.mubr.msk.bf16.mxu0 %vm1211_vm0, %v6514_v41  ;;  %v6570_v41 = vld [vmem:[%s8677_s0 + $0x1f0] ss:$8 sps:$4 sm:$0xff]  }
  0x9d   :  { %1647 = vmatmul.mubr.bf16.gmra.mxu0 %v6516_v42  ;;  %v6571_v42 = vld [vmem:[%s8677_s0 + $0x204] ss:$8 sps:$4 sm:$0xff]  }
  0x9e   :  { %5685 = vmatprep.mubr.msk.bf16.mxu0 %vm1211_vm0, %v6517_v43 }
  0xa5   :  { %1655 = vmatmul.mubr.bf16.gmra.mxu0 %v6519_v44 }
  0xa6   :  { %5686 = vmatprep.mubr.msk.bf16.mxu0 %vm1211_vm0, %v6520_v45 }
  0xad   :  { %1663 = vmatmul.mubr.bf16.gmra.mxu0 %v6522_v46 }
  0xae   :  { %5687 = vmatprep.mubr.msk.bf16.mxu0 %vm1211_vm0, %v6523_v47  ;;  %v6573_v47 = vld [vmem:[%s8677_s0 + $0x200] ss:$8 sps:$4 sm:$0xff]  }
  0xb5   :  { %1671 = vmatmul.mubr.bf16.gmra.mxu0 %v6525_v48  ;;  %v6574_v48 = vld [vmem:[%s8677_s0 + $0x214] ss:$8 sps:$4 sm:$0xff]  }
  0xb6   :  { %5688 = vmatprep.mubr.msk.bf16.mxu0 %vm1211_vm0, %v6526_v49 }
  0xbd   :  { %1679 = vmatmul.mubr.bf16.gmra.mxu0 %v6528_v50 }
  0xbe   :  { %5689 = vmatprep.mubr.msk.bf16.mxu0 %vm1211_vm0, %v6529_v51 }
  0xc5   :  { %1687 = vmatmul.mubr.bf16.gmra.mxu0 %v6531_v52 }
  0xc6   :  { %5690 = vmatprep.mubr.msk.bf16.mxu0 %vm1211_vm0, %v6532_v53  ;;  %v6576_v53 = vld [vmem:[%s8677_s0 + $0x210] ss:$8 sps:$4 sm:$0xff]  }
  0xcd   :  { %1695 = vmatmul.mubr.bf16.gmra.mxu0 %v6534_v54  ;;  %v6577_v54 = vld [vmem:[%s8677_s0 + $0x224] ss:$8 sps:$4 sm:$0xff]  }
  0xce   :  { %5691 = vmatprep.mubr.msk.bf16.mxu0 %vm1211_vm0, %v6535_v55 }
  0xd5   :  { %1703 = vmatmul.mubr.bf16.gmra.mxu0 %v6537_v56 }
  0xd6   :  { %5692 = vmatprep.mubr.msk.bf16.mxu0 %vm1211_vm0, %v6538_v57 }
  0xdd   :  { %1711 = vmatmul.mubr.bf16.gmra.mxu0 %v6540_v58 }
  0xde   :  { %5693 = vmatprep.mubr.msk.bf16.mxu0 %vm1211_vm0, %v6541_v59  ;;  %v6579_v59 = vld [vmem:[%s8677_s0 + $0x220] ss:$8 sps:$4 sm:$0xff]  }
  0xe5   :  { %1719 = vmatmul.mubr.bf16.gmra.mxu0 %v6543_v60  ;;  %v6580_v60 = vld [vmem:[%s8677_s0 + $0x234] ss:$8 sps:$4 sm:$0xff]  }
  0xe6   :  { %5694 = vmatprep.mubr.msk.bf16.mxu0 %vm1211_vm0, %v6544_v61 }
  0xed   :  { %1727 = vmatmul.mubr.bf16.gmra.mxu0 %v6546_v62 }
  0xee   :  { %5695 = vmatprep.mubr.msk.bf16.mxu0 %vm1211_vm0, %v6547_v63 }
  0xf5   :  { %v7131_v2 = vpop.f32.mrf.mxu0  ;;  %1735 = vmatmul.mubr.bf16.gmra.mxu0 %v6549_v0 }
  0xf6   :  { %5696 = vmatprep.mubr.msk.bf16.mxu0 %vm1211_vm0, %v6550_v1  ;;  %v6582_v1 = vld [vmem:[%s8677_s0 + $0x230] ss:$8 sps:$4 sm:$0xff]  }
  0xf7   :  { %v1546_v3 = vpop.f32.mrf.mxu0 }
  0xf8   :  { %v6583_v3 = vld [vmem:[%s8677_s0 + $0x244] ss:$8 sps:$4 sm:$0xff]  }
  0xf9   :  { %v7134_v4 = vpop.f32.mrf.mxu0 }
  0xfb   :  { %v1549_v7 = vpop.f32.mrf.mxu0 }
  0xfd   :  { %v7142_v8 = vpop.f32.mrf.mxu0  ;;  %1743 = vmatmul.mubr.bf16.gmra.mxu0 %v6552_v5 }
  0xfe   :  { %5697 = vmatprep.mubr.msk.bf16.mxu0 %vm1211_vm0, %v6553_v6 }
  0xff   :  { %v1554_v9 = vpop.f32.mrf.mxu0 }
 0x101   :  { %v7145_v10 = vpop.f32.mrf.mxu0 }
 0x103   :  { %v1557_v13 = vpop.f32.mrf.mxu0 }
 0x105   :  { %v7153_v14 = vpop.f32.mrf.mxu0  ;;  %1751 = vmatmul.mubr.bf16.gmra.mxu0 %v6555_v11  ;;  %v6585_v11 = vld [vmem:[%s8677_s0 + $0x240] ss:$8 sps:$4 sm:$0xff]  }
 0x106   :  { %5698 = vmatprep.mubr.msk.bf16.mxu0 %vm1211_vm0, %v6556_v12  ;;  %v6586_v12 = vld [vmem:[%s8677_s0 + $0x254] ss:$8 sps:$4 sm:$0xff]  }
 0x107   :  { %v1562_v15 = vpop.f32.mrf.mxu0 }
 0x109   :  { %v7156_v16 = vpop.f32.mrf.mxu0 }
 0x10b   :  { %v1565_v19 = vpop.f32.mrf.mxu0 }
 0x10c   :  { %v6588_v19 = vld [vmem:[%s8677_s0 + $0x250] ss:$8 sps:$4 sm:$0xff]  }
 0x10d   :  { %v7164_v20 = vpop.f32.mrf.mxu0  ;;  %1759 = vmatmul.mubr.bf16.gmra.mxu0 %v6558_v17 }
 0x10e   :  { %5699 = vmatprep.mubr.msk.bf16.mxu0 %vm1211_vm0, %v6559_v18 }
 0x10f   :  { %v1570_v21 = vpop.f32.mrf.mxu0 }
 0x110   :  { %v6589_v21 = vld [vmem:[%s8677_s0 + $0x264] ss:$8 sps:$4 sm:$0xff]  }
 0x111   :  { %v7167_v22 = vpop.f32.mrf.mxu0 }
 0x113   :  { %v1573_v25 = vpop.f32.mrf.mxu0 }
 0x115   :  { %v7175_v26 = vpop.f32.mrf.mxu0  ;;  %1767 = vmatmul.mubr.bf16.gmra.mxu0 %v6561_v23 }
 0x116   :  { %5700 = vmatprep.mubr.msk.bf16.mxu0 %vm1211_vm0, %v6562_v24 }
 0x117   :  { %v1578_v27 = vpop.f32.mrf.mxu0 }
 0x118   :  { %v6639_v27 = vld [vmem:[%s8677_s0 + $0x4e4] ss:$8 sps:$4 sm:$0xff]  }
 0x119   :  { %v7178_v28 = vpop.f32.mrf.mxu0  ;;  %5749 = vmatprep.mubr.msk.bf16.mxu1 %vm1211_vm0, %v6639_v27 }
 0x11b   :  { %v1581_v31 = vpop.f32.mrf.mxu0 }
 0x11c   :  { %v6637_v31 = vld [vmem:[%s8677_s0 + $0x4e0] ss:$8 sps:$4 sm:$0xff]  }
 0x11d   :  { %v7186_v32 = vpop.f32.mrf.mxu0  ;;  %1775 = vmatmul.mubr.bf16.gmra.mxu0 %v6564_v29  ;;  %2167 = vmatmul.mubr.bf16.vlgmr.msra.gmra.mxu1 %v6637_v31 }
 0x11e   :  { %5701 = vmatprep.mubr.msk.bf16.mxu0 %vm1211_vm0, %v6565_v30  ;;  %v6591_v30 = vld [vmem:[%s8677_s0 + $0x260] ss:$8 sps:$4 sm:$0xff]  }
 0x11f   :  { %v1586_v33 = vpop.f32.mrf.mxu0 }
 0x120   :  { %v6592_v33 = vld [vmem:[%s8677_s0 + $0x274] ss:$8 sps:$4 sm:$0xff]  }
 0x121   :  { %v7189_v34 = vpop.f32.mrf.mxu0 }
 0x123   :  { %v1589_v37 = vpop.f32.mrf.mxu0 }
 0x125   :  { %v7197_v38 = vpop.f32.mrf.mxu0  ;;  %1783 = vmatmul.mubr.bf16.gmra.mxu0 %v6567_v35 }
 0x126   :  { %5702 = vmatprep.mubr.msk.bf16.mxu0 %vm1211_vm0, %v6568_v36 }
 0x127   :  { %v1594_v39 = vpop.f32.mrf.mxu0 }
 0x128   :  { %v6643_v39 = vld [vmem:[%s8677_s0 + $0x4f4] ss:$8 sps:$4 sm:$0xff]  }
 0x129   :  { %v7200_v40 = vpop.f32.mrf.mxu0  ;;  %5750 = vmatprep.mubr.msk.bf16.mxu1 %vm1211_vm0, %v6643_v39  ;;  %v6669_v39 = vld [vmem:[%s8677_s0 + $0x530] ss:$8 sps:$4 sm:$0xff]  }
 0x12b   :  { %v1597_v43 = vpop.f32.mrf.mxu0 }
 0x12c   :  { %v6645_v43 = vld [vmem:[%s8677_s0 + $0x4f0] ss:$8 sps:$4 sm:$0xff]  }
 0x12d   :  { %v7208_v44 = vpop.f32.mrf.mxu0  ;;  %1791 = vmatmul.mubr.bf16.gmra.mxu0 %v6570_v41  ;;  %2175 = vmatmul.mubr.bf16.gmra.mxu1 %v6645_v43 }
 0x12e   :  { %5703 = vmatprep.mubr.msk.bf16.mxu0 %vm1211_vm0, %v6571_v42  ;;  %v6594_v42 = vld [vmem:[%s8677_s0 + $0x270] ss:$8 sps:$4 sm:$0xff]  }
 0x12f   :  { %v1602_v45 = vpop.f32.mrf.mxu0 }
 0x130   :  { %v6595_v45 = vld [vmem:[%s8677_s0 + $0x284] ss:$8 sps:$4 sm:$0xff]  }
 0x131   :  { %v7211_v46 = vpop.f32.mrf.mxu0 }
 0x133   :  { %v1605_v49 = vpop.f32.mrf.mxu0 }
 0x135   :  { %v7219_v50 = vpop.f32.mrf.mxu0  ;;  %1799 = vmatmul.mubr.bf16.gmra.mxu0 %v6573_v47 }
 0x136   :  { %5704 = vmatprep.mubr.msk.bf16.mxu0 %vm1211_vm0, %v6574_v48 }
 0x137   :  { %v1610_v51 = vpop.f32.mrf.mxu0 }
 0x138   :  { %v6649_v51 = vld [vmem:[%s8677_s0 + $0x504] ss:$8 sps:$4 sm:$0xff]  }
 0x139   :  { %v7222_v52 = vpop.f32.mrf.mxu0  ;;  %5751 = vmatprep.mubr.msk.bf16.mxu1 %vm1211_vm0, %v6649_v51 }
 0x13b   :  { %v1613_v55 = vpop.f32.mrf.mxu0 }
 0x13c   :  { %v6651_v55 = vld [vmem:[%s8677_s0 + $0x500] ss:$8 sps:$4 sm:$0xff]  }
 0x13d   :  { %v7230_v56 = vpop.f32.mrf.mxu0  ;;  %1807 = vmatmul.mubr.bf16.gmra.mxu0 %v6576_v53  ;;  %2183 = vmatmul.mubr.bf16.gmra.mxu1 %v6651_v55  ;;  %v6675_v55 = vld [vmem:[%s8677_s0 + $0x540] ss:$8 sps:$4 sm:$0xff]  }
 0x13e   :  { %5705 = vmatprep.mubr.msk.bf16.mxu0 %vm1211_vm0, %v6577_v54  ;;  %v6597_v54 = vld [vmem:[%s8677_s0 + $0x280] ss:$8 sps:$4 sm:$0xff]  }
 0x13f   :  { %v1618_v57 = vpop.f32.mrf.mxu0 }
 0x140   :  { %v6598_v57 = vld [vmem:[%s8677_s0 + $0x294] ss:$8 sps:$4 sm:$0xff]  }
 0x141   :  { %v7233_v58 = vpop.f32.mrf.mxu0 }
 0x143   :  { %v1621_v61 = vpop.f32.mrf.mxu0 }
 0x145   :  { %v7241_v62 = vpop.f32.mrf.mxu0  ;;  %1815 = vmatmul.mubr.bf16.gmra.mxu0 %v6579_v59 }
 0x146   :  { %5706 = vmatprep.mubr.msk.bf16.mxu0 %vm1211_vm0, %v6580_v60 }
 0x147   :  { %v1626_v63 = vpop.f32.mrf.mxu0 }
 0x148   :  { %v6655_v63 = vld [vmem:[%s8677_s0 + $0x514] ss:$8 sps:$4 sm:$0xff]  }
 0x149   :  { %v7244_v0 = vpop.f32.mrf.mxu0  ;;  %5752 = vmatprep.mubr.msk.bf16.mxu1 %vm1211_vm0, %v6655_v63 }
 0x14b   :  { %v1629_v5 = vpop.f32.mrf.mxu0 }
 0x14c   :  { %v6657_v5 = vld [vmem:[%s8677_s0 + $0x510] ss:$8 sps:$4 sm:$0xff]  }
 0x14d   :  { %v7252_v6 = vpop.f32.mrf.mxu0  ;;  %1823 = vmatmul.mubr.bf16.gmra.mxu0 %v6582_v1  ;;  %2191 = vmatmul.mubr.bf16.gmra.mxu1 %v6657_v5 }
 0x14e   :  { %5707 = vmatprep.mubr.msk.bf16.mxu0 %vm1211_vm0, %v6583_v3  ;;  %v6600_v3 = vld [vmem:[%s8677_s0 + $0x290] ss:$8 sps:$4 sm:$0xff]  }
 0x14f   :  { %v1634_v7 = vpop.f32.mrf.mxu0 }
 0x150   :  { %v6601_v7 = vld [vmem:[%s8677_s0 + $0x2a4] ss:$8 sps:$4 sm:$0xff]  }
 0x151   :  { %v7255_v9 = vpop.f32.mrf.mxu0 }
 0x153   :  { %v1637_v13 = vpop.f32.mrf.mxu0 }
 0x155   :  { %v7263_v15 = vpop.f32.mrf.mxu0  ;;  %1831 = vmatmul.mubr.bf16.gmra.mxu0 %v6585_v11 }
 0x156   :  { %5708 = vmatprep.mubr.msk.bf16.mxu0 %vm1211_vm0, %v6586_v12 }
 0x157   :  { %v1642_v17 = vpop.f32.mrf.mxu0 }
 0x158   :  { %v6661_v17 = vld [vmem:[%s8677_s0 + $0x524] ss:$8 sps:$4 sm:$0xff]  }
 0x159   :  { %v7266_v18 = vpop.f32.mrf.mxu0  ;;  %5753 = vmatprep.mubr.msk.bf16.mxu1 %vm1211_vm0, %v6661_v17 }
 0x15b   :  { %v1645_v23 = vpop.f32.mrf.mxu0 }
 0x15c   :  { %v6663_v23 = vld [vmem:[%s8677_s0 + $0x520] ss:$8 sps:$4 sm:$0xff]  }
 0x15d   :  { %v7274_v24 = vpop.f32.mrf.mxu0  ;;  %1839 = vmatmul.mubr.bf16.gmra.mxu0 %v6588_v19  ;;  %2199 = vmatmul.mubr.bf16.gmra.mxu1 %v6663_v23 }
 0x15e   :  { %8688 = vst [vmem:[#allocation2_spill] sm:$0xff] %v7274_v24  ;;  %5709 = vmatprep.mubr.msk.bf16.mxu0 %vm1211_vm0, %v6589_v21  ;;  %v6603_v21 = vld [vmem:[%s8677_s0 + $0x2a0] ss:$8 sps:$4 sm:$0xff]  }
 0x15f   :  { %v1650_v25 = vpop.f32.mrf.mxu0 }
 0x160   :  { %v6604_v25 = vld [vmem:[%s8677_s0 + $0x2b4] ss:$8 sps:$4 sm:$0xff]  }
 0x161   :  { %v7280_v29 = vpop.f32.mrf.mxu0 }
 0x162   :  { %8689 = vst [vmem:[#allocation3_spill] sm:$0xff] %v7280_v29  ;;  %v6696_v29 = vld [vmem:[%s8677_s0 + $0x3f0] ss:$8 sps:$4 sm:$0xff]  }
 0x163   :  { %v1653_v35 = vpop.f32.mrf.mxu0 }
 0x165   :  { %v7292_v36 = vpop.f32.mrf.mxu0  ;;  %1847 = vmatmul.mubr.bf16.gmra.mxu0 %v6591_v30 }
 0x166   :  { %8690 = vst [vmem:[#allocation4_spill] sm:$0xff] %v7292_v36  ;;  %5710 = vmatprep.mubr.msk.bf16.mxu0 %vm1211_vm0, %v6592_v33  ;;  %v6667_v33 = vld [vmem:[%s8677_s0 + $0x534] ss:$8 sps:$4 sm:$0xff]  }
 0x167   :  { %v1658_v37 = vpop.f32.mrf.mxu0  ;;  %5754 = vmatprep.mubr.msk.bf16.mxu1 %vm1211_vm0, %v6667_v33  ;;  %v6687_v33 = vld [vmem:[%s8677_s0 + $0x560] ss:$8 sps:$4 sm:$0xff]  }
 0x168   :  { %v6606_v37 = vld [vmem:[%s8677_s0 + $0x2b0] ss:$8 sps:$4 sm:$0xff]   ;;  %2207 = vmatmul.mubr.bf16.gmra.mxu1 %v6669_v39 }
 0x169   :  { %v7298_v41 = vpop.f32.mrf.mxu0 }
 0x16a   :  { %8691 = vst [vmem:[#allocation5_spill] sm:$0xff] %v7298_v41 }
 0x16b   :  { %v1661_v47 = vpop.f32.mrf.mxu0 }
 0x16d   :  { %v7310_v48 = vpop.f32.mrf.mxu0  ;;  %1855 = vmatmul.mubr.bf16.gmra.mxu0 %v6594_v42  ;;  %v6607_v42 = vld [vmem:[%s8677_s0 + $0x2c4] ss:$8 sps:$4 sm:$0xff]  }
 0x16e   :  { %8692 = vst [vmem:[#allocation6_spill] sm:$0xff] %v7310_v48  ;;  %5711 = vmatprep.mubr.msk.bf16.mxu0 %vm1211_vm0, %v6595_v45 }
 0x16f   :  { %v1666_v49 = vpop.f32.mrf.mxu0 }
 0x170   :  { %v6673_v49 = vld [vmem:[%s8677_s0 + $0x544] ss:$8 sps:$4 sm:$0xff]  }
 0x171   :  { %v7316_v53 = vpop.f32.mrf.mxu0  ;;  %5755 = vmatprep.mubr.msk.bf16.mxu1 %vm1211_vm0, %v6673_v49 }
 0x172   :  { %8693 = vst [vmem:[#allocation7_spill] sm:$0xff] %v7316_v53  ;;  %2215 = vmatmul.mubr.bf16.gmra.mxu1 %v6675_v55  ;;  %v6693_v55 = vld [vmem:[%s8677_s0 + $0x570] ss:$8 sps:$4 sm:$0xff]  }
 0x173   :  { %v1669_v59 = vpop.f32.mrf.mxu0 }
 0x175   :  { %v7328_v60 = vpop.f32.mrf.mxu0  ;;  %1863 = vmatmul.mubr.bf16.gmra.mxu0 %v6597_v54  ;;  %v6609_v54 = vld [vmem:[%s8677_s0 + $0x2c0] ss:$8 sps:$4 sm:$0xff]  }
 0x176   :  { %8694 = vst [vmem:[#allocation8_spill] sm:$0xff] %v7328_v60  ;;  %5712 = vmatprep.mubr.msk.bf16.mxu0 %vm1211_vm0, %v6598_v57  ;;  %v6610_v57 = vld [vmem:[%s8677_s0 + $0x2d4] ss:$8 sps:$4 sm:$0xff]  }
 0x177   :  { %v1674_v61 = vpop.f32.mrf.mxu0 }
 0x179   :  { %v7334_v1 = vpop.f32.mrf.mxu0 }
 0x17a   :  { %8695 = vst [vmem:[#allocation9_spill] sm:$0xff] %v7334_v1 }
 0x17b   :  { %v1677_v11 = vpop.f32.mrf.mxu0 }
 0x17c   :  { %v6681_v11 = vld [vmem:[%s8677_s0 + $0x550] ss:$8 sps:$4 sm:$0xff]  }
 0x17d   :  { %v7346_v12 = vpop.f32.mrf.mxu0  ;;  %1871 = vmatmul.mubr.bf16.gmra.mxu0 %v6600_v3  ;;  %v6679_v3 = vld [vmem:[%s8677_s0 + $0x554] ss:$8 sps:$4 sm:$0xff]  }
 0x17e   :  { %8696 = vst [vmem:[#allocation10_spill] sm:$0xff] %v7346_v12  ;;  %5713 = vmatprep.mubr.msk.bf16.mxu0 %vm1211_vm0, %v6601_v7  ;;  %v6612_v7 = vld [vmem:[%s8677_s0 + $0x2d0] ss:$8 sps:$4 sm:$0xff]   ;;  %5756 = vmatprep.mubr.msk.bf16.mxu1 %vm1211_vm0, %v6679_v3 }
 0x17f   :  { %v1682_v13 = vpop.f32.mrf.mxu0  ;;  %2223 = vmatmul.mubr.bf16.gmra.mxu1 %v6681_v11 }
 0x180   :  { %v6613_v13 = vld [vmem:[%s8677_s0 + $0x2e4] ss:$8 sps:$4 sm:$0xff]  }
 0x181   :  { %v7352_v19 = vpop.f32.mrf.mxu0 }
 0x182   :  { %8697 = vst [vmem:[#allocation11_spill] sm:$0xff] %v7352_v19 }
 0x183   :  { %v1685_v27 = vpop.f32.mrf.mxu0 }
 0x185   :  { %v7364_v30 = vpop.f32.mrf.mxu0  ;;  %1879 = vmatmul.mubr.bf16.gmra.mxu0 %v6603_v21 }
 0x186   :  { %8698 = vst [vmem:[#allocation12_spill] sm:$0xff] %v7364_v30  ;;  %5714 = vmatprep.mubr.msk.bf16.mxu0 %vm1211_vm0, %v6604_v25  ;;  %v6685_v25 = vld [vmem:[%s8677_s0 + $0x564] ss:$8 sps:$4 sm:$0xff]  }
 0x187   :  { %v1690_v31 = vpop.f32.mrf.mxu0  ;;  %5757 = vmatprep.mubr.msk.bf16.mxu1 %vm1211_vm0, %v6685_v25 }
 0x188   :  { %v6615_v31 = vld [vmem:[%s8677_s0 + $0x2e0] ss:$8 sps:$4 sm:$0xff]   ;;  %2231 = vmatmul.mubr.bf16.gmra.mxu1 %v6687_v33 }
 0x189   :  { %v7370_v35 = vpop.f32.mrf.mxu0 }
 0x18a   :  { %8699 = vst [vmem:[#allocation13_spill] sm:$0xff] %v7370_v35  ;;  %v6670_v35 = vld [vmem:[%s8677_s0 + $0x3b4] ss:$8 sps:$4 sm:$0xff]  }
 0x18b   :  { %v1693_v43 = vpop.f32.mrf.mxu0 }
 0x18d   :  { %v7382_v45 = vpop.f32.mrf.mxu0  ;;  %1887 = vmatmul.mubr.bf16.gmra.mxu0 %v6606_v37  ;;  %v6616_v37 = vld [vmem:[%s8677_s0 + $0x2f4] ss:$8 sps:$4 sm:$0xff]  }
 0x18e   :  { %8700 = vst [vmem:[#allocation14_spill] sm:$0xff] %v7382_v45  ;;  %5715 = vmatprep.mubr.msk.bf16.mxu0 %vm1211_vm0, %v6607_v42  ;;  %v6666_v45 = vld [vmem:[%s8677_s0 + $0x3a0] ss:$8 sps:$4 sm:$0xff]  }
 0x18f   :  { %v1698_v47 = vpop.f32.mrf.mxu0 }
 0x190   :  { %v6691_v47 = vld [vmem:[%s8677_s0 + $0x574] ss:$8 sps:$4 sm:$0xff]  }
 0x191   :  { %v7388_v51 = vpop.f32.mrf.mxu0  ;;  %5758 = vmatprep.mubr.msk.bf16.mxu1 %vm1211_vm0, %v6691_v47  ;;  %v6705_v47 = vld [vmem:[%s8677_s0 + $0x590] ss:$8 sps:$4 sm:$0xff]  }
 0x192   :  { %8701 = vst [vmem:[#allocation15_spill] sm:$0xff] %v7388_v51  ;;  %2239 = vmatmul.mubr.bf16.gmra.mxu1 %v6693_v55  ;;  %v6660_v51 = vld [vmem:[%s8677_s0 + $0x390] ss:$8 sps:$4 sm:$0xff]  }
 0x193   :  { %v1701_v59 = vpop.f32.mrf.mxu0 }
 0x195   :  { %v7400_v61 = vpop.f32.mrf.mxu0  ;;  %1895 = vmatmul.mubr.bf16.gmra.mxu0 %v6609_v54  ;;  %v6618_v54 = vld [vmem:[%s8677_s0 + $0x2f0] ss:$8 sps:$4 sm:$0xff]  }
 0x196   :  { %8702 = vst [vmem:[#allocation16_spill] sm:$0xff] %v7400_v61  ;;  %5716 = vmatprep.mubr.msk.bf16.mxu0 %vm1211_vm0, %v6610_v57  ;;  %v6619_v57 = vld [vmem:[%s8677_s0 + $0x304] ss:$8 sps:$4 sm:$0xff]  }
 0x197   :  { %v1706_v63 = vpop.f32.mrf.mxu0 }
 0x199   :  { %v7406_v5 = vpop.f32.mrf.mxu0 }
 0x19a   :  { %8703 = vst [vmem:[#allocation17_spill] sm:$0xff] %v7406_v5  ;;  %v6654_v5 = vld [vmem:[%s8677_s0 + $0x380] ss:$8 sps:$4 sm:$0xff]  }
 0x19b   :  { %v1709_v17 = vpop.f32.mrf.mxu0 }
 0x19c   :  { %v6699_v17 = vld [vmem:[%s8677_s0 + $0x580] ss:$8 sps:$4 sm:$0xff]  }
 0x19d   :  { %v7418_v21 = vpop.f32.mrf.mxu0  ;;  %1903 = vmatmul.mubr.bf16.gmra.mxu0 %v6612_v7  ;;  %v6697_v7 = vld [vmem:[%s8677_s0 + $0x584] ss:$8 sps:$4 sm:$0xff]  }
 0x19e   :  { %8704 = vst [vmem:[#allocation18_spill] sm:$0xff] %v7418_v21  ;;  %5717 = vmatprep.mubr.msk.bf16.mxu0 %vm1211_vm0, %v6613_v13  ;;  %v6621_v13 = vld [vmem:[%s8677_s0 + $0x300] ss:$8 sps:$4 sm:$0xff]   ;;  %5759 = vmatprep.mubr.msk.bf16.mxu1 %vm1211_vm0, %v6697_v7 }
 0x19f   :  { %v1714_v23 = vpop.f32.mrf.mxu0  ;;  %2247 = vmatmul.mubr.bf16.gmra.mxu1 %v6699_v17  ;;  %v6711_v17 = vld [vmem:[%s8677_s0 + $0x5a0] ss:$8 sps:$4 sm:$0xff]  }
 0x1a0   :  { %v6622_v23 = vld [vmem:[%s8677_s0 + $0x314] ss:$8 sps:$4 sm:$0xff]  }
 0x1a1   :  { %v7424_v27 = vpop.f32.mrf.mxu0 }
 0x1a2   :  { %8705 = vst [vmem:[#allocation19_spill] sm:$0xff] %v7424_v27  ;;  %v6648_v27 = vld [vmem:[%s8677_s0 + $0x370] ss:$8 sps:$4 sm:$0xff]  }
 0x1a3   :  { %v1717_v39 = vpop.f32.mrf.mxu0 }
 0x1a5   :  { %v7436_v42 = vpop.f32.mrf.mxu0  ;;  %1911 = vmatmul.mubr.bf16.gmra.mxu0 %v6615_v31 }
 0x1a6   :  { %8706 = vst [vmem:[#allocation20_spill] sm:$0xff] %v7436_v42  ;;  %5718 = vmatprep.mubr.msk.bf16.mxu0 %vm1211_vm0, %v6616_v37  ;;  %v6703_v37 = vld [vmem:[%s8677_s0 + $0x594] ss:$8 sps:$4 sm:$0xff]  }
 0x1a7   :  { %v1722_v43 = vpop.f32.mrf.mxu0  ;;  %5760 = vmatprep.mubr.msk.bf16.mxu1 %vm1211_vm0, %v6703_v37 }
 0x1a8   :  { %v6624_v43 = vld [vmem:[%s8677_s0 + $0x310] ss:$8 sps:$4 sm:$0xff]   ;;  %2255 = vmatmul.mubr.bf16.gmra.mxu1 %v6705_v47 }
 0x1a9   :  { %v7442_v49 = vpop.f32.mrf.mxu0 }
 0x1aa   :  { %8707 = vst [vmem:[#allocation21_spill] sm:$0xff] %v7442_v49  ;;  %v6642_v49 = vld [vmem:[%s8677_s0 + $0x360] ss:$8 sps:$4 sm:$0xff]  }
 0x1ab   :  { %v1725_v59 = vpop.f32.mrf.mxu0 }
 0x1ad   :  { %v7454_v63 = vpop.f32.mrf.mxu0  ;;  %1919 = vmatmul.mubr.bf16.gmra.mxu0 %v6618_v54  ;;  %v6625_v54 = vld [vmem:[%s8677_s0 + $0x324] ss:$8 sps:$4 sm:$0xff]  }
 0x1ae   :  { %8708 = vst [vmem:[#allocation22_spill] sm:$0xff] %v7454_v63  ;;  %5719 = vmatprep.mubr.msk.bf16.mxu0 %vm1211_vm0, %v6619_v57 }
 0x1af   :  { %v1730_v3 = vpop.f32.mrf.mxu0 }
 0x1b0   :  { %v6709_v3 = vld [vmem:[%s8677_s0 + $0x5a4] ss:$8 sps:$4 sm:$0xff]  }
 0x1b1   :  { %v7460_v11 = vpop.f32.mrf.mxu0  ;;  %5761 = vmatprep.mubr.msk.bf16.mxu1 %vm1211_vm0, %v6709_v3 }
 0x1b2   :  { %8709 = vst [vmem:[#allocation23_spill] sm:$0xff] %v7460_v11  ;;  %2263 = vmatmul.mubr.bf16.gmra.mxu1 %v6711_v17  ;;  %v6636_v11 = vld [vmem:[%s8677_s0 + $0x350] ss:$8 sps:$4 sm:$0xff]  }
 0x1b3   :  { %v1733_v25 = vpop.f32.mrf.mxu0 }
 0x1b5   :  { %v7472_v31 = vpop.f32.mrf.mxu0  ;;  %1927 = vmatmul.mubr.bf16.gmra.mxu0 %v6621_v13  ;;  %v6627_v13 = vld [vmem:[%s8677_s0 + $0x320] ss:$8 sps:$4 sm:$0xff]  }
 0x1b6   :  { %8710 = vst [vmem:[#allocation24_spill] sm:$0xff] %v7472_v31  ;;  %5720 = vmatprep.mubr.msk.bf16.mxu0 %vm1211_vm0, %v6622_v23  ;;  %v6628_v23 = vld [vmem:[%s8677_s0 + $0x334] ss:$8 sps:$4 sm:$0xff]  }
 0x1b7   :  { %v1738_v33 = vpop.f32.mrf.mxu0 }
 0x1b9   :  { %v7478_v39 = vpop.f32.mrf.mxu0 }
 0x1bb   :  { %v1741_v55 = vpop.f32.mrf.mxu0 }
 0x1bc   :  { %v6717_v55 = vld [vmem:[%s8677_s0 + $0x5b0] ss:$8 sps:$4 sm:$0xff]  }
 0x1bd   :  { %v7490_v57 = vpop.f32.mrf.mxu0  ;;  %1935 = vmatmul.mubr.bf16.gmra.mxu0 %v6624_v43  ;;  %v6715_v43 = vld [vmem:[%s8677_s0 + $0x5b4] ss:$8 sps:$4 sm:$0xff]  }
 0x1be   :  { %5721 = vmatprep.mubr.msk.bf16.mxu0 %vm1211_vm0, %v6625_v54  ;;  %v6630_v54 = vld [vmem:[%s8677_s0 + $0x330] ss:$8 sps:$4 sm:$0xff]   ;;  %5762 = vmatprep.mubr.msk.bf16.mxu1 %vm1211_vm0, %v6715_v43  ;;  %v6723_v43 = vld [vmem:[%s8677_s0 + $0x5c0] ss:$8 sps:$4 sm:$0xff]  }
 0x1bf   :  { %v1746_v59 = vpop.f32.mrf.mxu0  ;;  %2271 = vmatmul.mubr.bf16.gmra.mxu1 %v6717_v55 }
 0x1c0   :  { %v6631_v59 = vld [vmem:[%s8677_s0 + $0x344] ss:$8 sps:$4 sm:$0xff]  }
 0x1c1   :  { %v7496_v7 = vpop.f32.mrf.mxu0 }
 0x1c3   :  { %v1749_v25 = vpop.f32.mrf.mxu0 }
 0x1c5   :  { %v7508_v33 = vpop.f32.mrf.mxu0  ;;  %1943 = vmatmul.mubr.bf16.gmra.mxu0 %v6627_v13 }
 0x1c6   :  { %5722 = vmatprep.mubr.msk.bf16.mxu0 %vm1211_vm0, %v6628_v23  ;;  %v6721_v23 = vld [vmem:[%s8677_s0 + $0x5c4] ss:$8 sps:$4 sm:$0xff]  }
 0x1c7   :  { %v1754_v37 = vpop.f32.mrf.mxu0  ;;  %5763 = vmatprep.mubr.msk.bf16.mxu1 %vm1211_vm0, %v6721_v23  ;;  %v6729_v23 = vld [vmem:[%s8677_s0 + $0x5d0] ss:$8 sps:$4 sm:$0xff]  }
 0x1c8   :  { %v6633_v37 = vld [vmem:[%s8677_s0 + $0x340] ss:$8 sps:$4 sm:$0xff]   ;;  %2279 = vmatmul.mubr.bf16.gmra.mxu1 %v6723_v43 }
 0x1c9   :  { %v7514_v47 = vpop.f32.mrf.mxu0 }
 0x1cb   :  { %v1757_v3 = vpop.f32.mrf.mxu0 }
 0x1cd   :  { %v7526_v13 = vpop.f32.mrf.mxu0  ;;  %1951 = vmatmul.mubr.bf16.gmra.mxu0 %v6630_v54  ;;  %v6634_v54 = vld [vmem:[%s8677_s0 + $0x354] ss:$8 sps:$4 sm:$0xff]  }
 0x1ce   :  { %5723 = vmatprep.mubr.msk.bf16.mxu0 %vm1211_vm0, %v6631_v59 }
 0x1cf   :  { %v1762_v17 = vpop.f32.mrf.mxu0 }
 0x1d0   :  { %v6727_v17 = vld [vmem:[%s8677_s0 + $0x5d4] ss:$8 sps:$4 sm:$0xff]  }
 0x1d1   :  { %v7532_v25 = vpop.f32.mrf.mxu0  ;;  %5764 = vmatprep.mubr.msk.bf16.mxu1 %vm1211_vm0, %v6727_v17  ;;  %v6735_v17 = vld [vmem:[%s8677_s0 + $0x5e0] ss:$8 sps:$4 sm:$0xff]  }
 0x1d2   :  { %2287 = vmatmul.mubr.bf16.gmra.mxu1 %v6729_v23 }
 0x1d3   :  { %v1765_v55 = vpop.f32.mrf.mxu0 }
 0x1d5   :  { %v7544_v59 = vpop.f32.mrf.mxu0  ;;  %1959 = vmatmul.mubr.bf16.gmra.mxu0 %v6633_v37  ;;  %v6640_v37 = vld [vmem:[%s8677_s0 + $0x364] ss:$8 sps:$4 sm:$0xff]  }
 0x1d6   :  { %5724 = vmatprep.mubr.msk.bf16.mxu0 %vm1211_vm0, %v6634_v54 }
 0x1d7   :  { %v1770_v3 = vpop.f32.mrf.mxu0 }
 0x1d8   :  { %v6733_v3 = vld [vmem:[%s8677_s0 + $0x5e4] ss:$8 sps:$4 sm:$0xff]  }
 0x1d9   :  { %v7550_v31 = vpop.f32.mrf.mxu0  ;;  %5765 = vmatprep.mubr.msk.bf16.mxu1 %vm1211_vm0, %v6733_v3  ;;  %v6741_v3 = vld [vmem:[%s8677_s0 + $0x5f0] ss:$8 sps:$4 sm:$0xff]  }
 0x1da   :  { %2295 = vmatmul.mubr.bf16.gmra.mxu1 %v6735_v17 }
 0x1db   :  { %v1773_v43 = vpop.f32.mrf.mxu0 }
 0x1dd   :  { %v7562_v54 = vpop.f32.mrf.mxu0  ;;  %1967 = vmatmul.mubr.bf16.gmra.mxu0 %v6636_v11  ;;  %v6646_v11 = vld [vmem:[%s8677_s0 + $0x374] ss:$8 sps:$4 sm:$0xff]   ;;  %v7689_v41 = vpop.f32.mrf.mxu1 }
 0x1de   :  { %5725 = vmatprep.mubr.msk.bf16.mxu0 %vm1211_vm0, %v6640_v37  ;;  %8712 = vst [vmem:[#allocation26_spill] sm:$0xff] %v7689_v41 }
 0x1df   :  { %v1778_v55 = vpop.f32.mrf.mxu0 }
 0x1e0   :  { %v6739_v55 = vld [vmem:[%s8677_s0 + $0x5f4] ss:$8 sps:$4 sm:$0xff]  }
 0x1e1   :  { %v7568_v63 = vpop.f32.mrf.mxu0  ;;  %5766 = vmatprep.mubr.msk.bf16.mxu1 %vm1211_vm0, %v6739_v55  ;;  %v6747_v55 = vld [vmem:[%s8677_s0 + $0x600] ss:$8 sps:$4 sm:$0xff]  }
 0x1e2   :  { %2303 = vmatmul.mubr.bf16.gmra.mxu1 %v6741_v3 }
 0x1e3   :  { %v1781_v23 = vpop.f32.mrf.mxu0 }
 0x1e5   :  { %v7580_v37 = vpop.f32.mrf.mxu0  ;;  %1975 = vmatmul.mubr.bf16.gmra.mxu0 %v6642_v49  ;;  %v6652_v49 = vld [vmem:[%s8677_s0 + $0x384] ss:$8 sps:$4 sm:$0xff]  }
 0x1e6   :  { %5726 = vmatprep.mubr.msk.bf16.mxu0 %vm1211_vm0, %v6646_v11 }
 0x1e7   :  { %v1786_v43 = vpop.f32.mrf.mxu0 }
 0x1e8   :  { %v6745_v43 = vld [vmem:[%s8677_s0 + $0x604] ss:$8 sps:$4 sm:$0xff]  }
 0x1e9   :  { %v7586_v42 = vpop.f32.mrf.mxu0  ;;  %5767 = vmatprep.mubr.msk.bf16.mxu1 %vm1211_vm0, %v6745_v43  ;;  %v6753_v43 = vld [vmem:[%s8677_s0 + $0x610] ss:$8 sps:$4 sm:$0xff]  }
 0x1ea   :  { %2311 = vmatmul.mubr.bf16.gmra.mxu1 %v6747_v55 }
 0x1eb   :  { %v1789_v17 = vpop.f32.mrf.mxu0 }
 0x1ed   :  { %v7598_v11 = vpop.f32.mrf.mxu0  ;;  %1983 = vmatmul.mubr.bf16.gmra.mxu0 %v6648_v27  ;;  %v6658_v27 = vld [vmem:[%s8677_s0 + $0x394] ss:$8 sps:$4 sm:$0xff]  }
 0x1ee   :  { %5727 = vmatprep.mubr.msk.bf16.mxu0 %vm1211_vm0, %v6652_v49 }
 0x1ef   :  { %v1794_v23 = vpop.f32.mrf.mxu0 }
 0x1f0   :  { %v6751_v23 = vld [vmem:[%s8677_s0 + $0x614] ss:$8 sps:$4 sm:$0xff]  }
 0x1f1   :  { %v7604_v21 = vpop.f32.mrf.mxu0  ;;  %5768 = vmatprep.mubr.msk.bf16.mxu1 %vm1211_vm0, %v6751_v23 }
 0x1f2   :  { %2319 = vmatmul.mubr.bf16.gmra.mxu1 %v6753_v43 }
 0x1f3   :  { %v1797_v3 = vpop.f32.mrf.mxu0 }
 0x1f5   :  { %v7616_v49 = vpop.f32.mrf.mxu0  ;;  %1991 = vmatmul.mubr.bf16.gmra.mxu0 %v6654_v5  ;;  %v6664_v5 = vld [vmem:[%s8677_s0 + $0x3a4] ss:$8 sps:$4 sm:$0xff]  }
 0x1f6   :  { %5728 = vmatprep.mubr.msk.bf16.mxu0 %vm1211_vm0, %v6658_v27 }
 0x1f7   :  { %v1802_v17 = vpop.f32.mrf.mxu0 }
 0x1f9   :  { %v7622_v61 = vpop.f32.mrf.mxu0 }
 0x1fb   :  { %v1805_v55 = vpop.f32.mrf.mxu0 }
 0x1fc   :  { %v6676_v55 = vld [vmem:[%s8677_s0 + $0x3c4] ss:$8 sps:$4 sm:$0xff]  }
 0x1fd   :  { %v7634_v27 = vpop.f32.mrf.mxu0  ;;  %1999 = vmatmul.mubr.bf16.gmra.mxu0 %v6660_v51 }
 0x1fe   :  { %5729 = vmatprep.mubr.msk.bf16.mxu0 %vm1211_vm0, %v6664_v5  ;;  %v6672_v5 = vld [vmem:[%s8677_s0 + $0x3b0] ss:$8 sps:$4 sm:$0xff]  }
 0x1ff   :  { %v1810_v3 = vpop.f32.mrf.mxu0 }
 0x201   :  { %v7637_v17 = vpop.f32.mrf.mxu0 }
 0x203   :  { %v1813_v30 = vpop.f32.mrf.mxu0 }
 0x205   :  { %v7645_v23 = vpop.f32.mrf.mxu0  ;;  %2007 = vmatmul.mubr.bf16.gmra.mxu0 %v6666_v45 }
 0x206   :  { %5730 = vmatprep.mubr.msk.bf16.mxu0 %vm1211_vm0, %v6670_v35  ;;  %v6678_v35 = vld [vmem:[%s8677_s0 + $0x3c0] ss:$8 sps:$4 sm:$0xff]  }
 0x207   :  { %v1818_v51 = vpop.f32.mrf.mxu0 }
 0x208   :  { %v6682_v51 = vld [vmem:[%s8677_s0 + $0x3d4] ss:$8 sps:$4 sm:$0xff]  }
 0x209   :  { %v7648_v43 = vpop.f32.mrf.mxu0 }
 0x20b   :  { %v1821_v3 = vpop.f32.mrf.mxu0 }
 0x20d   :  { %v7656_v19 = vpop.f32.mrf.mxu0  ;;  %2015 = vmatmul.mubr.bf16.gmra.mxu0 %v6672_v5 }
 0x20e   :  { %5731 = vmatprep.mubr.msk.bf16.mxu0 %vm1211_vm0, %v6676_v55  ;;  %v6684_v55 = vld [vmem:[%s8677_s0 + $0x3d0] ss:$8 sps:$4 sm:$0xff]  }
 0x20f   :  { %v1826_v30 = vpop.f32.mrf.mxu0 }
 0x210   :  { %v6688_v30 = vld [vmem:[%s8677_s0 + $0x3e4] ss:$8 sps:$4 sm:$0xff]  }
 0x211   :  { %v7659_v45 = vpop.f32.mrf.mxu0 }
 0x213   :  { %v1829_v12 = vpop.f32.mrf.mxu0 }
 0x215   :  { %v7667_v1 = vpop.f32.mrf.mxu0  ;;  %2023 = vmatmul.mubr.bf16.gmra.mxu0 %v6678_v35 }
 0x216   :  { %5732 = vmatprep.mubr.msk.bf16.mxu0 %vm1211_vm0, %v6682_v51  ;;  %v6690_v51 = vld [vmem:[%s8677_s0 + $0x3e0] ss:$8 sps:$4 sm:$0xff]  }
 0x217   :  { %v1834_v5 = vpop.f32.mrf.mxu0 }
 0x218   :  { %v6694_v5 = vld [vmem:[%s8677_s0 + $0x3f4] ss:$8 sps:$4 sm:$0xff]  }
 0x219   :  { %v7670_v3 = vpop.f32.mrf.mxu0 }
 0x21b   :  { %v1837_v60 = vpop.f32.mrf.mxu0 }
 0x21d   :  { %v7678_v53 = vpop.f32.mrf.mxu0  ;;  %2031 = vmatmul.mubr.bf16.gmra.mxu0 %v6684_v55  ;;  %v2170_v55 = vpop.f32.mrf.mxu1 }
 0x21e   :  { %5733 = vmatprep.mubr.msk.bf16.mxu0 %vm1211_vm0, %v6688_v30 }
 0x21f   :  { %v1842_v12 = vpop.f32.mrf.mxu0 }
 0x220   :  { %v7694_v12 = vpop.f32.mrf.mxu1 }
 0x221   :  { %v7681_v35 = vpop.f32.mrf.mxu0  ;;  %8714 = vst [vmem:[#allocation28_spill] sm:$0xff] %v7694_v12 }
 0x222   :  { %8711 = vst [vmem:[#allocation25_spill] sm:$0xff] %v7681_v35  ;;  %v2173_v24 = vpop.f32.mrf.mxu1  ;;  %v6732_v35 = vld [vmem:[%s8677_s0 + $0x450] ss:$8 sps:$4 sm:$0xff]  }
 0x223   :  { %v1845_v48 = vpop.f32.mrf.mxu0  ;;  %v6702_v24 = vld [vmem:[%s8677_s0 + $0x400] ss:$8 sps:$4 sm:$0xff]  }
 0x224   :  { %v6700_v48 = vld [vmem:[%s8677_s0 + $0x404] ss:$8 sps:$4 sm:$0xff]  }
 0x225   :  { %v7691_v60 = vpop.f32.mrf.mxu0  ;;  %2039 = vmatmul.mubr.bf16.gmra.mxu0 %v6690_v51 }
 0x226   :  { %8713 = vst [vmem:[#allocation27_spill] sm:$0xff] %v7691_v60  ;;  %5734 = vmatprep.mubr.msk.bf16.mxu0 %vm1211_vm0, %v6694_v5  ;;  %v7704_v60 = vpop.f32.mrf.mxu1 }
 0x227   :  { %v1850_v30 = vpop.f32.mrf.mxu0  ;;  %8716 = vst [vmem:[#allocation30_spill] sm:$0xff] %v7704_v60 }
 0x228   :  { %v2178_v5 = vpop.f32.mrf.mxu1 }
 0x229   :  { %v7696_v36 = vpop.f32.mrf.mxu0 }
 0x22a   :  { %8715 = vst [vmem:[#allocation29_spill] sm:$0xff] %v7696_v36  ;;  %v7709_v30 = vpop.f32.mrf.mxu1 }
 0x22b   :  { %v1853_v41 = vpop.f32.mrf.mxu0  ;;  %8718 = vst [vmem:[#allocation32_spill] sm:$0xff] %v7709_v30 }
 0x22c   :  { %v2181_v36 = vpop.f32.mrf.mxu1  ;;  %v6706_v41 = vld [vmem:[%s8677_s0 + $0x414] ss:$8 sps:$4 sm:$0xff]  }
 0x22d   :  { %v7706_v51 = vpop.f32.mrf.mxu0  ;;  %2047 = vmatmul.mubr.bf16.gmra.mxu0 %v6696_v29  ;;  %v6769_v29 = vld [vmem:[%s8678_s3 + $0x8] sm:$0xff]  }
 0x22e   :  { %8717 = vst [vmem:[#allocation31_spill] sm:$0xff] %v7706_v51  ;;  %5735 = vmatprep.mubr.msk.bf16.mxu0 %vm1211_vm0, %v6700_v48  ;;  %v8686_v51 = vmov 0.0   ;;  %v7723_v48 = vpop.f32.mrf.mxu1 }
 0x22f   :  { %v1858_v55 = vpop.f32.mrf.mxu0  ;;  %6099 = vmatprep.subr.bf16.mxu1 %v8686_v51  ;;  %8720 = vst [vmem:[#allocation34_spill] sm:$0xff] %v7723_v48  ;;  %v6712_v48 = vld [vmem:[%s8677_s0 + $0x424] ss:$8 sps:$4 sm:$0xff]  }
 0x230   :  { %6100 = vmatpush3.bf16.msra.mxu1 %v6769_v29  ;;  %v2186_v55 = vpop.f32.mrf.mxu1 }
 0x231   :  { %v7711_v12 = vpop.f32.mrf.mxu0  ;;  %6105 = vmatprep.subr.bf16.mxu1 %v8686_v51 }
 0x232   :  { %8719 = vst [vmem:[#allocation33_spill] sm:$0xff] %v7711_v12  ;;  %v7732_v30 = vpop.f32.mrf.mxu1 }
 0x233   :  { %v1861_v60 = vpop.f32.mrf.mxu0  ;;  %8722 = vst [vmem:[#allocation36_spill] sm:$0xff] %v7732_v30  ;;  %v6714_v30 = vld [vmem:[%s8677_s0 + $0x420] ss:$8 sps:$4 sm:$0xff]  }
 0x234   :  { %v6708_v60 = vld [vmem:[%s8677_s0 + $0x410] ss:$8 sps:$4 sm:$0xff]  }
 0x235   :  { %v7725_v5 = vpop.f32.mrf.mxu0  ;;  %2055 = vmatmul.mubr.bf16.gmra.mxu0 %v6702_v24  ;;  %v2189_v24 = vpop.f32.mrf.mxu1 }
 0x236   :  { %8721 = vst [vmem:[#allocation35_spill] sm:$0xff] %v7725_v5  ;;  %5736 = vmatprep.mubr.msk.bf16.mxu0 %vm1211_vm0, %v6706_v41  ;;  %v6718_v24 = vld [vmem:[%s8677_s0 + $0x434] ss:$8 sps:$4 sm:$0xff]  }
 0x237   :  { %v1866_v36 = vpop.f32.mrf.mxu0  ;;  %v7739_v55 = vpop.f32.mrf.mxu1 }
 0x238   :  { %8724 = vst [vmem:[#allocation38_spill] sm:$0xff] %v7739_v55 }
 0x239   :  { %v7737_v12 = vpop.f32.mrf.mxu0  ;;  %v2194_v36 = vpop.f32.mrf.mxu1 }
 0x23a   :  { %8723 = vst [vmem:[#allocation37_spill] sm:$0xff] %v7737_v12  ;;  %v6720_v36 = vld [vmem:[%s8677_s0 + $0x430] ss:$8 sps:$4 sm:$0xff]  }
 0x23b   :  { %v1869_v29 = vpop.f32.mrf.mxu0  ;;  %v7747_v5 = vpop.f32.mrf.mxu1 }
 0x23c   :  { %8726 = vst [vmem:[#allocation40_spill] sm:$0xff] %v7747_v5 }
 0x23d   :  { %v7741_v41 = vpop.f32.mrf.mxu0  ;;  %2063 = vmatmul.mubr.bf16.gmra.mxu0 %v6708_v60  ;;  %v2197_v55 = vpop.f32.mrf.mxu1 }
 0x23e   :  { %8725 = vst [vmem:[#allocation39_spill] sm:$0xff] %v7741_v41  ;;  %5737 = vmatprep.mubr.msk.bf16.mxu0 %vm1211_vm0, %v6712_v48  ;;  %v6724_v55 = vld [vmem:[%s8677_s0 + $0x444] ss:$8 sps:$4 sm:$0xff]  }
 0x23f   :  { %v1874_v51 = vpop.f32.mrf.mxu0  ;;  %v7754_v41 = vpop.f32.mrf.mxu1 }
 0x240   :  { %8728 = vst [vmem:[#allocation42_spill] sm:$0xff] %v7754_v41 }
 0x241   :  { %v7752_v29 = vpop.f32.mrf.mxu0  ;;  %v2202_v51 = vpop.f32.mrf.mxu1 }
 0x242   :  { %8727 = vst [vmem:[#allocation41_spill] sm:$0xff] %v7752_v29 }
 0x243   :  { %v1877_v12 = vpop.f32.mrf.mxu0  ;;  %v7762_v5 = vpop.f32.mrf.mxu1 }
 0x244   :  { %8730 = vst [vmem:[#allocation44_spill] sm:$0xff] %v7762_v5 }
 0x245   :  { %v7756_v60 = vpop.f32.mrf.mxu0  ;;  %2071 = vmatmul.mubr.bf16.gmra.mxu0 %v6714_v30  ;;  %v2205_v41 = vpop.f32.mrf.mxu1 }
 0x246   :  { %8729 = vst [vmem:[#allocation43_spill] sm:$0xff] %v7756_v60  ;;  %5738 = vmatprep.mubr.msk.bf16.mxu0 %vm1211_vm0, %v6718_v24  ;;  %v6730_v41 = vld [vmem:[%s8677_s0 + $0x454] ss:$8 sps:$4 sm:$0xff]  }
 0x247   :  { %v1882_v48 = vpop.f32.mrf.mxu0  ;;  %v7769_v60 = vpop.f32.mrf.mxu1 }
 0x248   :  { %8732 = vst [vmem:[#allocation46_spill] sm:$0xff] %v7769_v60  ;;  %v6726_v48 = vld [vmem:[%s8677_s0 + $0x440] ss:$8 sps:$4 sm:$0xff]  }
 0x249   :  { %v7767_v12 = vpop.f32.mrf.mxu0  ;;  %v2210_v24 = vpop.f32.mrf.mxu1 }
 0x24a   :  { %8731 = vst [vmem:[#allocation45_spill] sm:$0xff] %v7767_v12 }
 0x24b   :  { %v1885_v29 = vpop.f32.mrf.mxu0  ;;  %v7777_v5 = vpop.f32.mrf.mxu1 }
 0x24c   :  { %8734 = vst [vmem:[#allocation48_spill] sm:$0xff] %v7777_v5 }
 0x24d   :  { %v7771_v30 = vpop.f32.mrf.mxu0  ;;  %2079 = vmatmul.mubr.bf16.gmra.mxu0 %v6720_v36  ;;  %v2213_v60 = vpop.f32.mrf.mxu1 }
 0x24e   :  { %8733 = vst [vmem:[#allocation47_spill] sm:$0xff] %v7771_v30  ;;  %5739 = vmatprep.mubr.msk.bf16.mxu0 %vm1211_vm0, %v6724_v55  ;;  %v6736_v60 = vld [vmem:[%s8677_s0 + $0x464] ss:$8 sps:$4 sm:$0xff]  }
 0x24f   :  { %v1890_v51 = vpop.f32.mrf.mxu0  ;;  %v7784_v30 = vpop.f32.mrf.mxu1 }
 0x250   :  { %8736 = vst [vmem:[#allocation50_spill] sm:$0xff] %v7784_v30 }
 0x251   :  { %v7782_v29 = vpop.f32.mrf.mxu0  ;;  %v2218_v55 = vpop.f32.mrf.mxu1 }
 0x252   :  { %8735 = vst [vmem:[#allocation49_spill] sm:$0xff] %v7782_v29 }
 0x253   :  { %v1893_v12 = vpop.f32.mrf.mxu0  ;;  %v7789_v51 = vpop.f32.mrf.mxu1 }
 0x254   :  { %8738 = vst [vmem:[#allocation52_spill] sm:$0xff] %v7789_v51 }
 0x255   :  { %v7786_v36 = vpop.f32.mrf.mxu0  ;;  %2087 = vmatmul.mubr.bf16.gmra.mxu0 %v6726_v48  ;;  %v2221_v29 = vpop.f32.mrf.mxu1 }
 0x256   :  { %8737 = vst [vmem:[#allocation51_spill] sm:$0xff] %v7786_v36  ;;  %5740 = vmatprep.mubr.msk.bf16.mxu0 %vm1211_vm0, %v6730_v41  ;;  %v6738_v29 = vld [vmem:[%s8677_s0 + $0x460] ss:$8 sps:$4 sm:$0xff]  }
 0x257   :  { %v1898_v24 = vpop.f32.mrf.mxu0  ;;  %v7799_v30 = vpop.f32.mrf.mxu1 }
 0x258   :  { %8740 = vst [vmem:[#allocation54_spill] sm:$0xff] %v7799_v30 }
 0x259   :  { %v7791_v5 = vpop.f32.mrf.mxu0  ;;  %v2226_v41 = vpop.f32.mrf.mxu1 }
 0x25a   :  { %8739 = vst [vmem:[#allocation53_spill] sm:$0xff] %v7791_v5 }
 0x25b   :  { %v1901_v12 = vpop.f32.mrf.mxu0  ;;  %v7804_v24 = vpop.f32.mrf.mxu1 }
 0x25c   :  { %8742 = vst [vmem:[#allocation56_spill] sm:$0xff] %v7804_v24  ;;  %v6742_v12 = vld [vmem:[%s8677_s0 + $0x474] ss:$8 sps:$4 sm:$0xff]  }
 0x25d   :  { %v7801_v48 = vpop.f32.mrf.mxu0  ;;  %2095 = vmatmul.mubr.bf16.gmra.mxu0 %v6732_v35  ;;  %v2229_v5 = vpop.f32.mrf.mxu1 }
 0x25e   :  { %8741 = vst [vmem:[#allocation55_spill] sm:$0xff] %v7801_v48  ;;  %5741 = vmatprep.mubr.msk.bf16.mxu0 %vm1211_vm0, %v6736_v60  ;;  %v6744_v5 = vld [vmem:[%s8677_s0 + $0x470] ss:$8 sps:$4 sm:$0xff]  }
 0x25f   :  { %v1906_v55 = vpop.f32.mrf.mxu0  ;;  %v7814_v48 = vpop.f32.mrf.mxu1 }
 0x260   :  { %8744 = vst [vmem:[#allocation58_spill] sm:$0xff] %v7814_v48 }
 0x261   :  { %v7806_v51 = vpop.f32.mrf.mxu0  ;;  %v2234_v60 = vpop.f32.mrf.mxu1 }
 0x262   :  { %8743 = vst [vmem:[#allocation57_spill] sm:$0xff] %v7806_v51 }
 0x263   :  { %v1909_v30 = vpop.f32.mrf.mxu0  ;;  %v7819_v55 = vpop.f32.mrf.mxu1 }
 0x264   :  { %8746 = vst [vmem:[#allocation60_spill] sm:$0xff] %v7819_v55  ;;  %v6748_v30 = vld [vmem:[%s8677_s0 + $0x484] ss:$8 sps:$4 sm:$0xff]  }
 0x265   :  { %v7816_v35 = vpop.f32.mrf.mxu0  ;;  %2103 = vmatmul.mubr.bf16.gmra.mxu0 %v6738_v29  ;;  %v2237_v51 = vpop.f32.mrf.mxu1 }
 0x266   :  { %8745 = vst [vmem:[#allocation59_spill] sm:$0xff] %v7816_v35  ;;  %5742 = vmatprep.mubr.msk.bf16.mxu0 %vm1211_vm0, %v6742_v12  ;;  %v6750_v51 = vld [vmem:[%s8677_s0 + $0x480] ss:$8 sps:$4 sm:$0xff]  }
 0x267   :  { %v1914_v41 = vpop.f32.mrf.mxu0  ;;  %v7829_v35 = vpop.f32.mrf.mxu1 }
 0x268   :  { %8748 = vst [vmem:[#allocation62_spill] sm:$0xff] %v7829_v35 }
 0x269   :  { %v7821_v24 = vpop.f32.mrf.mxu0  ;;  %v2242_v12 = vpop.f32.mrf.mxu1 }
 0x26a   :  { %8747 = vst [vmem:[#allocation61_spill] sm:$0xff] %v7821_v24 }
 0x26b   :  { %v1917_v48 = vpop.f32.mrf.mxu0  ;;  %v7834_v41 = vpop.f32.mrf.mxu1 }
 0x26c   :  { %8750 = vst [vmem:[#allocation64_spill] sm:$0xff] %v7834_v41  ;;  %v6754_v48 = vld [vmem:[%s8677_s0 + $0x494] ss:$8 sps:$4 sm:$0xff]  }
 0x26d   :  { %v7831_v29 = vpop.f32.mrf.mxu0  ;;  %2111 = vmatmul.mubr.bf16.gmra.mxu0 %v6744_v5  ;;  %v2245_v24 = vpop.f32.mrf.mxu1 }
 0x26e   :  { %8749 = vst [vmem:[#allocation63_spill] sm:$0xff] %v7831_v29  ;;  %5743 = vmatprep.mubr.msk.bf16.mxu0 %vm1211_vm0, %v6748_v30  ;;  %v6756_v24 = vld [vmem:[%s8677_s0 + $0x490] ss:$8 sps:$4 sm:$0xff]  }
 0x26f   :  { %v1922_v60 = vpop.f32.mrf.mxu0  ;;  %v7844_v29 = vpop.f32.mrf.mxu1 }
 0x270   :  { %8752 = vst [vmem:[#allocation66_spill] sm:$0xff] %v7844_v29 }
 0x271   :  { %v7836_v55 = vpop.f32.mrf.mxu0  ;;  %v2250_v30 = vpop.f32.mrf.mxu1 }
 0x272   :  { %8751 = vst [vmem:[#allocation65_spill] sm:$0xff] %v7836_v55 }
 0x273   :  { %v1925_v35 = vpop.f32.mrf.mxu0  ;;  %v7849_v60 = vpop.f32.mrf.mxu1 }
 0x274   :  { %8754 = vst [vmem:[#allocation68_spill] sm:$0xff] %v7849_v60  ;;  %v6757_v35 = vld [vmem:[%s8677_s0 + $0x4a4] ss:$8 sps:$4 sm:$0xff]  }
 0x275   :  { %v7846_v5 = vpop.f32.mrf.mxu0  ;;  %2119 = vmatmul.mubr.bf16.gmra.mxu0 %v6750_v51  ;;  %v2253_v55 = vpop.f32.mrf.mxu1  ;;  %v2327_v51 = vmax.f32 %v7131_v2, %v7478_v39  ;;  %v6760_v39 = vld [vmem:[%s8677_s0 + $0x4b4] ss:$8 sps:$4 sm:$0xff]  }
 0x276   :  { %8753 = vst [vmem:[#allocation67_spill] sm:$0xff] %v7846_v5  ;;  %5744 = vmatprep.mubr.msk.bf16.mxu0 %vm1211_vm0, %v6754_v48  ;;  %v2330_v55 = vmax.f32 %v7134_v4, %v7490_v57 }
 0x277   :  { %v1930_v12 = vpop.f32.mrf.mxu0  ;;  %v7859_v5 = vpop.f32.mrf.mxu1 }
 0x278   :  { %8756 = vst [vmem:[#allocation70_spill] sm:$0xff] %v7859_v5 }
 0x279   :  { %v7851_v41 = vpop.f32.mrf.mxu0  ;;  %v2258_v30 = vpop.f32.mrf.mxu1 }
 0x27a   :  { %8755 = vst [vmem:[#allocation69_spill] sm:$0xff] %v7851_v41 }
 0x27b   :  { %v1933_v29 = vpop.f32.mrf.mxu0  ;;  %v7866_v41 = vpop.f32.mrf.mxu1 }
 0x27c   :  { %v6759_v29 = vld [vmem:[%s8677_s0 + $0x4a0] ss:$8 sps:$4 sm:$0xff]  }
 0x27d   :  { %v1936_v48 = vpop.f32.mrf.mxu0  ;;  %2127 = vmatmul.mubr.bf16.gmra.mxu0 %v6756_v24  ;;  %v2261_v5 = vpop.f32.mrf.mxu1 }
 0x27e   :  { %v7863_v12 = vmax.f32 %v2327_v51, %v1936_v48  ;;  %5745 = vmatprep.mubr.msk.bf16.mxu0 %vm1211_vm0, %v6757_v35  ;;  %v2336_v48 = vmax.f32 %v7145_v10, %v7508_v33 }
 0x27f   :  { %v1938_v60 = vpop.f32.mrf.mxu0  ;;  %v7878_v35 = vpop.f32.mrf.mxu1 }
 0x280   :  { %v2333_v60 = vmax.f32 %v7142_v8, %v7496_v7  ;;  %v6763_v7 = vld [vmem:[%s8677_s0 + $0x4c4] ss:$8 sps:$4 sm:$0xff]  }
 0x281   :  { %v1939_v36 = vpop.f32.mrf.mxu0  ;;  %v2266_v4 = vpop.f32.mrf.mxu1 }
 0x282   :  { %v7873_v2 = vmax.f32 %v2330_v55, %v1939_v36  ;;  %v6762_v55 = vld [vmem:[%s8677_s0 + $0x4b0] ss:$8 sps:$4 sm:$0xff]  }
 0x283   :  { %v1941_v24 = vpop.f32.mrf.mxu0  ;;  %v7885_v36 = vpop.f32.mrf.mxu1 }
 0x285   :  { %v1944_v51 = vpop.f32.mrf.mxu0  ;;  %2135 = vmatmul.mubr.bf16.gmra.mxu0 %v6759_v29  ;;  %v2269_v24 = vpop.f32.mrf.mxu1 }
 0x286   :  { %v7882_v57 = vmax.f32 %v2333_v60, %v1944_v51  ;;  %5746 = vmatprep.mubr.msk.bf16.mxu0 %vm1211_vm0, %v6760_v39  ;;  %v2339_v60 = vmax.f32 %v7153_v14, %v7514_v47  ;;  %v6765_v24 = vld [vmem:[%s8677_s0 + $0x4c0] ss:$8 sps:$4 sm:$0xff]   ;;  %v6766_v47 = vld [vmem:[%s8677_s0 + $0x4d4] ss:$8 sps:$4 sm:$0xff]  }
 0x287   :  { %v1946_v5 = vpop.f32.mrf.mxu0  ;;  %v7897_v39 = vpop.f32.mrf.mxu1 }
 0x289   :  { %v1947_v30 = vpop.f32.mrf.mxu0  ;;  %v2274_v10 = vpop.f32.mrf.mxu1 }
 0x28a   :  { %v7892_v8 = vmax.f32 %v2336_v48, %v1947_v30  ;;  %v2342_v48 = vmax.f32 %v7156_v16, %v7526_v13 }
 0x28b   :  { %v1949_v29 = vpop.f32.mrf.mxu0  ;;  %v7904_v5 = vpop.f32.mrf.mxu1 }
 0x28d   :  { %v1952_v51 = vpop.f32.mrf.mxu0  ;;  %2143 = vmatmul.mubr.bf16.gmra.mxu0 %v6762_v55  ;;  %v2277_v29 = vpop.f32.mrf.mxu1 }
 0x28e   :  { %v7901_v33 = vmax.f32 %v2339_v60, %v1952_v51  ;;  %5747 = vmatprep.mubr.msk.bf16.mxu0 %vm1211_vm0, %v6763_v7  ;;  %v2345_v60 = vmax.f32 %v7164_v20, %v7532_v25  ;;  %v6768_v29 = vld [vmem:[%s8677_s0 + $0x4d0] ss:$8 sps:$4 sm:$0xff]  }
 0x28f   :  { %v1954_v4 = vpop.f32.mrf.mxu0  ;;  %v7916_v7 = vpop.f32.mrf.mxu1 }
 0x291   :  { %v1955_v30 = vpop.f32.mrf.mxu0  ;;  %v2282_v16 = vpop.f32.mrf.mxu1 }
 0x292   :  { %v7911_v14 = vmax.f32 %v2342_v48, %v1955_v30  ;;  %v2348_v48 = vmax.f32 %v7167_v22, %v7544_v59 }
 0x293   :  { %v1957_v55 = vpop.f32.mrf.mxu0  ;;  %v7923_v4 = vpop.f32.mrf.mxu1 }
 0x294   :  { %8757 = vst [vmem:[#allocation71_spill] sm:$0xff] %v7923_v4  ;;  %v8802_v4 = vld [vmem:[#allocation55_spill] sm:$0xff] }
 0x295   :  { %v1960_v51 = vpop.f32.mrf.mxu0  ;;  %2151 = vmatmul.mubr.bf16.gmra.mxu0 %v6765_v24  ;;  %v2285_v55 = vpop.f32.mrf.mxu1 }
 0x296   :  { %v7920_v13 = vmax.f32 %v2345_v60, %v1960_v51  ;;  %5748 = vmatprep.mubr.msk.bf16.mxu0 %vm1211_vm0, %v6766_v47  ;;  %v2351_v47 = vmax.f32 %v7175_v26, %v7550_v31  ;;  %v2357_v26 = vmax.f32 %v7186_v32, %v7568_v63  ;;  %v2363_v32 = vmax.f32 %v7197_v38, %v7586_v42 }
 0x297   :  { %v1962_v10 = vpop.f32.mrf.mxu0  ;;  %v7932_v24 = vpop.f32.mrf.mxu1  ;;  %v2369_v38 = vmax.f32 %v7208_v44, %v7604_v21  ;;  %v2375_v44 = vmax.f32 %v7219_v50, %v7622_v61 }
 0x298   :  { %8758 = vst [vmem:[#allocation72_spill] sm:$0xff] %v7932_v24  ;;  %v2354_v10 = vmax.f32 %v7178_v28, %v7562_v54  ;;  %v2360_v28 = vmax.f32 %v7189_v34, %v7580_v37  ;;  %v2366_v34 = vmax.f32 %v7200_v40, %v7598_v11  ;;  %v2372_v40 = vmax.f32 %v7211_v46, %v7616_v49 }
 0x299   :  { %v1963_v30 = vpop.f32.mrf.mxu0  ;;  %v2290_v51 = vpop.f32.mrf.mxu1  ;;  %v2378_v46 = vmax.f32 %v7222_v52, %v7634_v27  ;;  %v2387_v52 = vmax.f32 %v7241_v62, %v7648_v43 }
 0x29a   :  { %v7930_v20 = vmax.f32 %v2348_v48, %v1963_v30 }
 0x29b   :  { %v1965_v25 = vpop.f32.mrf.mxu0  ;;  %v7938_v59 = vpop.f32.mrf.mxu1 }
 0x29c   :  { %8759 = vst [vmem:[#allocation73_spill] sm:$0xff] %v7938_v59  ;;  %v8799_v59 = vld [vmem:[#allocation53_spill] sm:$0xff] }
 0x29d   :  { %v1968_v60 = vpop.f32.mrf.mxu0  ;;  %2159 = vmatmul.mubr.bf16.gmra.mxu0 %v6768_v29  ;;  %v2293_v48 = vpop.f32.mrf.mxu1 }
 0x29e   :  { %v7936_v16 = vmax.f32 %v2351_v47, %v1968_v60 }
 0x29f   :  { %v1970_v22 = vpop.f32.mrf.mxu0  ;;  %v7944_v24 = vpop.f32.mrf.mxu1 }
 0x2a0   :  { %8760 = vst [vmem:[#allocation74_spill] sm:$0xff] %v7944_v24  ;;  %v8796_v24 = vld [vmem:[#allocation51_spill] sm:$0xff] }
 0x2a1   :  { %v1971_v55 = vpop.f32.mrf.mxu0  ;;  %v2298_v29 = vpop.f32.mrf.mxu1 }
 0x2a2   :  { %v7942_v30 = vmax.f32 %v2354_v10, %v1971_v55 }
 0x2a3   :  { %v1973_v25 = vpop.f32.mrf.mxu0  ;;  %v7950_v51 = vpop.f32.mrf.mxu1 }
 0x2a4   :  { %8761 = vst [vmem:[#allocation75_spill] sm:$0xff] %v7950_v51  ;;  %v8793_v51 = vld [vmem:[#allocation49_spill] sm:$0xff] }
 0x2a5   :  { %v1976_v31 = vpop.f32.mrf.mxu0  ;;  %v2301_v22 = vpop.f32.mrf.mxu1 }
 0x2a6   :  { %v7948_v47 = vmax.f32 %v2357_v26, %v1976_v31 }
 0x2a7   :  { %v1978_v60 = vpop.f32.mrf.mxu0  ;;  %v7956_v48 = vpop.f32.mrf.mxu1 }
 0x2a8   :  { %8762 = vst [vmem:[#allocation76_spill] sm:$0xff] %v7956_v48  ;;  %v8791_v48 = vld [vmem:[#allocation47_spill] sm:$0xff] }
 0x2a9   :  { %v1979_v54 = vpop.f32.mrf.mxu0  ;;  %v2306_v25 = vpop.f32.mrf.mxu1 }
 0x2aa   :  { %v7954_v10 = vmax.f32 %v2360_v28, %v1979_v54 }
 0x2ab   :  { %v1981_v55 = vpop.f32.mrf.mxu0  ;;  %v7962_v29 = vpop.f32.mrf.mxu1 }
 0x2ac   :  { %8763 = vst [vmem:[#allocation77_spill] sm:$0xff] %v7962_v29  ;;  %v8789_v29 = vld [vmem:[#allocation45_spill] sm:$0xff] }
 0x2ad   :  { %v1984_v63 = vpop.f32.mrf.mxu0  ;;  %v2309_v60 = vpop.f32.mrf.mxu1 }
 0x2ae   :  { %v7960_v26 = vmax.f32 %v2363_v32, %v1984_v63 }
 0x2af   :  { %v1986_v31 = vpop.f32.mrf.mxu0  ;;  %v7968_v22 = vpop.f32.mrf.mxu1 }
 0x2b0   :  { %8764 = vst [vmem:[#allocation78_spill] sm:$0xff] %v7968_v22  ;;  %v8787_v22 = vld [vmem:[#allocation43_spill] sm:$0xff] }
 0x2b1   :  { %v1987_v37 = vpop.f32.mrf.mxu0  ;;  %v2314_v55 = vpop.f32.mrf.mxu1 }
 0x2b2   :  { %v7966_v28 = vmax.f32 %v2366_v34, %v1987_v37 }
 0x2b3   :  { %v1989_v54 = vpop.f32.mrf.mxu0  ;;  %v7974_v25 = vpop.f32.mrf.mxu1 }
 0x2b4   :  { %8765 = vst [vmem:[#allocation79_spill] sm:$0xff] %v7974_v25  ;;  %v8785_v25 = vld [vmem:[#allocation41_spill] sm:$0xff] }
 0x2b5   :  { %v1992_v42 = vpop.f32.mrf.mxu0  ;;  %v2317_v31 = vpop.f32.mrf.mxu1 }
 0x2b6   :  { %v7972_v32 = vmax.f32 %v2369_v38, %v1992_v42  ;;  %v2381_v31 = vmax.f32 %v7230_v56, %v7637_v17 }
 0x2b7   :  { %v1994_v63 = vpop.f32.mrf.mxu0  ;;  %v7980_v60 = vpop.f32.mrf.mxu1 }
 0x2b8   :  { %8766 = vst [vmem:[#allocation80_spill] sm:$0xff] %v7980_v60  ;;  %v8783_v60 = vld [vmem:[#allocation39_spill] sm:$0xff] }
 0x2b9   :  { %v1995_v11 = vpop.f32.mrf.mxu0  ;;  %v2322_v54 = vpop.f32.mrf.mxu1 }
 0x2ba   :  { %v7978_v34 = vmax.f32 %v2372_v40, %v1995_v11 }
 0x2bb   :  { %v1997_v37 = vpop.f32.mrf.mxu0  ;;  %v7986_v55 = vpop.f32.mrf.mxu1 }
 0x2bc   :  { %8767 = vst [vmem:[#allocation81_spill] sm:$0xff] %v7986_v55  ;;  %v8781_v55 = vld [vmem:[#allocation37_spill] sm:$0xff] }
 0x2bd   :  { %v2000_v21 = vpop.f32.mrf.mxu0  ;;  %v2325_v63 = vpop.f32.mrf.mxu1 }
 0x2be   :  { %v7984_v38 = vmax.f32 %v2375_v44, %v2000_v21  ;;  %v2384_v44 = vmax.f32 %v7233_v58, %v7645_v23 }
 0x2bf   :  { %v2002_v42 = vpop.f32.mrf.mxu0 }
 0x2c1   :  { %v2003_v49 = vpop.f32.mrf.mxu0 }
 0x2c2   :  { %v7990_v40 = vmax.f32 %v2378_v46, %v2003_v49  ;;  %v8768_v46 = vmov 0.0   ;;  %v2390_v49 = vmax.f32 %v7244_v0, %v7656_v19  ;;  %v2399_v0 = vmax.f32 %v7263_v15, %v7670_v3  ;;  %v8772_v15 = vld [vmem:[#allocation3_spill] sm:$0xff] }
 0x2c3   :  { %v2005_v11 = vpop.f32.mrf.mxu0  ;;  %6101 = vmatprep.mubr.msk.bf16.mxu1 %vm6837_vm2, %v8768_v46 }
 0x2c4   :  { %v2393_v11 = vmax.f32 %v7252_v6, %v7659_v45  ;;  %v2402_v6 = vmax.f32 %v7266_v18, %v7678_v53  ;;  %v8774_v18 = vld [vmem:[#allocation4_spill] sm:$0xff] }
 0x2c5   :  { %v2008_v37 = vpop.f32.mrf.mxu0 }
 0x2c6   :  { %v7994_v50 = vmax.f32 %v2381_v31, %v2008_v37  ;;  %v2396_v37 = vmax.f32 %v7255_v9, %v7667_v1  ;;  %v8770_v9 = vld [vmem:[#allocation2_spill] sm:$0xff] }
 0x2c7   :  { %v2010_v61 = vpop.f32.mrf.mxu0 }
 0x2c9   :  { %v2011_v21 = vpop.f32.mrf.mxu0 }
 0x2ca   :  { %v7998_v54 = vmax.f32 %v2384_v44, %v2011_v21 }
 0x2cb   :  { %v2013_v42 = vpop.f32.mrf.mxu0 }
 0x2cd   :  { %v2016_v27 = vpop.f32.mrf.mxu0 }
 0x2ce   :  { %v8004_v56 = vmax.f32 %v2387_v52, %v2016_v27 }
 0x2cf   :  { %v2018_v17 = vpop.f32.mrf.mxu0 }
 0x2d1   :  { %v2019_v63 = vpop.f32.mrf.mxu0 }
 0x2d2   :  { %v8008_v58 = vmax.f32 %v2390_v49, %v2019_v63  ;;  %v8769_v49 = vld [vmem:[#allocation25_spill] sm:$0xff] }
 0x2d3   :  { %v2021_v23 = vpop.f32.mrf.mxu0  ;;  %v2405_v1 = vmax.f32 %v8770_v9, %v8769_v49 }
 0x2d5   :  { %v2024_v31 = vpop.f32.mrf.mxu0 }
 0x2d6   :  { %v8012_v62 = vmax.f32 %v2393_v11, %v2024_v31  ;;  %v8771_v31 = vld [vmem:[#allocation27_spill] sm:$0xff] }
 0x2d7   :  { %v2026_v43 = vpop.f32.mrf.mxu0  ;;  %v2408_v3 = vmax.f32 %v8772_v15, %v8771_v31 }
 0x2d9   :  { %v2027_v61 = vpop.f32.mrf.mxu0 }
 0x2da   :  { %v8016_v44 = vmax.f32 %v2396_v37, %v2027_v61 }
 0x2db   :  { %v2029_v21 = vpop.f32.mrf.mxu0 }
 0x2dc   :  { %v8773_v21 = vld [vmem:[#allocation29_spill] sm:$0xff] }
 0x2dd   :  { %v2032_v19 = vpop.f32.mrf.mxu0  ;;  %v2411_v53 = vmax.f32 %v8774_v18, %v8773_v21  ;;  %v8780_v21 = vld [vmem:[#allocation7_spill] sm:$0xff] }
 0x2de   :  { %v8020_v42 = vmax.f32 %v2399_v0, %v2032_v19 }
 0x2df   :  { %v2034_v52 = vpop.f32.mrf.mxu0 }
 0x2e1   :  { %v2035_v45 = vpop.f32.mrf.mxu0 }
 0x2e2   :  { %v8024_v27 = vmax.f32 %v2402_v6, %v2035_v45  ;;  %v8775_v6 = vld [vmem:[#allocation31_spill] sm:$0xff]  ;;  %v8776_v45 = vld [vmem:[#allocation5_spill] sm:$0xff] }
 0x2e3   :  { %v2037_v17 = vpop.f32.mrf.mxu0 }
 0x2e4   :  { %v2414_v17 = vmax.f32 %v8776_v45, %v8775_v6  ;;  %v8782_v6 = vld [vmem:[#allocation8_spill] sm:$0xff] }
 0x2e5   :  { %v2040_v63 = vpop.f32.mrf.mxu0  ;;  %v2423_v45 = vmax.f32 %v8782_v6, %v8781_v55  ;;  %v8788_v55 = vld [vmem:[#allocation11_spill] sm:$0xff] }
 0x2e6   :  { %v8028_v23 = vmax.f32 %v2405_v1, %v2040_v63  ;;  %v8777_v63 = vld [vmem:[#allocation33_spill] sm:$0xff]  ;;  %v2432_v6 = vmax.f32 %v8788_v55, %v8787_v22  ;;  %v8794_v22 = vld [vmem:[#allocation14_spill] sm:$0xff] }
 0x2e7   :  { %v2042_v11 = vpop.f32.mrf.mxu0  ;;  %v2441_v55 = vmax.f32 %v8794_v22, %v8793_v51  ;;  %v8803_v51 = vld [vmem:[#allocation17_spill] sm:$0xff] }
 0x2e8   :  { %v8778_v11 = vld [vmem:[#allocation6_spill] sm:$0xff]  ;;  %v2450_v22 = vmax.f32 %v8803_v51, %v8802_v4  ;;  %v8812_v4 = vld [vmem:[#allocation20_spill] sm:$0xff] }
 0x2e9   :  { %v2043_v43 = vpop.f32.mrf.mxu0  ;;  %v2417_v31 = vmax.f32 %v8778_v11, %v8777_v63  ;;  %v8784_v63 = vld [vmem:[#allocation9_spill] sm:$0xff] }
 0x2ea   :  { %v8032_v37 = vmax.f32 %v2408_v3, %v2043_v43  ;;  %v2426_v11 = vmax.f32 %v8784_v63, %v8783_v60  ;;  %v8790_v60 = vld [vmem:[#allocation12_spill] sm:$0xff] }
 0x2eb   :  { %v2045_v61 = vpop.f32.mrf.mxu0  ;;  %v2435_v63 = vmax.f32 %v8790_v60, %v8789_v29  ;;  %v8797_v29 = vld [vmem:[#allocation15_spill] sm:$0xff] }
 0x2ec   :  { %v8779_v61 = vld [vmem:[#allocation35_spill] sm:$0xff]  ;;  %v2444_v60 = vmax.f32 %v8797_v29, %v8796_v24  ;;  %v8806_v24 = vld [vmem:[#allocation18_spill] sm:$0xff] }
 0x2ed   :  { %v2048_v0 = vpop.f32.mrf.mxu0  ;;  %v2420_v18 = vmax.f32 %v8780_v21, %v8779_v61  ;;  %v8786_v61 = vld [vmem:[#allocation10_spill] sm:$0xff] }
 0x2ee   :  { %v8036_v19 = vmax.f32 %v2411_v53, %v2048_v0  ;;  %v2429_v21 = vmax.f32 %v8786_v61, %v8785_v25  ;;  %v8792_v25 = vld [vmem:[#allocation13_spill] sm:$0xff] }
 0x2ef   :  { %v2050_v52 = vpop.f32.mrf.mxu0  ;;  %v2438_v61 = vmax.f32 %v8792_v25, %v8791_v48  ;;  %v8800_v48 = vld [vmem:[#allocation16_spill] sm:$0xff] }
 0x2f0   :  { %v2447_v25 = vmax.f32 %v8800_v48, %v8799_v59  ;;  %v8809_v59 = vld [vmem:[#allocation19_spill] sm:$0xff] }
 0x2f1   :  { %v2051_v49 = vpop.f32.mrf.mxu0 }
 0x2f2   :  { %v8040_v9 = vmax.f32 %v2414_v17, %v2051_v49 }
 0x2f3   :  { %v2053_v1 = vpop.f32.mrf.mxu0 }
 0x2f5   :  { %v2056_v15 = vpop.f32.mrf.mxu0 }
 0x2f6   :  { %v8044_v3 = vmax.f32 %v2417_v31, %v2056_v15 }
 0x2f7   :  { %v2058_v43 = vpop.f32.mrf.mxu0 }
 0x2f9   :  { %v2059_v53 = vpop.f32.mrf.mxu0 }
 0x2fa   :  { %v8048_v0 = vmax.f32 %v2420_v18, %v2059_v53 }
 0x2fb   :  { %v2061_v52 = vpop.f32.mrf.mxu0 }
 0x2fd   :  { %v2064_v17 = vpop.f32.mrf.mxu0 }
 0x2fe   :  { %v8052_v49 = vmax.f32 %v2423_v45, %v2064_v17 }
 0x2ff   :  { %v2066_v1 = vpop.f32.mrf.mxu0 }
 0x301   :  { %v2067_v31 = vpop.f32.mrf.mxu0 }
 0x302   :  { %v8056_v15 = vmax.f32 %v2426_v11, %v2067_v31 }
 0x303   :  { %v2069_v43 = vpop.f32.mrf.mxu0 }
 0x305   :  { %v2072_v18 = vpop.f32.mrf.mxu0 }
 0x306   :  { %v8060_v53 = vmax.f32 %v2429_v21, %v2072_v18 }
 0x307   :  { %v2074_v52 = vpop.f32.mrf.mxu0 }
 0x309   :  { %v2075_v45 = vpop.f32.mrf.mxu0 }
 0x30a   :  { %v8064_v17 = vmax.f32 %v2432_v6, %v2075_v45 }
 0x30b   :  { %v2077_v1 = vpop.f32.mrf.mxu0 }
 0x30d   :  { %v2080_v11 = vpop.f32.mrf.mxu0 }
 0x30e   :  { %v8068_v31 = vmax.f32 %v2435_v63, %v2080_v11 }
 0x30f   :  { %v2082_v43 = vpop.f32.mrf.mxu0 }
 0x311   :  { %v2083_v21 = vpop.f32.mrf.mxu0 }
 0x312   :  { %v8072_v18 = vmax.f32 %v2438_v61, %v2083_v21 }
 0x313   :  { %v2085_v52 = vpop.f32.mrf.mxu0 }
 0x315   :  { %v2088_v6 = vpop.f32.mrf.mxu0 }
 0x316   :  { %v8076_v45 = vmax.f32 %v2441_v55, %v2088_v6 }
 0x317   :  { %v2090_v1 = vpop.f32.mrf.mxu0 }
 0x318   :  { %8795 = vst [vmem:[#allocation25_spill] sm:$0xff] %v8076_v45  ;;  %v8805_v45 = vld [vmem:[#allocation57_spill] sm:$0xff] }
 0x319   :  { %v2091_v63 = vpop.f32.mrf.mxu0  ;;  %v2453_v29 = vmax.f32 %v8806_v24, %v8805_v45  ;;  %v8815_v45 = vld [vmem:[#allocation21_spill] sm:$0xff] }
 0x31a   :  { %v8080_v11 = vmax.f32 %v2444_v60, %v2091_v63 }
 0x31b   :  { %v2093_v43 = vpop.f32.mrf.mxu0 }
 0x31c   :  { %8798 = vst [vmem:[#allocation2_spill] sm:$0xff] %v8080_v11  ;;  %v8808_v11 = vld [vmem:[#allocation59_spill] sm:$0xff] }
 0x31d   :  { %v2096_v61 = vpop.f32.mrf.mxu0  ;;  %v2456_v48 = vmax.f32 %v8809_v59, %v8808_v11  ;;  %v8818_v11 = vld [vmem:[#allocation22_spill] sm:$0xff] }
 0x31e   :  { %v8084_v21 = vmax.f32 %v2447_v25, %v2096_v61 }
 0x31f   :  { %v2098_v52 = vpop.f32.mrf.mxu0 }
 0x320   :  { %8801 = vst [vmem:[#allocation27_spill] sm:$0xff] %v8084_v21  ;;  %v8811_v21 = vld [vmem:[#allocation61_spill] sm:$0xff] }
 0x321   :  { %v2099_v55 = vpop.f32.mrf.mxu0  ;;  %v2459_v51 = vmax.f32 %v8812_v4, %v8811_v21  ;;  %v8820_v21 = vld [vmem:[#allocation23_spill] sm:$0xff] }
 0x322   :  { %v8088_v6 = vmax.f32 %v2450_v22, %v2099_v55 }
 0x323   :  { %v2101_v1 = vpop.f32.mrf.mxu0 }
 0x324   :  { %8804 = vst [vmem:[#allocation3_spill] sm:$0xff] %v8088_v6  ;;  %v8814_v6 = vld [vmem:[#allocation63_spill] sm:$0xff] }
 0x325   :  { %v2104_v60 = vpop.f32.mrf.mxu0  ;;  %v2462_v24 = vmax.f32 %v8815_v45, %v8814_v6  ;;  %v8822_v6 = vld [vmem:[#allocation24_spill] sm:$0xff] }
 0x326   :  { %v8092_v63 = vmax.f32 %v2453_v29, %v2104_v60 }
 0x327   :  { %v2106_v43 = vpop.f32.mrf.mxu0 }
 0x328   :  { %8807 = vst [vmem:[#allocation29_spill] sm:$0xff] %v8092_v63  ;;  %v8817_v63 = vld [vmem:[#allocation65_spill] sm:$0xff] }
 0x329   :  { %v2107_v25 = vpop.f32.mrf.mxu0  ;;  %v2465_v59 = vmax.f32 %v8818_v11, %v8817_v63 }
 0x32a   :  { %v8096_v61 = vmax.f32 %v2456_v48, %v2107_v25 }
 0x32b   :  { %v2109_v52 = vpop.f32.mrf.mxu0 }
 0x32c   :  { %8810 = vst [vmem:[#allocation4_spill] sm:$0xff] %v8096_v61  ;;  %v8819_v61 = vld [vmem:[#allocation67_spill] sm:$0xff] }
 0x32d   :  { %v2112_v22 = vpop.f32.mrf.mxu0  ;;  %v2468_v4 = vmax.f32 %v8820_v21, %v8819_v61  ;;  %v8122_v61 = vld [vmem:[%s8679_s2] ss:$0 sm:$0xff] }
 0x32e   :  { %v8100_v55 = vmax.f32 %v2459_v51, %v2112_v22 }
 0x32f   :  { %v2114_v1 = vpop.f32.mrf.mxu0 }
 0x330   :  { %8813 = vst [vmem:[#allocation31_spill] sm:$0xff] %v8100_v55  ;;  %v8821_v55 = vld [vmem:[#allocation69_spill] sm:$0xff] }
 0x331   :  { %v2115_v29 = vpop.f32.mrf.mxu0  ;;  %v2471_v45 = vmax.f32 %v8822_v6, %v8821_v55 }
 0x332   :  { %v8104_v60 = vmax.f32 %v2462_v24, %v2115_v29 }
 0x333   :  { %v2117_v43 = vpop.f32.mrf.mxu0 }
 0x334   :  { %8816 = vst [vmem:[#allocation5_spill] sm:$0xff] %v8104_v60 }
 0x335   :  { %v2120_v48 = vpop.f32.mrf.mxu0 }
 0x336   :  { %v8108_v25 = vmax.f32 %v2465_v59, %v2120_v48 }
 0x337   :  { %v2122_v52 = vpop.f32.mrf.mxu0 }
 0x339   :  { %v2123_v51 = vpop.f32.mrf.mxu0 }
 0x33a   :  { %v8112_v22 = vmax.f32 %v2468_v4, %v2123_v51 }
 0x33b   :  { %v2125_v1 = vpop.f32.mrf.mxu0 }
 0x33c   :  { %v6770_v1 = vld [vmem:[%s8678_s3] sm:$0xff]  }
 0x33d   :  { %v2128_v24 = vpop.f32.mrf.mxu0 }
 0x33e   :  { %v8116_v29 = vmax.f32 %v2471_v45, %v2128_v24 }
 0x33f   :  { %v2130_v43 = vpop.f32.mrf.mxu0 }
 0x341   :  { %v2131_v60 = vpop.f32.mrf.mxu0 }
 0x342   :  { %v2329_v52 = vmax.f32 %v7863_v12, %v2131_v60 }
 0x343   :  { %v2133_v63 = vpop.f32.mrf.mxu0 }
 0x345   :  { %v2136_v11 = vpop.f32.mrf.mxu0 }
 0x346   :  { %v2332_v59 = vmax.f32 %v7873_v2, %v2136_v11  ;;  %v2481_v2 = vadd.f32 %v8122_v61, %v2329_v52  ;;  %v6771_v11 = vld [vmem:[%s8678_s3 + $0x10] sm:$0xff]  }
 0x347   :  { %v2138_v48 = vpop.f32.mrf.mxu0 }
 0x348   :  { %v2482_v21 = vadd.f32 %v8122_v61, %v2332_v59  ;;  %v2530_v12 = vmax.f32 %v2481_v2, 0.0 }
 0x349   :  { %v2139_v55 = vpop.f32.mrf.mxu0 }
 0x34a   :  { %v2531_v4 = vmax.f32 %v2482_v21, 0.0  ;;  %v2335_v60 = vmax.f32 %v7882_v57, %v2139_v55  ;;  %v2579_v59 = vpack.c.bf16 %v2530_v12, %v2530_v12 }
 0x34b   :  { %v2141_v51 = vpop.f32.mrf.mxu0 }
 0x34c   :  { %v2582_v6 = vpack.c.bf16 %v2531_v4, %v2531_v4  ;;  %v2483_v48 = vadd.f32 %v8122_v61, %v2335_v60 }
 0x34d   :  { %v2144_v45 = vpop.f32.mrf.mxu0 }
 0x34e   :  { %6102 = vmatmul.mubr.msk.bf16.vlgmr.msra.gmra.mxu1 %vm2592_vm3, %v2582_v6  ;;  %v2532_v57 = vmax.f32 %v2483_v48, 0.0  ;;  %v2338_v55 = vmax.f32 %v7892_v8, %v2144_v45 }
 0x34f   :  { %6106 = vmatpush3.bf16.msra.mxu1 %v6770_v1  ;;  %v2146_v24 = vpop.f32.mrf.mxu0  ;;  %6107 = vmatprep.mubr.msk.bf16.mxu1 %vm6837_vm2, %v8768_v46  ;;  %v6772_v1 = vld [vmem:[%s8678_s3 + $0x18] sm:$0xff]  }
 0x350   :  { %6111 = vmatprep.subr.bf16.mxu1 %v8768_v46  ;;  %v2685_v2 = vpack.c.bf16 %v2532_v57, %v2532_v57  ;;  %v2484_v6 = vadd.f32 %v8122_v61, %v2338_v55 }
 0x351   :  { %v2147_v43 = vpop.f32.mrf.mxu0 }
 0x352   :  { %v2533_v8 = vmax.f32 %v2484_v6, 0.0  ;;  %v2341_v45 = vmax.f32 %v7901_v33, %v2147_v43  ;;  %v6774_v43 = vld [vmem:[%s8678_s3 + $0x28] sm:$0xff]  }
 0x353   :  { %v2149_v63 = vpop.f32.mrf.mxu0 }
 0x354   :  { %v6773_v63 = vld [vmem:[%s8678_s3 + $0x20] sm:$0xff]   ;;  %v2485_v48 = vadd.f32 %v8122_v61, %v2341_v45 }
 0x355   :  { %v2152_v52 = vpop.f32.mrf.mxu0 }
 0x356   :  { %6108 = vmatmul.mubr.msk.bf16.vlgmr.msra.gmra.mxu1 %vm2592_vm3, %v2579_v59  ;;  %v2739_v59 = vpack.c.bf16 %v2533_v8, %v2533_v8  ;;  %v2344_v33 = vmax.f32 %v7911_v14, %v2152_v52  ;;  %v6775_v14 = vld [vmem:[%s8678_s3 + $0x30] sm:$0xff]  }
 0x357   :  { %6112 = vmatpush3.bf16.msra.mxu1 %v6771_v11  ;;  %v2154_v21 = vpop.f32.mrf.mxu0  ;;  %6113 = vmatprep.mubr.msk.bf16.mxu1 %vm6837_vm2, %v8768_v46 }
 0x358   :  { %6117 = vmatprep.subr.bf16.mxu1 %v8768_v46  ;;  %v2534_v21 = vmax.f32 %v2485_v48, 0.0  ;;  %v2486_v55 = vadd.f32 %v8122_v61, %v2344_v33 }
 0x359   :  { %v2155_v4 = vpop.f32.mrf.mxu0 }
 0x35a   :  { %v2793_v57 = vpack.c.bf16 %v2534_v21, %v2534_v21 }
 0x35b   :  { %v2157_v51 = vpop.f32.mrf.mxu0 }
 0x35c   :  { %v2535_v51 = vmax.f32 %v2486_v55, 0.0  ;;  %v6779_v55 = vld [vmem:[%s8678_s3 + $0x50] sm:$0xff]  }
 0x35d   :  { %v2160_v24 = vpop.f32.mrf.mxu0 }
 0x35e   :  { %6114 = vmatmul.mubr.msk.bf16.vlgmr.msra.gmra.mxu1 %vm2592_vm3, %v2685_v2  ;;  %v2847_v52 = vpack.c.bf16 %v2535_v51, %v2535_v51 }
 0x35f   :  { %6118 = vmatpush3.bf16.msra.mxu1 %v6772_v1  ;;  %v2162_v12 = vpop.f32.mrf.mxu0  ;;  %6119 = vmatprep.mubr.msk.bf16.mxu1 %vm6837_vm2, %v8768_v46  ;;  %v2347_v1 = vmax.f32 %v7920_v13, %v2155_v4  ;;  %v6776_v13 = vld [vmem:[%s8678_s3 + $0x38] sm:$0xff]  }
 0x360   :  { %6123 = vmatprep.subr.bf16.mxu1 %v8768_v46  ;;  %v2350_v12 = vmax.f32 %v7930_v20, %v2160_v24  ;;  %v6777_v20 = vld [vmem:[%s8678_s3 + $0x40] sm:$0xff]  }
 0x361   :  { %v2163_v60 = vpop.f32.mrf.mxu0  ;;  %v2487_v2 = vadd.f32 %v8122_v61, %v2347_v1 }
 0x362   :  { %v2488_v8 = vadd.f32 %v8122_v61, %v2350_v12 }
 0x363   :  { %v2165_v11 = vpop.f32.mrf.mxu0  ;;  %v2536_v6 = vmax.f32 %v2487_v2, 0.0 }
 0x364   :  { %v2537_v45 = vmax.f32 %v2488_v8, 0.0 }
 0x365   :  { %v2901_v4 = vpack.c.bf16 %v2536_v6, %v2536_v6 }
 0x366   :  { %6120 = vmatmul.mubr.msk.bf16.vlgmr.msra.gmra.mxu1 %vm2592_vm3, %v2739_v59  ;;  %v2955_v24 = vpack.c.bf16 %v2537_v45, %v2537_v45  ;;  %v8823_v59 = vld [vmem:[#allocation26_spill] sm:$0xff] }
 0x367   :  { %6124 = vmatpush3.bf16.msra.mxu1 %v6773_v63  ;;  %6125 = vmatprep.mubr.msk.bf16.mxu1 %vm6837_vm2, %v8768_v46  ;;  %v2353_v63 = vmax.f32 %v7936_v16, %v2163_v60  ;;  %v2356_v48 = vmax.f32 %v7942_v30, %v8823_v59  ;;  %v6778_v16 = vld [vmem:[%s8678_s3 + $0x48] sm:$0xff]  }
 0x368   :  { %6129 = vmatprep.subr.bf16.mxu1 %v8768_v46 }
 0x369   :  { %v2489_v11 = vadd.f32 %v8122_v61, %v2353_v63  ;;  %v2490_v60 = vadd.f32 %v8122_v61, %v2356_v48 }
 0x36b   :  { %v2538_v21 = vmax.f32 %v2489_v11, 0.0 }
 0x36d   :  { %v3009_v33 = vpack.c.bf16 %v2538_v21, %v2538_v21 }
 0x36e   :  { %6126 = vmatmul.mubr.msk.bf16.vlgmr.msra.gmra.mxu1 %vm2592_vm3, %v2793_v57  ;;  %v8824_v57 = vld [vmem:[#allocation28_spill] sm:$0xff] }
 0x36f   :  { %6130 = vmatpush3.bf16.msra.mxu1 %v6774_v43  ;;  %6131 = vmatprep.mubr.msk.bf16.mxu1 %vm6837_vm2, %v8768_v46  ;;  %v2539_v43 = vmax.f32 %v2490_v60, 0.0  ;;  %v2359_v30 = vmax.f32 %v7948_v47, %v8824_v57  ;;  %v6780_v47 = vld [vmem:[%s8678_s3 + $0x58] sm:$0xff]  }
 0x370   :  { %6135 = vmatprep.subr.bf16.mxu1 %v8768_v46 }
 0x371   :  { %v3063_v51 = vpack.c.bf16 %v2539_v43, %v2539_v43  ;;  %v2491_v1 = vadd.f32 %v8122_v61, %v2359_v30  ;;  %v8829_v30 = vld [vmem:[#allocation38_spill] sm:$0xff] }
 0x376   :  { %6132 = vmatmul.mubr.msk.bf16.vlgmr.msra.gmra.mxu1 %vm2592_vm3, %v2847_v52  ;;  %v8825_v52 = vld [vmem:[#allocation30_spill] sm:$0xff] }
 0x377   :  { %6136 = vmatpush3.bf16.msra.mxu1 %v6775_v14  ;;  %6137 = vmatprep.mubr.msk.bf16.mxu1 %vm6837_vm2, %v8768_v46  ;;  %v2540_v14 = vmax.f32 %v2491_v1, 0.0  ;;  %v2362_v2 = vmax.f32 %v7954_v10, %v8825_v52  ;;  %v6781_v10 = vld [vmem:[%s8678_s3 + $0x60] sm:$0xff]   ;;  %v8830_v52 = vld [vmem:[#allocation40_spill] sm:$0xff] }
 0x378   :  { %6141 = vmatprep.subr.bf16.mxu1 %v8768_v46 }
 0x379   :  { %v3117_v6 = vpack.c.bf16 %v2540_v14, %v2540_v14  ;;  %v2492_v12 = vadd.f32 %v8122_v61, %v2362_v2  ;;  %v2377_v2 = vmax.f32 %v7984_v38, %v8830_v52  ;;  %v6786_v38 = vld [vmem:[%s8678_s3 + $0x88] sm:$0xff]   ;;  %v8836_v52 = vld [vmem:[#allocation52_spill] sm:$0xff] }
 0x37e   :  { %6138 = vmatmul.mubr.msk.bf16.vlgmr.msra.gmra.mxu1 %vm2592_vm3, %v2901_v4  ;;  %v8826_v4 = vld [vmem:[#allocation32_spill] sm:$0xff] }
 0x37f   :  { %6142 = vmatpush3.bf16.msra.mxu1 %v6776_v13  ;;  %6143 = vmatprep.mubr.msk.bf16.mxu1 %vm6837_vm2, %v8768_v46  ;;  %v2541_v13 = vmax.f32 %v2492_v12, 0.0  ;;  %v2365_v8 = vmax.f32 %v7960_v26, %v8826_v4  ;;  %v6782_v26 = vld [vmem:[%s8678_s3 + $0x68] sm:$0xff]  }
 0x380   :  { %6147 = vmatprep.subr.bf16.mxu1 %v8768_v46 }
 0x381   :  { %v3171_v45 = vpack.c.bf16 %v2541_v13, %v2541_v13  ;;  %v2493_v63 = vadd.f32 %v8122_v61, %v2365_v8  ;;  %v8831_v13 = vld [vmem:[#allocation42_spill] sm:$0xff] }
 0x382   :  { %v2380_v4 = vmax.f32 %v7990_v40, %v8831_v13  ;;  %v6787_v40 = vld [vmem:[%s8678_s3 + $0x90] sm:$0xff]  }
 0x386   :  { %6144 = vmatmul.mubr.msk.bf16.vlgmr.msra.gmra.mxu1 %vm2592_vm3, %v2955_v24  ;;  %v8827_v24 = vld [vmem:[#allocation34_spill] sm:$0xff] }
 0x387   :  { %6148 = vmatpush3.bf16.msra.mxu1 %v6777_v20  ;;  %6149 = vmatprep.mubr.msk.bf16.mxu1 %vm6837_vm2, %v8768_v46  ;;  %v2542_v20 = vmax.f32 %v2493_v63, 0.0  ;;  %v2368_v11 = vmax.f32 %v7966_v28, %v8827_v24  ;;  %v6783_v28 = vld [vmem:[%s8678_s3 + $0x70] sm:$0xff]  }
 0x388   :  { %6153 = vmatprep.subr.bf16.mxu1 %v8768_v46  ;;  %v8832_v63 = vld [vmem:[#allocation44_spill] sm:$0xff] }
 0x389   :  { %v3225_v59 = vpack.c.bf16 %v2542_v20, %v2542_v20  ;;  %v2494_v48 = vadd.f32 %v8122_v61, %v2368_v11  ;;  %v2383_v20 = vmax.f32 %v7994_v50, %v8832_v63  ;;  %v6788_v50 = vld [vmem:[%s8678_s3 + $0x98] sm:$0xff]  }
 0x38b   :  { %v2543_v21 = vmax.f32 %v2494_v48, 0.0  ;;  %v2499_v11 = vadd.f32 %v8122_v61, %v2383_v20 }
 0x38e   :  { %6150 = vmatmul.mubr.msk.bf16.vlgmr.msra.gmra.mxu1 %vm2592_vm3, %v3009_v33  ;;  %v3279_v33 = vpack.c.bf16 %v2543_v21, %v2543_v21 }
 0x38f   :  { %6154 = vmatpush3.bf16.msra.mxu1 %v6778_v16  ;;  %6155 = vmatprep.mubr.msk.bf16.mxu1 %vm6837_vm2, %v8768_v46  ;;  %v8828_v16 = vld [vmem:[#allocation36_spill] sm:$0xff] }
 0x390   :  { %6159 = vmatprep.subr.bf16.mxu1 %v8768_v46  ;;  %v2371_v60 = vmax.f32 %v7972_v32, %v8828_v16  ;;  %v6784_v32 = vld [vmem:[%s8678_s3 + $0x78] sm:$0xff]  }
 0x392   :  { %v2495_v43 = vadd.f32 %v8122_v61, %v2371_v60 }
 0x394   :  { %v2544_v57 = vmax.f32 %v2495_v43, 0.0 }
 0x396   :  { %6156 = vmatmul.mubr.msk.bf16.vlgmr.msra.gmra.mxu1 %vm2592_vm3, %v3063_v51  ;;  %v3333_v51 = vpack.c.bf16 %v2544_v57, %v2544_v57 }
 0x397   :  { %6160 = vmatpush3.bf16.msra.mxu1 %v6779_v55  ;;  %6161 = vmatprep.mubr.msk.bf16.mxu1 %vm6837_vm2, %v8768_v46  ;;  %v2374_v55 = vmax.f32 %v7978_v34, %v8829_v30  ;;  %v6785_v34 = vld [vmem:[%s8678_s3 + $0x80] sm:$0xff]  }
 0x398   :  { %6165 = vmatprep.subr.bf16.mxu1 %v8768_v46 }
 0x399   :  { %v2496_v1 = vadd.f32 %v8122_v61, %v2374_v55  ;;  %v8835_v55 = vld [vmem:[#allocation50_spill] sm:$0xff] }
 0x39b   :  { %v2545_v14 = vmax.f32 %v2496_v1, 0.0 }
 0x39e   :  { %6162 = vmatmul.mubr.msk.bf16.vlgmr.msra.gmra.mxu1 %vm2592_vm3, %v3117_v6  ;;  %v2497_v6 = vadd.f32 %v8122_v61, %v2377_v2  ;;  %v2395_v2 = vmax.f32 %v8012_v62, %v8836_v52  ;;  %v6792_v62 = vld [vmem:[%s8678_s3 + $0xb8] sm:$0xff]  }
 0x39f   :  { %6166 = vmatpush3.bf16.msra.mxu1 %v6780_v47  ;;  %6167 = vmatprep.mubr.msk.bf16.mxu1 %vm6837_vm2, %v8768_v46  ;;  %v3387_v47 = vpack.c.bf16 %v2545_v14, %v2545_v14 }
 0x3a0   :  { %6171 = vmatprep.subr.bf16.mxu1 %v8768_v46  ;;  %v2546_v12 = vmax.f32 %v2497_v6, 0.0 }
 0x3a2   :  { %v3441_v8 = vpack.c.bf16 %v2546_v12, %v2546_v12  ;;  %v8837_v12 = vld [vmem:[#allocation54_spill] sm:$0xff] }
 0x3a3   :  { %v2398_v13 = vmax.f32 %v8016_v44, %v8837_v12  ;;  %v6793_v44 = vld [vmem:[%s8678_s3 + $0xc0] sm:$0xff]  }
 0x3a6   :  { %6168 = vmatmul.mubr.msk.bf16.vlgmr.msra.gmra.mxu1 %vm2592_vm3, %v3171_v45 }
 0x3a7   :  { %6172 = vmatpush3.bf16.msra.mxu1 %v6781_v10  ;;  %6173 = vmatprep.mubr.msk.bf16.mxu1 %vm6837_vm2, %v8768_v46  ;;  %v2498_v10 = vadd.f32 %v8122_v61, %v2380_v4 }
 0x3a8   :  { %6177 = vmatprep.subr.bf16.mxu1 %v8768_v46 }
 0x3a9   :  { %v2547_v45 = vmax.f32 %v2498_v10, 0.0  ;;  %v8838_v10 = vld [vmem:[#allocation56_spill] sm:$0xff] }
 0x3ab   :  { %v3495_v24 = vpack.c.bf16 %v2547_v45, %v2547_v45  ;;  %v2401_v45 = vmax.f32 %v8020_v42, %v8838_v10  ;;  %v6794_v42 = vld [vmem:[%s8678_s3 + $0xc8] sm:$0xff]  }
 0x3ad   :  { %v2505_v20 = vadd.f32 %v8122_v61, %v2401_v45 }
 0x3ae   :  { %6174 = vmatmul.mubr.msk.bf16.vlgmr.msra.gmra.mxu1 %vm2592_vm3, %v3225_v59  ;;  %v8833_v59 = vld [vmem:[#allocation46_spill] sm:$0xff] }
 0x3af   :  { %6178 = vmatpush3.bf16.msra.mxu1 %v6782_v26  ;;  %6179 = vmatprep.mubr.msk.bf16.mxu1 %vm6837_vm2, %v8768_v46  ;;  %v2548_v26 = vmax.f32 %v2499_v11, 0.0  ;;  %v2386_v48 = vmax.f32 %v7998_v54, %v8833_v59  ;;  %v6789_v54 = vld [vmem:[%s8678_s3 + $0xa0] sm:$0xff]  }
 0x3b0   :  { %6183 = vmatprep.subr.bf16.mxu1 %v8768_v46 }
 0x3b1   :  { %v3549_v21 = vpack.c.bf16 %v2548_v26, %v2548_v26  ;;  %v2500_v16 = vadd.f32 %v8122_v61, %v2386_v48 }
 0x3b3   :  { %v2549_v60 = vmax.f32 %v2500_v16, 0.0 }
 0x3b5   :  { %v3603_v43 = vpack.c.bf16 %v2549_v60, %v2549_v60 }
 0x3b6   :  { %6180 = vmatmul.mubr.msk.bf16.vlgmr.msra.gmra.mxu1 %vm2592_vm3, %v3279_v33 }
 0x3b7   :  { %6184 = vmatpush3.bf16.msra.mxu1 %v6783_v28  ;;  %6185 = vmatprep.mubr.msk.bf16.mxu1 %vm6837_vm2, %v8768_v46  ;;  %v8834_v28 = vld [vmem:[#allocation48_spill] sm:$0xff] }
 0x3b8   :  { %6189 = vmatprep.subr.bf16.mxu1 %v8768_v46  ;;  %v2389_v33 = vmax.f32 %v8004_v56, %v8834_v28  ;;  %v6790_v56 = vld [vmem:[%s8678_s3 + $0xa8] sm:$0xff]   ;;  %v6795_v28 = vld [vmem:[%s8678_s3 + $0xd0] sm:$0xff]  }
 0x3ba   :  { %v2501_v57 = vadd.f32 %v8122_v61, %v2389_v33 }
 0x3bc   :  { %v2550_v30 = vmax.f32 %v2501_v57, 0.0 }
 0x3be   :  { %6186 = vmatmul.mubr.msk.bf16.vlgmr.msra.gmra.mxu1 %vm2592_vm3, %v3333_v51  ;;  %v3657_v51 = vpack.c.bf16 %v2550_v30, %v2550_v30 }
 0x3bf   :  { %6190 = vmatpush3.bf16.msra.mxu1 %v6784_v32  ;;  %6191 = vmatprep.mubr.msk.bf16.mxu1 %vm6837_vm2, %v8768_v46  ;;  %v2392_v32 = vmax.f32 %v8008_v58, %v8835_v55  ;;  %v6791_v58 = vld [vmem:[%s8678_s3 + $0xb0] sm:$0xff]   ;;  %v8841_v55 = vld [vmem:[#allocation62_spill] sm:$0xff] }
 0x3c0   :  { %6195 = vmatprep.subr.bf16.mxu1 %v8768_v46 }
 0x3c1   :  { %v2502_v1 = vadd.f32 %v8122_v61, %v2392_v32  ;;  %v2410_v32 = vmax.f32 %v8032_v37, %v8841_v55 }
 0x3c3   :  { %v2551_v14 = vmax.f32 %v2502_v1, 0.0  ;;  %v6796_v1 = vld [vmem:[%s8678_s3 + $0xd8] sm:$0xff]   ;;  %v2508_v52 = vadd.f32 %v8122_v61, %v2410_v32 }
 0x3c5   :  { %v2557_v37 = vmax.f32 %v2508_v52, 0.0 }
 0x3c6   :  { %6192 = vmatmul.mubr.msk.bf16.vlgmr.msra.gmra.mxu1 %vm2592_vm3, %v3387_v47  ;;  %v2503_v47 = vadd.f32 %v8122_v61, %v2395_v2 }
 0x3c7   :  { %6196 = vmatpush3.bf16.msra.mxu1 %v6785_v34  ;;  %6197 = vmatprep.mubr.msk.bf16.mxu1 %vm6837_vm2, %v8768_v46  ;;  %v3711_v34 = vpack.c.bf16 %v2551_v14, %v2551_v14 }
 0x3c8   :  { %6201 = vmatprep.subr.bf16.mxu1 %v8768_v46  ;;  %v2552_v6 = vmax.f32 %v2503_v47, 0.0  ;;  %v8842_v47 = vld [vmem:[#allocation64_spill] sm:$0xff] }
 0x3ca   :  { %v3765_v4 = vpack.c.bf16 %v2552_v6, %v2552_v6  ;;  %v2413_v6 = vmax.f32 %v8036_v19, %v8842_v47  ;;  %v6801_v47 = vld [vmem:[%s8678_s3 + $0x100] sm:$0xff]  }
 0x3ce   :  { %6198 = vmatmul.mubr.msk.bf16.vlgmr.msra.gmra.mxu1 %vm2592_vm3, %v3441_v8 }
 0x3cf   :  { %6202 = vmatpush3.bf16.msra.mxu1 %v6786_v38  ;;  %6203 = vmatprep.mubr.msk.bf16.mxu1 %vm6837_vm2, %v8768_v46  ;;  %v2504_v38 = vadd.f32 %v8122_v61, %v2398_v13 }
 0x3d0   :  { %6207 = vmatprep.subr.bf16.mxu1 %v8768_v46 }
 0x3d1   :  { %v2553_v8 = vmax.f32 %v2504_v38, 0.0  ;;  %v2509_v38 = vadd.f32 %v8122_v61, %v2413_v6 }
 0x3d3   :  { %v3819_v63 = vpack.c.bf16 %v2553_v8, %v2553_v8  ;;  %v2558_v19 = vmax.f32 %v2509_v38, 0.0 }
 0x3d6   :  { %6204 = vmatmul.mubr.msk.bf16.vlgmr.msra.gmra.mxu1 %vm2592_vm3, %v3495_v24  ;;  %v8839_v24 = vld [vmem:[#allocation58_spill] sm:$0xff] }
 0x3d7   :  { %6208 = vmatpush3.bf16.msra.mxu1 %v6787_v40  ;;  %6209 = vmatprep.mubr.msk.bf16.mxu1 %vm6837_vm2, %v8768_v46  ;;  %v2554_v40 = vmax.f32 %v2505_v20, 0.0  ;;  %v2404_v11 = vmax.f32 %v8024_v27, %v8839_v24  ;;  %v6798_v24 = vld [vmem:[%s8678_s3 + $0xe8] sm:$0xff]  }
 0x3d8   :  { %6213 = vmatprep.subr.bf16.mxu1 %v8768_v46 }
 0x3d9   :  { %v3873_v26 = vpack.c.bf16 %v2554_v40, %v2554_v40  ;;  %v2506_v59 = vadd.f32 %v8122_v61, %v2404_v11  ;;  %v4089_v11 = vpack.c.bf16 %v2558_v19, %v2558_v19 }
 0x3de   :  { %6210 = vmatmul.mubr.msk.bf16.vlgmr.msra.gmra.mxu1 %vm2592_vm3, %v3549_v21  ;;  %v8840_v21 = vld [vmem:[#allocation60_spill] sm:$0xff] }
 0x3df   :  { %6214 = vmatpush3.bf16.msra.mxu1 %v6788_v50  ;;  %6215 = vmatprep.mubr.msk.bf16.mxu1 %vm6837_vm2, %v8768_v46  ;;  %v2555_v50 = vmax.f32 %v2506_v59, 0.0  ;;  %v2407_v27 = vmax.f32 %v8028_v23, %v8840_v21 }
 0x3e0   :  { %6219 = vmatprep.subr.bf16.mxu1 %v8768_v46 }
 0x3e1   :  { %v3927_v33 = vpack.c.bf16 %v2555_v50, %v2555_v50  ;;  %v8844_v50 = vld [vmem:[#allocation68_spill] sm:$0xff] }
 0x3e2   :  { %v2419_v21 = vmax.f32 %v8044_v3, %v8844_v50 }
 0x3e6   :  { %6216 = vmatmul.mubr.msk.bf16.vlgmr.msra.gmra.mxu1 %vm2592_vm3, %v3603_v43 }
 0x3e7   :  { %6220 = vmatpush3.bf16.msra.mxu1 %v6789_v54  ;;  %6221 = vmatprep.mubr.msk.bf16.mxu1 %vm6837_vm2, %v8768_v46  ;;  %v2507_v54 = vadd.f32 %v8122_v61, %v2407_v27 }
 0x3e8   :  { %6225 = vmatprep.subr.bf16.mxu1 %v8768_v46 }
 0x3e9   :  { %v2556_v23 = vmax.f32 %v2507_v54, 0.0 }
 0x3eb   :  { %v3981_v14 = vpack.c.bf16 %v2556_v23, %v2556_v23 }
 0x3ee   :  { %6222 = vmatmul.mubr.msk.bf16.vlgmr.msra.gmra.mxu1 %vm2592_vm3, %v3657_v51 }
 0x3ef   :  { %6226 = vmatpush3.bf16.msra.mxu1 %v6790_v56  ;;  %6227 = vmatprep.mubr.msk.bf16.mxu1 %vm6837_vm2, %v8768_v46 }
 0x3f0   :  { %6231 = vmatprep.subr.bf16.mxu1 %v8768_v46 }
 0x3f6   :  { %6228 = vmatmul.mubr.msk.bf16.vlgmr.msra.gmra.mxu1 %vm2592_vm3, %v3711_v34 }
 0x3f7   :  { %6232 = vmatpush3.bf16.msra.mxu1 %v6791_v58  ;;  %6233 = vmatprep.mubr.msk.bf16.mxu1 %vm6837_vm2, %v8768_v46 }
 0x3f8   :  { %6237 = vmatprep.subr.bf16.mxu1 %v8768_v46 }
 0x3fe   :  { %6234 = vmatmul.mubr.msk.bf16.vlgmr.msra.gmra.mxu1 %vm2592_vm3, %v3765_v4  ;;  %v4035_v4 = vpack.c.bf16 %v2557_v37, %v2557_v37 }
 0x3ff   :  { %6238 = vmatpush3.bf16.msra.mxu1 %v6792_v62  ;;  %6239 = vmatprep.mubr.msk.bf16.mxu1 %vm6837_vm2, %v8768_v46  ;;  %v6797_v62 = vld [vmem:[%s8678_s3 + $0xe0] sm:$0xff]  }
 0x400   :  { %6243 = vmatprep.subr.bf16.mxu1 %v8768_v46 }
 0x406   :  { %6240 = vmatmul.mubr.msk.bf16.vlgmr.msra.gmra.mxu1 %vm2592_vm3, %v3819_v63 }
 0x407   :  { %6244 = vmatpush3.bf16.msra.mxu1 %v6793_v44  ;;  %6245 = vmatprep.mubr.msk.bf16.mxu1 %vm6837_vm2, %v8768_v46  ;;  %v8843_v44 = vld [vmem:[#allocation66_spill] sm:$0xff] }
 0x408   :  { %6249 = vmatprep.subr.bf16.mxu1 %v8768_v46  ;;  %v2416_v63 = vmax.f32 %v8040_v9, %v8843_v44 }
 0x40e   :  { %v2630_v48 = vpop.f32.mrf.mxu1  ;;  %6246 = vmatmul.mubr.msk.bf16.vlgmr.msra.gmra.mxu1 %vm2592_vm3, %v3873_v26 }
 0x40f   :  { %6250 = vmatpush3.bf16.msra.mxu1 %v6794_v42  ;;  %6251 = vmatprep.mubr.msk.bf16.mxu1 %vm6837_vm2, %v8768_v46  ;;  %v2510_v42 = vadd.f32 %v8122_v61, %v2416_v63 }
 0x410   :  { %v6103_v16 = vpop.f32.mrf.mxu1  ;;  %6255 = vmatprep.subr.bf16.mxu1 %v8768_v46 }
 0x411   :  { %v2559_v9 = vmax.f32 %v2510_v42, 0.0 }
 0x412   :  { %v2633_v60 = vpop.f32.mrf.mxu1 }
 0x413   :  { %v6799_v60 = vld [vmem:[%s8678_s3 + $0xf0] sm:$0xff]  }
 0x414   :  { %v6104_v43 = vpop.f32.mrf.mxu1 }
 0x416   :  { %v2679_v57 = vpop.f32.mrf.mxu1  ;;  %6252 = vmatmul.mubr.msk.bf16.vlgmr.msra.gmra.mxu1 %vm2592_vm3, %v3927_v33  ;;  %v2511_v33 = vadd.f32 %v8122_v61, %v2419_v21 }
 0x417   :  { %v2680_v30 = vadd.f32 %v2679_v57, %v2630_v48  ;;  %6256 = vmatpush3.bf16.msra.mxu1 %v6795_v28  ;;  %6257 = vmatprep.mubr.msk.bf16.mxu1 %vm6837_vm2, %v8768_v46  ;;  %v4143_v28 = vpack.c.bf16 %v2559_v9, %v2559_v9 }
 0x418   :  { %v6109_v56 = vpop.f32.mrf.mxu1  ;;  %6261 = vmatprep.subr.bf16.mxu1 %v8768_v46  ;;  %v2560_v3 = vmax.f32 %v2511_v33, 0.0 }
 0x419   :  { %v6800_v56 = vld [vmem:[%s8678_s3 + $0xf8] sm:$0xff]  }
 0x41a   :  { %v2682_v51 = vpop.f32.mrf.mxu1 }
 0x41b   :  { %v4197_v51 = vpack.c.bf16 %v2560_v3, %v2560_v3  ;;  %v6805_v3 = vld [vmem:[%s8678_s3 + $0x120] sm:$0xff]  }
 0x41c   :  { %v6110_v2 = vpop.f32.mrf.mxu1 }
 0x41e   :  { %v2732_v58 = vpop.f32.mrf.mxu1  ;;  %6258 = vmatmul.mubr.msk.bf16.vlgmr.msra.gmra.mxu1 %vm2592_vm3, %v3981_v14 }
 0x41f   :  { %v2738_v34 = vadd.f32 %v2732_v58, %v2680_v30  ;;  %6262 = vmatpush3.bf16.msra.mxu1 %v6796_v1  ;;  %6263 = vmatprep.mubr.msk.bf16.mxu1 %vm6837_vm2, %v8768_v46  ;;  %v8845_v30 = vld [vmem:[#allocation70_spill] sm:$0xff]  ;;  %v2425_v58 = vmax.f32 %v8052_v49, %v7866_v41  ;;  %v2428_v49 = vmax.f32 %v8056_v15, %v7878_v35 }
 0x420   :  { %v6115_v12 = vpop.f32.mrf.mxu1  ;;  %6267 = vmatprep.subr.bf16.mxu1 %v8768_v46  ;;  %v2422_v23 = vmax.f32 %v8048_v0, %v8845_v30  ;;  %v2431_v15 = vmax.f32 %v8060_v53, %v7885_v36  ;;  %v2434_v53 = vmax.f32 %v8064_v17, %v7897_v39  ;;  %v2437_v17 = vmax.f32 %v8068_v31, %v7904_v5 }
 0x421   :  { %v2513_v12 = vadd.f32 %v8122_v61, %v2425_v58  ;;  %v2514_v19 = vadd.f32 %v8122_v61, %v2428_v49  ;;  %v2440_v31 = vmax.f32 %v8072_v18, %v7916_v7  ;;  %v8846_v18 = vld [vmem:[#allocation71_spill] sm:$0xff] }
 0x422   :  { %v2735_v13 = vpop.f32.mrf.mxu1  ;;  %v2512_v1 = vadd.f32 %v8122_v61, %v2422_v23  ;;  %v2517_v23 = vadd.f32 %v8122_v61, %v2437_v17 }
 0x423   :  { %v2562_v41 = vmax.f32 %v2513_v12, 0.0  ;;  %v2563_v35 = vmax.f32 %v2514_v19, 0.0 }
 0x424   :  { %v6116_v8 = vpop.f32.mrf.mxu1  ;;  %v2561_v0 = vmax.f32 %v2512_v1, 0.0  ;;  %v2566_v5 = vmax.f32 %v2517_v23, 0.0 }
 0x425   :  { %v4359_v42 = vpack.c.bf16 %v2563_v35, %v2563_v35 }
 0x426   :  { %v2786_v10 = vpop.f32.mrf.mxu1  ;;  %6264 = vmatmul.mubr.msk.bf16.vlgmr.msra.gmra.mxu1 %vm2592_vm3, %v4035_v4  ;;  %v4251_v6 = vpack.c.bf16 %v2561_v0, %v2561_v0 }
 0x427   :  { %v2792_v45 = vadd.f32 %v2786_v10, %v2738_v34  ;;  %6268 = vmatpush3.bf16.msra.mxu1 %v6797_v62  ;;  %6269 = vmatprep.mubr.msk.bf16.mxu1 %vm6837_vm2, %v8768_v46  ;;  %v6802_v10 = vld [vmem:[%s8678_s3 + $0x108] sm:$0xff]  }
 0x428   :  { %v6121_v20 = vpop.f32.mrf.mxu1  ;;  %6273 = vmatprep.subr.bf16.mxu1 %v8768_v46 }
 0x42a   :  { %v2789_v40 = vpop.f32.mrf.mxu1 }
 0x42c   :  { %v6122_v26 = vpop.f32.mrf.mxu1 }
 0x42d   :  { %v2515_v26 = vadd.f32 %v8122_v61, %v2431_v15 }
 0x42e   :  { %v2840_v59 = vpop.f32.mrf.mxu1  ;;  %6270 = vmatmul.mubr.msk.bf16.vlgmr.msra.gmra.mxu1 %vm2592_vm3, %v4089_v11  ;;  %v6803_v11 = vld [vmem:[%s8678_s3 + $0x110] sm:$0xff]  }
 0x42f   :  { %v2846_v48 = vadd.f32 %v2840_v59, %v2792_v45  ;;  %6274 = vmatpush3.bf16.msra.mxu1 %v6798_v24  ;;  %6275 = vmatprep.mubr.msk.bf16.mxu1 %vm6837_vm2, %v8768_v46  ;;  %v4305_v45 = vpack.c.bf16 %v2562_v41, %v2562_v41  ;;  %v2564_v36 = vmax.f32 %v2515_v26, 0.0  ;;  %v8850_v26 = vld [vmem:[#allocation73_spill] sm:$0xff] }
 0x430   :  { %v6127_v27 = vpop.f32.mrf.mxu1  ;;  %6279 = vmatprep.subr.bf16.mxu1 %v8768_v46 }
 0x431   :  { %v6804_v27 = vld [vmem:[%s8678_s3 + $0x118] sm:$0xff]  }
 0x432   :  { %v2843_v16 = vpop.f32.mrf.mxu1 }
 0x433   :  { %v4413_v16 = vpack.c.bf16 %v2564_v36, %v2564_v36 }
 0x434   :  { %v6128_v54 = vpop.f32.mrf.mxu1 }
 0x436   :  { %v2894_v43 = vpop.f32.mrf.mxu1  ;;  %6276 = vmatmul.mubr.msk.bf16.vlgmr.msra.gmra.mxu1 %vm2592_vm3, %v4143_v28 }
 0x437   :  { %v2900_v57 = vadd.f32 %v2894_v43, %v2846_v48  ;;  %6280 = vmatpush3.bf16.msra.mxu1 %v6799_v60  ;;  %6281 = vmatprep.mubr.msk.bf16.mxu1 %vm6837_vm2, %v8768_v46  ;;  %v2516_v60 = vadd.f32 %v8122_v61, %v2434_v53  ;;  %v6809_v53 = vld [vmem:[%s8678_s3 + $0x140] sm:$0xff]  }
 0x438   :  { %v6133_v55 = vpop.f32.mrf.mxu1  ;;  %6285 = vmatprep.subr.bf16.mxu1 %v8768_v46 }
 0x439   :  { %v2565_v39 = vmax.f32 %v2516_v60, 0.0 }
 0x43a   :  { %v2897_v32 = vpop.f32.mrf.mxu1 }
 0x43b   :  { %v4467_v30 = vpack.c.bf16 %v2565_v39, %v2565_v39 }
 0x43c   :  { %v6134_v14 = vpop.f32.mrf.mxu1 }
 0x43d   :  { %v6806_v14 = vld [vmem:[%s8678_s3 + $0x128] sm:$0xff]  }
 0x43e   :  { %v2948_v52 = vpop.f32.mrf.mxu1  ;;  %6282 = vmatmul.mubr.msk.bf16.vlgmr.msra.gmra.mxu1 %vm2592_vm3, %v4197_v51 }
 0x43f   :  { %v2954_v2 = vadd.f32 %v2948_v52, %v2900_v57  ;;  %6286 = vmatpush3.bf16.msra.mxu1 %v6800_v56  ;;  %6287 = vmatprep.mubr.msk.bf16.mxu1 %vm6837_vm2, %v8768_v46  ;;  %v4521_v52 = vpack.c.bf16 %v2566_v5, %v2566_v5  ;;  %v8854_v5 = vld [vmem:[#allocation75_spill] sm:$0xff] }
 0x440   :  { %v6139_v34 = vpop.f32.mrf.mxu1  ;;  %6291 = vmatprep.subr.bf16.mxu1 %v8768_v46 }
 0x442   :  { %v2951_v37 = vpop.f32.mrf.mxu1 }
 0x443   :  { %v8847_v37 = vld [vmem:[#allocation25_spill] sm:$0xff] }
 0x444   :  { %v6140_v13 = vpop.f32.mrf.mxu1 }
 0x445   :  { %v6807_v13 = vld [vmem:[%s8678_s3 + $0x130] sm:$0xff]  }
 0x446   :  { %v3002_v62 = vpop.f32.mrf.mxu1  ;;  %6288 = vmatmul.mubr.msk.bf16.vlgmr.msra.gmra.mxu1 %vm2592_vm3, %v4251_v6 }
 0x447   :  { %v3008_v4 = vadd.f32 %v3002_v62, %v2954_v2  ;;  %6292 = vmatpush3.bf16.msra.mxu1 %v6801_v47  ;;  %6293 = vmatprep.mubr.msk.bf16.mxu1 %vm6837_vm2, %v8768_v46  ;;  %v2518_v2 = vadd.f32 %v8122_v61, %v2440_v31  ;;  %v2443_v47 = vmax.f32 %v8847_v37, %v8846_v18  ;;  %v8855_v31 = vld [vmem:[#allocation29_spill] sm:$0xff]  ;;  %v8856_v37 = vld [vmem:[#allocation76_spill] sm:$0xff] }
 0x448   :  { %v6145_v38 = vpop.f32.mrf.mxu1  ;;  %6297 = vmatprep.subr.bf16.mxu1 %v8768_v46 }
 0x449   :  { %v2567_v7 = vmax.f32 %v2518_v2, 0.0 }
 0x44a   :  { %v3005_v8 = vpop.f32.mrf.mxu1 }
 0x44b   :  { %v4575_v62 = vpack.c.bf16 %v2567_v7, %v2567_v7 }
 0x44c   :  { %v6146_v44 = vpop.f32.mrf.mxu1 }
 0x44e   :  { %v3056_v63 = vpop.f32.mrf.mxu1  ;;  %6294 = vmatmul.mubr.msk.bf16.vlgmr.msra.gmra.mxu1 %vm2592_vm3, %v4305_v45  ;;  %v8849_v45 = vld [vmem:[#allocation2_spill] sm:$0xff] }
 0x44f   :  { %v3062_v20 = vadd.f32 %v3056_v63, %v3008_v4  ;;  %6298 = vmatpush3.bf16.msra.mxu1 %v6802_v10  ;;  %6299 = vmatprep.mubr.msk.bf16.mxu1 %vm6837_vm2, %v8768_v46  ;;  %v2519_v4 = vadd.f32 %v8122_v61, %v2443_v47  ;;  %v8848_v10 = vld [vmem:[#allocation72_spill] sm:$0xff] }
 0x450   :  { %v6151_v40 = vpop.f32.mrf.mxu1  ;;  %6303 = vmatprep.subr.bf16.mxu1 %v8768_v46  ;;  %v2446_v19 = vmax.f32 %v8849_v45, %v8848_v10  ;;  %v8857_v47 = vld [vmem:[#allocation4_spill] sm:$0xff]  ;;  %v8858_v45 = vld [vmem:[#allocation77_spill] sm:$0xff] }
 0x451   :  { %v2568_v8 = vmax.f32 %v2519_v4, 0.0 }
 0x452   :  { %v3059_v24 = vpop.f32.mrf.mxu1  ;;  %v2520_v15 = vadd.f32 %v8122_v61, %v2446_v19  ;;  %v8859_v19 = vld [vmem:[#allocation31_spill] sm:$0xff] }
 0x453   :  { %v4629_v35 = vpack.c.bf16 %v2568_v8, %v2568_v8 }
 0x454   :  { %v6152_v59 = vpop.f32.mrf.mxu1 }
 0x455   :  { %v8851_v59 = vld [vmem:[#allocation27_spill] sm:$0xff] }
 0x456   :  { %v3110_v48 = vpop.f32.mrf.mxu1  ;;  %6300 = vmatmul.mubr.msk.bf16.vlgmr.msra.gmra.mxu1 %vm2592_vm3, %v4359_v42  ;;  %v2569_v42 = vmax.f32 %v2520_v15, 0.0 }
 0x457   :  { %v3116_v9 = vadd.f32 %v3110_v48, %v3062_v20  ;;  %6304 = vmatpush3.bf16.msra.mxu1 %v6803_v11  ;;  %6305 = vmatprep.mubr.msk.bf16.mxu1 %vm6837_vm2, %v8768_v46  ;;  %v6808_v20 = vld [vmem:[%s8678_s3 + $0x138] sm:$0xff]   ;;  %v2449_v48 = vmax.f32 %v8851_v59, %v8850_v26  ;;  %v8860_v59 = vld [vmem:[#allocation78_spill] sm:$0xff] }
 0x458   :  { %v6157_v50 = vpop.f32.mrf.mxu1  ;;  %6309 = vmatprep.subr.bf16.mxu1 %v8768_v46 }
 0x459   :  { %v4683_v50 = vpack.c.bf16 %v2569_v42, %v2569_v42 }
 0x45a   :  { %v3113_v21 = vpop.f32.mrf.mxu1 }
 0x45b   :  { %v2521_v21 = vadd.f32 %v8122_v61, %v2449_v48  ;;  %v8861_v48 = vld [vmem:[#allocation5_spill] sm:$0xff] }
 0x45c   :  { %v6158_v28 = vpop.f32.mrf.mxu1 }
 0x45d   :  { %v2570_v28 = vmax.f32 %v2521_v21, 0.0  ;;  %v6834_v21 = vld [vmem:[%s8679_s2] ss:$0 sm:$0xff] }
 0x45e   :  { %v3164_v33 = vpop.f32.mrf.mxu1  ;;  %6306 = vmatmul.mubr.msk.bf16.vlgmr.msra.gmra.mxu1 %vm2592_vm3, %v4413_v16 }
 0x45f   :  { %v3170_v54 = vadd.f32 %v3164_v33, %v3116_v9  ;;  %6310 = vmatpush3.bf16.msra.mxu1 %v6804_v27  ;;  %6311 = vmatprep.mubr.msk.bf16.mxu1 %vm6837_vm2, %v8768_v46  ;;  %v8852_v33 = vld [vmem:[#allocation74_spill] sm:$0xff] }
 0x460   :  { %v6163_v43 = vpop.f32.mrf.mxu1  ;;  %6315 = vmatprep.subr.bf16.mxu1 %v8768_v46 }
 0x462   :  { %v3167_v57 = vpop.f32.mrf.mxu1 }
 0x463   :  { %v6810_v57 = vld [vmem:[%s8678_s3 + $0x148] sm:$0xff]  }
 0x464   :  { %v6164_v55 = vpop.f32.mrf.mxu1 }
 0x466   :  { %v3218_v32 = vpop.f32.mrf.mxu1  ;;  %6312 = vmatmul.mubr.msk.bf16.vlgmr.msra.gmra.mxu1 %vm2592_vm3, %v4467_v30 }
 0x467   :  { %v3224_v56 = vadd.f32 %v3218_v32, %v3170_v54  ;;  %6316 = vmatpush3.bf16.msra.mxu1 %v6805_v3  ;;  %6317 = vmatprep.mubr.msk.bf16.mxu1 %vm6837_vm2, %v8768_v46  ;;  %v8853_v54 = vld [vmem:[#allocation3_spill] sm:$0xff]  ;;  %v4737_v3 = vpack.c.bf16 %v2570_v28, %v2570_v28 }
 0x468   :  { %v6169_v51 = vpop.f32.mrf.mxu1  ;;  %6321 = vmatprep.subr.bf16.mxu1 %v8768_v46  ;;  %v2452_v39 = vmax.f32 %v8853_v54, %v8852_v33  ;;  %v8862_v54 = vld [vmem:[#allocation79_spill] sm:$0xff] }
 0x469   :  { %v2455_v51 = vmax.f32 %v8855_v31, %v8854_v5 }
 0x46a   :  { %v3221_v1 = vpop.f32.mrf.mxu1  ;;  %v2522_v30 = vadd.f32 %v8122_v61, %v2452_v39  ;;  %v2467_v39 = vmax.f32 %v8108_v25, %v8862_v54  ;;  %v6818_v54 = vld [vmem:[%s8680_s5 + $0x38] sm:$0xff]  }
 0x46c   :  { %v6170_v0 = vpop.f32.mrf.mxu1 }
 0x46d   :  { %v2523_v0 = vadd.f32 %v8122_v61, %v2455_v51 }
 0x46e   :  { %v3272_v58 = vpop.f32.mrf.mxu1  ;;  %6318 = vmatmul.mubr.msk.bf16.vlgmr.msra.gmra.mxu1 %vm2592_vm3, %v4521_v52  ;;  %v6811_v52 = vld [vmem:[%s8678_s3 + $0x150] sm:$0xff]  }
 0x46f   :  { %v3278_v34 = vadd.f32 %v3272_v58, %v3224_v56  ;;  %6322 = vmatpush3.bf16.msra.mxu1 %v6806_v14  ;;  %6323 = vmatprep.mubr.msk.bf16.mxu1 %vm6837_vm2, %v8768_v46  ;;  %v2571_v56 = vmax.f32 %v2522_v30, 0.0  ;;  %v2572_v18 = vmax.f32 %v2523_v0, 0.0  ;;  %v2527_v30 = vadd.f32 %v6834_v21, %v2467_v39 }
 0x470   :  { %v6175_v6 = vpop.f32.mrf.mxu1  ;;  %6327 = vmatprep.subr.bf16.mxu1 %v8768_v46 }
 0x471   :  { %v4791_v2 = vpack.c.bf16 %v2571_v56, %v2571_v56  ;;  %v2458_v6 = vmax.f32 %v8857_v47, %v8856_v37  ;;  %v4845_v4 = vpack.c.bf16 %v2572_v18, %v2572_v18  ;;  %v2576_v25 = vmax.f32 %v2527_v30, 0.0  ;;  %v8863_v56 = vld [vmem:[#allocation80_spill] sm:$0xff]  ;;  %v6817_v47 = vld [vmem:[%s8678_s3 + $0x180] sm:$0xff]  }
 0x472   :  { %v3275_v12 = vpop.f32.mrf.mxu1  ;;  %v2470_v5 = vmax.f32 %v8112_v22, %v8863_v56  ;;  %v6821_v56 = vld [vmem:[%s8680_s5 + $0x20] sm:$0xff]  }
 0x474   :  { %v6176_v41 = vpop.f32.mrf.mxu1 }
 0x475   :  { %v2524_v41 = vadd.f32 %v8122_v61, %v2458_v6 }
 0x476   :  { %v3326_v49 = vpop.f32.mrf.mxu1  ;;  %6324 = vmatmul.mubr.msk.bf16.vlgmr.msra.gmra.mxu1 %vm2592_vm3, %v4575_v62  ;;  %v6812_v62 = vld [vmem:[%s8678_s3 + $0x158] sm:$0xff]  }
 0x477   :  { %v3332_v38 = vadd.f32 %v3326_v49, %v3278_v34  ;;  %6328 = vmatpush3.bf16.msra.mxu1 %v6807_v13  ;;  %6329 = vmatprep.mubr.msk.bf16.mxu1 %vm6837_vm2, %v8768_v46  ;;  %v2573_v10 = vmax.f32 %v2524_v41, 0.0 }
 0x478   :  { %v6181_v44 = vpop.f32.mrf.mxu1  ;;  %6333 = vmatprep.subr.bf16.mxu1 %v8768_v46 }
 0x479   :  { %v2461_v44 = vmax.f32 %v8859_v19, %v8858_v45  ;;  %v4899_v15 = vpack.c.bf16 %v2573_v10, %v2573_v10 }
 0x47a   :  { %v3329_v63 = vpop.f32.mrf.mxu1 }
 0x47c   :  { %v6182_v40 = vpop.f32.mrf.mxu1 }
 0x47d   :  { %v2525_v40 = vadd.f32 %v8122_v61, %v2461_v44  ;;  %v6814_v61 = vld [vmem:[%s8678_s3 + $0x168] sm:$0xff]  }
 0x47e   :  { %v3380_v24 = vpop.f32.mrf.mxu1  ;;  %6330 = vmatmul.mubr.msk.bf16.vlgmr.msra.gmra.mxu1 %vm2592_vm3, %v4629_v35  ;;  %v6813_v35 = vld [vmem:[%s8678_s3 + $0x160] sm:$0xff]  }
 0x47f   :  { %v3386_v11 = vadd.f32 %v3380_v24, %v3332_v38  ;;  %6334 = vmatpush3.bf16.msra.mxu1 %v6808_v20  ;;  %6335 = vmatprep.mubr.msk.bf16.mxu1 %vm6837_vm2, %v8768_v46  ;;  %v2574_v26 = vmax.f32 %v2525_v40, 0.0 }
 0x480   :  { %v6187_v9 = vpop.f32.mrf.mxu1  ;;  %6339 = vmatprep.subr.bf16.mxu1 %v8768_v46 }
 0x481   :  { %v2464_v9 = vmax.f32 %v8861_v48, %v8860_v59 }
 0x482   :  { %v3383_v36 = vpop.f32.mrf.mxu1 }
 0x484   :  { %v6188_v27 = vpop.f32.mrf.mxu1 }
 0x485   :  { %v2526_v27 = vadd.f32 %v6834_v21, %v2464_v9 }
 0x486   :  { %v3434_v16 = vpop.f32.mrf.mxu1  ;;  %6336 = vmatmul.mubr.msk.bf16.vlgmr.msra.gmra.mxu1 %vm2592_vm3, %v4683_v50  ;;  %v4953_v50 = vpack.c.bf16 %v2574_v26, %v2574_v26 }
 0x487   :  { %v3440_v60 = vadd.f32 %v3434_v16, %v3386_v11  ;;  %6340 = vmatpush3.bf16.msra.mxu1 %v6809_v53  ;;  %6341 = vmatprep.mubr.msk.bf16.mxu1 %vm6837_vm2, %v8768_v46  ;;  %v2575_v33 = vmax.f32 %v2526_v27, 0.0 }
 0x488   :  { %v6193_v17 = vpop.f32.mrf.mxu1  ;;  %6345 = vmatprep.subr.bf16.mxu1 %v8768_v46 }
 0x48a   :  { %v3437_v43 = vpop.f32.mrf.mxu1 }
 0x48c   :  { %v6194_v23 = vpop.f32.mrf.mxu1 }
 0x48e   :  { %v3488_v55 = vpop.f32.mrf.mxu1  ;;  %6342 = vmatmul.mubr.msk.bf16.vlgmr.msra.gmra.mxu1 %vm2592_vm3, %v4737_v3  ;;  %v5007_v3 = vpack.c.bf16 %v2575_v33, %v2575_v33 }
 0x48f   :  { %v3494_v32 = vadd.f32 %v3488_v55, %v3440_v60  ;;  %6346 = vmatpush3.bf16.msra.mxu1 %v6810_v57  ;;  %6347 = vmatprep.mubr.msk.bf16.mxu1 %vm6837_vm2, %v8768_v46  ;;  %v6815_v57 = vld [vmem:[%s8678_s3 + $0x170] sm:$0xff]  }
 0x490   :  { %v6199_v1 = vpop.f32.mrf.mxu1  ;;  %6351 = vmatprep.subr.bf16.mxu1 %v8768_v46 }
 0x491   :  { %v6816_v1 = vld [vmem:[%s8678_s3 + $0x178] sm:$0xff]  }
 0x492   :  { %v3491_v14 = vpop.f32.mrf.mxu1 }
 0x493   :  { %v5061_v14 = vpack.c.bf16 %v2576_v25, %v2576_v25 }
 0x494   :  { %v6200_v58 = vpop.f32.mrf.mxu1 }
 0x496   :  { %v3542_v34 = vpop.f32.mrf.mxu1  ;;  %6348 = vmatmul.mubr.msk.bf16.vlgmr.msra.gmra.mxu1 %vm2592_vm3, %v4791_v2 }
 0x497   :  { %v3548_v7 = vadd.f32 %v3542_v34, %v3494_v32  ;;  %6352 = vmatpush3.bf16.msra.mxu1 %v6811_v52  ;;  %6353 = vmatprep.mubr.msk.bf16.mxu1 %vm6837_vm2, %v8768_v46  ;;  %v2528_v52 = vadd.f32 %v6834_v21, %v2470_v5  ;;  %v8864_v34 = vld [vmem:[#allocation81_spill] sm:$0xff] }
 0x498   :  { %v6205_v12 = vpop.f32.mrf.mxu1  ;;  %6357 = vmatprep.subr.bf16.mxu1 %v8768_v46 }
 0x499   :  { %v2577_v22 = vmax.f32 %v2528_v52, 0.0 }
 0x49a   :  { %v3545_v13 = vpop.f32.mrf.mxu1 }
 0x49b   :  { %v5115_v6 = vpack.c.bf16 %v2577_v22, %v2577_v22  ;;  %v6824_v22 = vld [vmem:[%s8680_s5 + $0x8] sm:$0xff]  }
 0x49c   :  { %v6206_v49 = vpop.f32.mrf.mxu1 }
 0x49e   :  { %v3596_v38 = vpop.f32.mrf.mxu1  ;;  %6354 = vmatmul.mubr.msk.bf16.vlgmr.msra.gmra.mxu1 %vm2592_vm3, %v4845_v4 }
 0x49f   :  { %v3602_v8 = vadd.f32 %v3596_v38, %v3548_v7  ;;  %6358 = vmatpush3.bf16.msra.mxu1 %v6812_v62  ;;  %6359 = vmatprep.mubr.msk.bf16.mxu1 %vm6837_vm2, %v8768_v46  ;;  %v2473_v7 = vmax.f32 %v8116_v29, %v8864_v34 }
 0x4a0   :  { %v6211_v63 = vpop.f32.mrf.mxu1  ;;  %6363 = vmatprep.subr.bf16.mxu1 %v8768_v46 }
 0x4a1   :  { %v2529_v12 = vadd.f32 %v6834_v21, %v2473_v7 }
 0x4a2   :  { %v3599_v20 = vpop.f32.mrf.mxu1 }
 0x4a3   :  { %v2578_v29 = vmax.f32 %v2529_v12, 0.0 }
 0x4a4   :  { %v6212_v24 = vpop.f32.mrf.mxu1 }
 0x4a5   :  { %v5169_v38 = vpack.c.bf16 %v2578_v29, %v2578_v29 }
 0x4a6   :  { %v3650_v11 = vpop.f32.mrf.mxu1  ;;  %6360 = vmatmul.mubr.msk.bf16.vlgmr.msra.gmra.mxu1 %vm2592_vm3, %v4899_v15 }
 0x4a7   :  { %v3656_v42 = vadd.f32 %v3650_v11, %v3602_v8  ;;  %6364 = vmatpush3.bf16.msra.mxu1 %v6813_v35  ;;  %6365 = vmatprep.mubr.msk.bf16.mxu1 %vm6837_vm2, %v8768_v46 }
 0x4a8   :  { %v6217_v36 = vpop.f32.mrf.mxu1  ;;  %6369 = vmatprep.subr.bf16.mxu1 %v8768_v46 }
 0x4aa   :  { %v3653_v53 = vpop.f32.mrf.mxu1 }
 0x4ac   :  { %v6218_v16 = vpop.f32.mrf.mxu1 }
 0x4ae   :  { %v3704_v60 = vpop.f32.mrf.mxu1  ;;  %6366 = vmatmul.mubr.msk.bf16.vlgmr.msra.gmra.mxu1 %vm2592_vm3, %v4953_v50 }
 0x4af   :  { %v3710_v28 = vadd.f32 %v3704_v60, %v3656_v42  ;;  %6370 = vmatpush3.bf16.msra.mxu1 %v6814_v61  ;;  %6371 = vmatprep.mubr.msk.bf16.mxu1 %vm6837_vm2, %v8768_v46 }
 0x4b0   :  { %v6223_v17 = vpop.f32.mrf.mxu1  ;;  %6375 = vmatprep.subr.bf16.mxu1 %v8768_v46 }
 0x4b2   :  { %v3707_v43 = vpop.f32.mrf.mxu1 }
 0x4b4   :  { %v6224_v23 = vpop.f32.mrf.mxu1 }
 0x4b5   :  { %v6820_v23 = vld [vmem:[%s8680_s5 + $0x28] sm:$0xff]  }
 0x4b6   :  { %v3758_v55 = vpop.f32.mrf.mxu1  ;;  %6372 = vmatmul.mubr.msk.bf16.vlgmr.msra.gmra.mxu1 %vm2592_vm3, %v5007_v3 }
 0x4b7   :  { %v3764_v32 = vadd.f32 %v3758_v55, %v3710_v28  ;;  %6376 = vmatpush3.bf16.msra.mxu1 %v6815_v57  ;;  %6377 = vmatprep.mubr.msk.bf16.mxu1 %vm6837_vm2, %v8768_v46  ;;  %v6819_v57 = vld [vmem:[%s8680_s5 + $0x30] sm:$0xff]  }
 0x4b8   :  { %v6229_v31 = vpop.f32.mrf.mxu1  ;;  %6381 = vmatprep.subr.bf16.mxu1 %v8768_v46 }
 0x4ba   :  { %v3761_v51 = vpop.f32.mrf.mxu1 }
 0x4bb   :  { %v6822_v51 = vld [vmem:[%s8680_s5 + $0x18] sm:$0xff]  }
 0x4bc   :  { %v6230_v2 = vpop.f32.mrf.mxu1 }
 0x4bd   :  { %v6823_v2 = vld [vmem:[%s8680_s5 + $0x10] sm:$0xff]  }
 0x4be   :  { %v3812_v0 = vpop.f32.mrf.mxu1  ;;  %6378 = vmatmul.mubr.msk.bf16.vlgmr.msra.gmra.mxu1 %vm2592_vm3, %v5061_v14 }
 0x4bf   :  { %v3818_v58 = vadd.f32 %v3812_v0, %v3764_v32  ;;  %6382 = vmatpush3.bf16.msra.mxu1 %v6816_v1  ;;  %6383 = vmatprep.mubr.msk.bf16.mxu1 %vm6837_vm2, %v8768_v46 }
 0x4c0   :  { %v6235_v18 = vpop.f32.mrf.mxu1  ;;  %6387 = vmatprep.subr.bf16.mxu1 %v8768_v46 }
 0x4c2   :  { %v3815_v37 = vpop.f32.mrf.mxu1 }
 0x4c3   :  { %v6825_v37 = vld [vmem:[%s8680_s5] sm:$0xff]  }
 0x4c4   :  { %v6236_v13 = vpop.f32.mrf.mxu1 }
 0x4c6   :  { %v3866_v62 = vpop.f32.mrf.mxu1  ;;  %6384 = vmatmul.mubr.msk.bf16.vlgmr.msra.gmra.mxu1 %vm2592_vm3, %v5115_v6 }
 0x4c7   :  { %v3872_v4 = vadd.f32 %v3866_v62, %v3818_v58  ;;  %6388 = vmatpush3.bf16.msra.mxu1 %v6817_v47  ;;  %6389 = vmatprep.mubr.msk.bf16.mxu1 %vm6837_vm2, %v8768_v46 }
 0x4c8   :  { %v6241_v41 = vpop.f32.mrf.mxu1  ;;  %6393 = vmatprep.subr.bf16.mxu1 %v8768_v46 }
 0x4ca   :  { %v3869_v49 = vpop.f32.mrf.mxu1 }
 0x4cc   :  { %v6242_v8 = vpop.f32.mrf.mxu1 }
 0x4ce   :  { %v3920_v10 = vpop.f32.mrf.mxu1  ;;  %6390 = vmatmul.mubr.msk.bf16.vlgmr.msra.gmra.mxu1 %vm2592_vm3, %v5169_v38 }
 0x4cf   :  { %v3926_v45 = vadd.f32 %v3920_v10, %v3872_v4  ;;  %6409 = vmatprep.mubr.msk.bf16.mxu1 %vm6837_vm2, %v8768_v46  ;;  %6394 = vmatpush3.bf16.msra.mxu1 %v6818_v54 }
 0x4d0   :  { %v6247_v19 = vpop.f32.mrf.mxu1  ;;  %6395 = vmatprep.subr.bf16.mxu1 %v8768_v46 }
 0x4d2   :  { %v3923_v44 = vpop.f32.mrf.mxu1 }
 0x4d3   :  { %6396 = vmatpush3.bf16.msra.mxu1 %v6819_v57 }
 0x4d4   :  { %v6248_v63 = vpop.f32.mrf.mxu1  ;;  %6397 = vmatprep.subr.bf16.mxu1 %v8768_v46 }
 0x4d6   :  { %v3974_v20 = vpop.f32.mrf.mxu1 }
 0x4d7   :  { %v3980_v35 = vadd.f32 %v3974_v20, %v3926_v45  ;;  %6398 = vmatpush3.bf16.msra.mxu1 %v6820_v23 }
 0x4d8   :  { %v6253_v15 = vpop.f32.mrf.mxu1  ;;  %6399 = vmatprep.subr.bf16.mxu1 %v8768_v46 }
 0x4da   :  { %v3977_v40 = vpop.f32.mrf.mxu1 }
 0x4db   :  { %6400 = vmatpush3.bf16.msra.mxu1 %v6821_v56 }
 0x4dc   :  { %v6254_v24 = vpop.f32.mrf.mxu1  ;;  %6401 = vmatprep.subr.bf16.mxu1 %v8768_v46 }
 0x4de   :  { %v4028_v11 = vpop.f32.mrf.mxu1 }
 0x4df   :  { %v4034_v42 = vadd.f32 %v4028_v11, %v3980_v35  ;;  %6402 = vmatpush3.bf16.msra.mxu1 %v6822_v51 }
 0x4e0   :  { %v6259_v26 = vpop.f32.mrf.mxu1  ;;  %6403 = vmatprep.subr.bf16.mxu1 %v8768_v46 }
 0x4e2   :  { %v4031_v59 = vpop.f32.mrf.mxu1 }
 0x4e3   :  { %6404 = vmatpush3.bf16.msra.mxu1 %v6823_v2 }
 0x4e4   :  { %v6260_v48 = vpop.f32.mrf.mxu1  ;;  %6405 = vmatprep.subr.bf16.mxu1 %v8768_v46 }
 0x4e6   :  { %v4082_v9 = vpop.f32.mrf.mxu1 }
 0x4e7   :  { %v4088_v36 = vadd.f32 %v4082_v9, %v4034_v42  ;;  %6406 = vmatpush3.bf16.msra.mxu1 %v6824_v22 }
 0x4e8   :  { %v6265_v53 = vpop.f32.mrf.mxu1  ;;  %6407 = vmatprep.subr.bf16.mxu1 %v8768_v46 }
 0x4ea   :  { %v4085_v61 = vpop.f32.mrf.mxu1 }
 0x4eb   :  { %6408 = vmatpush3.bf16.msra.mxu1 %v6825_v37 }
 0x4ec   :  { %v6266_v50 = vpop.f32.mrf.mxu1  ;;  %6413 = vmatprep.subr.bf16.mxu1 %v8768_v46 }
 0x4ee   :  { %v4136_v21 = vpop.f32.mrf.mxu1 }
 0x4ef   :  { %v4142_v27 = vadd.f32 %v4136_v21, %v4088_v36 }
 0x4f0   :  { %v6271_v16 = vpop.f32.mrf.mxu1 }
 0x4f2   :  { %v4139_v60 = vpop.f32.mrf.mxu1 }
 0x4f4   :  { %v6272_v28 = vpop.f32.mrf.mxu1 }
 0x4f6   :  { %v4190_v33 = vpop.f32.mrf.mxu1 }
 0x4f7   :  { %v4196_v39 = vadd.f32 %v4190_v33, %v4142_v27 }
 0x4f8   :  { %v6277_v17 = vpop.f32.mrf.mxu1 }
 0x4fa   :  { %v4193_v43 = vpop.f32.mrf.mxu1 }
 0x4fc   :  { %v6278_v3 = vpop.f32.mrf.mxu1 }
 0x4fe   :  { %v4244_v30 = vpop.f32.mrf.mxu1 }
 0x4ff   :  { %v4250_v55 = vadd.f32 %v4244_v30, %v4196_v39 }
 0x500   :  { %v6283_v32 = vpop.f32.mrf.mxu1 }
 0x502   :  { %v4247_v25 = vpop.f32.mrf.mxu1 }
 0x504   :  { %v6284_v5 = vpop.f32.mrf.mxu1 }
 0x506   :  { %v4298_v31 = vpop.f32.mrf.mxu1 }
 0x507   :  { %v4304_v1 = vadd.f32 %v4298_v31, %v4250_v55 }
 0x508   :  { %v6289_v14 = vpop.f32.mrf.mxu1 }
 0x50a   :  { %v4301_v52 = vpop.f32.mrf.mxu1 }
 0x50c   :  { %v6290_v0 = vpop.f32.mrf.mxu1 }
 0x50e   :  { %v4352_v58 = vpop.f32.mrf.mxu1 }
 0x50f   :  { %v4358_v34 = vadd.f32 %v4352_v58, %v4304_v1 }
 0x510   :  { %v6295_v7 = vpop.f32.mrf.mxu1 }
 0x512   :  { %v4355_v18 = vpop.f32.mrf.mxu1 }
 0x514   :  { %v6296_v47 = vpop.f32.mrf.mxu1 }
 0x516   :  { %v4406_v6 = vpop.f32.mrf.mxu1 }
 0x517   :  { %v4412_v12 = vadd.f32 %v4406_v6, %v4358_v34 }
 0x518   :  { %v6301_v13 = vpop.f32.mrf.mxu1 }
 0x51a   :  { %v4409_v62 = vpop.f32.mrf.mxu1 }
 0x51c   :  { %v6302_v4 = vpop.f32.mrf.mxu1 }
 0x51e   :  { %v4460_v29 = vpop.f32.mrf.mxu1 }
 0x51f   :  { %v4466_v41 = vadd.f32 %v4460_v29, %v4412_v12 }
 0x520   :  { %v6307_v49 = vpop.f32.mrf.mxu1 }
 0x522   :  { %v4463_v38 = vpop.f32.mrf.mxu1 }
 0x524   :  { %v6308_v8 = vpop.f32.mrf.mxu1 }
 0x526   :  { %v4514_v10 = vpop.f32.mrf.mxu1 }
 0x527   :  { %v4520_v45 = vadd.f32 %v4514_v10, %v4466_v41 }
 0x528   :  { %v6313_v19 = vpop.f32.mrf.mxu1 }
 0x52a   :  { %v4517_v44 = vpop.f32.mrf.mxu1 }
 0x52b   :  { %v5964_v44 = vld [vmem:[%s8682_s4] ss:$0 sm:$0xff] }
 0x52c   :  { %v6314_v63 = vpop.f32.mrf.mxu1 }
 0x52e   :  { %v4568_v20 = vpop.f32.mrf.mxu1 }
 0x52f   :  { %v4574_v35 = vadd.f32 %v4568_v20, %v4520_v45 }
 0x530   :  { %v6319_v15 = vpop.f32.mrf.mxu1 }
 0x532   :  { %v4571_v40 = vpop.f32.mrf.mxu1 }
 0x534   :  { %v6320_v24 = vpop.f32.mrf.mxu1 }
 0x536   :  { %v4622_v11 = vpop.f32.mrf.mxu1 }
 0x537   :  { %v4628_v42 = vadd.f32 %v4622_v11, %v4574_v35  ;;  %v6826_v11 = vld [vmem:[%s8681_s7 + $0x38] sm:$0xff]  }
 0x538   :  { %v6325_v26 = vpop.f32.mrf.mxu1 }
 0x539   :  { %v6827_v26 = vld [vmem:[%s8681_s7 + $0x30] sm:$0xff]  }
 0x53a   :  { %v4625_v59 = vpop.f32.mrf.mxu1 }
 0x53b   :  { %v6828_v59 = vld [vmem:[%s8681_s7 + $0x28] sm:$0xff]  }
 0x53c   :  { %v6326_v48 = vpop.f32.mrf.mxu1 }
 0x53d   :  { %v6829_v48 = vld [vmem:[%s8681_s7 + $0x20] sm:$0xff]  }
 0x53e   :  { %v4676_v9 = vpop.f32.mrf.mxu1 }
 0x53f   :  { %v4682_v58 = vadd.f32 %v4676_v9, %v4628_v42  ;;  %v6830_v9 = vld [vmem:[%s8681_s7 + $0x18] sm:$0xff]  }
 0x540   :  { %v6331_v36 = vpop.f32.mrf.mxu1 }
 0x541   :  { %v6831_v36 = vld [vmem:[%s8681_s7 + $0x10] sm:$0xff]  }
 0x542   :  { %v4679_v53 = vpop.f32.mrf.mxu1 }
 0x543   :  { %v6832_v53 = vld [vmem:[%s8681_s7 + $0x8] sm:$0xff]  }
 0x544   :  { %v6332_v61 = vpop.f32.mrf.mxu1 }
 0x545   :  { %v6833_v61 = vld [vmem:[%s8681_s7] sm:$0xff]  }
 0x546   :  { %v4730_v50 = vpop.f32.mrf.mxu1 }
 0x547   :  { %v4736_v34 = vadd.f32 %v4730_v50, %v4682_v58  ;;  %v5965_v50 = vld [vmem:[%s8683_s6] ss:$0 sm:$0xff] }
 0x548   :  { %v6337_v21 = vpop.f32.mrf.mxu1 }
 0x54a   :  { %v4733_v27 = vpop.f32.mrf.mxu1 }
 0x54c   :  { %v6338_v16 = vpop.f32.mrf.mxu1 }
 0x54e   :  { %v4784_v60 = vpop.f32.mrf.mxu1 }
 0x54f   :  { %v4790_v18 = vadd.f32 %v4784_v60, %v4736_v34 }
 0x550   :  { %v6343_v28 = vpop.f32.mrf.mxu1 }
 0x552   :  { %v4787_v33 = vpop.f32.mrf.mxu1 }
 0x554   :  { %v6344_v54 = vpop.f32.mrf.mxu1 }
 0x556   :  { %v4838_v39 = vpop.f32.mrf.mxu1 }
 0x557   :  { %v4844_v47 = vadd.f32 %v4838_v39, %v4790_v18 }
 0x558   :  { %v6349_v17 = vpop.f32.mrf.mxu1 }
 0x55a   :  { %v4841_v43 = vpop.f32.mrf.mxu1 }
 0x55c   :  { %v6350_v57 = vpop.f32.mrf.mxu1 }
 0x55e   :  { %v4892_v3 = vpop.f32.mrf.mxu1 }
 0x55f   :  { %v4898_v12 = vadd.f32 %v4892_v3, %v4844_v47 }
 0x560   :  { %v6355_v30 = vpop.f32.mrf.mxu1 }
 0x562   :  { %v4895_v23 = vpop.f32.mrf.mxu1 }
 0x564   :  { %v6356_v55 = vpop.f32.mrf.mxu1 }
 0x566   :  { %v4946_v32 = vpop.f32.mrf.mxu1 }
 0x567   :  { %v4952_v62 = vadd.f32 %v4946_v32, %v4898_v12 }
 0x568   :  { %v6361_v25 = vpop.f32.mrf.mxu1 }
 0x56a   :  { %v4949_v56 = vpop.f32.mrf.mxu1 }
 0x56c   :  { %v6362_v5 = vpop.f32.mrf.mxu1 }
 0x56e   :  { %v5000_v31 = vpop.f32.mrf.mxu1 }
 0x56f   :  { %v5006_v29 = vadd.f32 %v5000_v31, %v4952_v62 }
 0x570   :  { %v6367_v51 = vpop.f32.mrf.mxu1 }
 0x572   :  { %v5003_v1 = vpop.f32.mrf.mxu1 }
 0x574   :  { %v6368_v14 = vpop.f32.mrf.mxu1 }
 0x576   :  { %v5054_v52 = vpop.f32.mrf.mxu1 }
 0x577   :  { %v5060_v49 = vadd.f32 %v5054_v52, %v5006_v29 }
 0x578   :  { %v6373_v2 = vpop.f32.mrf.mxu1 }
 0x57a   :  { %v5057_v0 = vpop.f32.mrf.mxu1 }
 0x57c   :  { %v6374_v22 = vpop.f32.mrf.mxu1 }
 0x57e   :  { %v5108_v7 = vpop.f32.mrf.mxu1 }
 0x57f   :  { %v5114_v8 = vadd.f32 %v5108_v7, %v5060_v49 }
 0x580   :  { %v6379_v37 = vpop.f32.mrf.mxu1 }
 0x582   :  { %v5111_v6 = vpop.f32.mrf.mxu1 }
 0x584   :  { %v6380_v13 = vpop.f32.mrf.mxu1 }
 0x586   :  { %v5162_v4 = vpop.f32.mrf.mxu1 }
 0x587   :  { %v5168_v45 = vadd.f32 %v5162_v4, %v5114_v8 }
 0x588   :  { %v6385_v41 = vpop.f32.mrf.mxu1 }
 0x58a   :  { %v5165_v38 = vpop.f32.mrf.mxu1 }
 0x58c   :  { %v6386_v10 = vpop.f32.mrf.mxu1 }
 0x58e   :  { %v5216_v19 = vpop.f32.mrf.mxu1 }
 0x58f   :  { %v5222_v63 = vadd.f32 %v5216_v19, %v5168_v45 }
 0x590   :  { %v6391_v20 = vpop.f32.mrf.mxu1 }
 0x591   :  { %v5230_v35 = vadd.f32 %v5964_v44, %v5222_v63 }
 0x592   :  { %v5219_v15 = vpop.f32.mrf.mxu1 }
 0x593   :  { %v5231_v40 = vmax.f32 %v5230_v35, 0.0 }
 0x594   :  { %v6392_v24 = vpop.f32.mrf.mxu1 }
 0x595   :  { %v5232_v42 = vpack.c.bf16 %v5231_v40, %v5231_v40 }
 0x597   :  { %6410 = vmatmul.mubr.bf16.vlgmr.msra.gmra.mxu1 %v5232_v42 }
 0x598   :  { %6414 = vmatpush3.bf16.msra.mxu1 %v6826_v11  ;;  %6429 = vmatprep.mubr.msk.bf16.mxu1 %vm6837_vm2, %v8768_v46 }
 0x599   :  { %6415 = vmatprep.subr.bf16.mxu1 %v8768_v46 }
 0x59c   :  { %6416 = vmatpush3.bf16.msra.mxu1 %v6827_v26 }
 0x59d   :  { %6417 = vmatprep.subr.bf16.mxu1 %v8768_v46 }
 0x5a0   :  { %6418 = vmatpush3.bf16.msra.mxu1 %v6828_v59 }
 0x5a1   :  { %6419 = vmatprep.subr.bf16.mxu1 %v8768_v46 }
 0x5a4   :  { %6420 = vmatpush3.bf16.msra.mxu1 %v6829_v48 }
 0x5a5   :  { %6421 = vmatprep.subr.bf16.mxu1 %v8768_v46 }
 0x5a8   :  { %6422 = vmatpush3.bf16.msra.mxu1 %v6830_v9 }
 0x5a9   :  { %6423 = vmatprep.subr.bf16.mxu1 %v8768_v46 }
 0x5ac   :  { %6424 = vmatpush3.bf16.msra.mxu1 %v6831_v36 }
 0x5ad   :  { %6425 = vmatprep.subr.bf16.mxu1 %v8768_v46 }
 0x5b0   :  { %6426 = vmatpush3.bf16.msra.mxu1 %v6832_v53 }
 0x5b1   :  { %6427 = vmatprep.subr.bf16.mxu1 %v8768_v46  ;;  %v5974_v46 = vld [vmem:[%s8684_s8] ss:$0 sm:$0xff] }
 0x5b4   :  { %6428 = vmatpush3.bf16.msra.mxu1 %v6833_v61 }
 0x657   :  { %v5338_v21 = vpop.f32.mrf.mxu1 }
 0x658   :  { %v5339_v27 = vadd.f32 %v5965_v50, %v5338_v21 }
 0x659   :  { %v6411_v16 = vpop.f32.mrf.mxu1 }
 0x65a   :  { %v5344_v60 = vmax.f32 %v5339_v27, 0.0 }
 0x65b   :  { %v5341_v28 = vpop.f32.mrf.mxu1 }
 0x65c   :  { %v5345_v33 = vpack.c.bf16 %v5344_v60, %v5344_v60 }
 0x65d   :  { %v6412_v54 = vpop.f32.mrf.mxu1 }
 0x65e   :  { %6430 = vmatmul.mubr.bf16.vlgmr.msra.gmra.mxu1 %v5345_v33 }
 0x71e   :  { %v5451_v39 = vpop.f32.mrf.mxu1 }
 0x71f   :  { %v5452_v17 = vadd.f32 %v5974_v46, %v5451_v39 }
 0x720   :  { %v6431_v43 = vpop.f32.mrf.mxu1 }
 0x721   :  { %5457 = vst [vmem:[%s8685_s9] sm:$0xff] %v5452_v17 }
 0x722   :  { %v5454_v57 = vpop.f32.mrf.mxu1 }
 0x724   :  { %v6432_v3 = vpop.f32.mrf.mxu1 }

</bundles_post_ra>
